<compile_context>
chip_gen: v7x
topology: tpu7x:2x2x1
jax: 0.10.0
libtpu: 0.0.40
codegen_flags: <defaults>
</compile_context>

<pallas_src>
import jax
import jax.numpy as jnp
from jax.experimental import pallas as pl
from jax.experimental.pallas import tpu as pltpu

LANE = 128     # lane width / padded output channels
NS = 8         # samples per tail grid step (multiple of 8 -> sublane aligned)
P2 = 100       # conv2 output positions (10 x 10)
K2 = 256       # conv2 patch features (4*4*16)
H1 = 256       # fc1 hidden size
C2 = 32        # conv2 output channels


# --------------------------------------------------------------------------
# Kernel 1: conv1 as an im2col matmul (2 samples = 896 rows per grid step).
#   x:(tm, 256) bf16  w:(256, 128) bf16  b:(1, 128) f32 -> o:(tm, 128) bf16
# --------------------------------------------------------------------------
def _conv1_kernel(x_ref, w_ref, b_ref, o_ref):
    acc = jnp.dot(x_ref[...], w_ref[...], preferred_element_type=jnp.float32)
    o_ref[...] = jnp.maximum(acc + b_ref[...], 0.0).astype(o_ref.dtype)


def conv1_pallas(col1, w, b, batch, samples_per_step):
    rows, K = col1.shape
    tm = (rows // batch) * samples_per_step
    N = w.shape[1]
    steps = batch // samples_per_step
    flops = 2 * rows * K * N
    bytes_accessed = rows * K * 2 + K * N * 2 + N * 4 + rows * N * 2
    return pl.pallas_call(
        _conv1_kernel,
        out_shape=jax.ShapeDtypeStruct((rows, N), jnp.bfloat16),
        grid_spec=pltpu.PrefetchScalarGridSpec(
            num_scalar_prefetch=0,
            grid=(steps,),
            in_specs=[
                pl.BlockSpec((tm, K), lambda i: (i, 0)),   # per-step patch rows
                pl.BlockSpec((K, N), lambda i: (0, 0)),    # weight (VMEM-resident)
                pl.BlockSpec((1, N), lambda i: (0, 0)),    # bias
            ],
            out_specs=pl.BlockSpec((tm, N), lambda i: (i, 0)),
        ),
        compiler_params=pltpu.CompilerParams(dimension_semantics=("parallel",)),
        cost_estimate=pl.CostEstimate(flops=flops, transcendentals=0,
                                      bytes_accessed=bytes_accessed),
    )(col1, w, b)


# --------------------------------------------------------------------------
# Kernel 2: fused conv2 + flatten + fc1 + fc2, NS samples per grid step.
#
# col2 rows are pre-ordered position-major / sample-minor (row = p*NS + s), so
# y2[p*NS:(p+1)*NS, :] is the (NS, 32) conv2 activation tile for position p
# with no relayout.  fc1 then contracts channels per position with one small
# MXU dot per position (weight block f1w_ref[p] is (32, 256)) and accumulates.
# --------------------------------------------------------------------------
def _tail_kernel(col2_ref, c2w_ref, c2b_ref, f1w_ref, f1b_ref,
                 f2w_ref, f2b_ref, o_ref):
    # conv2 for all NS samples of this step: (P2*NS, 256) @ (256, 32).
    y2 = jnp.dot(col2_ref[0], c2w_ref[...], preferred_element_type=jnp.float32)
    y2 = jnp.maximum(y2 + c2b_ref[...], 0.0)                 # (P2*NS, 32) f32

    # fc1: per-position channel contraction, accumulated over the 100 positions.
    # Four accumulators break the (cheap) VALU add chain; MXU is the serializer.
    accs = [jnp.zeros((NS, H1), jnp.float32) for _ in range(4)]
    for p in range(P2):
        lhs = y2[p * NS:(p + 1) * NS, :].astype(jnp.bfloat16)   # (NS, 32)
        accs[p % 4] = accs[p % 4] + jnp.dot(
            lhs, f1w_ref[p], preferred_element_type=jnp.float32)
    h = (accs[0] + accs[1]) + (accs[2] + accs[3])
    h = jnp.maximum(h + f1b_ref[...], 0.0)                    # (NS, 256) f32

    # fc2 (actions padded to 128 lanes; padded lanes are exact zeros + bias 0).
    q = jnp.dot(h.astype(jnp.bfloat16), f2w_ref[...],
                preferred_element_type=jnp.float32)
    o_ref[0] = q + f2b_ref[...]                               # (NS, 128) f32


def tail_pallas(col2i, c2w, c2b, f1w, f1b, f2w, f2b):
    G, rows, K = col2i.shape
    NO = f2w.shape[1]
    flops = G * (2 * rows * K * C2 + 2 * NS * P2 * C2 * H1 + 2 * NS * H1 * NO)
    bytes_accessed = (col2i.size * 2 + c2w.size * 2 + f1w.size * 2
                      + f2w.size * 2 + (c2b.size + f1b.size + f2b.size) * 4
                      + G * NS * NO * 4)
    return pl.pallas_call(
        _tail_kernel,
        out_shape=jax.ShapeDtypeStruct((G, NS, NO), jnp.float32),
        grid_spec=pltpu.PrefetchScalarGridSpec(
            num_scalar_prefetch=0,
            grid=(G,),
            in_specs=[
                pl.BlockSpec((1, rows, K), lambda g: (g, 0, 0)),   # patches
                pl.BlockSpec((K, C2), lambda g: (0, 0)),           # conv2 W
                pl.BlockSpec((1, C2), lambda g: (0, 0)),           # conv2 b
                pl.BlockSpec((P2, C2, H1), lambda g: (0, 0, 0)),   # fc1 W (p,c,h)
                pl.BlockSpec((1, H1), lambda g: (0, 0)),           # fc1 b
                pl.BlockSpec((H1, NO), lambda g: (0, 0)),          # fc2 W (padded)
                pl.BlockSpec((1, NO), lambda g: (0, 0)),           # fc2 b (padded)
            ],
            out_specs=pl.BlockSpec((1, NS, NO), lambda g: (g, 0, 0)),
        ),
        compiler_params=pltpu.CompilerParams(dimension_semantics=("parallel",)),
        cost_estimate=pl.CostEstimate(flops=flops, transcendentals=0,
                                      bytes_accessed=bytes_accessed),
    )(col2i, c2w, c2b, f1w, f1b, f2w, f2b)


# --------------------------------------------------------------------------
# Plain-JAX glue: im2col patch extraction (pure data movement, no FLOPs).
# --------------------------------------------------------------------------
def im2col_nchw(x, kh, kw, stride, pad):
    """x:(B,C,H,W) -> (B, OH*OW, C*kh*kw), features in (c, kh, kw) order."""
    B, C, H, W = x.shape
    xp = jnp.pad(x, ((0, 0), (0, 0), (pad, pad), (pad, pad)))
    OH = (H + 2 * pad - kh) // stride + 1
    OW = (W + 2 * pad - kw) // stride + 1
    cols = []
    for i in range(kh):
        for j in range(kw):
            cols.append(xp[:, :,
                           i:i + stride * (OH - 1) + 1:stride,
                           j:j + stride * (OW - 1) + 1:stride])
    col = jnp.stack(cols, axis=2).reshape(B, C, kh, kw, OH, OW)
    col = col.transpose(0, 4, 5, 1, 2, 3).reshape(B, OH * OW, C * kh * kw)
    return col, OH, OW


def im2col_nhwc(x, kh, kw, stride, pad):
    """x:(B,H,W,C) -> (B, OH*OW, kh*kw*C), features in (kh, kw, c) order."""
    B, H, W, C = x.shape
    xp = jnp.pad(x, ((0, 0), (pad, pad), (pad, pad), (0, 0)))
    OH = (H + 2 * pad - kh) // stride + 1
    OW = (W + 2 * pad - kw) // stride + 1
    cols = []
    for i in range(kh):
        for j in range(kw):
            cols.append(xp[:,
                           i:i + stride * (OH - 1) + 1:stride,
                           j:j + stride * (OW - 1) + 1:stride, :])
    col = jnp.stack(cols, axis=3)                 # (B, OH, OW, kh*kw, C)
    col = col.reshape(B, OH * OW, kh * kw * C)
    return col, OH, OW


# --------------------------------------------------------------------------
# One-time parameter preparation (hoisted out of the forward pass).
# --------------------------------------------------------------------------
def prepare_params(params):
    f32, bf16 = jnp.float32, jnp.bfloat16

    # conv1: (16, C, 8, 8) -> (C*64, 16) rows in (c,kh,kw) order, pad 16->128.
    c1w = params["conv1_w"]
    n1, cin = c1w.shape[0], c1w.shape[1]
    c1w_p = jnp.pad(c1w.reshape(n1, cin * 64).T,
                    ((0, 0), (0, LANE - n1))).astype(bf16)            # (C*64,128)
    c1b_p = jnp.pad(params["conv1_b"], (0, LANE - n1)).reshape(1, LANE).astype(f32)

    # conv2: (32, 16, 4, 4) -> (kh, kw, cin, cout) -> (256, 32).
    c2w = params["conv2_w"]
    c2w_r = c2w.transpose(2, 3, 1, 0).reshape(4 * 4 * 16, C2).astype(bf16)
    c2b_r = params["conv2_b"].reshape(1, C2).astype(f32)

    # fc1: PyTorch flattens conv2 output in (c, h, w) order -> flat = c*100 + p.
    # Reshape to (p, c, hidden) so each conv2 position owns a (32, 256) block.
    f1w = params["fc1_w"]                                              # (256, 3200)
    f1w_r = f1w.reshape(H1, C2, P2).transpose(2, 1, 0).astype(bf16)    # (100,32,256)
    f1b_r = params["fc1_b"].reshape(1, H1).astype(f32)

    # fc2: pad num_actions -> 128 lanes with zeros (sliced off outside).
    f2w = params["fc2_w"]                                              # (A, 256)
    A = f2w.shape[0]
    assert A <= LANE
    f2w_p = jnp.pad(f2w.T, ((0, 0), (0, LANE - A))).astype(bf16)       # (256, 128)
    f2b_p = jnp.pad(params["fc2_b"], (0, LANE - A)).reshape(1, LANE).astype(f32)

    return dict(c1w=c1w_p, c1b=c1b_p, c2w=c2w_r, c2b=c2b_r,
                f1w=f1w_r, f1b=f1b_r, f2w=f2w_p, f2b=f2b_p)


# --------------------------------------------------------------------------
# Deterministic parameter construction (same shapes as the nn.Module).
# --------------------------------------------------------------------------
def init_params(num_frames, num_actions, key):
    ks = jax.random.split(key, 8)
    s = 0.05
    return {
        "conv1_w": jax.random.normal(ks[0], (16, num_frames, 8, 8), jnp.float32) * s,
        "conv1_b": jax.random.normal(ks[1], (16,), jnp.float32) * s,
        "conv2_w": jax.random.normal(ks[2], (32, 16, 4, 4), jnp.float32) * s,
        "conv2_b": jax.random.normal(ks[3], (32,), jnp.float32) * s,
        "fc1_w": jax.random.normal(ks[4], (256, 3200), jnp.float32) * s,   # (out, in)
        "fc1_b": jax.random.normal(ks[5], (256,), jnp.float32) * s,
        "fc2_w": jax.random.normal(ks[6], (num_actions, 256), jnp.float32) * s,
        "fc2_b": jax.random.normal(ks[7], (num_actions,), jnp.float32) * s,
    }


# --------------------------------------------------------------------------
# Forward pass (matches DeepQNetworkAtari.forward).
# --------------------------------------------------------------------------
def dqn_forward(x, pp, num_actions):
    B = x.shape[0]

    # conv1 patches straight from the NCHW input, feature order (c, kh, kw).
    col1, oh1, ow1 = im2col_nchw(x, 8, 8, 4, 2)                 # (B, 441, 256)
    p1 = oh1 * ow1
    p1_pad = ((p1 + 7) // 8) * 8                                # 448
    col1 = jnp.pad(col1, ((0, 0), (0, p1_pad - p1), (0, 0)))
    col1 = col1.astype(jnp.bfloat16).reshape(B * p1_pad, -1)

    sps = 2 if B % 2 == 0 else 1                                # samples / conv1 step
    y1 = conv1_pallas(col1, pp["c1w"], pp["c1b"], B, sps)       # (B*448, 128) bf16
    # Keep only the 441 real positions and 16 real channels -> NHWC, no transpose.
    y1 = y1.reshape(B, p1_pad, LANE)[:, :p1, :16].reshape(B, oh1, ow1, 16)

    # conv2 patches in (kh, kw, c) feature order (matches c2w row order).
    # TODO(synk): fuse this im2col into the tail kernel to avoid the extra HBM
    # round trip between the two pallas_calls.
    col2, _, _ = im2col_nhwc(y1, 4, 4, 2, 1)                    # (B, 100, 256) bf16

    # Pad batch to a multiple of NS and interleave rows as (position, sample) so
    # the per-position (NS, 32) slices inside the kernel are sublane aligned.
    B_pad = ((B + NS - 1) // NS) * NS
    G = B_pad // NS
    col2 = jnp.pad(col2, ((0, B_pad - B), (0, 0), (0, 0)))
    col2i = col2.reshape(G, NS, P2, K2).transpose(0, 2, 1, 3).reshape(G, P2 * NS, K2)

    # Fused conv2 + flatten + fc1 + fc2.
    q = tail_pallas(col2i, pp["c2w"], pp["c2b"], pp["f1w"], pp["f1b"],
                    pp["f2w"], pp["f2b"])                       # (G, NS, 128) f32
    return q.reshape(B_pad, LANE)[:B, :num_actions]


if __name__ == "__main__":
    num_frames = 4
    num_actions = 6
    batch = 4
    # fc1 expects 3200 = 32*10*10 features, which pins the input to 84x84
    # (standard Atari preprocessing for this module).
    key = jax.random.PRNGKey(0)
    k_x, k_p = jax.random.split(key)
    x = jax.random.normal(k_x, (batch, num_frames, 84, 84), jnp.float32)
    params = init_params(num_frames, num_actions, k_p)
    pp = prepare_params(params)                 # weight prep done once

    fwd = jax.jit(dqn_forward, static_argnums=2)
    q_values = fwd(x, pp, num_actions)
    jax.block_until_ready(q_values)

    assert q_values.shape == (batch, num_actions)
    assert q_values.dtype == jnp.float32
    assert bool(jnp.all(jnp.isfinite(q_values)))
    print("KERNEL_OK")
</pallas_src>

<mosaic_0001>
module attributes {stable_mosaic.version = 11 : i64} {
  func.func @_conv1_kernel(%arg0: i32, %arg1: memref<896x256xbf16, #tpu.memory_space<vmem>>, %arg2: memref<256x128xbf16, #tpu.memory_space<vmem>>, %arg3: memref<1x128xf32, #tpu.memory_space<vmem>>, %arg4: memref<896x128xbf16, #tpu.memory_space<vmem>>) attributes {dimension_semantics = [#tpu.dimension_semantics<parallel>], iteration_bounds = array<i64: 2>, scalar_prefetch = 0 : i64, scratch_operands = 0 : i64, tpu.core_type = #tpu.core_type<tc>, window_params = [{transform_indices = @transform_0, window_bounds = array<i64: 896, 256>}, {pipeline_mode = #tpu.pipeline_mode<synchronous>, transform_indices = @transform_1, window_bounds = array<i64: 256, 128>}, {pipeline_mode = #tpu.pipeline_mode<synchronous>, transform_indices = @transform_2, window_bounds = array<i64: 1, 128>}, {transform_indices = @transform_3, window_bounds = array<i64: 896, 128>}]} {
    %c0 = arith.constant 0 : index
    %c0_0 = arith.constant 0 : index
    %0 = vector.load %arg1[%c0, %c0_0] : memref<896x256xbf16, #tpu.memory_space<vmem>>, vector<896x256xbf16>
    %c0_1 = arith.constant 0 : index
    %c0_2 = arith.constant 0 : index
    %1 = vector.load %arg2[%c0_1, %c0_2] : memref<256x128xbf16, #tpu.memory_space<vmem>>, vector<256x128xbf16>
    %cst = arith.constant dense<0.000000e+00> : vector<896x128xf32>
    %2 = tpu.matmul %0, %1, %cst {dimension_numbers = #tpu.dot_dimension_numbers<[1], [0], [0], [1], [0, 0, 1, 1], [], []>} : vector<896x256xbf16>, vector<256x128xbf16>, vector<896x128xf32> -> vector<896x128xf32>
    %c0_3 = arith.constant 0 : index
    %c0_4 = arith.constant 0 : index
    %3 = vector.load %arg3[%c0_3, %c0_4] : memref<1x128xf32, #tpu.memory_space<vmem>>, vector<1x128xf32>
    %4 = vector.broadcast %3 : vector<1x128xf32> to vector<896x128xf32>
    %5 = arith.addf %2, %4 : vector<896x128xf32>
    %cst_5 = arith.constant 0.000000e+00 : f32
    %6 = vector.broadcast %cst_5 : f32 to vector<896x128xf32>
    %7 = arith.maximumf %5, %6 : vector<896x128xf32>
    %8 = arith.truncf %7 : vector<896x128xf32> to vector<896x128xbf16>
    %c0_6 = arith.constant 0 : index
    %c0_7 = arith.constant 0 : index
    %9 = vector.load %arg4[%c0_6, %c0_7] : memref<896x128xbf16, #tpu.memory_space<vmem>>, vector<896x128xbf16>
    tpu.vector_store %arg4[%c0_6, %c0_7], %8 {strides = array<i32>} : memref<896x128xbf16, #tpu.memory_space<vmem>>, vector<896x128xbf16>,
    return
  }
  func.func @transform_0(%arg0: i32) -> (i32, i32) {
    %c0_i32 = arith.constant 0 : i32
    %c0_i32_0 = arith.constant 0 : i32
    return %arg0, %c0_i32 : i32, i32
  }
  func.func @transform_1(%arg0: i32) -> (i32, i32) {
    %c0_i32 = arith.constant 0 : i32
    %c0_i32_0 = arith.constant 0 : i32
    %c0_i32_1 = arith.constant 0 : i32
    return %c0_i32, %c0_i32_0 : i32, i32
  }
  func.func @transform_2(%arg0: i32) -> (i32, i32) {
    %c0_i32 = arith.constant 0 : i32
    %c0_i32_0 = arith.constant 0 : i32
    %c0_i32_1 = arith.constant 0 : i32
    return %c0_i32, %c0_i32_0 : i32, i32
  }
  func.func @transform_3(%arg0: i32) -> (i32, i32) {
    %c0_i32 = arith.constant 0 : i32
    %c0_i32_0 = arith.constant 0 : i32
    return %arg0, %c0_i32 : i32, i32
  }
}

module attributes {stable_mosaic.version = 11 : i64} {
  func.func @_tail_kernel(%arg0: i32, %arg1: memref<1x800x256xbf16, #tpu.memory_space<vmem>>, %arg2: memref<256x32xbf16, #tpu.memory_space<vmem>>, %arg3: memref<1x32xf32, #tpu.memory_space<vmem>>, %arg4: memref<100x32x256xbf16, #tpu.memory_space<vmem>>, %arg5: memref<1x256xf32, #tpu.memory_space<vmem>>, %arg6: memref<256x128xbf16, #tpu.memory_space<vmem>>, %arg7: memref<1x128xf32, #tpu.memory_space<vmem>>, %arg8: memref<1x8x128xf32, #tpu.memory_space<vmem>>) attributes {dimension_semantics = [#tpu.dimension_semantics<parallel>], iteration_bounds = array<i64: 1>, scalar_prefetch = 0 : i64, scratch_operands = 0 : i64, tpu.core_type = #tpu.core_type<tc>, window_params = [{transform_indices = @transform_0, window_bounds = array<i64: 1, 800, 256>}, {pipeline_mode = #tpu.pipeline_mode<synchronous>, transform_indices = @transform_1, window_bounds = array<i64: 256, 32>}, {pipeline_mode = #tpu.pipeline_mode<synchronous>, transform_indices = @transform_2, window_bounds = array<i64: 1, 32>}, {pipeline_mode = #tpu.pipeline_mode<synchronous>, transform_indices = @transform_3, window_bounds = array<i64: 100, 32, 256>}, {pipeline_mode = #tpu.pipeline_mode<synchronous>, transform_indices = @transform_4, window_bounds = array<i64: 1, 256>}, {pipeline_mode = #tpu.pipeline_mode<synchronous>, transform_indices = @transform_5, window_bounds = array<i64: 256, 128>}, {pipeline_mode = #tpu.pipeline_mode<synchronous>, transform_indices = @transform_6, window_bounds = array<i64: 1, 128>}, {transform_indices = @transform_7, window_bounds = array<i64: 1, 8, 128>}]} {
    %c0 = arith.constant 0 : index
    %c0_0 = arith.constant 0 : index
    %c0_1 = arith.constant 0 : index
    %0 = vector.load %arg1[%c0, %c0_0, %c0_1] : memref<1x800x256xbf16, #tpu.memory_space<vmem>>, vector<1x800x256xbf16>
    %1 = vector.shape_cast %0 : vector<1x800x256xbf16> to vector<800x256xbf16>
    %c0_2 = arith.constant 0 : index
    %c0_3 = arith.constant 0 : index
    %2 = vector.load %arg2[%c0_2, %c0_3] : memref<256x32xbf16, #tpu.memory_space<vmem>>, vector<256x32xbf16>
    %cst = arith.constant dense<0.000000e+00> : vector<800x32xf32>
    %3 = tpu.matmul %1, %2, %cst {dimension_numbers = #tpu.dot_dimension_numbers<[1], [0], [0], [1], [0, 0, 1, 1], [], []>} : vector<800x256xbf16>, vector<256x32xbf16>, vector<800x32xf32> -> vector<800x32xf32>
    %c0_4 = arith.constant 0 : index
    %c0_5 = arith.constant 0 : index
    %4 = vector.load %arg3[%c0_4, %c0_5] : memref<1x32xf32, #tpu.memory_space<vmem>>, vector<1x32xf32>
    %5 = vector.broadcast %4 : vector<1x32xf32> to vector<800x32xf32>
    %6 = arith.addf %3, %5 : vector<800x32xf32>
    %cst_6 = arith.constant 0.000000e+00 : f32
    %7 = vector.broadcast %cst_6 : f32 to vector<800x32xf32>
    %8 = arith.maximumf %6, %7 : vector<800x32xf32>
    %cst_7 = arith.constant 0.000000e+00 : f32
    %9 = vector.broadcast %cst_7 : f32 to vector<8x256xf32>
    %cst_8 = arith.constant 0.000000e+00 : f32
    %10 = vector.broadcast %cst_8 : f32 to vector<8x256xf32>
    %cst_9 = arith.constant 0.000000e+00 : f32
    %11 = vector.broadcast %cst_9 : f32 to vector<8x256xf32>
    %cst_10 = arith.constant 0.000000e+00 : f32
    %12 = vector.broadcast %cst_10 : f32 to vector<8x256xf32>
    %13 = vector.extract_strided_slice %8 {offsets = [0, 0], sizes = [8, 32], strides = [1, 1]} : vector<800x32xf32> to vector<8x32xf32>
    %14 = arith.truncf %13 : vector<8x32xf32> to vector<8x32xbf16>
    %c0_11 = arith.constant 0 : index
    %c0_12 = arith.constant 0 : index
    %c0_13 = arith.constant 0 : index
    %15 = vector.load %arg4[%c0_11, %c0_12, %c0_13] : memref<100x32x256xbf16, #tpu.memory_space<vmem>>, vector<1x32x256xbf16>
    %16 = vector.shape_cast %15 : vector<1x32x256xbf16> to vector<32x256xbf16>
    %cst_14 = arith.constant dense<0.000000e+00> : vector<8x256xf32>
    %17 = tpu.matmul %14, %16, %cst_14 {dimension_numbers = #tpu.dot_dimension_numbers<[1], [0], [0], [1], [0, 0, 1, 1], [], []>} : vector<8x32xbf16>, vector<32x256xbf16>, vector<8x256xf32> -> vector<8x256xf32>
    %18 = arith.addf %9, %17 : vector<8x256xf32>
    %19 = vector.extract_strided_slice %8 {offsets = [8, 0], sizes = [8, 32], strides = [1, 1]} : vector<800x32xf32> to vector<8x32xf32>
    %20 = arith.truncf %19 : vector<8x32xf32> to vector<8x32xbf16>
    %c1 = arith.constant 1 : index
    %c0_15 = arith.constant 0 : index
    %c0_16 = arith.constant 0 : index
    %21 = vector.load %arg4[%c1, %c0_15, %c0_16] : memref<100x32x256xbf16, #tpu.memory_space<vmem>>, vector<1x32x256xbf16>
    %22 = vector.shape_cast %21 : vector<1x32x256xbf16> to vector<32x256xbf16>
    %cst_17 = arith.constant dense<0.000000e+00> : vector<8x256xf32>
    %23 = tpu.matmul %20, %22, %cst_17 {dimension_numbers = #tpu.dot_dimension_numbers<[1], [0], [0], [1], [0, 0, 1, 1], [], []>} : vector<8x32xbf16>, vector<32x256xbf16>, vector<8x256xf32> -> vector<8x256xf32>
    %24 = arith.addf %10, %23 : vector<8x256xf32>
    %25 = vector.extract_strided_slice %8 {offsets = [16, 0], sizes = [8, 32], strides = [1, 1]} : vector<800x32xf32> to vector<8x32xf32>
    %26 = arith.truncf %25 : vector<8x32xf32> to vector<8x32xbf16>
    %c2 = arith.constant 2 : index
    %c0_18 = arith.constant 0 : index
    %c0_19 = arith.constant 0 : index
    %27 = vector.load %arg4[%c2, %c0_18, %c0_19] : memref<100x32x256xbf16, #tpu.memory_space<vmem>>, vector<1x32x256xbf16>
    %28 = vector.shape_cast %27 : vector<1x32x256xbf16> to vector<32x256xbf16>
    %cst_20 = arith.constant dense<0.000000e+00> : vector<8x256xf32>
    %29 = tpu.matmul %26, %28, %cst_20 {dimension_numbers = #tpu.dot_dimension_numbers<[1], [0], [0], [1], [0, 0, 1, 1], [], []>} : vector<8x32xbf16>, vector<32x256xbf16>, vector<8x256xf32> -> vector<8x256xf32>
    %30 = arith.addf %11, %29 : vector<8x256xf32>
    %31 = vector.extract_strided_slice %8 {offsets = [24, 0], sizes = [8, 32], strides = [1, 1]} : vector<800x32xf32> to vector<8x32xf32>
    %32 = arith.truncf %31 : vector<8x32xf32> to vector<8x32xbf16>
    %c3 = arith.constant 3 : index
    %c0_21 = arith.constant 0 : index
    %c0_22 = arith.constant 0 : index
    %33 = vector.load %arg4[%c3, %c0_21, %c0_22] : memref<100x32x256xbf16, #tpu.memory_space<vmem>>, vector<1x32x256xbf16>
    %34 = vector.shape_cast %33 : vector<1x32x256xbf16> to vector<32x256xbf16>
    %cst_23 = arith.constant dense<0.000000e+00> : vector<8x256xf32>
    %35 = tpu.matmul %32, %34, %cst_23 {dimension_numbers = #tpu.dot_dimension_numbers<[1], [0], [0], [1], [0, 0, 1, 1], [], []>} : vector<8x32xbf16>, vector<32x256xbf16>, vector<8x256xf32> -> vector<8x256xf32>
    %36 = arith.addf %12, %35 : vector<8x256xf32>
    %37 = vector.extract_strided_slice %8 {offsets = [32, 0], sizes = [8, 32], strides = [1, 1]} : vector<800x32xf32> to vector<8x32xf32>
    %38 = arith.truncf %37 : vector<8x32xf32> to vector<8x32xbf16>
    %c4 = arith.constant 4 : index
    %c0_24 = arith.constant 0 : index
    %c0_25 = arith.constant 0 : index
    %39 = vector.load %arg4[%c4, %c0_24, %c0_25] : memref<100x32x256xbf16, #tpu.memory_space<vmem>>, vector<1x32x256xbf16>
    %40 = vector.shape_cast %39 : vector<1x32x256xbf16> to vector<32x256xbf16>
    %cst_26 = arith.constant dense<0.000000e+00> : vector<8x256xf32>
    %41 = tpu.matmul %38, %40, %cst_26 {dimension_numbers = #tpu.dot_dimension_numbers<[1], [0], [0], [1], [0, 0, 1, 1], [], []>} : vector<8x32xbf16>, vector<32x256xbf16>, vector<8x256xf32> -> vector<8x256xf32>
    %42 = arith.addf %18, %41 : vector<8x256xf32>
    %43 = vector.extract_strided_slice %8 {offsets = [40, 0], sizes = [8, 32], strides = [1, 1]} : vector<800x32xf32> to vector<8x32xf32>
    %44 = arith.truncf %43 : vector<8x32xf32> to vector<8x32xbf16>
    %c5 = arith.constant 5 : index
    %c0_27 = arith.constant 0 : index
    %c0_28 = arith.constant 0 : index
    %45 = vector.load %arg4[%c5, %c0_27, %c0_28] : memref<100x32x256xbf16, #tpu.memory_space<vmem>>, vector<1x32x256xbf16>
    %46 = vector.shape_cast %45 : vector<1x32x256xbf16> to vector<32x256xbf16>
    %cst_29 = arith.constant dense<0.000000e+00> : vector<8x256xf32>
    %47 = tpu.matmul %44, %46, %cst_29 {dimension_numbers = #tpu.dot_dimension_numbers<[1], [0], [0], [1], [0, 0, 1, 1], [], []>} : vector<8x32xbf16>, vector<32x256xbf16>, vector<8x256xf32> -> vector<8x256xf32>
    %48 = arith.addf %24, %47 : vector<8x256xf32>
    %49 = vector.extract_strided_slice %8 {offsets = [48, 0], sizes = [8, 32], strides = [1, 1]} : vector<800x32xf32> to vector<8x32xf32>
    %50 = arith.truncf %49 : vector<8x32xf32> to vector<8x32xbf16>
    %c6 = arith.constant 6 : index
    %c0_30 = arith.constant 0 : index
    %c0_31 = arith.constant 0 : index
    %51 = vector.load %arg4[%c6, %c0_30, %c0_31] : memref<100x32x256xbf16, #tpu.memory_space<vmem>>, vector<1x32x256xbf16>
    %52 = vector.shape_cast %51 : vector<1x32x256xbf16> to vector<32x256xbf16>
    %cst_32 = arith.constant dense<0.000000e+00> : vector<8x256xf32>
    %53 = tpu.matmul %50, %52, %cst_32 {dimension_numbers = #tpu.dot_dimension_numbers<[1], [0], [0], [1], [0, 0, 1, 1], [], []>} : vector<8x32xbf16>, vector<32x256xbf16>, vector<8x256xf32> -> vector<8x256xf32>
    %54 = arith.addf %30, %53 : vector<8x256xf32>
    %55 = vector.extract_strided_slice %8 {offsets = [56, 0], sizes = [8, 32], strides = [1, 1]} : vector<800x32xf32> to vector<8x32xf32>
    %56 = arith.truncf %55 : vector<8x32xf32> to vector<8x32xbf16>
    %c7 = arith.constant 7 : index
    %c0_33 = arith.constant 0 : index
    %c0_34 = arith.constant 0 : index
    %57 = vector.load %arg4[%c7, %c0_33, %c0_34] : memref<100x32x256xbf16, #tpu.memory_space<vmem>>, vector<1x32x256xbf16>
    %58 = vector.shape_cast %57 : vector<1x32x256xbf16> to vector<32x256xbf16>
    %cst_35 = arith.constant dense<0.000000e+00> : vector<8x256xf32>
    %59 = tpu.matmul %56, %58, %cst_35 {dimension_numbers = #tpu.dot_dimension_numbers<[1], [0], [0], [1], [0, 0, 1, 1], [], []>} : vector<8x32xbf16>, vector<32x256xbf16>, vector<8x256xf32> -> vector<8x256xf32>
    %60 = arith.addf %36, %59 : vector<8x256xf32>
    %61 = vector.extract_strided_slice %8 {offsets = [64, 0], sizes = [8, 32], strides = [1, 1]} : vector<800x32xf32> to vector<8x32xf32>
    %62 = arith.truncf %61 : vector<8x32xf32> to vector<8x32xbf16>
    %c8 = arith.constant 8 : index
    %c0_36 = arith.constant 0 : index
    %c0_37 = arith.constant 0 : index
    %63 = vector.load %arg4[%c8, %c0_36, %c0_37] : memref<100x32x256xbf16, #tpu.memory_space<vmem>>, vector<1x32x256xbf16>
    %64 = vector.shape_cast %63 : vector<1x32x256xbf16> to vector<32x256xbf16>
    %cst_38 = arith.constant dense<0.000000e+00> : vector<8x256xf32>
    %65 = tpu.matmul %62, %64, %cst_38 {dimension_numbers = #tpu.dot_dimension_numbers<[1], [0], [0], [1], [0, 0, 1, 1], [], []>} : vector<8x32xbf16>, vector<32x256xbf16>, vector<8x256xf32> -> vector<8x256xf32>
    %66 = arith.addf %42, %65 : vector<8x256xf32>
    %67 = vector.extract_strided_slice %8 {offsets = [72, 0], sizes = [8, 32], strides = [1, 1]} : vector<800x32xf32> to vector<8x32xf32>
    %68 = arith.truncf %67 : vector<8x32xf32> to vector<8x32xbf16>
    %c9 = arith.constant 9 : index
    %c0_39 = arith.constant 0 : index
    %c0_40 = arith.constant 0 : index
    %69 = vector.load %arg4[%c9, %c0_39, %c0_40] : memref<100x32x256xbf16, #tpu.memory_space<vmem>>, vector<1x32x256xbf16>
    %70 = vector.shape_cast %69 : vector<1x32x256xbf16> to vector<32x256xbf16>
    %cst_41 = arith.constant dense<0.000000e+00> : vector<8x256xf32>
    %71 = tpu.matmul %68, %70, %cst_41 {dimension_numbers = #tpu.dot_dimension_numbers<[1], [0], [0], [1], [0, 0, 1, 1], [], []>} : vector<8x32xbf16>, vector<32x256xbf16>, vector<8x256xf32> -> vector<8x256xf32>
    %72 = arith.addf %48, %71 : vector<8x256xf32>
    %73 = vector.extract_strided_slice %8 {offsets = [80, 0], sizes = [8, 32], strides = [1, 1]} : vector<800x32xf32> to vector<8x32xf32>
    %74 = arith.truncf %73 : vector<8x32xf32> to vector<8x32xbf16>
    %c10 = arith.constant 10 : index
    %c0_42 = arith.constant 0 : index
    %c0_43 = arith.constant 0 : index
    %75 = vector.load %arg4[%c10, %c0_42, %c0_43] : memref<100x32x256xbf16, #tpu.memory_space<vmem>>, vector<1x32x256xbf16>
    %76 = vector.shape_cast %75 : vector<1x32x256xbf16> to vector<32x256xbf16>
    %cst_44 = arith.constant dense<0.000000e+00> : vector<8x256xf32>
    %77 = tpu.matmul %74, %76, %cst_44 {dimension_numbers = #tpu.dot_dimension_numbers<[1], [0], [0], [1], [0, 0, 1, 1], [], []>} : vector<8x32xbf16>, vector<32x256xbf16>, vector<8x256xf32> -> vector<8x256xf32>
    %78 = arith.addf %54, %77 : vector<8x256xf32>
    %79 = vector.extract_strided_slice %8 {offsets = [88, 0], sizes = [8, 32], strides = [1, 1]} : vector<800x32xf32> to vector<8x32xf32>
    %80 = arith.truncf %79 : vector<8x32xf32> to vector<8x32xbf16>
    %c11 = arith.constant 11 : index
    %c0_45 = arith.constant 0 : index
    %c0_46 = arith.constant 0 : index
    %81 = vector.load %arg4[%c11, %c0_45, %c0_46] : memref<100x32x256xbf16, #tpu.memory_space<vmem>>, vector<1x32x256xbf16>
    %82 = vector.shape_cast %81 : vector<1x32x256xbf16> to vector<32x256xbf16>
    %cst_47 = arith.constant dense<0.000000e+00> : vector<8x256xf32>
    %83 = tpu.matmul %80, %82, %cst_47 {dimension_numbers = #tpu.dot_dimension_numbers<[1], [0], [0], [1], [0, 0, 1, 1], [], []>} : vector<8x32xbf16>, vector<32x256xbf16>, vector<8x256xf32> -> vector<8x256xf32>
    %84 = arith.addf %60, %83 : vector<8x256xf32>
    %85 = vector.extract_strided_slice %8 {offsets = [96, 0], sizes = [8, 32], strides = [1, 1]} : vector<800x32xf32> to vector<8x32xf32>
    %86 = arith.truncf %85 : vector<8x32xf32> to vector<8x32xbf16>
    %c12 = arith.constant 12 : index
    %c0_48 = arith.constant 0 : index
    %c0_49 = arith.constant 0 : index
    %87 = vector.load %arg4[%c12, %c0_48, %c0_49] : memref<100x32x256xbf16, #tpu.memory_space<vmem>>, vector<1x32x256xbf16>
    %88 = vector.shape_cast %87 : vector<1x32x256xbf16> to vector<32x256xbf16>
    %cst_50 = arith.constant dense<0.000000e+00> : vector<8x256xf32>
    %89 = tpu.matmul %86, %88, %cst_50 {dimension_numbers = #tpu.dot_dimension_numbers<[1], [0], [0], [1], [0, 0, 1, 1], [], []>} : vector<8x32xbf16>, vector<32x256xbf16>, vector<8x256xf32> -> vector<8x256xf32>
    %90 = arith.addf %66, %89 : vector<8x256xf32>
    %91 = vector.extract_strided_slice %8 {offsets = [104, 0], sizes = [8, 32], strides = [1, 1]} : vector<800x32xf32> to vector<8x32xf32>
    %92 = arith.truncf %91 : vector<8x32xf32> to vector<8x32xbf16>
    %c13 = arith.constant 13 : index
    %c0_51 = arith.constant 0 : index
    %c0_52 = arith.constant 0 : index
    %93 = vector.load %arg4[%c13, %c0_51, %c0_52] : memref<100x32x256xbf16, #tpu.memory_space<vmem>>, vector<1x32x256xbf16>
    %94 = vector.shape_cast %93 : vector<1x32x256xbf16> to vector<32x256xbf16>
    %cst_53 = arith.constant dense<0.000000e+00> : vector<8x256xf32>
    %95 = tpu.matmul %92, %94, %cst_53 {dimension_numbers = #tpu.dot_dimension_numbers<[1], [0], [0], [1], [0, 0, 1, 1], [], []>} : vector<8x32xbf16>, vector<32x256xbf16>, vector<8x256xf32> -> vector<8x256xf32>
    %96 = arith.addf %72, %95 : vector<8x256xf32>
    %97 = vector.extract_strided_slice %8 {offsets = [112, 0], sizes = [8, 32], strides = [1, 1]} : vector<800x32xf32> to vector<8x32xf32>
    %98 = arith.truncf %97 : vector<8x32xf32> to vector<8x32xbf16>
    %c14 = arith.constant 14 : index
    %c0_54 = arith.constant 0 : index
    %c0_55 = arith.constant 0 : index
    %99 = vector.load %arg4[%c14, %c0_54, %c0_55] : memref<100x32x256xbf16, #tpu.memory_space<vmem>>, vector<1x32x256xbf16>
    %100 = vector.shape_cast %99 : vector<1x32x256xbf16> to vector<32x256xbf16>
    %cst_56 = arith.constant dense<0.000000e+00> : vector<8x256xf32>
    %101 = tpu.matmul %98, %100, %cst_56 {dimension_numbers = #tpu.dot_dimension_numbers<[1], [0], [0], [1], [0, 0, 1, 1], [], []>} : vector<8x32xbf16>, vector<32x256xbf16>, vector<8x256xf32> -> vector<8x256xf32>
    %102 = arith.addf %78, %101 : vector<8x256xf32>
    %103 = vector.extract_strided_slice %8 {offsets = [120, 0], sizes = [8, 32], strides = [1, 1]} : vector<800x32xf32> to vector<8x32xf32>
    %104 = arith.truncf %103 : vector<8x32xf32> to vector<8x32xbf16>
    %c15 = arith.constant 15 : index
    %c0_57 = arith.constant 0 : index
    %c0_58 = arith.constant 0 : index
    %105 = vector.load %arg4[%c15, %c0_57, %c0_58] : memref<100x32x256xbf16, #tpu.memory_space<vmem>>, vector<1x32x256xbf16>
    %106 = vector.shape_cast %105 : vector<1x32x256xbf16> to vector<32x256xbf16>
    %cst_59 = arith.constant dense<0.000000e+00> : vector<8x256xf32>
    %107 = tpu.matmul %104, %106, %cst_59 {dimension_numbers = #tpu.dot_dimension_numbers<[1], [0], [0], [1], [0, 0, 1, 1], [], []>} : vector<8x32xbf16>, vector<32x256xbf16>, vector<8x256xf32> -> vector<8x256xf32>
    %108 = arith.addf %84, %107 : vector<8x256xf32>
    %109 = vector.extract_strided_slice %8 {offsets = [128, 0], sizes = [8, 32], strides = [1, 1]} : vector<800x32xf32> to vector<8x32xf32>
    %110 = arith.truncf %109 : vector<8x32xf32> to vector<8x32xbf16>
    %c16 = arith.constant 16 : index
    %c0_60 = arith.constant 0 : index
    %c0_61 = arith.constant 0 : index
    %111 = vector.load %arg4[%c16, %c0_60, %c0_61] : memref<100x32x256xbf16, #tpu.memory_space<vmem>>, vector<1x32x256xbf16>
    %112 = vector.shape_cast %111 : vector<1x32x256xbf16> to vector<32x256xbf16>
    %cst_62 = arith.constant dense<0.000000e+00> : vector<8x256xf32>
    %113 = tpu.matmul %110, %112, %cst_62 {dimension_numbers = #tpu.dot_dimension_numbers<[1], [0], [0], [1], [0, 0, 1, 1], [], []>} : vector<8x32xbf16>, vector<32x256xbf16>, vector<8x256xf32> -> vector<8x256xf32>
    %114 = arith.addf %90, %113 : vector<8x256xf32>
    %115 = vector.extract_strided_slice %8 {offsets = [136, 0], sizes = [8, 32], strides = [1, 1]} : vector<800x32xf32> to vector<8x32xf32>
    %116 = arith.truncf %115 : vector<8x32xf32> to vector<8x32xbf16>
    %c17 = arith.constant 17 : index
    %c0_63 = arith.constant 0 : index
    %c0_64 = arith.constant 0 : index
    %117 = vector.load %arg4[%c17, %c0_63, %c0_64] : memref<100x32x256xbf16, #tpu.memory_space<vmem>>, vector<1x32x256xbf16>
    %118 = vector.shape_cast %117 : vector<1x32x256xbf16> to vector<32x256xbf16>
    %cst_65 = arith.constant dense<0.000000e+00> : vector<8x256xf32>
    %119 = tpu.matmul %116, %118, %cst_65 {dimension_numbers = #tpu.dot_dimension_numbers<[1], [0], [0], [1], [0, 0, 1, 1], [], []>} : vector<8x32xbf16>, vector<32x256xbf16>, vector<8x256xf32> -> vector<8x256xf32>
    %120 = arith.addf %96, %119 : vector<8x256xf32>
    %121 = vector.extract_strided_slice %8 {offsets = [144, 0], sizes = [8, 32], strides = [1, 1]} : vector<800x32xf32> to vector<8x32xf32>
    %122 = arith.truncf %121 : vector<8x32xf32> to vector<8x32xbf16>
    %c18 = arith.constant 18 : index
    %c0_66 = arith.constant 0 : index
    %c0_67 = arith.constant 0 : index
    %123 = vector.load %arg4[%c18, %c0_66, %c0_67] : memref<100x32x256xbf16, #tpu.memory_space<vmem>>, vector<1x32x256xbf16>
    %124 = vector.shape_cast %123 : vector<1x32x256xbf16> to vector<32x256xbf16>
    %cst_68 = arith.constant dense<0.000000e+00> : vector<8x256xf32>
    %125 = tpu.matmul %122, %124, %cst_68 {dimension_numbers = #tpu.dot_dimension_numbers<[1], [0], [0], [1], [0, 0, 1, 1], [], []>} : vector<8x32xbf16>, vector<32x256xbf16>, vector<8x256xf32> -> vector<8x256xf32>
    %126 = arith.addf %102, %125 : vector<8x256xf32>
    %127 = vector.extract_strided_slice %8 {offsets = [152, 0], sizes = [8, 32], strides = [1, 1]} : vector<800x32xf32> to vector<8x32xf32>
    %128 = arith.truncf %127 : vector<8x32xf32> to vector<8x32xbf16>
    %c19 = arith.constant 19 : index
    %c0_69 = arith.constant 0 : index
    %c0_70 = arith.constant 0 : index
    %129 = vector.load %arg4[%c19, %c0_69, %c0_70] : memref<100x32x256xbf16, #tpu.memory_space<vmem>>, vector<1x32x256xbf16>
    %130 = vector.shape_cast %129 : vector<1x32x256xbf16> to vector<32x256xbf16>
    %cst_71 = arith.constant dense<0.000000e+00> : vector<8x256xf32>
    %131 = tpu.matmul %128, %130, %cst_71 {dimension_numbers = #tpu.dot_dimension_numbers<[1], [0], [0], [1], [0, 0, 1, 1], [], []>} : vector<8x32xbf16>, vector<32x256xbf16>, vector<8x256xf32> -> vector<8x256xf32>
    %132 = arith.addf %108, %131 : vector<8x256xf32>
    %133 = vector.extract_strided_slice %8 {offsets = [160, 0], sizes = [8, 32], strides = [1, 1]} : vector<800x32xf32> to vector<8x32xf32>
    %134 = arith.truncf %133 : vector<8x32xf32> to vector<8x32xbf16>
    %c20 = arith.constant 20 : index
    %c0_72 = arith.constant 0 : index
    %c0_73 = arith.constant 0 : index
    %135 = vector.load %arg4[%c20, %c0_72, %c0_73] : memref<100x32x256xbf16, #tpu.memory_space<vmem>>, vector<1x32x256xbf16>
    %136 = vector.shape_cast %135 : vector<1x32x256xbf16> to vector<32x256xbf16>
    %cst_74 = arith.constant dense<0.000000e+00> : vector<8x256xf32>
    %137 = tpu.matmul %134, %136, %cst_74 {dimension_numbers = #tpu.dot_dimension_numbers<[1], [0], [0], [1], [0, 0, 1, 1], [], []>} : vector<8x32xbf16>, vector<32x256xbf16>, vector<8x256xf32> -> vector<8x256xf32>
    %138 = arith.addf %114, %137 : vector<8x256xf32>
    %139 = vector.extract_strided_slice %8 {offsets = [168, 0], sizes = [8, 32], strides = [1, 1]} : vector<800x32xf32> to vector<8x32xf32>
    %140 = arith.truncf %139 : vector<8x32xf32> to vector<8x32xbf16>
    %c21 = arith.constant 21 : index
    %c0_75 = arith.constant 0 : index
    %c0_76 = arith.constant 0 : index
    %141 = vector.load %arg4[%c21, %c0_75, %c0_76] : memref<100x32x256xbf16, #tpu.memory_space<vmem>>, vector<1x32x256xbf16>
    %142 = vector.shape_cast %141 : vector<1x32x256xbf16> to vector<32x256xbf16>
    %cst_77 = arith.constant dense<0.000000e+00> : vector<8x256xf32>
    %143 = tpu.matmul %140, %142, %cst_77 {dimension_numbers = #tpu.dot_dimension_numbers<[1], [0], [0], [1], [0, 0, 1, 1], [], []>} : vector<8x32xbf16>, vector<32x256xbf16>, vector<8x256xf32> -> vector<8x256xf32>
    %144 = arith.addf %120, %143 : vector<8x256xf32>
    %145 = vector.extract_strided_slice %8 {offsets = [176, 0], sizes = [8, 32], strides = [1, 1]} : vector<800x32xf32> to vector<8x32xf32>
    %146 = arith.truncf %145 : vector<8x32xf32> to vector<8x32xbf16>
    %c22 = arith.constant 22 : index
    %c0_78 = arith.constant 0 : index
    %c0_79 = arith.constant 0 : index
    %147 = vector.load %arg4[%c22, %c0_78, %c0_79] : memref<100x32x256xbf16, #tpu.memory_space<vmem>>, vector<1x32x256xbf16>
    %148 = vector.shape_cast %147 : vector<1x32x256xbf16> to vector<32x256xbf16>
    %cst_80 = arith.constant dense<0.000000e+00> : vector<8x256xf32>
    %149 = tpu.matmul %146, %148, %cst_80 {dimension_numbers = #tpu.dot_dimension_numbers<[1], [0], [0], [1], [0, 0, 1, 1], [], []>} : vector<8x32xbf16>, vector<32x256xbf16>, vector<8x256xf32> -> vector<8x256xf32>
    %150 = arith.addf %126, %149 : vector<8x256xf32>
    %151 = vector.extract_strided_slice %8 {offsets = [184, 0], sizes = [8, 32], strides = [1, 1]} : vector<800x32xf32> to vector<8x32xf32>
    %152 = arith.truncf %151 : vector<8x32xf32> to vector<8x32xbf16>
    %c23 = arith.constant 23 : index
    %c0_81 = arith.constant 0 : index
    %c0_82 = arith.constant 0 : index
    %153 = vector.load %arg4[%c23, %c0_81, %c0_82] : memref<100x32x256xbf16, #tpu.memory_space<vmem>>, vector<1x32x256xbf16>
    %154 = vector.shape_cast %153 : vector<1x32x256xbf16> to vector<32x256xbf16>
    %cst_83 = arith.constant dense<0.000000e+00> : vector<8x256xf32>
    %155 = tpu.matmul %152, %154, %cst_83 {dimension_numbers = #tpu.dot_dimension_numbers<[1], [0], [0], [1], [0, 0, 1, 1], [], []>} : vector<8x32xbf16>, vector<32x256xbf16>, vector<8x256xf32> -> vector<8x256xf32>
    %156 = arith.addf %132, %155 : vector<8x256xf32>
    %157 = vector.extract_strided_slice %8 {offsets = [192, 0], sizes = [8, 32], strides = [1, 1]} : vector<800x32xf32> to vector<8x32xf32>
    %158 = arith.truncf %157 : vector<8x32xf32> to vector<8x32xbf16>
    %c24 = arith.constant 24 : index
    %c0_84 = arith.constant 0 : index
    %c0_85 = arith.constant 0 : index
    %159 = vector.load %arg4[%c24, %c0_84, %c0_85] : memref<100x32x256xbf16, #tpu.memory_space<vmem>>, vector<1x32x256xbf16>
    %160 = vector.shape_cast %159 : vector<1x32x256xbf16> to vector<32x256xbf16>
    %cst_86 = arith.constant dense<0.000000e+00> : vector<8x256xf32>
    %161 = tpu.matmul %158, %160, %cst_86 {dimension_numbers = #tpu.dot_dimension_numbers<[1], [0], [0], [1], [0, 0, 1, 1], [], []>} : vector<8x32xbf16>, vector<32x256xbf16>, vector<8x256xf32> -> vector<8x256xf32>
    %162 = arith.addf %138, %161 : vector<8x256xf32>
    %163 = vector.extract_strided_slice %8 {offsets = [200, 0], sizes = [8, 32], strides = [1, 1]} : vector<800x32xf32> to vector<8x32xf32>
    %164 = arith.truncf %163 : vector<8x32xf32> to vector<8x32xbf16>
    %c25 = arith.constant 25 : index
    %c0_87 = arith.constant 0 : index
    %c0_88 = arith.constant 0 : index
    %165 = vector.load %arg4[%c25, %c0_87, %c0_88] : memref<100x32x256xbf16, #tpu.memory_space<vmem>>, vector<1x32x256xbf16>
    %166 = vector.shape_cast %165 : vector<1x32x256xbf16> to vector<32x256xbf16>
    %cst_89 = arith.constant dense<0.000000e+00> : vector<8x256xf32>
    %167 = tpu.matmul %164, %166, %cst_89 {dimension_numbers = #tpu.dot_dimension_numbers<[1], [0], [0], [1], [0, 0, 1, 1], [], []>} : vector<8x32xbf16>, vector<32x256xbf16>, vector<8x256xf32> -> vector<8x256xf32>
    %168 = arith.addf %144, %167 : vector<8x256xf32>
    %169 = vector.extract_strided_slice %8 {offsets = [208, 0], sizes = [8, 32], strides = [1, 1]} : vector<800x32xf32> to vector<8x32xf32>
    %170 = arith.truncf %169 : vector<8x32xf32> to vector<8x32xbf16>
    %c26 = arith.constant 26 : index
    %c0_90 = arith.constant 0 : index
    %c0_91 = arith.constant 0 : index
    %171 = vector.load %arg4[%c26, %c0_90, %c0_91] : memref<100x32x256xbf16, #tpu.memory_space<vmem>>, vector<1x32x256xbf16>
    %172 = vector.shape_cast %171 : vector<1x32x256xbf16> to vector<32x256xbf16>
    %cst_92 = arith.constant dense<0.000000e+00> : vector<8x256xf32>
    %173 = tpu.matmul %170, %172, %cst_92 {dimension_numbers = #tpu.dot_dimension_numbers<[1], [0], [0], [1], [0, 0, 1, 1], [], []>} : vector<8x32xbf16>, vector<32x256xbf16>, vector<8x256xf32> -> vector<8x256xf32>
    %174 = arith.addf %150, %173 : vector<8x256xf32>
    %175 = vector.extract_strided_slice %8 {offsets = [216, 0], sizes = [8, 32], strides = [1, 1]} : vector<800x32xf32> to vector<8x32xf32>
    %176 = arith.truncf %175 : vector<8x32xf32> to vector<8x32xbf16>
    %c27 = arith.constant 27 : index
    %c0_93 = arith.constant 0 : index
    %c0_94 = arith.constant 0 : index
    %177 = vector.load %arg4[%c27, %c0_93, %c0_94] : memref<100x32x256xbf16, #tpu.memory_space<vmem>>, vector<1x32x256xbf16>
    %178 = vector.shape_cast %177 : vector<1x32x256xbf16> to vector<32x256xbf16>
    %cst_95 = arith.constant dense<0.000000e+00> : vector<8x256xf32>
    %179 = tpu.matmul %176, %178, %cst_95 {dimension_numbers = #tpu.dot_dimension_numbers<[1], [0], [0], [1], [0, 0, 1, 1], [], []>} : vector<8x32xbf16>, vector<32x256xbf16>, vector<8x256xf32> -> vector<8x256xf32>
    %180 = arith.addf %156, %179 : vector<8x256xf32>
    %181 = vector.extract_strided_slice %8 {offsets = [224, 0], sizes = [8, 32], strides = [1, 1]} : vector<800x32xf32> to vector<8x32xf32>
    %182 = arith.truncf %181 : vector<8x32xf32> to vector<8x32xbf16>
    %c28 = arith.constant 28 : index
    %c0_96 = arith.constant 0 : index
    %c0_97 = arith.constant 0 : index
    %183 = vector.load %arg4[%c28, %c0_96, %c0_97] : memref<100x32x256xbf16, #tpu.memory_space<vmem>>, vector<1x32x256xbf16>
    %184 = vector.shape_cast %183 : vector<1x32x256xbf16> to vector<32x256xbf16>
    %cst_98 = arith.constant dense<0.000000e+00> : vector<8x256xf32>
    %185 = tpu.matmul %182, %184, %cst_98 {dimension_numbers = #tpu.dot_dimension_numbers<[1], [0], [0], [1], [0, 0, 1, 1], [], []>} : vector<8x32xbf16>, vector<32x256xbf16>, vector<8x256xf32> -> vector<8x256xf32>
    %186 = arith.addf %162, %185 : vector<8x256xf32>
    %187 = vector.extract_strided_slice %8 {offsets = [232, 0], sizes = [8, 32], strides = [1, 1]} : vector<800x32xf32> to vector<8x32xf32>
    %188 = arith.truncf %187 : vector<8x32xf32> to vector<8x32xbf16>
    %c29 = arith.constant 29 : index
    %c0_99 = arith.constant 0 : index
    %c0_100 = arith.constant 0 : index
    %189 = vector.load %arg4[%c29, %c0_99, %c0_100] : memref<100x32x256xbf16, #tpu.memory_space<vmem>>, vector<1x32x256xbf16>
    %190 = vector.shape_cast %189 : vector<1x32x256xbf16> to vector<32x256xbf16>
    %cst_101 = arith.constant dense<0.000000e+00> : vector<8x256xf32>
    %191 = tpu.matmul %188, %190, %cst_101 {dimension_numbers = #tpu.dot_dimension_numbers<[1], [0], [0], [1], [0, 0, 1, 1], [], []>} : vector<8x32xbf16>, vector<32x256xbf16>, vector<8x256xf32> -> vector<8x256xf32>
    %192 = arith.addf %168, %191 : vector<8x256xf32>
    %193 = vector.extract_strided_slice %8 {offsets = [240, 0], sizes = [8, 32], strides = [1, 1]} : vector<800x32xf32> to vector<8x32xf32>
    %194 = arith.truncf %193 : vector<8x32xf32> to vector<8x32xbf16>
    %c30 = arith.constant 30 : index
    %c0_102 = arith.constant 0 : index
    %c0_103 = arith.constant 0 : index
    %195 = vector.load %arg4[%c30, %c0_102, %c0_103] : memref<100x32x256xbf16, #tpu.memory_space<vmem>>, vector<1x32x256xbf16>
    %196 = vector.shape_cast %195 : vector<1x32x256xbf16> to vector<32x256xbf16>
    %cst_104 = arith.constant dense<0.000000e+00> : vector<8x256xf32>
    %197 = tpu.matmul %194, %196, %cst_104 {dimension_numbers = #tpu.dot_dimension_numbers<[1], [0], [0], [1], [0, 0, 1, 1], [], []>} : vector<8x32xbf16>, vector<32x256xbf16>, vector<8x256xf32> -> vector<8x256xf32>
    %198 = arith.addf %174, %197 : vector<8x256xf32>
    %199 = vector.extract_strided_slice %8 {offsets = [248, 0], sizes = [8, 32], strides = [1, 1]} : vector<800x32xf32> to vector<8x32xf32>
    %200 = arith.truncf %199 : vector<8x32xf32> to vector<8x32xbf16>
    %c31 = arith.constant 31 : index
    %c0_105 = arith.constant 0 : index
    %c0_106 = arith.constant 0 : index
    %201 = vector.load %arg4[%c31, %c0_105, %c0_106] : memref<100x32x256xbf16, #tpu.memory_space<vmem>>, vector<1x32x256xbf16>
    %202 = vector.shape_cast %201 : vector<1x32x256xbf16> to vector<32x256xbf16>
    %cst_107 = arith.constant dense<0.000000e+00> : vector<8x256xf32>
    %203 = tpu.matmul %200, %202, %cst_107 {dimension_numbers = #tpu.dot_dimension_numbers<[1], [0], [0], [1], [0, 0, 1, 1], [], []>} : vector<8x32xbf16>, vector<32x256xbf16>, vector<8x256xf32> -> vector<8x256xf32>
    %204 = arith.addf %180, %203 : vector<8x256xf32>
    %205 = vector.extract_strided_slice %8 {offsets = [256, 0], sizes = [8, 32], strides = [1, 1]} : vector<800x32xf32> to vector<8x32xf32>
    %206 = arith.truncf %205 : vector<8x32xf32> to vector<8x32xbf16>
    %c32 = arith.constant 32 : index
    %c0_108 = arith.constant 0 : index
    %c0_109 = arith.constant 0 : index
    %207 = vector.load %arg4[%c32, %c0_108, %c0_109] : memref<100x32x256xbf16, #tpu.memory_space<vmem>>, vector<1x32x256xbf16>
    %208 = vector.shape_cast %207 : vector<1x32x256xbf16> to vector<32x256xbf16>
    %cst_110 = arith.constant dense<0.000000e+00> : vector<8x256xf32>
    %209 = tpu.matmul %206, %208, %cst_110 {dimension_numbers = #tpu.dot_dimension_numbers<[1], [0], [0], [1], [0, 0, 1, 1], [], []>} : vector<8x32xbf16>, vector<32x256xbf16>, vector<8x256xf32> -> vector<8x256xf32>
    %210 = arith.addf %186, %209 : vector<8x256xf32>
    %211 = vector.extract_strided_slice %8 {offsets = [264, 0], sizes = [8, 32], strides = [1, 1]} : vector<800x32xf32> to vector<8x32xf32>
    %212 = arith.truncf %211 : vector<8x32xf32> to vector<8x32xbf16>
    %c33 = arith.constant 33 : index
    %c0_111 = arith.constant 0 : index
    %c0_112 = arith.constant 0 : index
    %213 = vector.load %arg4[%c33, %c0_111, %c0_112] : memref<100x32x256xbf16, #tpu.memory_space<vmem>>, vector<1x32x256xbf16>
    %214 = vector.shape_cast %213 : vector<1x32x256xbf16> to vector<32x256xbf16>
    %cst_113 = arith.constant dense<0.000000e+00> : vector<8x256xf32>
    %215 = tpu.matmul %212, %214, %cst_113 {dimension_numbers = #tpu.dot_dimension_numbers<[1], [0], [0], [1], [0, 0, 1, 1], [], []>} : vector<8x32xbf16>, vector<32x256xbf16>, vector<8x256xf32> -> vector<8x256xf32>
    %216 = arith.addf %192, %215 : vector<8x256xf32>
    %217 = vector.extract_strided_slice %8 {offsets = [272, 0], sizes = [8, 32], strides = [1, 1]} : vector<800x32xf32> to vector<8x32xf32>
    %218 = arith.truncf %217 : vector<8x32xf32> to vector<8x32xbf16>
    %c34 = arith.constant 34 : index
    %c0_114 = arith.constant 0 : index
    %c0_115 = arith.constant 0 : index
    %219 = vector.load %arg4[%c34, %c0_114, %c0_115] : memref<100x32x256xbf16, #tpu.memory_space<vmem>>, vector<1x32x256xbf16>
    %220 = vector.shape_cast %219 : vector<1x32x256xbf16> to vector<32x256xbf16>
    %cst_116 = arith.constant dense<0.000000e+00> : vector<8x256xf32>
    %221 = tpu.matmul %218, %220, %cst_116 {dimension_numbers = #tpu.dot_dimension_numbers<[1], [0], [0], [1], [0, 0, 1, 1], [], []>} : vector<8x32xbf16>, vector<32x256xbf16>, vector<8x256xf32> -> vector<8x256xf32>
    %222 = arith.addf %198, %221 : vector<8x256xf32>
    %223 = vector.extract_strided_slice %8 {offsets = [280, 0], sizes = [8, 32], strides = [1, 1]} : vector<800x32xf32> to vector<8x32xf32>
    %224 = arith.truncf %223 : vector<8x32xf32> to vector<8x32xbf16>
    %c35 = arith.constant 35 : index
    %c0_117 = arith.constant 0 : index
    %c0_118 = arith.constant 0 : index
    %225 = vector.load %arg4[%c35, %c0_117, %c0_118] : memref<100x32x256xbf16, #tpu.memory_space<vmem>>, vector<1x32x256xbf16>
    %226 = vector.shape_cast %225 : vector<1x32x256xbf16> to vector<32x256xbf16>
    %cst_119 = arith.constant dense<0.000000e+00> : vector<8x256xf32>
    %227 = tpu.matmul %224, %226, %cst_119 {dimension_numbers = #tpu.dot_dimension_numbers<[1], [0], [0], [1], [0, 0, 1, 1], [], []>} : vector<8x32xbf16>, vector<32x256xbf16>, vector<8x256xf32> -> vector<8x256xf32>
    %228 = arith.addf %204, %227 : vector<8x256xf32>
    %229 = vector.extract_strided_slice %8 {offsets = [288, 0], sizes = [8, 32], strides = [1, 1]} : vector<800x32xf32> to vector<8x32xf32>
    %230 = arith.truncf %229 : vector<8x32xf32> to vector<8x32xbf16>
    %c36 = arith.constant 36 : index
    %c0_120 = arith.constant 0 : index
    %c0_121 = arith.constant 0 : index
    %231 = vector.load %arg4[%c36, %c0_120, %c0_121] : memref<100x32x256xbf16, #tpu.memory_space<vmem>>, vector<1x32x256xbf16>
    %232 = vector.shape_cast %231 : vector<1x32x256xbf16> to vector<32x256xbf16>
    %cst_122 = arith.constant dense<0.000000e+00> : vector<8x256xf32>
    %233 = tpu.matmul %230, %232, %cst_122 {dimension_numbers = #tpu.dot_dimension_numbers<[1], [0], [0], [1], [0, 0, 1, 1], [], []>} : vector<8x32xbf16>, vector<32x256xbf16>, vector<8x256xf32> -> vector<8x256xf32>
    %234 = arith.addf %210, %233 : vector<8x256xf32>
    %235 = vector.extract_strided_slice %8 {offsets = [296, 0], sizes = [8, 32], strides = [1, 1]} : vector<800x32xf32> to vector<8x32xf32>
    %236 = arith.truncf %235 : vector<8x32xf32> to vector<8x32xbf16>
    %c37 = arith.constant 37 : index
    %c0_123 = arith.constant 0 : index
    %c0_124 = arith.constant 0 : index
    %237 = vector.load %arg4[%c37, %c0_123, %c0_124] : memref<100x32x256xbf16, #tpu.memory_space<vmem>>, vector<1x32x256xbf16>
    %238 = vector.shape_cast %237 : vector<1x32x256xbf16> to vector<32x256xbf16>
    %cst_125 = arith.constant dense<0.000000e+00> : vector<8x256xf32>
    %239 = tpu.matmul %236, %238, %cst_125 {dimension_numbers = #tpu.dot_dimension_numbers<[1], [0], [0], [1], [0, 0, 1, 1], [], []>} : vector<8x32xbf16>, vector<32x256xbf16>, vector<8x256xf32> -> vector<8x256xf32>
    %240 = arith.addf %216, %239 : vector<8x256xf32>
    %241 = vector.extract_strided_slice %8 {offsets = [304, 0], sizes = [8, 32], strides = [1, 1]} : vector<800x32xf32> to vector<8x32xf32>
    %242 = arith.truncf %241 : vector<8x32xf32> to vector<8x32xbf16>
    %c38 = arith.constant 38 : index
    %c0_126 = arith.constant 0 : index
    %c0_127 = arith.constant 0 : index
    %243 = vector.load %arg4[%c38, %c0_126, %c0_127] : memref<100x32x256xbf16, #tpu.memory_space<vmem>>, vector<1x32x256xbf16>
    %244 = vector.shape_cast %243 : vector<1x32x256xbf16> to vector<32x256xbf16>
    %cst_128 = arith.constant dense<0.000000e+00> : vector<8x256xf32>
    %245 = tpu.matmul %242, %244, %cst_128 {dimension_numbers = #tpu.dot_dimension_numbers<[1], [0], [0], [1], [0, 0, 1, 1], [], []>} : vector<8x32xbf16>, vector<32x256xbf16>, vector<8x256xf32> -> vector<8x256xf32>
    %246 = arith.addf %222, %245 : vector<8x256xf32>
    %247 = vector.extract_strided_slice %8 {offsets = [312, 0], sizes = [8, 32], strides = [1, 1]} : vector<800x32xf32> to vector<8x32xf32>
    %248 = arith.truncf %247 : vector<8x32xf32> to vector<8x32xbf16>
    %c39 = arith.constant 39 : index
    %c0_129 = arith.constant 0 : index
    %c0_130 = arith.constant 0 : index
    %249 = vector.load %arg4[%c39, %c0_129, %c0_130] : memref<100x32x256xbf16, #tpu.memory_space<vmem>>, vector<1x32x256xbf16>
    %250 = vector.shape_cast %249 : vector<1x32x256xbf16> to vector<32x256xbf16>
    %cst_131 = arith.constant dense<0.000000e+00> : vector<8x256xf32>
    %251 = tpu.matmul %248, %250, %cst_131 {dimension_numbers = #tpu.dot_dimension_numbers<[1], [0], [0], [1], [0, 0, 1, 1], [], []>} : vector<8x32xbf16>, vector<32x256xbf16>, vector<8x256xf32> -> vector<8x256xf32>
    %252 = arith.addf %228, %251 : vector<8x256xf32>
    %253 = vector.extract_strided_slice %8 {offsets = [320, 0], sizes = [8, 32], strides = [1, 1]} : vector<800x32xf32> to vector<8x32xf32>
    %254 = arith.truncf %253 : vector<8x32xf32> to vector<8x32xbf16>
    %c40 = arith.constant 40 : index
    %c0_132 = arith.constant 0 : index
    %c0_133 = arith.constant 0 : index
    %255 = vector.load %arg4[%c40, %c0_132, %c0_133] : memref<100x32x256xbf16, #tpu.memory_space<vmem>>, vector<1x32x256xbf16>
    %256 = vector.shape_cast %255 : vector<1x32x256xbf16> to vector<32x256xbf16>
    %cst_134 = arith.constant dense<0.000000e+00> : vector<8x256xf32>
    %257 = tpu.matmul %254, %256, %cst_134 {dimension_numbers = #tpu.dot_dimension_numbers<[1], [0], [0], [1], [0, 0, 1, 1], [], []>} : vector<8x32xbf16>, vector<32x256xbf16>, vector<8x256xf32> -> vector<8x256xf32>
    %258 = arith.addf %234, %257 : vector<8x256xf32>
    %259 = vector.extract_strided_slice %8 {offsets = [328, 0], sizes = [8, 32], strides = [1, 1]} : vector<800x32xf32> to vector<8x32xf32>
    %260 = arith.truncf %259 : vector<8x32xf32> to vector<8x32xbf16>
    %c41 = arith.constant 41 : index
    %c0_135 = arith.constant 0 : index
    %c0_136 = arith.constant 0 : index
    %261 = vector.load %arg4[%c41, %c0_135, %c0_136] : memref<100x32x256xbf16, #tpu.memory_space<vmem>>, vector<1x32x256xbf16>
    %262 = vector.shape_cast %261 : vector<1x32x256xbf16> to vector<32x256xbf16>
    %cst_137 = arith.constant dense<0.000000e+00> : vector<8x256xf32>
    %263 = tpu.matmul %260, %262, %cst_137 {dimension_numbers = #tpu.dot_dimension_numbers<[1], [0], [0], [1], [0, 0, 1, 1], [], []>} : vector<8x32xbf16>, vector<32x256xbf16>, vector<8x256xf32> -> vector<8x256xf32>
    %264 = arith.addf %240, %263 : vector<8x256xf32>
    %265 = vector.extract_strided_slice %8 {offsets = [336, 0], sizes = [8, 32], strides = [1, 1]} : vector<800x32xf32> to vector<8x32xf32>
    %266 = arith.truncf %265 : vector<8x32xf32> to vector<8x32xbf16>
    %c42 = arith.constant 42 : index
    %c0_138 = arith.constant 0 : index
    %c0_139 = arith.constant 0 : index
    %267 = vector.load %arg4[%c42, %c0_138, %c0_139] : memref<100x32x256xbf16, #tpu.memory_space<vmem>>, vector<1x32x256xbf16>
    %268 = vector.shape_cast %267 : vector<1x32x256xbf16> to vector<32x256xbf16>
    %cst_140 = arith.constant dense<0.000000e+00> : vector<8x256xf32>
    %269 = tpu.matmul %266, %268, %cst_140 {dimension_numbers = #tpu.dot_dimension_numbers<[1], [0], [0], [1], [0, 0, 1, 1], [], []>} : vector<8x32xbf16>, vector<32x256xbf16>, vector<8x256xf32> -> vector<8x256xf32>
    %270 = arith.addf %246, %269 : vector<8x256xf32>
    %271 = vector.extract_strided_slice %8 {offsets = [344, 0], sizes = [8, 32], strides = [1, 1]} : vector<800x32xf32> to vector<8x32xf32>
    %272 = arith.truncf %271 : vector<8x32xf32> to vector<8x32xbf16>
    %c43 = arith.constant 43 : index
    %c0_141 = arith.constant 0 : index
    %c0_142 = arith.constant 0 : index
    %273 = vector.load %arg4[%c43, %c0_141, %c0_142] : memref<100x32x256xbf16, #tpu.memory_space<vmem>>, vector<1x32x256xbf16>
    %274 = vector.shape_cast %273 : vector<1x32x256xbf16> to vector<32x256xbf16>
    %cst_143 = arith.constant dense<0.000000e+00> : vector<8x256xf32>
    %275 = tpu.matmul %272, %274, %cst_143 {dimension_numbers = #tpu.dot_dimension_numbers<[1], [0], [0], [1], [0, 0, 1, 1], [], []>} : vector<8x32xbf16>, vector<32x256xbf16>, vector<8x256xf32> -> vector<8x256xf32>
    %276 = arith.addf %252, %275 : vector<8x256xf32>
    %277 = vector.extract_strided_slice %8 {offsets = [352, 0], sizes = [8, 32], strides = [1, 1]} : vector<800x32xf32> to vector<8x32xf32>
    %278 = arith.truncf %277 : vector<8x32xf32> to vector<8x32xbf16>
    %c44 = arith.constant 44 : index
    %c0_144 = arith.constant 0 : index
    %c0_145 = arith.constant 0 : index
    %279 = vector.load %arg4[%c44, %c0_144, %c0_145] : memref<100x32x256xbf16, #tpu.memory_space<vmem>>, vector<1x32x256xbf16>
    %280 = vector.shape_cast %279 : vector<1x32x256xbf16> to vector<32x256xbf16>
    %cst_146 = arith.constant dense<0.000000e+00> : vector<8x256xf32>
    %281 = tpu.matmul %278, %280, %cst_146 {dimension_numbers = #tpu.dot_dimension_numbers<[1], [0], [0], [1], [0, 0, 1, 1], [], []>} : vector<8x32xbf16>, vector<32x256xbf16>, vector<8x256xf32> -> vector<8x256xf32>
    %282 = arith.addf %258, %281 : vector<8x256xf32>
    %283 = vector.extract_strided_slice %8 {offsets = [360, 0], sizes = [8, 32], strides = [1, 1]} : vector<800x32xf32> to vector<8x32xf32>
    %284 = arith.truncf %283 : vector<8x32xf32> to vector<8x32xbf16>
    %c45 = arith.constant 45 : index
    %c0_147 = arith.constant 0 : index
    %c0_148 = arith.constant 0 : index
    %285 = vector.load %arg4[%c45, %c0_147, %c0_148] : memref<100x32x256xbf16, #tpu.memory_space<vmem>>, vector<1x32x256xbf16>
    %286 = vector.shape_cast %285 : vector<1x32x256xbf16> to vector<32x256xbf16>
    %cst_149 = arith.constant dense<0.000000e+00> : vector<8x256xf32>
    %287 = tpu.matmul %284, %286, %cst_149 {dimension_numbers = #tpu.dot_dimension_numbers<[1], [0], [0], [1], [0, 0, 1, 1], [], []>} : vector<8x32xbf16>, vector<32x256xbf16>, vector<8x256xf32> -> vector<8x256xf32>
    %288 = arith.addf %264, %287 : vector<8x256xf32>
    %289 = vector.extract_strided_slice %8 {offsets = [368, 0], sizes = [8, 32], strides = [1, 1]} : vector<800x32xf32> to vector<8x32xf32>
    %290 = arith.truncf %289 : vector<8x32xf32> to vector<8x32xbf16>
    %c46 = arith.constant 46 : index
    %c0_150 = arith.constant 0 : index
    %c0_151 = arith.constant 0 : index
    %291 = vector.load %arg4[%c46, %c0_150, %c0_151] : memref<100x32x256xbf16, #tpu.memory_space<vmem>>, vector<1x32x256xbf16>
    %292 = vector.shape_cast %291 : vector<1x32x256xbf16> to vector<32x256xbf16>
    %cst_152 = arith.constant dense<0.000000e+00> : vector<8x256xf32>
    %293 = tpu.matmul %290, %292, %cst_152 {dimension_numbers = #tpu.dot_dimension_numbers<[1], [0], [0], [1], [0, 0, 1, 1], [], []>} : vector<8x32xbf16>, vector<32x256xbf16>, vector<8x256xf32> -> vector<8x256xf32>
    %294 = arith.addf %270, %293 : vector<8x256xf32>
    %295 = vector.extract_strided_slice %8 {offsets = [376, 0], sizes = [8, 32], strides = [1, 1]} : vector<800x32xf32> to vector<8x32xf32>
    %296 = arith.truncf %295 : vector<8x32xf32> to vector<8x32xbf16>
    %c47 = arith.constant 47 : index
    %c0_153 = arith.constant 0 : index
    %c0_154 = arith.constant 0 : index
    %297 = vector.load %arg4[%c47, %c0_153, %c0_154] : memref<100x32x256xbf16, #tpu.memory_space<vmem>>, vector<1x32x256xbf16>
    %298 = vector.shape_cast %297 : vector<1x32x256xbf16> to vector<32x256xbf16>
    %cst_155 = arith.constant dense<0.000000e+00> : vector<8x256xf32>
    %299 = tpu.matmul %296, %298, %cst_155 {dimension_numbers = #tpu.dot_dimension_numbers<[1], [0], [0], [1], [0, 0, 1, 1], [], []>} : vector<8x32xbf16>, vector<32x256xbf16>, vector<8x256xf32> -> vector<8x256xf32>
    %300 = arith.addf %276, %299 : vector<8x256xf32>
    %301 = vector.extract_strided_slice %8 {offsets = [384, 0], sizes = [8, 32], strides = [1, 1]} : vector<800x32xf32> to vector<8x32xf32>
    %302 = arith.truncf %301 : vector<8x32xf32> to vector<8x32xbf16>
    %c48 = arith.constant 48 : index
    %c0_156 = arith.constant 0 : index
    %c0_157 = arith.constant 0 : index
    %303 = vector.load %arg4[%c48, %c0_156, %c0_157] : memref<100x32x256xbf16, #tpu.memory_space<vmem>>, vector<1x32x256xbf16>
    %304 = vector.shape_cast %303 : vector<1x32x256xbf16> to vector<32x256xbf16>
    %cst_158 = arith.constant dense<0.000000e+00> : vector<8x256xf32>
    %305 = tpu.matmul %302, %304, %cst_158 {dimension_numbers = #tpu.dot_dimension_numbers<[1], [0], [0], [1], [0, 0, 1, 1], [], []>} : vector<8x32xbf16>, vector<32x256xbf16>, vector<8x256xf32> -> vector<8x256xf32>
    %306 = arith.addf %282, %305 : vector<8x256xf32>
    %307 = vector.extract_strided_slice %8 {offsets = [392, 0], sizes = [8, 32], strides = [1, 1]} : vector<800x32xf32> to vector<8x32xf32>
    %308 = arith.truncf %307 : vector<8x32xf32> to vector<8x32xbf16>
    %c49 = arith.constant 49 : index
    %c0_159 = arith.constant 0 : index
    %c0_160 = arith.constant 0 : index
    %309 = vector.load %arg4[%c49, %c0_159, %c0_160] : memref<100x32x256xbf16, #tpu.memory_space<vmem>>, vector<1x32x256xbf16>
    %310 = vector.shape_cast %309 : vector<1x32x256xbf16> to vector<32x256xbf16>
    %cst_161 = arith.constant dense<0.000000e+00> : vector<8x256xf32>
    %311 = tpu.matmul %308, %310, %cst_161 {dimension_numbers = #tpu.dot_dimension_numbers<[1], [0], [0], [1], [0, 0, 1, 1], [], []>} : vector<8x32xbf16>, vector<32x256xbf16>, vector<8x256xf32> -> vector<8x256xf32>
    %312 = arith.addf %288, %311 : vector<8x256xf32>
    %313 = vector.extract_strided_slice %8 {offsets = [400, 0], sizes = [8, 32], strides = [1, 1]} : vector<800x32xf32> to vector<8x32xf32>
    %314 = arith.truncf %313 : vector<8x32xf32> to vector<8x32xbf16>
    %c50 = arith.constant 50 : index
    %c0_162 = arith.constant 0 : index
    %c0_163 = arith.constant 0 : index
    %315 = vector.load %arg4[%c50, %c0_162, %c0_163] : memref<100x32x256xbf16, #tpu.memory_space<vmem>>, vector<1x32x256xbf16>
    %316 = vector.shape_cast %315 : vector<1x32x256xbf16> to vector<32x256xbf16>
    %cst_164 = arith.constant dense<0.000000e+00> : vector<8x256xf32>
    %317 = tpu.matmul %314, %316, %cst_164 {dimension_numbers = #tpu.dot_dimension_numbers<[1], [0], [0], [1], [0, 0, 1, 1], [], []>} : vector<8x32xbf16>, vector<32x256xbf16>, vector<8x256xf32> -> vector<8x256xf32>
    %318 = arith.addf %294, %317 : vector<8x256xf32>
    %319 = vector.extract_strided_slice %8 {offsets = [408, 0], sizes = [8, 32], strides = [1, 1]} : vector<800x32xf32> to vector<8x32xf32>
    %320 = arith.truncf %319 : vector<8x32xf32> to vector<8x32xbf16>
    %c51 = arith.constant 51 : index
    %c0_165 = arith.constant 0 : index
    %c0_166 = arith.constant 0 : index
    %321 = vector.load %arg4[%c51, %c0_165, %c0_166] : memref<100x32x256xbf16, #tpu.memory_space<vmem>>, vector<1x32x256xbf16>
    %322 = vector.shape_cast %321 : vector<1x32x256xbf16> to vector<32x256xbf16>
    %cst_167 = arith.constant dense<0.000000e+00> : vector<8x256xf32>
    %323 = tpu.matmul %320, %322, %cst_167 {dimension_numbers = #tpu.dot_dimension_numbers<[1], [0], [0], [1], [0, 0, 1, 1], [], []>} : vector<8x32xbf16>, vector<32x256xbf16>, vector<8x256xf32> -> vector<8x256xf32>
    %324 = arith.addf %300, %323 : vector<8x256xf32>
    %325 = vector.extract_strided_slice %8 {offsets = [416, 0], sizes = [8, 32], strides = [1, 1]} : vector<800x32xf32> to vector<8x32xf32>
    %326 = arith.truncf %325 : vector<8x32xf32> to vector<8x32xbf16>
    %c52 = arith.constant 52 : index
    %c0_168 = arith.constant 0 : index
    %c0_169 = arith.constant 0 : index
    %327 = vector.load %arg4[%c52, %c0_168, %c0_169] : memref<100x32x256xbf16, #tpu.memory_space<vmem>>, vector<1x32x256xbf16>
    %328 = vector.shape_cast %327 : vector<1x32x256xbf16> to vector<32x256xbf16>
    %cst_170 = arith.constant dense<0.000000e+00> : vector<8x256xf32>
    %329 = tpu.matmul %326, %328, %cst_170 {dimension_numbers = #tpu.dot_dimension_numbers<[1], [0], [0], [1], [0, 0, 1, 1], [], []>} : vector<8x32xbf16>, vector<32x256xbf16>, vector<8x256xf32> -> vector<8x256xf32>
    %330 = arith.addf %306, %329 : vector<8x256xf32>
    %331 = vector.extract_strided_slice %8 {offsets = [424, 0], sizes = [8, 32], strides = [1, 1]} : vector<800x32xf32> to vector<8x32xf32>
    %332 = arith.truncf %331 : vector<8x32xf32> to vector<8x32xbf16>
    %c53 = arith.constant 53 : index
    %c0_171 = arith.constant 0 : index
    %c0_172 = arith.constant 0 : index
    %333 = vector.load %arg4[%c53, %c0_171, %c0_172] : memref<100x32x256xbf16, #tpu.memory_space<vmem>>, vector<1x32x256xbf16>
    %334 = vector.shape_cast %333 : vector<1x32x256xbf16> to vector<32x256xbf16>
    %cst_173 = arith.constant dense<0.000000e+00> : vector<8x256xf32>
    %335 = tpu.matmul %332, %334, %cst_173 {dimension_numbers = #tpu.dot_dimension_numbers<[1], [0], [0], [1], [0, 0, 1, 1], [], []>} : vector<8x32xbf16>, vector<32x256xbf16>, vector<8x256xf32> -> vector<8x256xf32>
    %336 = arith.addf %312, %335 : vector<8x256xf32>
    %337 = vector.extract_strided_slice %8 {offsets = [432, 0], sizes = [8, 32], strides = [1, 1]} : vector<800x32xf32> to vector<8x32xf32>
    %338 = arith.truncf %337 : vector<8x32xf32> to vector<8x32xbf16>
    %c54 = arith.constant 54 : index
    %c0_174 = arith.constant 0 : index
    %c0_175 = arith.constant 0 : index
    %339 = vector.load %arg4[%c54, %c0_174, %c0_175] : memref<100x32x256xbf16, #tpu.memory_space<vmem>>, vector<1x32x256xbf16>
    %340 = vector.shape_cast %339 : vector<1x32x256xbf16> to vector<32x256xbf16>
    %cst_176 = arith.constant dense<0.000000e+00> : vector<8x256xf32>
    %341 = tpu.matmul %338, %340, %cst_176 {dimension_numbers = #tpu.dot_dimension_numbers<[1], [0], [0], [1], [0, 0, 1, 1], [], []>} : vector<8x32xbf16>, vector<32x256xbf16>, vector<8x256xf32> -> vector<8x256xf32>
    %342 = arith.addf %318, %341 : vector<8x256xf32>
    %343 = vector.extract_strided_slice %8 {offsets = [440, 0], sizes = [8, 32], strides = [1, 1]} : vector<800x32xf32> to vector<8x32xf32>
    %344 = arith.truncf %343 : vector<8x32xf32> to vector<8x32xbf16>
    %c55 = arith.constant 55 : index
    %c0_177 = arith.constant 0 : index
    %c0_178 = arith.constant 0 : index
    %345 = vector.load %arg4[%c55, %c0_177, %c0_178] : memref<100x32x256xbf16, #tpu.memory_space<vmem>>, vector<1x32x256xbf16>
    %346 = vector.shape_cast %345 : vector<1x32x256xbf16> to vector<32x256xbf16>
    %cst_179 = arith.constant dense<0.000000e+00> : vector<8x256xf32>
    %347 = tpu.matmul %344, %346, %cst_179 {dimension_numbers = #tpu.dot_dimension_numbers<[1], [0], [0], [1], [0, 0, 1, 1], [], []>} : vector<8x32xbf16>, vector<32x256xbf16>, vector<8x256xf32> -> vector<8x256xf32>
    %348 = arith.addf %324, %347 : vector<8x256xf32>
    %349 = vector.extract_strided_slice %8 {offsets = [448, 0], sizes = [8, 32], strides = [1, 1]} : vector<800x32xf32> to vector<8x32xf32>
    %350 = arith.truncf %349 : vector<8x32xf32> to vector<8x32xbf16>
    %c56 = arith.constant 56 : index
    %c0_180 = arith.constant 0 : index
    %c0_181 = arith.constant 0 : index
    %351 = vector.load %arg4[%c56, %c0_180, %c0_181] : memref<100x32x256xbf16, #tpu.memory_space<vmem>>, vector<1x32x256xbf16>
    %352 = vector.shape_cast %351 : vector<1x32x256xbf16> to vector<32x256xbf16>
    %cst_182 = arith.constant dense<0.000000e+00> : vector<8x256xf32>
    %353 = tpu.matmul %350, %352, %cst_182 {dimension_numbers = #tpu.dot_dimension_numbers<[1], [0], [0], [1], [0, 0, 1, 1], [], []>} : vector<8x32xbf16>, vector<32x256xbf16>, vector<8x256xf32> -> vector<8x256xf32>
    %354 = arith.addf %330, %353 : vector<8x256xf32>
    %355 = vector.extract_strided_slice %8 {offsets = [456, 0], sizes = [8, 32], strides = [1, 1]} : vector<800x32xf32> to vector<8x32xf32>
    %356 = arith.truncf %355 : vector<8x32xf32> to vector<8x32xbf16>
    %c57 = arith.constant 57 : index
    %c0_183 = arith.constant 0 : index
    %c0_184 = arith.constant 0 : index
    %357 = vector.load %arg4[%c57, %c0_183, %c0_184] : memref<100x32x256xbf16, #tpu.memory_space<vmem>>, vector<1x32x256xbf16>
    %358 = vector.shape_cast %357 : vector<1x32x256xbf16> to vector<32x256xbf16>
    %cst_185 = arith.constant dense<0.000000e+00> : vector<8x256xf32>
    %359 = tpu.matmul %356, %358, %cst_185 {dimension_numbers = #tpu.dot_dimension_numbers<[1], [0], [0], [1], [0, 0, 1, 1], [], []>} : vector<8x32xbf16>, vector<32x256xbf16>, vector<8x256xf32> -> vector<8x256xf32>
    %360 = arith.addf %336, %359 : vector<8x256xf32>
    %361 = vector.extract_strided_slice %8 {offsets = [464, 0], sizes = [8, 32], strides = [1, 1]} : vector<800x32xf32> to vector<8x32xf32>
    %362 = arith.truncf %361 : vector<8x32xf32> to vector<8x32xbf16>
    %c58 = arith.constant 58 : index
    %c0_186 = arith.constant 0 : index
    %c0_187 = arith.constant 0 : index
    %363 = vector.load %arg4[%c58, %c0_186, %c0_187] : memref<100x32x256xbf16, #tpu.memory_space<vmem>>, vector<1x32x256xbf16>
    %364 = vector.shape_cast %363 : vector<1x32x256xbf16> to vector<32x256xbf16>
    %cst_188 = arith.constant dense<0.000000e+00> : vector<8x256xf32>
    %365 = tpu.matmul %362, %364, %cst_188 {dimension_numbers = #tpu.dot_dimension_numbers<[1], [0], [0], [1], [0, 0, 1, 1], [], []>} : vector<8x32xbf16>, vector<32x256xbf16>, vector<8x256xf32> -> vector<8x256xf32>
    %366 = arith.addf %342, %365 : vector<8x256xf32>
    %367 = vector.extract_strided_slice %8 {offsets = [472, 0], sizes = [8, 32], strides = [1, 1]} : vector<800x32xf32> to vector<8x32xf32>
    %368 = arith.truncf %367 : vector<8x32xf32> to vector<8x32xbf16>
    %c59 = arith.constant 59 : index
    %c0_189 = arith.constant 0 : index
    %c0_190 = arith.constant 0 : index
    %369 = vector.load %arg4[%c59, %c0_189, %c0_190] : memref<100x32x256xbf16, #tpu.memory_space<vmem>>, vector<1x32x256xbf16>
    %370 = vector.shape_cast %369 : vector<1x32x256xbf16> to vector<32x256xbf16>
    %cst_191 = arith.constant dense<0.000000e+00> : vector<8x256xf32>
    %371 = tpu.matmul %368, %370, %cst_191 {dimension_numbers = #tpu.dot_dimension_numbers<[1], [0], [0], [1], [0, 0, 1, 1], [], []>} : vector<8x32xbf16>, vector<32x256xbf16>, vector<8x256xf32> -> vector<8x256xf32>
    %372 = arith.addf %348, %371 : vector<8x256xf32>
    %373 = vector.extract_strided_slice %8 {offsets = [480, 0], sizes = [8, 32], strides = [1, 1]} : vector<800x32xf32> to vector<8x32xf32>
    %374 = arith.truncf %373 : vector<8x32xf32> to vector<8x32xbf16>
    %c60 = arith.constant 60 : index
    %c0_192 = arith.constant 0 : index
    %c0_193 = arith.constant 0 : index
    %375 = vector.load %arg4[%c60, %c0_192, %c0_193] : memref<100x32x256xbf16, #tpu.memory_space<vmem>>, vector<1x32x256xbf16>
    %376 = vector.shape_cast %375 : vector<1x32x256xbf16> to vector<32x256xbf16>
    %cst_194 = arith.constant dense<0.000000e+00> : vector<8x256xf32>
    %377 = tpu.matmul %374, %376, %cst_194 {dimension_numbers = #tpu.dot_dimension_numbers<[1], [0], [0], [1], [0, 0, 1, 1], [], []>} : vector<8x32xbf16>, vector<32x256xbf16>, vector<8x256xf32> -> vector<8x256xf32>
    %378 = arith.addf %354, %377 : vector<8x256xf32>
    %379 = vector.extract_strided_slice %8 {offsets = [488, 0], sizes = [8, 32], strides = [1, 1]} : vector<800x32xf32> to vector<8x32xf32>
    %380 = arith.truncf %379 : vector<8x32xf32> to vector<8x32xbf16>
    %c61 = arith.constant 61 : index
    %c0_195 = arith.constant 0 : index
    %c0_196 = arith.constant 0 : index
    %381 = vector.load %arg4[%c61, %c0_195, %c0_196] : memref<100x32x256xbf16, #tpu.memory_space<vmem>>, vector<1x32x256xbf16>
    %382 = vector.shape_cast %381 : vector<1x32x256xbf16> to vector<32x256xbf16>
    %cst_197 = arith.constant dense<0.000000e+00> : vector<8x256xf32>
    %383 = tpu.matmul %380, %382, %cst_197 {dimension_numbers = #tpu.dot_dimension_numbers<[1], [0], [0], [1], [0, 0, 1, 1], [], []>} : vector<8x32xbf16>, vector<32x256xbf16>, vector<8x256xf32> -> vector<8x256xf32>
    %384 = arith.addf %360, %383 : vector<8x256xf32>
    %385 = vector.extract_strided_slice %8 {offsets = [496, 0], sizes = [8, 32], strides = [1, 1]} : vector<800x32xf32> to vector<8x32xf32>
    %386 = arith.truncf %385 : vector<8x32xf32> to vector<8x32xbf16>
    %c62 = arith.constant 62 : index
    %c0_198 = arith.constant 0 : index
    %c0_199 = arith.constant 0 : index
    %387 = vector.load %arg4[%c62, %c0_198, %c0_199] : memref<100x32x256xbf16, #tpu.memory_space<vmem>>, vector<1x32x256xbf16>
    %388 = vector.shape_cast %387 : vector<1x32x256xbf16> to vector<32x256xbf16>
    %cst_200 = arith.constant dense<0.000000e+00> : vector<8x256xf32>
    %389 = tpu.matmul %386, %388, %cst_200 {dimension_numbers = #tpu.dot_dimension_numbers<[1], [0], [0], [1], [0, 0, 1, 1], [], []>} : vector<8x32xbf16>, vector<32x256xbf16>, vector<8x256xf32> -> vector<8x256xf32>
    %390 = arith.addf %366, %389 : vector<8x256xf32>
    %391 = vector.extract_strided_slice %8 {offsets = [504, 0], sizes = [8, 32], strides = [1, 1]} : vector<800x32xf32> to vector<8x32xf32>
    %392 = arith.truncf %391 : vector<8x32xf32> to vector<8x32xbf16>
    %c63 = arith.constant 63 : index
    %c0_201 = arith.constant 0 : index
    %c0_202 = arith.constant 0 : index
    %393 = vector.load %arg4[%c63, %c0_201, %c0_202] : memref<100x32x256xbf16, #tpu.memory_space<vmem>>, vector<1x32x256xbf16>
    %394 = vector.shape_cast %393 : vector<1x32x256xbf16> to vector<32x256xbf16>
    %cst_203 = arith.constant dense<0.000000e+00> : vector<8x256xf32>
    %395 = tpu.matmul %392, %394, %cst_203 {dimension_numbers = #tpu.dot_dimension_numbers<[1], [0], [0], [1], [0, 0, 1, 1], [], []>} : vector<8x32xbf16>, vector<32x256xbf16>, vector<8x256xf32> -> vector<8x256xf32>
    %396 = arith.addf %372, %395 : vector<8x256xf32>
    %397 = vector.extract_strided_slice %8 {offsets = [512, 0], sizes = [8, 32], strides = [1, 1]} : vector<800x32xf32> to vector<8x32xf32>
    %398 = arith.truncf %397 : vector<8x32xf32> to vector<8x32xbf16>
    %c64 = arith.constant 64 : index
    %c0_204 = arith.constant 0 : index
    %c0_205 = arith.constant 0 : index
    %399 = vector.load %arg4[%c64, %c0_204, %c0_205] : memref<100x32x256xbf16, #tpu.memory_space<vmem>>, vector<1x32x256xbf16>
    %400 = vector.shape_cast %399 : vector<1x32x256xbf16> to vector<32x256xbf16>
    %cst_206 = arith.constant dense<0.000000e+00> : vector<8x256xf32>
    %401 = tpu.matmul %398, %400, %cst_206 {dimension_numbers = #tpu.dot_dimension_numbers<[1], [0], [0], [1], [0, 0, 1, 1], [], []>} : vector<8x32xbf16>, vector<32x256xbf16>, vector<8x256xf32> -> vector<8x256xf32>
    %402 = arith.addf %378, %401 : vector<8x256xf32>
    %403 = vector.extract_strided_slice %8 {offsets = [520, 0], sizes = [8, 32], strides = [1, 1]} : vector<800x32xf32> to vector<8x32xf32>
    %404 = arith.truncf %403 : vector<8x32xf32> to vector<8x32xbf16>
    %c65 = arith.constant 65 : index
    %c0_207 = arith.constant 0 : index
    %c0_208 = arith.constant 0 : index
    %405 = vector.load %arg4[%c65, %c0_207, %c0_208] : memref<100x32x256xbf16, #tpu.memory_space<vmem>>, vector<1x32x256xbf16>
    %406 = vector.shape_cast %405 : vector<1x32x256xbf16> to vector<32x256xbf16>
    %cst_209 = arith.constant dense<0.000000e+00> : vector<8x256xf32>
    %407 = tpu.matmul %404, %406, %cst_209 {dimension_numbers = #tpu.dot_dimension_numbers<[1], [0], [0], [1], [0, 0, 1, 1], [], []>} : vector<8x32xbf16>, vector<32x256xbf16>, vector<8x256xf32> -> vector<8x256xf32>
    %408 = arith.addf %384, %407 : vector<8x256xf32>
    %409 = vector.extract_strided_slice %8 {offsets = [528, 0], sizes = [8, 32], strides = [1, 1]} : vector<800x32xf32> to vector<8x32xf32>
    %410 = arith.truncf %409 : vector<8x32xf32> to vector<8x32xbf16>
    %c66 = arith.constant 66 : index
    %c0_210 = arith.constant 0 : index
    %c0_211 = arith.constant 0 : index
    %411 = vector.load %arg4[%c66, %c0_210, %c0_211] : memref<100x32x256xbf16, #tpu.memory_space<vmem>>, vector<1x32x256xbf16>
    %412 = vector.shape_cast %411 : vector<1x32x256xbf16> to vector<32x256xbf16>
    %cst_212 = arith.constant dense<0.000000e+00> : vector<8x256xf32>
    %413 = tpu.matmul %410, %412, %cst_212 {dimension_numbers = #tpu.dot_dimension_numbers<[1], [0], [0], [1], [0, 0, 1, 1], [], []>} : vector<8x32xbf16>, vector<32x256xbf16>, vector<8x256xf32> -> vector<8x256xf32>
    %414 = arith.addf %390, %413 : vector<8x256xf32>
    %415 = vector.extract_strided_slice %8 {offsets = [536, 0], sizes = [8, 32], strides = [1, 1]} : vector<800x32xf32> to vector<8x32xf32>
    %416 = arith.truncf %415 : vector<8x32xf32> to vector<8x32xbf16>
    %c67 = arith.constant 67 : index
    %c0_213 = arith.constant 0 : index
    %c0_214 = arith.constant 0 : index
    %417 = vector.load %arg4[%c67, %c0_213, %c0_214] : memref<100x32x256xbf16, #tpu.memory_space<vmem>>, vector<1x32x256xbf16>
    %418 = vector.shape_cast %417 : vector<1x32x256xbf16> to vector<32x256xbf16>
    %cst_215 = arith.constant dense<0.000000e+00> : vector<8x256xf32>
    %419 = tpu.matmul %416, %418, %cst_215 {dimension_numbers = #tpu.dot_dimension_numbers<[1], [0], [0], [1], [0, 0, 1, 1], [], []>} : vector<8x32xbf16>, vector<32x256xbf16>, vector<8x256xf32> -> vector<8x256xf32>
    %420 = arith.addf %396, %419 : vector<8x256xf32>
    %421 = vector.extract_strided_slice %8 {offsets = [544, 0], sizes = [8, 32], strides = [1, 1]} : vector<800x32xf32> to vector<8x32xf32>
    %422 = arith.truncf %421 : vector<8x32xf32> to vector<8x32xbf16>
    %c68 = arith.constant 68 : index
    %c0_216 = arith.constant 0 : index
    %c0_217 = arith.constant 0 : index
    %423 = vector.load %arg4[%c68, %c0_216, %c0_217] : memref<100x32x256xbf16, #tpu.memory_space<vmem>>, vector<1x32x256xbf16>
    %424 = vector.shape_cast %423 : vector<1x32x256xbf16> to vector<32x256xbf16>
    %cst_218 = arith.constant dense<0.000000e+00> : vector<8x256xf32>
    %425 = tpu.matmul %422, %424, %cst_218 {dimension_numbers = #tpu.dot_dimension_numbers<[1], [0], [0], [1], [0, 0, 1, 1], [], []>} : vector<8x32xbf16>, vector<32x256xbf16>, vector<8x256xf32> -> vector<8x256xf32>
    %426 = arith.addf %402, %425 : vector<8x256xf32>
    %427 = vector.extract_strided_slice %8 {offsets = [552, 0], sizes = [8, 32], strides = [1, 1]} : vector<800x32xf32> to vector<8x32xf32>
    %428 = arith.truncf %427 : vector<8x32xf32> to vector<8x32xbf16>
    %c69 = arith.constant 69 : index
    %c0_219 = arith.constant 0 : index
    %c0_220 = arith.constant 0 : index
    %429 = vector.load %arg4[%c69, %c0_219, %c0_220] : memref<100x32x256xbf16, #tpu.memory_space<vmem>>, vector<1x32x256xbf16>
    %430 = vector.shape_cast %429 : vector<1x32x256xbf16> to vector<32x256xbf16>
    %cst_221 = arith.constant dense<0.000000e+00> : vector<8x256xf32>
    %431 = tpu.matmul %428, %430, %cst_221 {dimension_numbers = #tpu.dot_dimension_numbers<[1], [0], [0], [1], [0, 0, 1, 1], [], []>} : vector<8x32xbf16>, vector<32x256xbf16>, vector<8x256xf32> -> vector<8x256xf32>
    %432 = arith.addf %408, %431 : vector<8x256xf32>
    %433 = vector.extract_strided_slice %8 {offsets = [560, 0], sizes = [8, 32], strides = [1, 1]} : vector<800x32xf32> to vector<8x32xf32>
    %434 = arith.truncf %433 : vector<8x32xf32> to vector<8x32xbf16>
    %c70 = arith.constant 70 : index
    %c0_222 = arith.constant 0 : index
    %c0_223 = arith.constant 0 : index
    %435 = vector.load %arg4[%c70, %c0_222, %c0_223] : memref<100x32x256xbf16, #tpu.memory_space<vmem>>, vector<1x32x256xbf16>
    %436 = vector.shape_cast %435 : vector<1x32x256xbf16> to vector<32x256xbf16>
    %cst_224 = arith.constant dense<0.000000e+00> : vector<8x256xf32>
    %437 = tpu.matmul %434, %436, %cst_224 {dimension_numbers = #tpu.dot_dimension_numbers<[1], [0], [0], [1], [0, 0, 1, 1], [], []>} : vector<8x32xbf16>, vector<32x256xbf16>, vector<8x256xf32> -> vector<8x256xf32>
    %438 = arith.addf %414, %437 : vector<8x256xf32>
    %439 = vector.extract_strided_slice %8 {offsets = [568, 0], sizes = [8, 32], strides = [1, 1]} : vector<800x32xf32> to vector<8x32xf32>
    %440 = arith.truncf %439 : vector<8x32xf32> to vector<8x32xbf16>
    %c71 = arith.constant 71 : index
    %c0_225 = arith.constant 0 : index
    %c0_226 = arith.constant 0 : index
    %441 = vector.load %arg4[%c71, %c0_225, %c0_226] : memref<100x32x256xbf16, #tpu.memory_space<vmem>>, vector<1x32x256xbf16>
    %442 = vector.shape_cast %441 : vector<1x32x256xbf16> to vector<32x256xbf16>
    %cst_227 = arith.constant dense<0.000000e+00> : vector<8x256xf32>
    %443 = tpu.matmul %440, %442, %cst_227 {dimension_numbers = #tpu.dot_dimension_numbers<[1], [0], [0], [1], [0, 0, 1, 1], [], []>} : vector<8x32xbf16>, vector<32x256xbf16>, vector<8x256xf32> -> vector<8x256xf32>
    %444 = arith.addf %420, %443 : vector<8x256xf32>
    %445 = vector.extract_strided_slice %8 {offsets = [576, 0], sizes = [8, 32], strides = [1, 1]} : vector<800x32xf32> to vector<8x32xf32>
    %446 = arith.truncf %445 : vector<8x32xf32> to vector<8x32xbf16>
    %c72 = arith.constant 72 : index
    %c0_228 = arith.constant 0 : index
    %c0_229 = arith.constant 0 : index
    %447 = vector.load %arg4[%c72, %c0_228, %c0_229] : memref<100x32x256xbf16, #tpu.memory_space<vmem>>, vector<1x32x256xbf16>
    %448 = vector.shape_cast %447 : vector<1x32x256xbf16> to vector<32x256xbf16>
    %cst_230 = arith.constant dense<0.000000e+00> : vector<8x256xf32>
    %449 = tpu.matmul %446, %448, %cst_230 {dimension_numbers = #tpu.dot_dimension_numbers<[1], [0], [0], [1], [0, 0, 1, 1], [], []>} : vector<8x32xbf16>, vector<32x256xbf16>, vector<8x256xf32> -> vector<8x256xf32>
    %450 = arith.addf %426, %449 : vector<8x256xf32>
    %451 = vector.extract_strided_slice %8 {offsets = [584, 0], sizes = [8, 32], strides = [1, 1]} : vector<800x32xf32> to vector<8x32xf32>
    %452 = arith.truncf %451 : vector<8x32xf32> to vector<8x32xbf16>
    %c73 = arith.constant 73 : index
    %c0_231 = arith.constant 0 : index
    %c0_232 = arith.constant 0 : index
    %453 = vector.load %arg4[%c73, %c0_231, %c0_232] : memref<100x32x256xbf16, #tpu.memory_space<vmem>>, vector<1x32x256xbf16>
    %454 = vector.shape_cast %453 : vector<1x32x256xbf16> to vector<32x256xbf16>
    %cst_233 = arith.constant dense<0.000000e+00> : vector<8x256xf32>
    %455 = tpu.matmul %452, %454, %cst_233 {dimension_numbers = #tpu.dot_dimension_numbers<[1], [0], [0], [1], [0, 0, 1, 1], [], []>} : vector<8x32xbf16>, vector<32x256xbf16>, vector<8x256xf32> -> vector<8x256xf32>
    %456 = arith.addf %432, %455 : vector<8x256xf32>
    %457 = vector.extract_strided_slice %8 {offsets = [592, 0], sizes = [8, 32], strides = [1, 1]} : vector<800x32xf32> to vector<8x32xf32>
    %458 = arith.truncf %457 : vector<8x32xf32> to vector<8x32xbf16>
    %c74 = arith.constant 74 : index
    %c0_234 = arith.constant 0 : index
    %c0_235 = arith.constant 0 : index
    %459 = vector.load %arg4[%c74, %c0_234, %c0_235] : memref<100x32x256xbf16, #tpu.memory_space<vmem>>, vector<1x32x256xbf16>
    %460 = vector.shape_cast %459 : vector<1x32x256xbf16> to vector<32x256xbf16>
    %cst_236 = arith.constant dense<0.000000e+00> : vector<8x256xf32>
    %461 = tpu.matmul %458, %460, %cst_236 {dimension_numbers = #tpu.dot_dimension_numbers<[1], [0], [0], [1], [0, 0, 1, 1], [], []>} : vector<8x32xbf16>, vector<32x256xbf16>, vector<8x256xf32> -> vector<8x256xf32>
    %462 = arith.addf %438, %461 : vector<8x256xf32>
    %463 = vector.extract_strided_slice %8 {offsets = [600, 0], sizes = [8, 32], strides = [1, 1]} : vector<800x32xf32> to vector<8x32xf32>
    %464 = arith.truncf %463 : vector<8x32xf32> to vector<8x32xbf16>
    %c75 = arith.constant 75 : index
    %c0_237 = arith.constant 0 : index
    %c0_238 = arith.constant 0 : index
    %465 = vector.load %arg4[%c75, %c0_237, %c0_238] : memref<100x32x256xbf16, #tpu.memory_space<vmem>>, vector<1x32x256xbf16>
    %466 = vector.shape_cast %465 : vector<1x32x256xbf16> to vector<32x256xbf16>
    %cst_239 = arith.constant dense<0.000000e+00> : vector<8x256xf32>
    %467 = tpu.matmul %464, %466, %cst_239 {dimension_numbers = #tpu.dot_dimension_numbers<[1], [0], [0], [1], [0, 0, 1, 1], [], []>} : vector<8x32xbf16>, vector<32x256xbf16>, vector<8x256xf32> -> vector<8x256xf32>
    %468 = arith.addf %444, %467 : vector<8x256xf32>
    %469 = vector.extract_strided_slice %8 {offsets = [608, 0], sizes = [8, 32], strides = [1, 1]} : vector<800x32xf32> to vector<8x32xf32>
    %470 = arith.truncf %469 : vector<8x32xf32> to vector<8x32xbf16>
    %c76 = arith.constant 76 : index
    %c0_240 = arith.constant 0 : index
    %c0_241 = arith.constant 0 : index
    %471 = vector.load %arg4[%c76, %c0_240, %c0_241] : memref<100x32x256xbf16, #tpu.memory_space<vmem>>, vector<1x32x256xbf16>
    %472 = vector.shape_cast %471 : vector<1x32x256xbf16> to vector<32x256xbf16>
    %cst_242 = arith.constant dense<0.000000e+00> : vector<8x256xf32>
    %473 = tpu.matmul %470, %472, %cst_242 {dimension_numbers = #tpu.dot_dimension_numbers<[1], [0], [0], [1], [0, 0, 1, 1], [], []>} : vector<8x32xbf16>, vector<32x256xbf16>, vector<8x256xf32> -> vector<8x256xf32>
    %474 = arith.addf %450, %473 : vector<8x256xf32>
    %475 = vector.extract_strided_slice %8 {offsets = [616, 0], sizes = [8, 32], strides = [1, 1]} : vector<800x32xf32> to vector<8x32xf32>
    %476 = arith.truncf %475 : vector<8x32xf32> to vector<8x32xbf16>
    %c77 = arith.constant 77 : index
    %c0_243 = arith.constant 0 : index
    %c0_244 = arith.constant 0 : index
    %477 = vector.load %arg4[%c77, %c0_243, %c0_244] : memref<100x32x256xbf16, #tpu.memory_space<vmem>>, vector<1x32x256xbf16>
    %478 = vector.shape_cast %477 : vector<1x32x256xbf16> to vector<32x256xbf16>
    %cst_245 = arith.constant dense<0.000000e+00> : vector<8x256xf32>
    %479 = tpu.matmul %476, %478, %cst_245 {dimension_numbers = #tpu.dot_dimension_numbers<[1], [0], [0], [1], [0, 0, 1, 1], [], []>} : vector<8x32xbf16>, vector<32x256xbf16>, vector<8x256xf32> -> vector<8x256xf32>
    %480 = arith.addf %456, %479 : vector<8x256xf32>
    %481 = vector.extract_strided_slice %8 {offsets = [624, 0], sizes = [8, 32], strides = [1, 1]} : vector<800x32xf32> to vector<8x32xf32>
    %482 = arith.truncf %481 : vector<8x32xf32> to vector<8x32xbf16>
    %c78 = arith.constant 78 : index
    %c0_246 = arith.constant 0 : index
    %c0_247 = arith.constant 0 : index
    %483 = vector.load %arg4[%c78, %c0_246, %c0_247] : memref<100x32x256xbf16, #tpu.memory_space<vmem>>, vector<1x32x256xbf16>
    %484 = vector.shape_cast %483 : vector<1x32x256xbf16> to vector<32x256xbf16>
    %cst_248 = arith.constant dense<0.000000e+00> : vector<8x256xf32>
    %485 = tpu.matmul %482, %484, %cst_248 {dimension_numbers = #tpu.dot_dimension_numbers<[1], [0], [0], [1], [0, 0, 1, 1], [], []>} : vector<8x32xbf16>, vector<32x256xbf16>, vector<8x256xf32> -> vector<8x256xf32>
    %486 = arith.addf %462, %485 : vector<8x256xf32>
    %487 = vector.extract_strided_slice %8 {offsets = [632, 0], sizes = [8, 32], strides = [1, 1]} : vector<800x32xf32> to vector<8x32xf32>
    %488 = arith.truncf %487 : vector<8x32xf32> to vector<8x32xbf16>
    %c79 = arith.constant 79 : index
    %c0_249 = arith.constant 0 : index
    %c0_250 = arith.constant 0 : index
    %489 = vector.load %arg4[%c79, %c0_249, %c0_250] : memref<100x32x256xbf16, #tpu.memory_space<vmem>>, vector<1x32x256xbf16>
    %490 = vector.shape_cast %489 : vector<1x32x256xbf16> to vector<32x256xbf16>
    %cst_251 = arith.constant dense<0.000000e+00> : vector<8x256xf32>
    %491 = tpu.matmul %488, %490, %cst_251 {dimension_numbers = #tpu.dot_dimension_numbers<[1], [0], [0], [1], [0, 0, 1, 1], [], []>} : vector<8x32xbf16>, vector<32x256xbf16>, vector<8x256xf32> -> vector<8x256xf32>
    %492 = arith.addf %468, %491 : vector<8x256xf32>
    %493 = vector.extract_strided_slice %8 {offsets = [640, 0], sizes = [8, 32], strides = [1, 1]} : vector<800x32xf32> to vector<8x32xf32>
    %494 = arith.truncf %493 : vector<8x32xf32> to vector<8x32xbf16>
    %c80 = arith.constant 80 : index
    %c0_252 = arith.constant 0 : index
    %c0_253 = arith.constant 0 : index
    %495 = vector.load %arg4[%c80, %c0_252, %c0_253] : memref<100x32x256xbf16, #tpu.memory_space<vmem>>, vector<1x32x256xbf16>
    %496 = vector.shape_cast %495 : vector<1x32x256xbf16> to vector<32x256xbf16>
    %cst_254 = arith.constant dense<0.000000e+00> : vector<8x256xf32>
    %497 = tpu.matmul %494, %496, %cst_254 {dimension_numbers = #tpu.dot_dimension_numbers<[1], [0], [0], [1], [0, 0, 1, 1], [], []>} : vector<8x32xbf16>, vector<32x256xbf16>, vector<8x256xf32> -> vector<8x256xf32>
    %498 = arith.addf %474, %497 : vector<8x256xf32>
    %499 = vector.extract_strided_slice %8 {offsets = [648, 0], sizes = [8, 32], strides = [1, 1]} : vector<800x32xf32> to vector<8x32xf32>
    %500 = arith.truncf %499 : vector<8x32xf32> to vector<8x32xbf16>
    %c81 = arith.constant 81 : index
    %c0_255 = arith.constant 0 : index
    %c0_256 = arith.constant 0 : index
    %501 = vector.load %arg4[%c81, %c0_255, %c0_256] : memref<100x32x256xbf16, #tpu.memory_space<vmem>>, vector<1x32x256xbf16>
    %502 = vector.shape_cast %501 : vector<1x32x256xbf16> to vector<32x256xbf16>
    %cst_257 = arith.constant dense<0.000000e+00> : vector<8x256xf32>
    %503 = tpu.matmul %500, %502, %cst_257 {dimension_numbers = #tpu.dot_dimension_numbers<[1], [0], [0], [1], [0, 0, 1, 1], [], []>} : vector<8x32xbf16>, vector<32x256xbf16>, vector<8x256xf32> -> vector<8x256xf32>
    %504 = arith.addf %480, %503 : vector<8x256xf32>
    %505 = vector.extract_strided_slice %8 {offsets = [656, 0], sizes = [8, 32], strides = [1, 1]} : vector<800x32xf32> to vector<8x32xf32>
    %506 = arith.truncf %505 : vector<8x32xf32> to vector<8x32xbf16>
    %c82 = arith.constant 82 : index
    %c0_258 = arith.constant 0 : index
    %c0_259 = arith.constant 0 : index
    %507 = vector.load %arg4[%c82, %c0_258, %c0_259] : memref<100x32x256xbf16, #tpu.memory_space<vmem>>, vector<1x32x256xbf16>
    %508 = vector.shape_cast %507 : vector<1x32x256xbf16> to vector<32x256xbf16>
    %cst_260 = arith.constant dense<0.000000e+00> : vector<8x256xf32>
    %509 = tpu.matmul %506, %508, %cst_260 {dimension_numbers = #tpu.dot_dimension_numbers<[1], [0], [0], [1], [0, 0, 1, 1], [], []>} : vector<8x32xbf16>, vector<32x256xbf16>, vector<8x256xf32> -> vector<8x256xf32>
    %510 = arith.addf %486, %509 : vector<8x256xf32>
    %511 = vector.extract_strided_slice %8 {offsets = [664, 0], sizes = [8, 32], strides = [1, 1]} : vector<800x32xf32> to vector<8x32xf32>
    %512 = arith.truncf %511 : vector<8x32xf32> to vector<8x32xbf16>
    %c83 = arith.constant 83 : index
    %c0_261 = arith.constant 0 : index
    %c0_262 = arith.constant 0 : index
    %513 = vector.load %arg4[%c83, %c0_261, %c0_262] : memref<100x32x256xbf16, #tpu.memory_space<vmem>>, vector<1x32x256xbf16>
    %514 = vector.shape_cast %513 : vector<1x32x256xbf16> to vector<32x256xbf16>
    %cst_263 = arith.constant dense<0.000000e+00> : vector<8x256xf32>
    %515 = tpu.matmul %512, %514, %cst_263 {dimension_numbers = #tpu.dot_dimension_numbers<[1], [0], [0], [1], [0, 0, 1, 1], [], []>} : vector<8x32xbf16>, vector<32x256xbf16>, vector<8x256xf32> -> vector<8x256xf32>
    %516 = arith.addf %492, %515 : vector<8x256xf32>
    %517 = vector.extract_strided_slice %8 {offsets = [672, 0], sizes = [8, 32], strides = [1, 1]} : vector<800x32xf32> to vector<8x32xf32>
    %518 = arith.truncf %517 : vector<8x32xf32> to vector<8x32xbf16>
    %c84 = arith.constant 84 : index
    %c0_264 = arith.constant 0 : index
    %c0_265 = arith.constant 0 : index
    %519 = vector.load %arg4[%c84, %c0_264, %c0_265] : memref<100x32x256xbf16, #tpu.memory_space<vmem>>, vector<1x32x256xbf16>
    %520 = vector.shape_cast %519 : vector<1x32x256xbf16> to vector<32x256xbf16>
    %cst_266 = arith.constant dense<0.000000e+00> : vector<8x256xf32>
    %521 = tpu.matmul %518, %520, %cst_266 {dimension_numbers = #tpu.dot_dimension_numbers<[1], [0], [0], [1], [0, 0, 1, 1], [], []>} : vector<8x32xbf16>, vector<32x256xbf16>, vector<8x256xf32> -> vector<8x256xf32>
    %522 = arith.addf %498, %521 : vector<8x256xf32>
    %523 = vector.extract_strided_slice %8 {offsets = [680, 0], sizes = [8, 32], strides = [1, 1]} : vector<800x32xf32> to vector<8x32xf32>
    %524 = arith.truncf %523 : vector<8x32xf32> to vector<8x32xbf16>
    %c85 = arith.constant 85 : index
    %c0_267 = arith.constant 0 : index
    %c0_268 = arith.constant 0 : index
    %525 = vector.load %arg4[%c85, %c0_267, %c0_268] : memref<100x32x256xbf16, #tpu.memory_space<vmem>>, vector<1x32x256xbf16>
    %526 = vector.shape_cast %525 : vector<1x32x256xbf16> to vector<32x256xbf16>
    %cst_269 = arith.constant dense<0.000000e+00> : vector<8x256xf32>
    %527 = tpu.matmul %524, %526, %cst_269 {dimension_numbers = #tpu.dot_dimension_numbers<[1], [0], [0], [1], [0, 0, 1, 1], [], []>} : vector<8x32xbf16>, vector<32x256xbf16>, vector<8x256xf32> -> vector<8x256xf32>
    %528 = arith.addf %504, %527 : vector<8x256xf32>
    %529 = vector.extract_strided_slice %8 {offsets = [688, 0], sizes = [8, 32], strides = [1, 1]} : vector<800x32xf32> to vector<8x32xf32>
    %530 = arith.truncf %529 : vector<8x32xf32> to vector<8x32xbf16>
    %c86 = arith.constant 86 : index
    %c0_270 = arith.constant 0 : index
    %c0_271 = arith.constant 0 : index
    %531 = vector.load %arg4[%c86, %c0_270, %c0_271] : memref<100x32x256xbf16, #tpu.memory_space<vmem>>, vector<1x32x256xbf16>
    %532 = vector.shape_cast %531 : vector<1x32x256xbf16> to vector<32x256xbf16>
    %cst_272 = arith.constant dense<0.000000e+00> : vector<8x256xf32>
    %533 = tpu.matmul %530, %532, %cst_272 {dimension_numbers = #tpu.dot_dimension_numbers<[1], [0], [0], [1], [0, 0, 1, 1], [], []>} : vector<8x32xbf16>, vector<32x256xbf16>, vector<8x256xf32> -> vector<8x256xf32>
    %534 = arith.addf %510, %533 : vector<8x256xf32>
    %535 = vector.extract_strided_slice %8 {offsets = [696, 0], sizes = [8, 32], strides = [1, 1]} : vector<800x32xf32> to vector<8x32xf32>
    %536 = arith.truncf %535 : vector<8x32xf32> to vector<8x32xbf16>
    %c87 = arith.constant 87 : index
    %c0_273 = arith.constant 0 : index
    %c0_274 = arith.constant 0 : index
    %537 = vector.load %arg4[%c87, %c0_273, %c0_274] : memref<100x32x256xbf16, #tpu.memory_space<vmem>>, vector<1x32x256xbf16>
    %538 = vector.shape_cast %537 : vector<1x32x256xbf16> to vector<32x256xbf16>
    %cst_275 = arith.constant dense<0.000000e+00> : vector<8x256xf32>
    %539 = tpu.matmul %536, %538, %cst_275 {dimension_numbers = #tpu.dot_dimension_numbers<[1], [0], [0], [1], [0, 0, 1, 1], [], []>} : vector<8x32xbf16>, vector<32x256xbf16>, vector<8x256xf32> -> vector<8x256xf32>
    %540 = arith.addf %516, %539 : vector<8x256xf32>
    %541 = vector.extract_strided_slice %8 {offsets = [704, 0], sizes = [8, 32], strides = [1, 1]} : vector<800x32xf32> to vector<8x32xf32>
    %542 = arith.truncf %541 : vector<8x32xf32> to vector<8x32xbf16>
    %c88 = arith.constant 88 : index
    %c0_276 = arith.constant 0 : index
    %c0_277 = arith.constant 0 : index
    %543 = vector.load %arg4[%c88, %c0_276, %c0_277] : memref<100x32x256xbf16, #tpu.memory_space<vmem>>, vector<1x32x256xbf16>
    %544 = vector.shape_cast %543 : vector<1x32x256xbf16> to vector<32x256xbf16>
    %cst_278 = arith.constant dense<0.000000e+00> : vector<8x256xf32>
    %545 = tpu.matmul %542, %544, %cst_278 {dimension_numbers = #tpu.dot_dimension_numbers<[1], [0], [0], [1], [0, 0, 1, 1], [], []>} : vector<8x32xbf16>, vector<32x256xbf16>, vector<8x256xf32> -> vector<8x256xf32>
    %546 = arith.addf %522, %545 : vector<8x256xf32>
    %547 = vector.extract_strided_slice %8 {offsets = [712, 0], sizes = [8, 32], strides = [1, 1]} : vector<800x32xf32> to vector<8x32xf32>
    %548 = arith.truncf %547 : vector<8x32xf32> to vector<8x32xbf16>
    %c89 = arith.constant 89 : index
    %c0_279 = arith.constant 0 : index
    %c0_280 = arith.constant 0 : index
    %549 = vector.load %arg4[%c89, %c0_279, %c0_280] : memref<100x32x256xbf16, #tpu.memory_space<vmem>>, vector<1x32x256xbf16>
    %550 = vector.shape_cast %549 : vector<1x32x256xbf16> to vector<32x256xbf16>
    %cst_281 = arith.constant dense<0.000000e+00> : vector<8x256xf32>
    %551 = tpu.matmul %548, %550, %cst_281 {dimension_numbers = #tpu.dot_dimension_numbers<[1], [0], [0], [1], [0, 0, 1, 1], [], []>} : vector<8x32xbf16>, vector<32x256xbf16>, vector<8x256xf32> -> vector<8x256xf32>
    %552 = arith.addf %528, %551 : vector<8x256xf32>
    %553 = vector.extract_strided_slice %8 {offsets = [720, 0], sizes = [8, 32], strides = [1, 1]} : vector<800x32xf32> to vector<8x32xf32>
    %554 = arith.truncf %553 : vector<8x32xf32> to vector<8x32xbf16>
    %c90 = arith.constant 90 : index
    %c0_282 = arith.constant 0 : index
    %c0_283 = arith.constant 0 : index
    %555 = vector.load %arg4[%c90, %c0_282, %c0_283] : memref<100x32x256xbf16, #tpu.memory_space<vmem>>, vector<1x32x256xbf16>
    %556 = vector.shape_cast %555 : vector<1x32x256xbf16> to vector<32x256xbf16>
    %cst_284 = arith.constant dense<0.000000e+00> : vector<8x256xf32>
    %557 = tpu.matmul %554, %556, %cst_284 {dimension_numbers = #tpu.dot_dimension_numbers<[1], [0], [0], [1], [0, 0, 1, 1], [], []>} : vector<8x32xbf16>, vector<32x256xbf16>, vector<8x256xf32> -> vector<8x256xf32>
    %558 = arith.addf %534, %557 : vector<8x256xf32>
    %559 = vector.extract_strided_slice %8 {offsets = [728, 0], sizes = [8, 32], strides = [1, 1]} : vector<800x32xf32> to vector<8x32xf32>
    %560 = arith.truncf %559 : vector<8x32xf32> to vector<8x32xbf16>
    %c91 = arith.constant 91 : index
    %c0_285 = arith.constant 0 : index
    %c0_286 = arith.constant 0 : index
    %561 = vector.load %arg4[%c91, %c0_285, %c0_286] : memref<100x32x256xbf16, #tpu.memory_space<vmem>>, vector<1x32x256xbf16>
    %562 = vector.shape_cast %561 : vector<1x32x256xbf16> to vector<32x256xbf16>
    %cst_287 = arith.constant dense<0.000000e+00> : vector<8x256xf32>
    %563 = tpu.matmul %560, %562, %cst_287 {dimension_numbers = #tpu.dot_dimension_numbers<[1], [0], [0], [1], [0, 0, 1, 1], [], []>} : vector<8x32xbf16>, vector<32x256xbf16>, vector<8x256xf32> -> vector<8x256xf32>
    %564 = arith.addf %540, %563 : vector<8x256xf32>
    %565 = vector.extract_strided_slice %8 {offsets = [736, 0], sizes = [8, 32], strides = [1, 1]} : vector<800x32xf32> to vector<8x32xf32>
    %566 = arith.truncf %565 : vector<8x32xf32> to vector<8x32xbf16>
    %c92 = arith.constant 92 : index
    %c0_288 = arith.constant 0 : index
    %c0_289 = arith.constant 0 : index
    %567 = vector.load %arg4[%c92, %c0_288, %c0_289] : memref<100x32x256xbf16, #tpu.memory_space<vmem>>, vector<1x32x256xbf16>
    %568 = vector.shape_cast %567 : vector<1x32x256xbf16> to vector<32x256xbf16>
    %cst_290 = arith.constant dense<0.000000e+00> : vector<8x256xf32>
    %569 = tpu.matmul %566, %568, %cst_290 {dimension_numbers = #tpu.dot_dimension_numbers<[1], [0], [0], [1], [0, 0, 1, 1], [], []>} : vector<8x32xbf16>, vector<32x256xbf16>, vector<8x256xf32> -> vector<8x256xf32>
    %570 = arith.addf %546, %569 : vector<8x256xf32>
    %571 = vector.extract_strided_slice %8 {offsets = [744, 0], sizes = [8, 32], strides = [1, 1]} : vector<800x32xf32> to vector<8x32xf32>
    %572 = arith.truncf %571 : vector<8x32xf32> to vector<8x32xbf16>
    %c93 = arith.constant 93 : index
    %c0_291 = arith.constant 0 : index
    %c0_292 = arith.constant 0 : index
    %573 = vector.load %arg4[%c93, %c0_291, %c0_292] : memref<100x32x256xbf16, #tpu.memory_space<vmem>>, vector<1x32x256xbf16>
    %574 = vector.shape_cast %573 : vector<1x32x256xbf16> to vector<32x256xbf16>
    %cst_293 = arith.constant dense<0.000000e+00> : vector<8x256xf32>
    %575 = tpu.matmul %572, %574, %cst_293 {dimension_numbers = #tpu.dot_dimension_numbers<[1], [0], [0], [1], [0, 0, 1, 1], [], []>} : vector<8x32xbf16>, vector<32x256xbf16>, vector<8x256xf32> -> vector<8x256xf32>
    %576 = arith.addf %552, %575 : vector<8x256xf32>
    %577 = vector.extract_strided_slice %8 {offsets = [752, 0], sizes = [8, 32], strides = [1, 1]} : vector<800x32xf32> to vector<8x32xf32>
    %578 = arith.truncf %577 : vector<8x32xf32> to vector<8x32xbf16>
    %c94 = arith.constant 94 : index
    %c0_294 = arith.constant 0 : index
    %c0_295 = arith.constant 0 : index
    %579 = vector.load %arg4[%c94, %c0_294, %c0_295] : memref<100x32x256xbf16, #tpu.memory_space<vmem>>, vector<1x32x256xbf16>
    %580 = vector.shape_cast %579 : vector<1x32x256xbf16> to vector<32x256xbf16>
    %cst_296 = arith.constant dense<0.000000e+00> : vector<8x256xf32>
    %581 = tpu.matmul %578, %580, %cst_296 {dimension_numbers = #tpu.dot_dimension_numbers<[1], [0], [0], [1], [0, 0, 1, 1], [], []>} : vector<8x32xbf16>, vector<32x256xbf16>, vector<8x256xf32> -> vector<8x256xf32>
    %582 = arith.addf %558, %581 : vector<8x256xf32>
    %583 = vector.extract_strided_slice %8 {offsets = [760, 0], sizes = [8, 32], strides = [1, 1]} : vector<800x32xf32> to vector<8x32xf32>
    %584 = arith.truncf %583 : vector<8x32xf32> to vector<8x32xbf16>
    %c95 = arith.constant 95 : index
    %c0_297 = arith.constant 0 : index
    %c0_298 = arith.constant 0 : index
    %585 = vector.load %arg4[%c95, %c0_297, %c0_298] : memref<100x32x256xbf16, #tpu.memory_space<vmem>>, vector<1x32x256xbf16>
    %586 = vector.shape_cast %585 : vector<1x32x256xbf16> to vector<32x256xbf16>
    %cst_299 = arith.constant dense<0.000000e+00> : vector<8x256xf32>
    %587 = tpu.matmul %584, %586, %cst_299 {dimension_numbers = #tpu.dot_dimension_numbers<[1], [0], [0], [1], [0, 0, 1, 1], [], []>} : vector<8x32xbf16>, vector<32x256xbf16>, vector<8x256xf32> -> vector<8x256xf32>
    %588 = arith.addf %564, %587 : vector<8x256xf32>
    %589 = vector.extract_strided_slice %8 {offsets = [768, 0], sizes = [8, 32], strides = [1, 1]} : vector<800x32xf32> to vector<8x32xf32>
    %590 = arith.truncf %589 : vector<8x32xf32> to vector<8x32xbf16>
    %c96 = arith.constant 96 : index
    %c0_300 = arith.constant 0 : index
    %c0_301 = arith.constant 0 : index
    %591 = vector.load %arg4[%c96, %c0_300, %c0_301] : memref<100x32x256xbf16, #tpu.memory_space<vmem>>, vector<1x32x256xbf16>
    %592 = vector.shape_cast %591 : vector<1x32x256xbf16> to vector<32x256xbf16>
    %cst_302 = arith.constant dense<0.000000e+00> : vector<8x256xf32>
    %593 = tpu.matmul %590, %592, %cst_302 {dimension_numbers = #tpu.dot_dimension_numbers<[1], [0], [0], [1], [0, 0, 1, 1], [], []>} : vector<8x32xbf16>, vector<32x256xbf16>, vector<8x256xf32> -> vector<8x256xf32>
    %594 = arith.addf %570, %593 : vector<8x256xf32>
    %595 = vector.extract_strided_slice %8 {offsets = [776, 0], sizes = [8, 32], strides = [1, 1]} : vector<800x32xf32> to vector<8x32xf32>
    %596 = arith.truncf %595 : vector<8x32xf32> to vector<8x32xbf16>
    %c97 = arith.constant 97 : index
    %c0_303 = arith.constant 0 : index
    %c0_304 = arith.constant 0 : index
    %597 = vector.load %arg4[%c97, %c0_303, %c0_304] : memref<100x32x256xbf16, #tpu.memory_space<vmem>>, vector<1x32x256xbf16>
    %598 = vector.shape_cast %597 : vector<1x32x256xbf16> to vector<32x256xbf16>
    %cst_305 = arith.constant dense<0.000000e+00> : vector<8x256xf32>
    %599 = tpu.matmul %596, %598, %cst_305 {dimension_numbers = #tpu.dot_dimension_numbers<[1], [0], [0], [1], [0, 0, 1, 1], [], []>} : vector<8x32xbf16>, vector<32x256xbf16>, vector<8x256xf32> -> vector<8x256xf32>
    %600 = arith.addf %576, %599 : vector<8x256xf32>
    %601 = vector.extract_strided_slice %8 {offsets = [784, 0], sizes = [8, 32], strides = [1, 1]} : vector<800x32xf32> to vector<8x32xf32>
    %602 = arith.truncf %601 : vector<8x32xf32> to vector<8x32xbf16>
    %c98 = arith.constant 98 : index
    %c0_306 = arith.constant 0 : index
    %c0_307 = arith.constant 0 : index
    %603 = vector.load %arg4[%c98, %c0_306, %c0_307] : memref<100x32x256xbf16, #tpu.memory_space<vmem>>, vector<1x32x256xbf16>
    %604 = vector.shape_cast %603 : vector<1x32x256xbf16> to vector<32x256xbf16>
    %cst_308 = arith.constant dense<0.000000e+00> : vector<8x256xf32>
    %605 = tpu.matmul %602, %604, %cst_308 {dimension_numbers = #tpu.dot_dimension_numbers<[1], [0], [0], [1], [0, 0, 1, 1], [], []>} : vector<8x32xbf16>, vector<32x256xbf16>, vector<8x256xf32> -> vector<8x256xf32>
    %606 = arith.addf %582, %605 : vector<8x256xf32>
    %607 = vector.extract_strided_slice %8 {offsets = [792, 0], sizes = [8, 32], strides = [1, 1]} : vector<800x32xf32> to vector<8x32xf32>
    %608 = arith.truncf %607 : vector<8x32xf32> to vector<8x32xbf16>
    %c99 = arith.constant 99 : index
    %c0_309 = arith.constant 0 : index
    %c0_310 = arith.constant 0 : index
    %609 = vector.load %arg4[%c99, %c0_309, %c0_310] : memref<100x32x256xbf16, #tpu.memory_space<vmem>>, vector<1x32x256xbf16>
    %610 = vector.shape_cast %609 : vector<1x32x256xbf16> to vector<32x256xbf16>
    %cst_311 = arith.constant dense<0.000000e+00> : vector<8x256xf32>
    %611 = tpu.matmul %608, %610, %cst_311 {dimension_numbers = #tpu.dot_dimension_numbers<[1], [0], [0], [1], [0, 0, 1, 1], [], []>} : vector<8x32xbf16>, vector<32x256xbf16>, vector<8x256xf32> -> vector<8x256xf32>
    %612 = arith.addf %588, %611 : vector<8x256xf32>
    %613 = arith.addf %594, %600 : vector<8x256xf32>
    %614 = arith.addf %606, %612 : vector<8x256xf32>
    %615 = arith.addf %613, %614 : vector<8x256xf32>
    %c0_312 = arith.constant 0 : index
    %c0_313 = arith.constant 0 : index
    %616 = vector.load %arg5[%c0_312, %c0_313] : memref<1x256xf32, #tpu.memory_space<vmem>>, vector<1x256xf32>
    %617 = vector.broadcast %616 : vector<1x256xf32> to vector<8x256xf32>
    %618 = arith.addf %615, %617 : vector<8x256xf32>
    %cst_314 = arith.constant 0.000000e+00 : f32
    %619 = vector.broadcast %cst_314 : f32 to vector<8x256xf32>
    %620 = arith.maximumf %618, %619 : vector<8x256xf32>
    %621 = arith.truncf %620 : vector<8x256xf32> to vector<8x256xbf16>
    %c0_315 = arith.constant 0 : index
    %c0_316 = arith.constant 0 : index
    %622 = vector.load %arg6[%c0_315, %c0_316] : memref<256x128xbf16, #tpu.memory_space<vmem>>, vector<256x128xbf16>
    %cst_317 = arith.constant dense<0.000000e+00> : vector<8x128xf32>
    %623 = tpu.matmul %621, %622, %cst_317 {dimension_numbers = #tpu.dot_dimension_numbers<[1], [0], [0], [1], [0, 0, 1, 1], [], []>} : vector<8x256xbf16>, vector<256x128xbf16>, vector<8x128xf32> -> vector<8x128xf32>
    %c0_318 = arith.constant 0 : index
    %c0_319 = arith.constant 0 : index
    %624 = vector.load %arg7[%c0_318, %c0_319] : memref<1x128xf32, #tpu.memory_space<vmem>>, vector<1x128xf32>
    %625 = vector.broadcast %624 : vector<1x128xf32> to vector<8x128xf32>
    %626 = arith.addf %623, %625 : vector<8x128xf32>
    %c0_320 = arith.constant 0 : index
    %c0_321 = arith.constant 0 : index
    %c0_322 = arith.constant 0 : index
    %627 = vector.load %arg8[%c0_320, %c0_321, %c0_322] : memref<1x8x128xf32, #tpu.memory_space<vmem>>, vector<1x8x128xf32>
    %628 = vector.shape_cast %627 : vector<1x8x128xf32> to vector<8x128xf32>
    %629 = vector.shape_cast %626 : vector<8x128xf32> to vector<1x8x128xf32>
    tpu.vector_store %arg8[%c0_320, %c0_321, %c0_322], %629 {strides = array<i32>} : memref<1x8x128xf32, #tpu.memory_space<vmem>>, vector<1x8x128xf32>,
    return
  }
  func.func @transform_0(%arg0: i32) -> (i32, i32, i32) {
    %c0_i32 = arith.constant 0 : i32
    %c0_i32_0 = arith.constant 0 : i32
    %c0_i32_1 = arith.constant 0 : i32
    return %arg0, %c0_i32, %c0_i32_0 : i32, i32, i32
  }
  func.func @transform_1(%arg0: i32) -> (i32, i32) {
    %c0_i32 = arith.constant 0 : i32
    %c0_i32_0 = arith.constant 0 : i32
    %c0_i32_1 = arith.constant 0 : i32
    return %c0_i32, %c0_i32_0 : i32, i32
  }
  func.func @transform_2(%arg0: i32) -> (i32, i32) {
    %c0_i32 = arith.constant 0 : i32
    %c0_i32_0 = arith.constant 0 : i32
    %c0_i32_1 = arith.constant 0 : i32
    return %c0_i32, %c0_i32_0 : i32, i32
  }
  func.func @transform_3(%arg0: i32) -> (i32, i32, i32) {
    %c0_i32 = arith.constant 0 : i32
    %c0_i32_0 = arith.constant 0 : i32
    %c0_i32_1 = arith.constant 0 : i32
    %c0_i32_2 = arith.constant 0 : i32
    return %c0_i32, %c0_i32_0, %c0_i32_1 : i32, i32, i32
  }
  func.func @transform_4(%arg0: i32) -> (i32, i32) {
    %c0_i32 = arith.constant 0 : i32
    %c0_i32_0 = arith.constant 0 : i32
    %c0_i32_1 = arith.constant 0 : i32
    return %c0_i32, %c0_i32_0 : i32, i32
  }
  func.func @transform_5(%arg0: i32) -> (i32, i32) {
    %c0_i32 = arith.constant 0 : i32
    %c0_i32_0 = arith.constant 0 : i32
    %c0_i32_1 = arith.constant 0 : i32
    return %c0_i32, %c0_i32_0 : i32, i32
  }
  func.func @transform_6(%arg0: i32) -> (i32, i32) {
    %c0_i32 = arith.constant 0 : i32
    %c0_i32_0 = arith.constant 0 : i32
    %c0_i32_1 = arith.constant 0 : i32
    return %c0_i32, %c0_i32_0 : i32, i32
  }
  func.func @transform_7(%arg0: i32) -> (i32, i32, i32) {
    %c0_i32 = arith.constant 0 : i32
    %c0_i32_0 = arith.constant 0 : i32
    %c0_i32_1 = arith.constant 0 : i32
    return %arg0, %c0_i32, %c0_i32_0 : i32, i32, i32
  }
}

</mosaic_0001>

<bundles_post_ra>
// kernel: dqn_forward.2
= control target key start
LH: loop header
LB: loop body
LE: loop exit
PB: predicated region body
PF: predicated region fallthrough
CT: control target
= control target key end

     0   :  { %s3148_s12 = smov 0   ;;  %s3530_s0 = inlined_call_operand.vmem [shape: bf16[1792,256], index: 0, kind: input, shape index: {}]   ;;  %s3531_s1 = inlined_call_operand.vmem [shape: bf16[256,128], index: 1, kind: input, shape index: {}]   ;;  %s3532_s2 = inlined_call_operand.vmem [shape: f32[1,128], index: 2, kind: input, shape index: {}]   ;;  %s3533_s3 = inlined_call_operand.vmem [shape: bf16[1792,128], index: 3, kind: output, shape index: {}]  }
   0x1 LB: > { %s2194_s13 = sadd.s32 4294967295, %s3125_s12   ;;  %p2198_p0 = scmp.ge.s32.totalorder %s3125_s12, 1  ;;  %s3125_s12 = sphi %s3148_s12, %s13_s12  }
   0x2   : > { %p139_p1 = scmp.lt.s32.totalorder %s3125_s12, 3 }
   0x4   : > { %p140_p2 = pnand %p2198_p0, %p139_p1 }
   0x5   : > { %v2934_v0 = vld [vmem:[%s3531_s1] sm:$0xff] (!%p140_p2)   ;;  %v3127_v1 = vmov (!%p140_p2), 0   ;;  %s164_s16 = smul.u32 (!%p140_p2), 112, %s2194_s13  ;;  %v2935_v2 = vld [vmem:[%s3531_s1 + $0x8] sm:$0xff] (!%p140_p2)   ;;  %v2936_v3 = vld [vmem:[%s3531_s1 + $0x10] sm:$0xff] (!%p140_p2)  }
   0x6   : > { %143 = sbr.rel (%p140_p2) target bundleno = 507 (0x1fb), region = 32  ;;  %985 = vmatprep.subr.bf16.mxu0 (!%p140_p2), %v3127_v1  ;;  %2893 = vmatprep.subr.bf16.mxu1 (!%p140_p2), %v3127_v1  ;;  %v2937_v4 = vld [vmem:[%s3531_s1 + $0x18] sm:$0xff] (!%p140_p2)   ;;  %v2938_v5 = vld [vmem:[%s3531_s1 + $0x20] sm:$0xff] (!%p140_p2)   ;;  %v2939_v7 = vld [vmem:[%s3531_s1 + $0x28] sm:$0xff] (!%p140_p2)  }
   0x7   : > { %986 = vmatpush1.bf16.msra.mxu0 (!%p140_p2), %v2934_v0  ;;  %2909 = vmatpush1.bf16.msra.mxu1 (!%p140_p2), %v2934_v0  ;;  %p165_p3 = scmp.lt.s32.totalorder (!%p140_p2), %s164_s16, 223  ;;  %v2940_v9 = vld [vmem:[%s3531_s1 + $0x30] sm:$0xff] (!%p140_p2)   ;;  %v2941_v10 = vld [vmem:[%s3531_s1 + $0x38] sm:$0xff] (!%p140_p2)   ;;  %v2942_v11 = vld [vmem:[%s3531_s1 + $0x40] sm:$0xff] (!%p140_p2)  }
   0x8   : > { %987 = vmatprep.subr.bf16.mxu0 (!%p140_p2), %v3127_v1  ;;  %2894 = vmatprep.subr.bf16.mxu1 (!%p140_p2), %v3127_v1  ;;  %v2943_v12 = vld [vmem:[%s3531_s1 + $0x48] sm:$0xff] (!%p140_p2)   ;;  %v2944_v13 = vld [vmem:[%s3531_s1 + $0x50] sm:$0xff] (!%p140_p2)   ;;  %v2945_v14 = vld [vmem:[%s3531_s1 + $0x58] sm:$0xff] (!%p140_p2)  }
   0x9   : > { %v2946_v15 = vld [vmem:[%s3531_s1 + $0x60] sm:$0xff] (!%p140_p2)   ;;  %v2947_v16 = vld [vmem:[%s3531_s1 + $0x68] sm:$0xff] (!%p140_p2)   ;;  %v2948_v17 = vld [vmem:[%s3531_s1 + $0x70] sm:$0xff] (!%p140_p2)  }
   0xa   : > { %v2949_v18 = vld [vmem:[%s3531_s1 + $0x78] sm:$0xff] (!%p140_p2)  }
   0xb   : > { %988 = vmatpush1.bf16.msra.mxu0 (!%p140_p2), %v2935_v2  ;;  %2910 = vmatpush1.bf16.msra.mxu1 (!%p140_p2), %v2935_v2 }
   0xc   : > { %989 = vmatprep.subr.bf16.mxu0 (!%p140_p2), %v3127_v1  ;;  %2895 = vmatprep.subr.bf16.mxu1 (!%p140_p2), %v3127_v1 }
   0xd   : > { %s3535_s16 = smov (!%p165_p3, %s164_s16), 223 }
   0xe   : > { %s2445_s23 = sshll.u32 %s3535_s16, 3  ;;  %s2201_s29 = sshll.u32 %s3535_s16, 2 }
   0xf   : > { %990 = vmatpush1.bf16.msra.mxu0 %v2936_v3  ;;  %2911 = vmatpush1.bf16.msra.mxu1 %v2936_v3  ;;  %s3185_s28 = scalar_lea.vmem %s3530_s0, %s2445_s23  ;;  %s3369_s5 = scalar_lea.vmem %s3533_s3, %s2201_s29 }
  0x10   : > { %991 = vmatprep.subr.bf16.mxu0 %v3127_v1  ;;  %2896 = vmatprep.subr.bf16.mxu1 %v3127_v1  ;;  %v2952_v6 = vld [vmem:[%s3185_s28 + $0x4] ss:$8 sps:$4 sm:$0xff]   ;;  %v2950_v19 = vld [vmem:[%s3185_s28] ss:$8 sps:$4 sm:$0xff]   ;;  %v2956_v21 = vld [vmem:[%s3185_s28 + $0x14] ss:$8 sps:$4 sm:$0xff]  }
  0x11   : > { %v2955_v8 = vld [vmem:[%s3185_s28 + $0x1c4] ss:$8 sps:$4 sm:$0xff]   ;;  %1017 = vmatprep.mubr.bf16.mxu0 %v2952_v6  ;;  %v2953_v20 = vld [vmem:[%s3185_s28 + $0x1c0] ss:$8 sps:$4 sm:$0xff]   ;;  %v2958_v22 = vld [vmem:[%s3185_s28 + $0x1d4] ss:$8 sps:$4 sm:$0xff]  }
  0x12   : > { %1241 = vmatprep.mubr.bf16.mxu1 %v2955_v8  ;;  %v2960_v23 = vld [vmem:[%s3185_s28 + $0x10] ss:$8 sps:$4 sm:$0xff]   ;;  %v2962_v25 = vld [vmem:[%s3185_s28 + $0x24] ss:$8 sps:$4 sm:$0xff]   ;;  %v2966_v27 = vld [vmem:[%s3185_s28 + $0x20] ss:$8 sps:$4 sm:$0xff]  }
  0x13   : > { %992 = vmatpush1.bf16.msra.mxu0 %v2937_v4  ;;  %2912 = vmatpush1.bf16.msra.mxu1 %v2937_v4  ;;  %v2961_v24 = vld [vmem:[%s3185_s28 + $0x1d0] ss:$8 sps:$4 sm:$0xff]   ;;  %v2964_v26 = vld [vmem:[%s3185_s28 + $0x1e4] ss:$8 sps:$4 sm:$0xff]   ;;  %v2967_v28 = vld [vmem:[%s3185_s28 + $0x1e0] ss:$8 sps:$4 sm:$0xff]  }
  0x14   : > { %993 = vmatprep.subr.bf16.mxu0 %v3127_v1  ;;  %2897 = vmatprep.subr.bf16.mxu1 %v3127_v1  ;;  %v2968_v29 = vld [vmem:[%s3185_s28 + $0x34] ss:$8 sps:$4 sm:$0xff]   ;;  %v2972_v31 = vld [vmem:[%s3185_s28 + $0x30] ss:$8 sps:$4 sm:$0xff]   ;;  %v2974_v33 = vld [vmem:[%s3185_s28 + $0x44] ss:$8 sps:$4 sm:$0xff]  }
  0x15   : > { %v2970_v30 = vld [vmem:[%s3185_s28 + $0x1f4] ss:$8 sps:$4 sm:$0xff]   ;;  %v2973_v32 = vld [vmem:[%s3185_s28 + $0x1f0] ss:$8 sps:$4 sm:$0xff]   ;;  %v2976_v34 = vld [vmem:[%s3185_s28 + $0x204] ss:$8 sps:$4 sm:$0xff]  }
  0x16   : > { %v2978_v35 = vld [vmem:[%s3185_s28 + $0x40] ss:$8 sps:$4 sm:$0xff]   ;;  %v2980_v37 = vld [vmem:[%s3185_s28 + $0x54] ss:$8 sps:$4 sm:$0xff]   ;;  %v2984_v39 = vld [vmem:[%s3185_s28 + $0x50] ss:$8 sps:$4 sm:$0xff]  }
  0x17   : > { %994 = vmatpush1.bf16.msra.mxu0 %v2938_v5  ;;  %2913 = vmatpush1.bf16.msra.mxu1 %v2938_v5  ;;  %v2979_v36 = vld [vmem:[%s3185_s28 + $0x200] ss:$8 sps:$4 sm:$0xff]   ;;  %v2982_v38 = vld [vmem:[%s3185_s28 + $0x214] ss:$8 sps:$4 sm:$0xff]   ;;  %v2985_v40 = vld [vmem:[%s3185_s28 + $0x210] ss:$8 sps:$4 sm:$0xff]  }
  0x18   : > { %995 = vmatprep.subr.bf16.mxu0 %v3127_v1  ;;  %2898 = vmatprep.subr.bf16.mxu1 %v3127_v1  ;;  %v2986_v41 = vld [vmem:[%s3185_s28 + $0x64] ss:$8 sps:$4 sm:$0xff]   ;;  %v2990_v43 = vld [vmem:[%s3185_s28 + $0x60] ss:$8 sps:$4 sm:$0xff]   ;;  %v2992_v45 = vld [vmem:[%s3185_s28 + $0x74] ss:$8 sps:$4 sm:$0xff]  }
  0x19   : > { %v2988_v42 = vld [vmem:[%s3185_s28 + $0x224] ss:$8 sps:$4 sm:$0xff]   ;;  %v2991_v44 = vld [vmem:[%s3185_s28 + $0x220] ss:$8 sps:$4 sm:$0xff]   ;;  %v2994_v46 = vld [vmem:[%s3185_s28 + $0x234] ss:$8 sps:$4 sm:$0xff]  }
  0x1a   : > { %v2996_v47 = vld [vmem:[%s3185_s28 + $0x70] ss:$8 sps:$4 sm:$0xff]   ;;  %v2998_v49 = vld [vmem:[%s3185_s28 + $0x84] ss:$8 sps:$4 sm:$0xff]   ;;  %v3002_v51 = vld [vmem:[%s3185_s28 + $0x80] ss:$8 sps:$4 sm:$0xff]  }
  0x1b   : > { %996 = vmatpush1.bf16.msra.mxu0 %v2939_v7  ;;  %2914 = vmatpush1.bf16.msra.mxu1 %v2939_v7  ;;  %v2997_v48 = vld [vmem:[%s3185_s28 + $0x230] ss:$8 sps:$4 sm:$0xff]   ;;  %v3000_v50 = vld [vmem:[%s3185_s28 + $0x244] ss:$8 sps:$4 sm:$0xff]   ;;  %v3003_v52 = vld [vmem:[%s3185_s28 + $0x240] ss:$8 sps:$4 sm:$0xff]  }
  0x1c   : > { %997 = vmatprep.subr.bf16.mxu0 %v3127_v1  ;;  %2899 = vmatprep.subr.bf16.mxu1 %v3127_v1  ;;  %v3004_v53 = vld [vmem:[%s3185_s28 + $0x94] ss:$8 sps:$4 sm:$0xff]   ;;  %v3008_v55 = vld [vmem:[%s3185_s28 + $0x90] ss:$8 sps:$4 sm:$0xff]   ;;  %v3010_v57 = vld [vmem:[%s3185_s28 + $0xa4] ss:$8 sps:$4 sm:$0xff]  }
  0x1d   : > { %v3006_v54 = vld [vmem:[%s3185_s28 + $0x254] ss:$8 sps:$4 sm:$0xff]   ;;  %v3009_v56 = vld [vmem:[%s3185_s28 + $0x250] ss:$8 sps:$4 sm:$0xff]   ;;  %v3012_v58 = vld [vmem:[%s3185_s28 + $0x264] ss:$8 sps:$4 sm:$0xff]  }
  0x1e   : > { %v3014_v59 = vld [vmem:[%s3185_s28 + $0xa0] ss:$8 sps:$4 sm:$0xff]   ;;  %v3016_v61 = vld [vmem:[%s3185_s28 + $0xb4] ss:$8 sps:$4 sm:$0xff]   ;;  %v3020_v63 = vld [vmem:[%s3185_s28 + $0xb0] ss:$8 sps:$4 sm:$0xff]  }
  0x1f   : > { %998 = vmatpush1.bf16.msra.mxu0 %v2940_v9  ;;  %2915 = vmatpush1.bf16.msra.mxu1 %v2940_v9  ;;  %v3015_v60 = vld [vmem:[%s3185_s28 + $0x260] ss:$8 sps:$4 sm:$0xff]   ;;  %v3018_v62 = vld [vmem:[%s3185_s28 + $0x274] ss:$8 sps:$4 sm:$0xff]   ;;  %v3021_v0 = vld [vmem:[%s3185_s28 + $0x270] ss:$8 sps:$4 sm:$0xff]  }
  0x20   : > { %999 = vmatprep.subr.bf16.mxu0 %v3127_v1  ;;  %2900 = vmatprep.subr.bf16.mxu1 %v3127_v1  ;;  %v3024_v2 = vld [vmem:[%s3185_s28 + $0x284] ss:$8 sps:$4 sm:$0xff]   ;;  %v3026_v3 = vld [vmem:[%s3185_s28 + $0xc0] ss:$8 sps:$4 sm:$0xff]   ;;  %v3028_v5 = vld [vmem:[%s3185_s28 + $0xd4] ss:$8 sps:$4 sm:$0xff]  }
  0x21   : > { %v3027_v4 = vld [vmem:[%s3185_s28 + $0x280] ss:$8 sps:$4 sm:$0xff]   ;;  %v3030_v6 = vld [vmem:[%s3185_s28 + $0x294] ss:$8 sps:$4 sm:$0xff]   ;;  %v3032_v7 = vld [vmem:[%s3185_s28 + $0xd0] ss:$8 sps:$4 sm:$0xff]  }
  0x22   : > { %v3033_v8 = vld [vmem:[%s3185_s28 + $0x290] ss:$8 sps:$4 sm:$0xff]   ;;  %v3034_v9 = vld [vmem:[%s3185_s28 + $0xe4] ss:$8 sps:$4 sm:$0xff]  }
  0x23   : > { %1000 = vmatpush1.bf16.msra.mxu0 %v2941_v10  ;;  %2916 = vmatpush1.bf16.msra.mxu1 %v2941_v10  ;;  %v3036_v10 = vld [vmem:[%s3185_s28 + $0x2a4] ss:$8 sps:$4 sm:$0xff]  }
  0x24   : > { %1001 = vmatprep.subr.bf16.mxu0 %v3127_v1  ;;  %2901 = vmatprep.subr.bf16.mxu1 %v3127_v1 }
  0x27   : > { %1002 = vmatpush1.bf16.msra.mxu0 %v2942_v11  ;;  %2917 = vmatpush1.bf16.msra.mxu1 %v2942_v11  ;;  %v3038_v11 = vld [vmem:[%s3185_s28 + $0xe0] ss:$8 sps:$4 sm:$0xff]  }
  0x28   : > { %1003 = vmatprep.subr.bf16.mxu0 %v3127_v1  ;;  %2902 = vmatprep.subr.bf16.mxu1 %v3127_v1 }
  0x2b   : > { %1004 = vmatpush1.bf16.msra.mxu0 %v2943_v12  ;;  %2918 = vmatpush1.bf16.msra.mxu1 %v2943_v12  ;;  %v3039_v12 = vld [vmem:[%s3185_s28 + $0x2a0] ss:$8 sps:$4 sm:$0xff]  }
  0x2c   : > { %1005 = vmatprep.subr.bf16.mxu0 %v3127_v1  ;;  %2903 = vmatprep.subr.bf16.mxu1 %v3127_v1 }
  0x2f   : > { %1006 = vmatpush1.bf16.msra.mxu0 %v2944_v13  ;;  %2919 = vmatpush1.bf16.msra.mxu1 %v2944_v13  ;;  %v3040_v13 = vld [vmem:[%s3185_s28 + $0xf4] ss:$8 sps:$4 sm:$0xff]  }
  0x30   : > { %1007 = vmatprep.subr.bf16.mxu0 %v3127_v1  ;;  %2904 = vmatprep.subr.bf16.mxu1 %v3127_v1 }
  0x33   : > { %1008 = vmatpush1.bf16.msra.mxu0 %v2945_v14  ;;  %2920 = vmatpush1.bf16.msra.mxu1 %v2945_v14  ;;  %v3042_v14 = vld [vmem:[%s3185_s28 + $0x2b4] ss:$8 sps:$4 sm:$0xff]  }
  0x34   : > { %1009 = vmatprep.subr.bf16.mxu0 %v3127_v1  ;;  %2905 = vmatprep.subr.bf16.mxu1 %v3127_v1 }
  0x37   : > { %1010 = vmatpush1.bf16.msra.mxu0 %v2946_v15  ;;  %2921 = vmatpush1.bf16.msra.mxu1 %v2946_v15  ;;  %v3044_v15 = vld [vmem:[%s3185_s28 + $0xf0] ss:$8 sps:$4 sm:$0xff]  }
  0x38   : > { %1011 = vmatprep.subr.bf16.mxu0 %v3127_v1  ;;  %2906 = vmatprep.subr.bf16.mxu1 %v3127_v1 }
  0x3b   : > { %1012 = vmatpush1.bf16.msra.mxu0 %v2947_v16  ;;  %2922 = vmatpush1.bf16.msra.mxu1 %v2947_v16  ;;  %v3045_v16 = vld [vmem:[%s3185_s28 + $0x2b0] ss:$8 sps:$4 sm:$0xff]  }
  0x3c   : > { %1013 = vmatprep.subr.bf16.mxu0 %v3127_v1  ;;  %2907 = vmatprep.subr.bf16.mxu1 %v3127_v1 }
  0x3f   : > { %1014 = vmatpush1.bf16.msra.mxu0 %v2948_v17  ;;  %2923 = vmatpush1.bf16.msra.mxu1 %v2948_v17  ;;  %v3046_v17 = vld [vmem:[%s3185_s28 + $0x104] ss:$8 sps:$4 sm:$0xff]  }
  0x40   : > { %1015 = vmatprep.subr.bf16.mxu0 %v3127_v1  ;;  %2908 = vmatprep.subr.bf16.mxu1 %v3127_v1  ;;  %v3022_v1 = vld [vmem:[%s3185_s28 + $0xc4] ss:$8 sps:$4 sm:$0xff]  }
  0x43   : > { %1016 = vmatpush1.bf16.msra.mxu0 %v2949_v18  ;;  %2924 = vmatpush1.bf16.msra.mxu1 %v2949_v18  ;;  %v3048_v18 = vld [vmem:[%s3185_s28 + $0x2c4] ss:$8 sps:$4 sm:$0xff]  }
  0x46   : > { %1018 = vmatmul.mubr.bf16.vlgmr.msra.gmra.mrb[0].mxu0 %v2950_v19  ;;  %1242 = vmatmul.mubr.bf16.vlgmr.msra.gmra.mrb[0].mxu1 %v2953_v20  ;;  %v3050_v19 = vld [vmem:[%s3185_s28 + $0x100] ss:$8 sps:$4 sm:$0xff]  }
  0x47   : > { %1025 = vmatprep.mubr.bf16.mxu0 %v2956_v21  ;;  %1249 = vmatprep.mubr.bf16.mxu1 %v2958_v22  ;;  %v3051_v20 = vld [vmem:[%s3185_s28 + $0x2c0] ss:$8 sps:$4 sm:$0xff]   ;;  %v3052_v21 = vld [vmem:[%s3185_s28 + $0x114] ss:$8 sps:$4 sm:$0xff]  }
  0x48   : > { %v3054_v22 = vld [vmem:[%s3185_s28 + $0x2d4] ss:$8 sps:$4 sm:$0xff]  }
  0x4e   : > { %1026 = vmatmul.mubr.bf16.gmra.mrb[4].mxu0 %v2960_v23  ;;  %1250 = vmatmul.mubr.bf16.gmra.mrb[4].mxu1 %v2961_v24  ;;  %v3056_v23 = vld [vmem:[%s3185_s28 + $0x110] ss:$8 sps:$4 sm:$0xff]  }
  0x4f   : > { %1033 = vmatprep.mubr.bf16.mxu0 %v2962_v25  ;;  %1257 = vmatprep.mubr.bf16.mxu1 %v2964_v26  ;;  %v3057_v24 = vld [vmem:[%s3185_s28 + $0x2d0] ss:$8 sps:$4 sm:$0xff]   ;;  %v3058_v25 = vld [vmem:[%s3185_s28 + $0x124] ss:$8 sps:$4 sm:$0xff]  }
  0x50   : > { %v3060_v26 = vld [vmem:[%s3185_s28 + $0x2e4] ss:$8 sps:$4 sm:$0xff]  }
  0x56   : > { %1034 = vmatmul.mubr.bf16.gmra.mrb[8].mxu0 %v2966_v27  ;;  %1258 = vmatmul.mubr.bf16.gmra.mrb[8].mxu1 %v2967_v28  ;;  %v3062_v27 = vld [vmem:[%s3185_s28 + $0x120] ss:$8 sps:$4 sm:$0xff]  }
  0x57   : > { %1041 = vmatprep.mubr.bf16.mxu0 %v2968_v29  ;;  %1265 = vmatprep.mubr.bf16.mxu1 %v2970_v30  ;;  %v3063_v28 = vld [vmem:[%s3185_s28 + $0x2e0] ss:$8 sps:$4 sm:$0xff]   ;;  %v3064_v29 = vld [vmem:[%s3185_s28 + $0x134] ss:$8 sps:$4 sm:$0xff]  }
  0x58   : > { %v3066_v30 = vld [vmem:[%s3185_s28 + $0x2f4] ss:$8 sps:$4 sm:$0xff]  }
  0x5e   : > { %1042 = vmatmul.mubr.bf16.gmra.mrb[12].mxu0 %v2972_v31  ;;  %1266 = vmatmul.mubr.bf16.gmra.mrb[12].mxu1 %v2973_v32  ;;  %v3068_v31 = vld [vmem:[%s3185_s28 + $0x130] ss:$8 sps:$4 sm:$0xff]  }
  0x5f   : > { %1049 = vmatprep.mubr.bf16.mxu0 %v2974_v33  ;;  %1273 = vmatprep.mubr.bf16.mxu1 %v2976_v34  ;;  %v3069_v32 = vld [vmem:[%s3185_s28 + $0x2f0] ss:$8 sps:$4 sm:$0xff]   ;;  %v3070_v33 = vld [vmem:[%s3185_s28 + $0x144] ss:$8 sps:$4 sm:$0xff]  }
  0x60   : > { %v3072_v34 = vld [vmem:[%s3185_s28 + $0x304] ss:$8 sps:$4 sm:$0xff]  }
  0x66   : > { %1050 = vmatmul.mubr.bf16.gmra.mrb[16].mxu0 %v2978_v35  ;;  %1274 = vmatmul.mubr.bf16.gmra.mrb[16].mxu1 %v2979_v36  ;;  %v3074_v35 = vld [vmem:[%s3185_s28 + $0x140] ss:$8 sps:$4 sm:$0xff]  }
  0x67   : > { %1057 = vmatprep.mubr.bf16.mxu0 %v2980_v37  ;;  %1281 = vmatprep.mubr.bf16.mxu1 %v2982_v38  ;;  %v3075_v36 = vld [vmem:[%s3185_s28 + $0x300] ss:$8 sps:$4 sm:$0xff]   ;;  %v3076_v37 = vld [vmem:[%s3185_s28 + $0x154] ss:$8 sps:$4 sm:$0xff]  }
  0x68   : > { %v3078_v38 = vld [vmem:[%s3185_s28 + $0x314] ss:$8 sps:$4 sm:$0xff]  }
  0x6e   : > { %1058 = vmatmul.mubr.bf16.gmra.mrb[20].mxu0 %v2984_v39  ;;  %1282 = vmatmul.mubr.bf16.gmra.mrb[20].mxu1 %v2985_v40  ;;  %v3080_v39 = vld [vmem:[%s3185_s28 + $0x150] ss:$8 sps:$4 sm:$0xff]  }
  0x6f   : > { %1065 = vmatprep.mubr.bf16.mxu0 %v2986_v41  ;;  %1289 = vmatprep.mubr.bf16.mxu1 %v2988_v42  ;;  %v3081_v40 = vld [vmem:[%s3185_s28 + $0x310] ss:$8 sps:$4 sm:$0xff]   ;;  %v3082_v41 = vld [vmem:[%s3185_s28 + $0x164] ss:$8 sps:$4 sm:$0xff]  }
  0x70   : > { %v3084_v42 = vld [vmem:[%s3185_s28 + $0x324] ss:$8 sps:$4 sm:$0xff]  }
  0x76   : > { %1066 = vmatmul.mubr.bf16.gmra.mrb[24].mxu0 %v2990_v43  ;;  %1290 = vmatmul.mubr.bf16.gmra.mrb[24].mxu1 %v2991_v44  ;;  %v3086_v43 = vld [vmem:[%s3185_s28 + $0x160] ss:$8 sps:$4 sm:$0xff]  }
  0x77   : > { %1073 = vmatprep.mubr.bf16.mxu0 %v2992_v45  ;;  %1297 = vmatprep.mubr.bf16.mxu1 %v2994_v46  ;;  %v3087_v44 = vld [vmem:[%s3185_s28 + $0x320] ss:$8 sps:$4 sm:$0xff]   ;;  %v3088_v45 = vld [vmem:[%s3185_s28 + $0x174] ss:$8 sps:$4 sm:$0xff]  }
  0x78   : > { %v3090_v46 = vld [vmem:[%s3185_s28 + $0x334] ss:$8 sps:$4 sm:$0xff]  }
  0x7e   : > { %1074 = vmatmul.mubr.bf16.gmra.mrb[28].mxu0 %v2996_v47  ;;  %1298 = vmatmul.mubr.bf16.gmra.mrb[28].mxu1 %v2997_v48  ;;  %v3092_v47 = vld [vmem:[%s3185_s28 + $0x170] ss:$8 sps:$4 sm:$0xff]  }
  0x7f   : > { %1081 = vmatprep.mubr.bf16.mxu0 %v2998_v49  ;;  %1305 = vmatprep.mubr.bf16.mxu1 %v3000_v50  ;;  %v3093_v48 = vld [vmem:[%s3185_s28 + $0x330] ss:$8 sps:$4 sm:$0xff]   ;;  %v3094_v49 = vld [vmem:[%s3185_s28 + $0x184] ss:$8 sps:$4 sm:$0xff]  }
  0x80   : > { %v3096_v50 = vld [vmem:[%s3185_s28 + $0x344] ss:$8 sps:$4 sm:$0xff]  }
  0x86   : > { %1082 = vmatmul.mubr.bf16.gmra.mrb[32].mxu0 %v3002_v51  ;;  %1306 = vmatmul.mubr.bf16.gmra.mrb[32].mxu1 %v3003_v52  ;;  %v3098_v51 = vld [vmem:[%s3185_s28 + $0x180] ss:$8 sps:$4 sm:$0xff]  }
  0x87   : > { %1089 = vmatprep.mubr.bf16.mxu0 %v3004_v53  ;;  %1313 = vmatprep.mubr.bf16.mxu1 %v3006_v54  ;;  %v3099_v52 = vld [vmem:[%s3185_s28 + $0x340] ss:$8 sps:$4 sm:$0xff]   ;;  %v3100_v53 = vld [vmem:[%s3185_s28 + $0x194] ss:$8 sps:$4 sm:$0xff]  }
  0x88   : > { %v3102_v54 = vld [vmem:[%s3185_s28 + $0x354] ss:$8 sps:$4 sm:$0xff]  }
  0x8e   : > { %1090 = vmatmul.mubr.bf16.gmra.mrb[36].mxu0 %v3008_v55  ;;  %1314 = vmatmul.mubr.bf16.gmra.mrb[36].mxu1 %v3009_v56  ;;  %v3104_v55 = vld [vmem:[%s3185_s28 + $0x190] ss:$8 sps:$4 sm:$0xff]  }
  0x8f   : > { %1097 = vmatprep.mubr.bf16.mxu0 %v3010_v57  ;;  %1321 = vmatprep.mubr.bf16.mxu1 %v3012_v58  ;;  %v3105_v56 = vld [vmem:[%s3185_s28 + $0x350] ss:$8 sps:$4 sm:$0xff]   ;;  %v3106_v57 = vld [vmem:[%s3185_s28 + $0x1a4] ss:$8 sps:$4 sm:$0xff]  }
  0x90   : > { %v3108_v58 = vld [vmem:[%s3185_s28 + $0x364] ss:$8 sps:$4 sm:$0xff]  }
  0x96   : > { %1098 = vmatmul.mubr.bf16.gmra.mrb[40].mxu0 %v3014_v59  ;;  %1322 = vmatmul.mubr.bf16.gmra.mrb[40].mxu1 %v3015_v60  ;;  %v3110_v59 = vld [vmem:[%s3185_s28 + $0x1a0] ss:$8 sps:$4 sm:$0xff]  }
  0x97   : > { %1105 = vmatprep.mubr.bf16.mxu0 %v3016_v61  ;;  %1329 = vmatprep.mubr.bf16.mxu1 %v3018_v62  ;;  %v3111_v60 = vld [vmem:[%s3185_s28 + $0x360] ss:$8 sps:$4 sm:$0xff]   ;;  %v3112_v61 = vld [vmem:[%s3185_s28 + $0x1b4] ss:$8 sps:$4 sm:$0xff]  }
  0x98   : > { %v3114_v62 = vld [vmem:[%s3185_s28 + $0x374] ss:$8 sps:$4 sm:$0xff]  }
  0x9e   : > { %1106 = vmatmul.mubr.bf16.gmra.mrb[44].mxu0 %v3020_v63  ;;  %1330 = vmatmul.mubr.bf16.gmra.mrb[44].mxu1 %v3021_v0  ;;  %v3357_v63 = vld [vmem:[%s3532_s2] ss:$0 sm:$0xff] }
  0x9f   : > { %1113 = vmatprep.mubr.bf16.mxu0 %v3022_v1  ;;  %1337 = vmatprep.mubr.bf16.mxu1 %v3024_v2 }
  0xa6   : > { %1114 = vmatmul.mubr.bf16.gmra.mrb[48].mxu0 %v3026_v3  ;;  %1338 = vmatmul.mubr.bf16.gmra.mrb[48].mxu1 %v3027_v4 }
  0xa7   : > { %1121 = vmatprep.mubr.bf16.mxu0 %v3028_v5  ;;  %1345 = vmatprep.mubr.bf16.mxu1 %v3030_v6  ;;  %v3116_v6 = vld [vmem:[%s3185_s28 + $0x1b0] ss:$8 sps:$4 sm:$0xff]  }
  0xae   : > { %1122 = vmatmul.mubr.bf16.gmra.mrb[52].mxu0 %v3032_v7  ;;  %1346 = vmatmul.mubr.bf16.gmra.mrb[52].mxu1 %v3033_v8  ;;  %v3117_v7 = vld [vmem:[%s3185_s28 + $0x370] ss:$8 sps:$4 sm:$0xff]  }
  0xaf   : > { %1129 = vmatprep.mubr.bf16.mxu0 %v3034_v9  ;;  %1353 = vmatprep.mubr.bf16.mxu1 %v3036_v10 }
  0xb6   : > { %1130 = vmatmul.mubr.bf16.gmra.mrb[56].mxu0 %v3038_v11  ;;  %1354 = vmatmul.mubr.bf16.gmra.mrb[56].mxu1 %v3039_v12 }
  0xb7   : > { %1137 = vmatprep.mubr.bf16.mxu0 %v3040_v13  ;;  %1361 = vmatprep.mubr.bf16.mxu1 %v3042_v14 }
  0xbe   : > { %1138 = vmatmul.mubr.bf16.gmra.mrb[60].mxu0 %v3044_v15  ;;  %1362 = vmatmul.mubr.bf16.gmra.mrb[60].mxu1 %v3045_v16 }
  0xbf   : > { %1145 = vmatprep.mubr.bf16.mxu0 %v3046_v17  ;;  %1369 = vmatprep.mubr.bf16.mxu1 %v3048_v18 }
  0xc6   : > { %1146 = vmatmul.mubr.bf16.gmra.mrb[64].mxu0 %v3050_v19  ;;  %1370 = vmatmul.mubr.bf16.gmra.mrb[64].mxu1 %v3051_v20 }
  0xc7   : > { %1153 = vmatprep.mubr.bf16.mxu0 %v3052_v21  ;;  %1377 = vmatprep.mubr.bf16.mxu1 %v3054_v22 }
  0xce   : > { %1154 = vmatmul.mubr.bf16.gmra.mrb[68].mxu0 %v3056_v23  ;;  %1378 = vmatmul.mubr.bf16.gmra.mrb[68].mxu1 %v3057_v24 }
  0xcf   : > { %1161 = vmatprep.mubr.bf16.mxu0 %v3058_v25  ;;  %1385 = vmatprep.mubr.bf16.mxu1 %v3060_v26 }
  0xd6   : > { %1162 = vmatmul.mubr.bf16.gmra.mrb[72].mxu0 %v3062_v27  ;;  %1386 = vmatmul.mubr.bf16.gmra.mrb[72].mxu1 %v3063_v28 }
  0xd7   : > { %1169 = vmatprep.mubr.bf16.mxu0 %v3064_v29  ;;  %1393 = vmatprep.mubr.bf16.mxu1 %v3066_v30 }
  0xde   : > { %1170 = vmatmul.mubr.bf16.gmra.mrb[76].mxu0 %v3068_v31  ;;  %1394 = vmatmul.mubr.bf16.gmra.mrb[76].mxu1 %v3069_v32 }
  0xdf   : > { %1177 = vmatprep.mubr.bf16.mxu0 %v3070_v33  ;;  %1401 = vmatprep.mubr.bf16.mxu1 %v3072_v34 }
  0xe6   : > { %1178 = vmatmul.mubr.bf16.gmra.mrb[80].mxu0 %v3074_v35  ;;  %1402 = vmatmul.mubr.bf16.gmra.mrb[80].mxu1 %v3075_v36 }
  0xe7   : > { %1185 = vmatprep.mubr.bf16.mxu0 %v3076_v37  ;;  %1409 = vmatprep.mubr.bf16.mxu1 %v3078_v38 }
  0xee   : > { %1186 = vmatmul.mubr.bf16.gmra.mrb[84].mxu0 %v3080_v39  ;;  %1410 = vmatmul.mubr.bf16.gmra.mrb[84].mxu1 %v3081_v40 }
  0xef   : > { %1193 = vmatprep.mubr.bf16.mxu0 %v3082_v41  ;;  %1417 = vmatprep.mubr.bf16.mxu1 %v3084_v42 }
  0xf6   : > { %1194 = vmatmul.mubr.bf16.gmra.mrb[88].mxu0 %v3086_v43  ;;  %1418 = vmatmul.mubr.bf16.gmra.mrb[88].mxu1 %v3087_v44 }
  0xf7   : > { %1201 = vmatprep.mubr.bf16.mxu0 %v3088_v45  ;;  %1425 = vmatprep.mubr.bf16.mxu1 %v3090_v46 }
  0xfe   : > { %1202 = vmatmul.mubr.bf16.gmra.mrb[92].mxu0 %v3092_v47  ;;  %1426 = vmatmul.mubr.bf16.gmra.mrb[92].mxu1 %v3093_v48 }
  0xff   : > { %1209 = vmatprep.mubr.bf16.mxu0 %v3094_v49  ;;  %1433 = vmatprep.mubr.bf16.mxu1 %v3096_v50 }
 0x106   : > { %1210 = vmatmul.mubr.bf16.gmra.mrb[96].mxu0 %v3098_v51  ;;  %1434 = vmatmul.mubr.bf16.gmra.mrb[96].mxu1 %v3099_v52 }
 0x107   : > { %1217 = vmatprep.mubr.bf16.mxu0 %v3100_v53  ;;  %1441 = vmatprep.mubr.bf16.mxu1 %v3102_v54 }
 0x10e   : > { %1218 = vmatmul.mubr.bf16.gmra.mrb[100].mxu0 %v3104_v55  ;;  %1442 = vmatmul.mubr.bf16.gmra.mrb[100].mxu1 %v3105_v56 }
 0x10f   : > { %1225 = vmatprep.mubr.bf16.mxu0 %v3106_v57  ;;  %1449 = vmatprep.mubr.bf16.mxu1 %v3108_v58 }
 0x116   : > { %1226 = vmatmul.mubr.bf16.gmra.mrb[104].mxu0 %v3110_v59  ;;  %1450 = vmatmul.mubr.bf16.gmra.mrb[104].mxu1 %v3111_v60 }
 0x117   : > { %1233 = vmatprep.mubr.bf16.mxu0 %v3112_v61  ;;  %1457 = vmatprep.mubr.bf16.mxu1 %v3114_v62 }
 0x119   : > { %v1019_v0 = vpop.f32.mrb[0].mxu0  ;;  %v1243_v1 = vpop.f32.mrb[0].mxu1 }
 0x11a   : > { %v1020_v2 = vadd.f32 %v3357_v63, %v1019_v0  ;;  %v1244_v3 = vadd.f32 %v3357_v63, %v1243_v1  ;;  %v1021_v4 = vpop.f32.mrb[1].mxu0  ;;  %v1245_v5 = vpop.f32.mrb[1].mxu1 }
 0x11b   : > { %v1022_v8 = vpop.f32.mrb[2].mxu0  ;;  %v1246_v9 = vpop.f32.mrb[2].mxu1 }
 0x11c   : > { %v1023_v10 = vadd.f32 %v3357_v63, %v1022_v8  ;;  %v1247_v11 = vadd.f32 %v3357_v63, %v1246_v9  ;;  %v1024_v12 = vpop.f32.mrb[3].mxu0  ;;  %v1248_v13 = vpop.f32.mrb[3].mxu1  ;;  %v1466_v14 = vmax.f32 %v1020_v2, 0.0  ;;  %v1522_v15 = vmax.f32 %v1244_v3, 0.0 }
 0x11e   : > { %v1467_v16 = vmax.f32 %v1023_v10, 0.0  ;;  %v1523_v17 = vmax.f32 %v1247_v11, 0.0  ;;  %1234 = vmatmul.mubr.bf16.gmra.mrb[108].mxu0 %v3116_v6  ;;  %1458 = vmatmul.mubr.bf16.gmra.mrb[108].mxu1 %v3117_v7 }
 0x120   : > { %v2561_v18 = vpack.c.bf16 %v1467_v16, %v1466_v14  ;;  %v2701_v19 = vpack.c.bf16 %v1523_v17, %v1522_v15 }
 0x121   : > { %v1027_v20 = vpop.f32.mrb[4].mxu0  ;;  %v1251_v21 = vpop.f32.mrb[4].mxu1 }
 0x122   : > { %2562 = vst [vmem:[%s3369_s5] sm:$0xff] %v2561_v18   ;;  %2865 = vst [vmem:[%s3369_s5 + $0xe0] sm:$0xff] %v2701_v19   ;;  %v1028_v22 = vadd.f32 %v3357_v63, %v1027_v20  ;;  %v1252_v23 = vadd.f32 %v3357_v63, %v1251_v21  ;;  %v1029_v24 = vpop.f32.mrb[5].mxu0  ;;  %v1253_v25 = vpop.f32.mrb[5].mxu1 }
 0x123   : > { %v1030_v26 = vpop.f32.mrb[6].mxu0  ;;  %v1254_v27 = vpop.f32.mrb[6].mxu1 }
 0x124   : > { %v1031_v28 = vadd.f32 %v3357_v63, %v1030_v26  ;;  %v1255_v29 = vadd.f32 %v3357_v63, %v1254_v27  ;;  %v1032_v30 = vpop.f32.mrb[7].mxu0  ;;  %v1256_v31 = vpop.f32.mrb[7].mxu1  ;;  %v1468_v32 = vmax.f32 %v1028_v22, 0.0  ;;  %v1524_v33 = vmax.f32 %v1252_v23, 0.0 }
 0x126   : > { %v1469_v34 = vmax.f32 %v1031_v28, 0.0  ;;  %v1525_v35 = vmax.f32 %v1255_v29, 0.0 }
 0x128   : > { %v2566_v36 = vpack.c.bf16 %v1469_v34, %v1468_v32  ;;  %v2706_v37 = vpack.c.bf16 %v1525_v35, %v1524_v33 }
 0x129   : > { %v1035_v38 = vpop.f32.mrb[8].mxu0  ;;  %v1259_v39 = vpop.f32.mrb[8].mxu1 }
 0x12a   : > { %2838 = vst [vmem:[%s3369_s5 + $0x8] sm:$0xff] %v2566_v36   ;;  %2866 = vst [vmem:[%s3369_s5 + $0xe8] sm:$0xff] %v2706_v37   ;;  %v1036_v40 = vadd.f32 %v3357_v63, %v1035_v38  ;;  %v1260_v41 = vadd.f32 %v3357_v63, %v1259_v39  ;;  %v1037_v42 = vpop.f32.mrb[9].mxu0  ;;  %v1261_v43 = vpop.f32.mrb[9].mxu1 }
 0x12b   : > { %v1038_v44 = vpop.f32.mrb[10].mxu0  ;;  %v1262_v45 = vpop.f32.mrb[10].mxu1 }
 0x12c   : > { %v1039_v46 = vadd.f32 %v3357_v63, %v1038_v44  ;;  %v1263_v47 = vadd.f32 %v3357_v63, %v1262_v45  ;;  %v1040_v48 = vpop.f32.mrb[11].mxu0  ;;  %v1264_v49 = vpop.f32.mrb[11].mxu1  ;;  %v1470_v50 = vmax.f32 %v1036_v40, 0.0  ;;  %v1526_v51 = vmax.f32 %v1260_v41, 0.0 }
 0x12e   : > { %v1471_v52 = vmax.f32 %v1039_v46, 0.0  ;;  %v1527_v53 = vmax.f32 %v1263_v47, 0.0 }
 0x130   : > { %v2571_v54 = vpack.c.bf16 %v1471_v52, %v1470_v50  ;;  %v2711_v55 = vpack.c.bf16 %v1527_v53, %v1526_v51 }
 0x131   : > { %v1043_v56 = vpop.f32.mrb[12].mxu0  ;;  %v1267_v57 = vpop.f32.mrb[12].mxu1 }
 0x132   : > { %2839 = vst [vmem:[%s3369_s5 + $0x10] sm:$0xff] %v2571_v54   ;;  %2867 = vst [vmem:[%s3369_s5 + $0xf0] sm:$0xff] %v2711_v55   ;;  %v1044_v58 = vadd.f32 %v3357_v63, %v1043_v56  ;;  %v1268_v59 = vadd.f32 %v3357_v63, %v1267_v57  ;;  %v1045_v60 = vpop.f32.mrb[13].mxu0  ;;  %v1269_v61 = vpop.f32.mrb[13].mxu1 }
 0x133   : > { %v1046_v62 = vpop.f32.mrb[14].mxu0  ;;  %v1270_v0 = vpop.f32.mrb[14].mxu1 }
 0x134   : > { %v1047_v1 = vadd.f32 %v3357_v63, %v1046_v62  ;;  %v1271_v2 = vadd.f32 %v3357_v63, %v1270_v0  ;;  %v1048_v3 = vpop.f32.mrb[15].mxu0  ;;  %v1272_v4 = vpop.f32.mrb[15].mxu1  ;;  %v1472_v5 = vmax.f32 %v1044_v58, 0.0  ;;  %v1528_v6 = vmax.f32 %v1268_v59, 0.0 }
 0x136   : > { %v1473_v7 = vmax.f32 %v1047_v1, 0.0  ;;  %v1529_v8 = vmax.f32 %v1271_v2, 0.0 }
 0x138   : > { %v2576_v9 = vpack.c.bf16 %v1473_v7, %v1472_v5  ;;  %v2716_v10 = vpack.c.bf16 %v1529_v8, %v1528_v6 }
 0x139   : > { %v1051_v11 = vpop.f32.mrb[16].mxu0  ;;  %v1275_v12 = vpop.f32.mrb[16].mxu1 }
 0x13a   : > { %2840 = vst [vmem:[%s3369_s5 + $0x18] sm:$0xff] %v2576_v9   ;;  %2868 = vst [vmem:[%s3369_s5 + $0xf8] sm:$0xff] %v2716_v10   ;;  %v1052_v13 = vadd.f32 %v3357_v63, %v1051_v11  ;;  %v1276_v14 = vadd.f32 %v3357_v63, %v1275_v12  ;;  %v1053_v15 = vpop.f32.mrb[17].mxu0  ;;  %v1277_v16 = vpop.f32.mrb[17].mxu1 }
 0x13b   : > { %v1054_v17 = vpop.f32.mrb[18].mxu0  ;;  %v1278_v18 = vpop.f32.mrb[18].mxu1 }
 0x13c   : > { %v1055_v19 = vadd.f32 %v3357_v63, %v1054_v17  ;;  %v1279_v20 = vadd.f32 %v3357_v63, %v1278_v18  ;;  %v1056_v21 = vpop.f32.mrb[19].mxu0  ;;  %v1280_v22 = vpop.f32.mrb[19].mxu1  ;;  %v1474_v23 = vmax.f32 %v1052_v13, 0.0  ;;  %v1530_v24 = vmax.f32 %v1276_v14, 0.0 }
 0x13e   : > { %v1475_v25 = vmax.f32 %v1055_v19, 0.0  ;;  %v1531_v26 = vmax.f32 %v1279_v20, 0.0 }
 0x140   : > { %v2581_v27 = vpack.c.bf16 %v1475_v25, %v1474_v23  ;;  %v2721_v28 = vpack.c.bf16 %v1531_v26, %v1530_v24 }
 0x141   : > { %v1059_v29 = vpop.f32.mrb[20].mxu0  ;;  %v1283_v30 = vpop.f32.mrb[20].mxu1 }
 0x142   : > { %2841 = vst [vmem:[%s3369_s5 + $0x20] sm:$0xff] %v2581_v27   ;;  %2869 = vst [vmem:[%s3369_s5 + $0x100] sm:$0xff] %v2721_v28   ;;  %v1060_v31 = vadd.f32 %v3357_v63, %v1059_v29  ;;  %v1284_v32 = vadd.f32 %v3357_v63, %v1283_v30  ;;  %v1061_v33 = vpop.f32.mrb[21].mxu0  ;;  %v1285_v34 = vpop.f32.mrb[21].mxu1 }
 0x143   : > { %v1062_v35 = vpop.f32.mrb[22].mxu0  ;;  %v1286_v36 = vpop.f32.mrb[22].mxu1 }
 0x144   : > { %v1063_v37 = vadd.f32 %v3357_v63, %v1062_v35  ;;  %v1287_v38 = vadd.f32 %v3357_v63, %v1286_v36  ;;  %v1064_v39 = vpop.f32.mrb[23].mxu0  ;;  %v1288_v40 = vpop.f32.mrb[23].mxu1  ;;  %v1476_v41 = vmax.f32 %v1060_v31, 0.0  ;;  %v1532_v42 = vmax.f32 %v1284_v32, 0.0 }
 0x146   : > { %v1477_v43 = vmax.f32 %v1063_v37, 0.0  ;;  %v1533_v44 = vmax.f32 %v1287_v38, 0.0 }
 0x148   : > { %v2586_v45 = vpack.c.bf16 %v1477_v43, %v1476_v41  ;;  %v2726_v46 = vpack.c.bf16 %v1533_v44, %v1532_v42 }
 0x149   : > { %v1067_v47 = vpop.f32.mrb[24].mxu0  ;;  %v1291_v48 = vpop.f32.mrb[24].mxu1 }
 0x14a   : > { %2842 = vst [vmem:[%s3369_s5 + $0x28] sm:$0xff] %v2586_v45   ;;  %2870 = vst [vmem:[%s3369_s5 + $0x108] sm:$0xff] %v2726_v46   ;;  %v1068_v49 = vadd.f32 %v3357_v63, %v1067_v47  ;;  %v1292_v50 = vadd.f32 %v3357_v63, %v1291_v48  ;;  %v1069_v51 = vpop.f32.mrb[25].mxu0  ;;  %v1293_v52 = vpop.f32.mrb[25].mxu1 }
 0x14b   : > { %v1070_v53 = vpop.f32.mrb[26].mxu0  ;;  %v1294_v54 = vpop.f32.mrb[26].mxu1 }
 0x14c   : > { %v1071_v55 = vadd.f32 %v3357_v63, %v1070_v53  ;;  %v1295_v56 = vadd.f32 %v3357_v63, %v1294_v54  ;;  %v1072_v57 = vpop.f32.mrb[27].mxu0  ;;  %v1296_v58 = vpop.f32.mrb[27].mxu1  ;;  %v1478_v59 = vmax.f32 %v1068_v49, 0.0  ;;  %v1534_v60 = vmax.f32 %v1292_v50, 0.0 }
 0x14e   : > { %v1479_v61 = vmax.f32 %v1071_v55, 0.0  ;;  %v1535_v62 = vmax.f32 %v1295_v56, 0.0 }
 0x150   : > { %v2591_v0 = vpack.c.bf16 %v1479_v61, %v1478_v59  ;;  %v2731_v1 = vpack.c.bf16 %v1535_v62, %v1534_v60 }
 0x151   : > { %v1075_v2 = vpop.f32.mrb[28].mxu0  ;;  %v1299_v3 = vpop.f32.mrb[28].mxu1 }
 0x152   : > { %2843 = vst [vmem:[%s3369_s5 + $0x30] sm:$0xff] %v2591_v0   ;;  %2871 = vst [vmem:[%s3369_s5 + $0x110] sm:$0xff] %v2731_v1   ;;  %v1076_v4 = vadd.f32 %v3357_v63, %v1075_v2  ;;  %v1300_v5 = vadd.f32 %v3357_v63, %v1299_v3  ;;  %v1077_v6 = vpop.f32.mrb[29].mxu0  ;;  %v1301_v7 = vpop.f32.mrb[29].mxu1 }
 0x153   : > { %v1078_v8 = vpop.f32.mrb[30].mxu0  ;;  %v1302_v9 = vpop.f32.mrb[30].mxu1 }
 0x154   : > { %v1079_v10 = vadd.f32 %v3357_v63, %v1078_v8  ;;  %v1303_v11 = vadd.f32 %v3357_v63, %v1302_v9  ;;  %v1080_v12 = vpop.f32.mrb[31].mxu0  ;;  %v1304_v13 = vpop.f32.mrb[31].mxu1  ;;  %v1480_v14 = vmax.f32 %v1076_v4, 0.0  ;;  %v1536_v15 = vmax.f32 %v1300_v5, 0.0 }
 0x156   : > { %v1481_v16 = vmax.f32 %v1079_v10, 0.0  ;;  %v1537_v17 = vmax.f32 %v1303_v11, 0.0 }
 0x158   : > { %v2596_v18 = vpack.c.bf16 %v1481_v16, %v1480_v14  ;;  %v2736_v19 = vpack.c.bf16 %v1537_v17, %v1536_v15 }
 0x159   : > { %v1083_v20 = vpop.f32.mrb[32].mxu0  ;;  %v1307_v21 = vpop.f32.mrb[32].mxu1 }
 0x15a   : > { %2844 = vst [vmem:[%s3369_s5 + $0x38] sm:$0xff] %v2596_v18   ;;  %2872 = vst [vmem:[%s3369_s5 + $0x118] sm:$0xff] %v2736_v19   ;;  %v1084_v22 = vadd.f32 %v3357_v63, %v1083_v20  ;;  %v1308_v23 = vadd.f32 %v3357_v63, %v1307_v21  ;;  %v1085_v24 = vpop.f32.mrb[33].mxu0  ;;  %v1309_v25 = vpop.f32.mrb[33].mxu1 }
 0x15b   : > { %v1086_v26 = vpop.f32.mrb[34].mxu0  ;;  %v1310_v27 = vpop.f32.mrb[34].mxu1 }
 0x15c   : > { %v1087_v28 = vadd.f32 %v3357_v63, %v1086_v26  ;;  %v1311_v29 = vadd.f32 %v3357_v63, %v1310_v27  ;;  %v1088_v30 = vpop.f32.mrb[35].mxu0  ;;  %v1312_v31 = vpop.f32.mrb[35].mxu1  ;;  %v1482_v32 = vmax.f32 %v1084_v22, 0.0  ;;  %v1538_v33 = vmax.f32 %v1308_v23, 0.0 }
 0x15e   : > { %v1483_v34 = vmax.f32 %v1087_v28, 0.0  ;;  %v1539_v35 = vmax.f32 %v1311_v29, 0.0 }
 0x160   : > { %v2601_v36 = vpack.c.bf16 %v1483_v34, %v1482_v32  ;;  %v2741_v37 = vpack.c.bf16 %v1539_v35, %v1538_v33 }
 0x161   : > { %v1091_v38 = vpop.f32.mrb[36].mxu0  ;;  %v1315_v39 = vpop.f32.mrb[36].mxu1 }
 0x162   : > { %2845 = vst [vmem:[%s3369_s5 + $0x40] sm:$0xff] %v2601_v36   ;;  %2873 = vst [vmem:[%s3369_s5 + $0x120] sm:$0xff] %v2741_v37   ;;  %v1092_v40 = vadd.f32 %v3357_v63, %v1091_v38  ;;  %v1316_v41 = vadd.f32 %v3357_v63, %v1315_v39  ;;  %v1093_v42 = vpop.f32.mrb[37].mxu0  ;;  %v1317_v43 = vpop.f32.mrb[37].mxu1 }
 0x163   : > { %v1094_v44 = vpop.f32.mrb[38].mxu0  ;;  %v1318_v45 = vpop.f32.mrb[38].mxu1 }
 0x164   : > { %v1095_v46 = vadd.f32 %v3357_v63, %v1094_v44  ;;  %v1319_v47 = vadd.f32 %v3357_v63, %v1318_v45  ;;  %v1096_v48 = vpop.f32.mrb[39].mxu0  ;;  %v1320_v49 = vpop.f32.mrb[39].mxu1  ;;  %v1484_v50 = vmax.f32 %v1092_v40, 0.0  ;;  %v1540_v51 = vmax.f32 %v1316_v41, 0.0 }
 0x166   : > { %v1485_v52 = vmax.f32 %v1095_v46, 0.0  ;;  %v1541_v53 = vmax.f32 %v1319_v47, 0.0 }
 0x168   : > { %v2606_v54 = vpack.c.bf16 %v1485_v52, %v1484_v50  ;;  %v2746_v55 = vpack.c.bf16 %v1541_v53, %v1540_v51 }
 0x169   : > { %v1099_v56 = vpop.f32.mrb[40].mxu0  ;;  %v1323_v57 = vpop.f32.mrb[40].mxu1 }
 0x16a   : > { %2846 = vst [vmem:[%s3369_s5 + $0x48] sm:$0xff] %v2606_v54   ;;  %2874 = vst [vmem:[%s3369_s5 + $0x128] sm:$0xff] %v2746_v55   ;;  %v1100_v58 = vadd.f32 %v3357_v63, %v1099_v56  ;;  %v1324_v59 = vadd.f32 %v3357_v63, %v1323_v57  ;;  %v1101_v60 = vpop.f32.mrb[41].mxu0  ;;  %v1325_v61 = vpop.f32.mrb[41].mxu1 }
 0x16b   : > { %v1102_v62 = vpop.f32.mrb[42].mxu0  ;;  %v1326_v0 = vpop.f32.mrb[42].mxu1 }
 0x16c   : > { %v1103_v1 = vadd.f32 %v3357_v63, %v1102_v62  ;;  %v1327_v2 = vadd.f32 %v3357_v63, %v1326_v0  ;;  %v1104_v3 = vpop.f32.mrb[43].mxu0  ;;  %v1328_v4 = vpop.f32.mrb[43].mxu1  ;;  %v1486_v5 = vmax.f32 %v1100_v58, 0.0  ;;  %v1542_v6 = vmax.f32 %v1324_v59, 0.0 }
 0x16e   : > { %v1487_v7 = vmax.f32 %v1103_v1, 0.0  ;;  %v1543_v8 = vmax.f32 %v1327_v2, 0.0 }
 0x170   : > { %v2611_v9 = vpack.c.bf16 %v1487_v7, %v1486_v5  ;;  %v2751_v10 = vpack.c.bf16 %v1543_v8, %v1542_v6 }
 0x171   : > { %v1107_v11 = vpop.f32.mrb[44].mxu0  ;;  %v1331_v12 = vpop.f32.mrb[44].mxu1 }
 0x172   : > { %2847 = vst [vmem:[%s3369_s5 + $0x50] sm:$0xff] %v2611_v9   ;;  %2875 = vst [vmem:[%s3369_s5 + $0x130] sm:$0xff] %v2751_v10   ;;  %v1108_v13 = vadd.f32 %v3357_v63, %v1107_v11  ;;  %v1332_v14 = vadd.f32 %v3357_v63, %v1331_v12  ;;  %v1109_v15 = vpop.f32.mrb[45].mxu0  ;;  %v1333_v16 = vpop.f32.mrb[45].mxu1 }
 0x173   : > { %v1110_v17 = vpop.f32.mrb[46].mxu0  ;;  %v1334_v18 = vpop.f32.mrb[46].mxu1 }
 0x174   : > { %v1111_v19 = vadd.f32 %v3357_v63, %v1110_v17  ;;  %v1335_v20 = vadd.f32 %v3357_v63, %v1334_v18  ;;  %v1112_v21 = vpop.f32.mrb[47].mxu0  ;;  %v1336_v22 = vpop.f32.mrb[47].mxu1  ;;  %v1488_v23 = vmax.f32 %v1108_v13, 0.0  ;;  %v1544_v24 = vmax.f32 %v1332_v14, 0.0 }
 0x176   : > { %v1489_v25 = vmax.f32 %v1111_v19, 0.0  ;;  %v1545_v26 = vmax.f32 %v1335_v20, 0.0 }
 0x178   : > { %v2616_v27 = vpack.c.bf16 %v1489_v25, %v1488_v23  ;;  %v2756_v28 = vpack.c.bf16 %v1545_v26, %v1544_v24 }
 0x179   : > { %v1115_v29 = vpop.f32.mrb[48].mxu0  ;;  %v1339_v30 = vpop.f32.mrb[48].mxu1 }
 0x17a   : > { %2848 = vst [vmem:[%s3369_s5 + $0x58] sm:$0xff] %v2616_v27   ;;  %2876 = vst [vmem:[%s3369_s5 + $0x138] sm:$0xff] %v2756_v28   ;;  %v1116_v31 = vadd.f32 %v3357_v63, %v1115_v29  ;;  %v1340_v32 = vadd.f32 %v3357_v63, %v1339_v30  ;;  %v1117_v33 = vpop.f32.mrb[49].mxu0  ;;  %v1341_v34 = vpop.f32.mrb[49].mxu1 }
 0x17b   : > { %v1118_v35 = vpop.f32.mrb[50].mxu0  ;;  %v1342_v36 = vpop.f32.mrb[50].mxu1 }
 0x17c   : > { %v1119_v37 = vadd.f32 %v3357_v63, %v1118_v35  ;;  %v1343_v38 = vadd.f32 %v3357_v63, %v1342_v36  ;;  %v1120_v39 = vpop.f32.mrb[51].mxu0  ;;  %v1344_v40 = vpop.f32.mrb[51].mxu1  ;;  %v1490_v41 = vmax.f32 %v1116_v31, 0.0  ;;  %v1546_v42 = vmax.f32 %v1340_v32, 0.0 }
 0x17e   : > { %v1491_v43 = vmax.f32 %v1119_v37, 0.0  ;;  %v1547_v44 = vmax.f32 %v1343_v38, 0.0 }
 0x180   : > { %v2621_v45 = vpack.c.bf16 %v1491_v43, %v1490_v41  ;;  %v2761_v46 = vpack.c.bf16 %v1547_v44, %v1546_v42 }
 0x181   : > { %v1123_v47 = vpop.f32.mrb[52].mxu0  ;;  %v1347_v48 = vpop.f32.mrb[52].mxu1 }
 0x182   : > { %2849 = vst [vmem:[%s3369_s5 + $0x60] sm:$0xff] %v2621_v45   ;;  %2877 = vst [vmem:[%s3369_s5 + $0x140] sm:$0xff] %v2761_v46   ;;  %v1124_v49 = vadd.f32 %v3357_v63, %v1123_v47  ;;  %v1348_v50 = vadd.f32 %v3357_v63, %v1347_v48  ;;  %v1125_v51 = vpop.f32.mrb[53].mxu0  ;;  %v1349_v52 = vpop.f32.mrb[53].mxu1 }
 0x183   : > { %v1126_v53 = vpop.f32.mrb[54].mxu0  ;;  %v1350_v54 = vpop.f32.mrb[54].mxu1 }
 0x184   : > { %v1127_v55 = vadd.f32 %v3357_v63, %v1126_v53  ;;  %v1351_v56 = vadd.f32 %v3357_v63, %v1350_v54  ;;  %v1128_v57 = vpop.f32.mrb[55].mxu0  ;;  %v1352_v58 = vpop.f32.mrb[55].mxu1  ;;  %v1492_v59 = vmax.f32 %v1124_v49, 0.0  ;;  %v1548_v60 = vmax.f32 %v1348_v50, 0.0 }
 0x186   : > { %v1493_v61 = vmax.f32 %v1127_v55, 0.0  ;;  %v1549_v62 = vmax.f32 %v1351_v56, 0.0 }
 0x188   : > { %v2626_v0 = vpack.c.bf16 %v1493_v61, %v1492_v59  ;;  %v2766_v1 = vpack.c.bf16 %v1549_v62, %v1548_v60 }
 0x189   : > { %v1131_v2 = vpop.f32.mrb[56].mxu0  ;;  %v1355_v3 = vpop.f32.mrb[56].mxu1 }
 0x18a   : > { %2850 = vst [vmem:[%s3369_s5 + $0x68] sm:$0xff] %v2626_v0   ;;  %2878 = vst [vmem:[%s3369_s5 + $0x148] sm:$0xff] %v2766_v1   ;;  %v1132_v4 = vadd.f32 %v3357_v63, %v1131_v2  ;;  %v1356_v5 = vadd.f32 %v3357_v63, %v1355_v3  ;;  %v1133_v6 = vpop.f32.mrb[57].mxu0  ;;  %v1357_v7 = vpop.f32.mrb[57].mxu1 }
 0x18b   : > { %v1134_v8 = vpop.f32.mrb[58].mxu0  ;;  %v1358_v9 = vpop.f32.mrb[58].mxu1 }
 0x18c   : > { %v1135_v10 = vadd.f32 %v3357_v63, %v1134_v8  ;;  %v1359_v11 = vadd.f32 %v3357_v63, %v1358_v9  ;;  %v1136_v12 = vpop.f32.mrb[59].mxu0  ;;  %v1360_v13 = vpop.f32.mrb[59].mxu1  ;;  %v1494_v14 = vmax.f32 %v1132_v4, 0.0  ;;  %v1550_v15 = vmax.f32 %v1356_v5, 0.0 }
 0x18e   : > { %v1495_v16 = vmax.f32 %v1135_v10, 0.0  ;;  %v1551_v17 = vmax.f32 %v1359_v11, 0.0 }
 0x190   : > { %v2631_v18 = vpack.c.bf16 %v1495_v16, %v1494_v14  ;;  %v2771_v19 = vpack.c.bf16 %v1551_v17, %v1550_v15 }
 0x191   : > { %v1139_v20 = vpop.f32.mrb[60].mxu0  ;;  %v1363_v21 = vpop.f32.mrb[60].mxu1 }
 0x192   : > { %2851 = vst [vmem:[%s3369_s5 + $0x70] sm:$0xff] %v2631_v18   ;;  %2879 = vst [vmem:[%s3369_s5 + $0x150] sm:$0xff] %v2771_v19   ;;  %v1140_v22 = vadd.f32 %v3357_v63, %v1139_v20  ;;  %v1364_v23 = vadd.f32 %v3357_v63, %v1363_v21  ;;  %v1141_v24 = vpop.f32.mrb[61].mxu0  ;;  %v1365_v25 = vpop.f32.mrb[61].mxu1 }
 0x193   : > { %v1142_v26 = vpop.f32.mrb[62].mxu0  ;;  %v1366_v27 = vpop.f32.mrb[62].mxu1 }
 0x194   : > { %v1143_v28 = vadd.f32 %v3357_v63, %v1142_v26  ;;  %v1367_v29 = vadd.f32 %v3357_v63, %v1366_v27  ;;  %v1144_v30 = vpop.f32.mrb[63].mxu0  ;;  %v1368_v31 = vpop.f32.mrb[63].mxu1  ;;  %v1496_v32 = vmax.f32 %v1140_v22, 0.0  ;;  %v1552_v33 = vmax.f32 %v1364_v23, 0.0 }
 0x196   : > { %v1497_v34 = vmax.f32 %v1143_v28, 0.0  ;;  %v1553_v35 = vmax.f32 %v1367_v29, 0.0 }
 0x198   : > { %v2636_v36 = vpack.c.bf16 %v1497_v34, %v1496_v32  ;;  %v2776_v37 = vpack.c.bf16 %v1553_v35, %v1552_v33 }
 0x199   : > { %v1147_v38 = vpop.f32.mrb[64].mxu0  ;;  %v1371_v39 = vpop.f32.mrb[64].mxu1 }
 0x19a   : > { %2852 = vst [vmem:[%s3369_s5 + $0x78] sm:$0xff] %v2636_v36   ;;  %2880 = vst [vmem:[%s3369_s5 + $0x158] sm:$0xff] %v2776_v37   ;;  %v1148_v40 = vadd.f32 %v3357_v63, %v1147_v38  ;;  %v1372_v41 = vadd.f32 %v3357_v63, %v1371_v39  ;;  %v1149_v42 = vpop.f32.mrb[65].mxu0  ;;  %v1373_v43 = vpop.f32.mrb[65].mxu1 }
 0x19b   : > { %v1150_v44 = vpop.f32.mrb[66].mxu0  ;;  %v1374_v45 = vpop.f32.mrb[66].mxu1 }
 0x19c   : > { %v1151_v46 = vadd.f32 %v3357_v63, %v1150_v44  ;;  %v1375_v47 = vadd.f32 %v3357_v63, %v1374_v45  ;;  %v1152_v48 = vpop.f32.mrb[67].mxu0  ;;  %v1376_v49 = vpop.f32.mrb[67].mxu1  ;;  %v1498_v50 = vmax.f32 %v1148_v40, 0.0  ;;  %v1554_v51 = vmax.f32 %v1372_v41, 0.0 }
 0x19e   : > { %v1499_v52 = vmax.f32 %v1151_v46, 0.0  ;;  %v1555_v53 = vmax.f32 %v1375_v47, 0.0 }
 0x1a0   : > { %v2641_v54 = vpack.c.bf16 %v1499_v52, %v1498_v50  ;;  %v2781_v55 = vpack.c.bf16 %v1555_v53, %v1554_v51 }
 0x1a1   : > { %v1155_v56 = vpop.f32.mrb[68].mxu0  ;;  %v1379_v57 = vpop.f32.mrb[68].mxu1 }
 0x1a2   : > { %2853 = vst [vmem:[%s3369_s5 + $0x80] sm:$0xff] %v2641_v54   ;;  %2881 = vst [vmem:[%s3369_s5 + $0x160] sm:$0xff] %v2781_v55   ;;  %v1156_v58 = vadd.f32 %v3357_v63, %v1155_v56  ;;  %v1380_v59 = vadd.f32 %v3357_v63, %v1379_v57  ;;  %v1157_v60 = vpop.f32.mrb[69].mxu0  ;;  %v1381_v61 = vpop.f32.mrb[69].mxu1 }
 0x1a3   : > { %v1158_v62 = vpop.f32.mrb[70].mxu0  ;;  %v1382_v0 = vpop.f32.mrb[70].mxu1 }
 0x1a4   : > { %v1159_v1 = vadd.f32 %v3357_v63, %v1158_v62  ;;  %v1383_v2 = vadd.f32 %v3357_v63, %v1382_v0  ;;  %v1160_v3 = vpop.f32.mrb[71].mxu0  ;;  %v1384_v4 = vpop.f32.mrb[71].mxu1  ;;  %v1500_v5 = vmax.f32 %v1156_v58, 0.0  ;;  %v1556_v6 = vmax.f32 %v1380_v59, 0.0 }
 0x1a6   : > { %v1501_v7 = vmax.f32 %v1159_v1, 0.0  ;;  %v1557_v8 = vmax.f32 %v1383_v2, 0.0 }
 0x1a8   : > { %v2646_v9 = vpack.c.bf16 %v1501_v7, %v1500_v5  ;;  %v2786_v10 = vpack.c.bf16 %v1557_v8, %v1556_v6 }
 0x1a9   : > { %v1163_v11 = vpop.f32.mrb[72].mxu0  ;;  %v1387_v12 = vpop.f32.mrb[72].mxu1 }
 0x1aa   : > { %2854 = vst [vmem:[%s3369_s5 + $0x88] sm:$0xff] %v2646_v9   ;;  %2882 = vst [vmem:[%s3369_s5 + $0x168] sm:$0xff] %v2786_v10   ;;  %v1164_v13 = vadd.f32 %v3357_v63, %v1163_v11  ;;  %v1388_v14 = vadd.f32 %v3357_v63, %v1387_v12  ;;  %v1165_v15 = vpop.f32.mrb[73].mxu0  ;;  %v1389_v16 = vpop.f32.mrb[73].mxu1 }
 0x1ab   : > { %v1166_v17 = vpop.f32.mrb[74].mxu0  ;;  %v1390_v18 = vpop.f32.mrb[74].mxu1 }
 0x1ac   : > { %v1167_v19 = vadd.f32 %v3357_v63, %v1166_v17  ;;  %v1391_v20 = vadd.f32 %v3357_v63, %v1390_v18  ;;  %v1168_v21 = vpop.f32.mrb[75].mxu0  ;;  %v1392_v22 = vpop.f32.mrb[75].mxu1  ;;  %v1502_v23 = vmax.f32 %v1164_v13, 0.0  ;;  %v1558_v24 = vmax.f32 %v1388_v14, 0.0 }
 0x1ae   : > { %v1503_v25 = vmax.f32 %v1167_v19, 0.0  ;;  %v1559_v26 = vmax.f32 %v1391_v20, 0.0 }
 0x1b0   : > { %v2651_v27 = vpack.c.bf16 %v1503_v25, %v1502_v23  ;;  %v2791_v28 = vpack.c.bf16 %v1559_v26, %v1558_v24 }
 0x1b1   : > { %v1171_v29 = vpop.f32.mrb[76].mxu0  ;;  %v1395_v30 = vpop.f32.mrb[76].mxu1 }
 0x1b2   : > { %2855 = vst [vmem:[%s3369_s5 + $0x90] sm:$0xff] %v2651_v27   ;;  %2883 = vst [vmem:[%s3369_s5 + $0x170] sm:$0xff] %v2791_v28   ;;  %v1172_v31 = vadd.f32 %v3357_v63, %v1171_v29  ;;  %v1396_v32 = vadd.f32 %v3357_v63, %v1395_v30  ;;  %v1173_v33 = vpop.f32.mrb[77].mxu0  ;;  %v1397_v34 = vpop.f32.mrb[77].mxu1 }
 0x1b3   : > { %v1174_v35 = vpop.f32.mrb[78].mxu0  ;;  %v1398_v36 = vpop.f32.mrb[78].mxu1 }
 0x1b4   : > { %v1175_v37 = vadd.f32 %v3357_v63, %v1174_v35  ;;  %v1399_v38 = vadd.f32 %v3357_v63, %v1398_v36  ;;  %v1176_v39 = vpop.f32.mrb[79].mxu0  ;;  %v1400_v40 = vpop.f32.mrb[79].mxu1  ;;  %v1504_v41 = vmax.f32 %v1172_v31, 0.0  ;;  %v1560_v42 = vmax.f32 %v1396_v32, 0.0 }
 0x1b6   : > { %v1505_v43 = vmax.f32 %v1175_v37, 0.0  ;;  %v1561_v44 = vmax.f32 %v1399_v38, 0.0 }
 0x1b8   : > { %v2656_v45 = vpack.c.bf16 %v1505_v43, %v1504_v41  ;;  %v2796_v46 = vpack.c.bf16 %v1561_v44, %v1560_v42 }
 0x1b9   : > { %v1179_v47 = vpop.f32.mrb[80].mxu0  ;;  %v1403_v48 = vpop.f32.mrb[80].mxu1 }
 0x1ba   : > { %2856 = vst [vmem:[%s3369_s5 + $0x98] sm:$0xff] %v2656_v45   ;;  %2884 = vst [vmem:[%s3369_s5 + $0x178] sm:$0xff] %v2796_v46   ;;  %v1180_v49 = vadd.f32 %v3357_v63, %v1179_v47  ;;  %v1404_v50 = vadd.f32 %v3357_v63, %v1403_v48  ;;  %v1181_v51 = vpop.f32.mrb[81].mxu0  ;;  %v1405_v52 = vpop.f32.mrb[81].mxu1 }
 0x1bb   : > { %v1182_v53 = vpop.f32.mrb[82].mxu0  ;;  %v1406_v54 = vpop.f32.mrb[82].mxu1 }
 0x1bc   : > { %v1183_v55 = vadd.f32 %v3357_v63, %v1182_v53  ;;  %v1407_v56 = vadd.f32 %v3357_v63, %v1406_v54  ;;  %v1184_v57 = vpop.f32.mrb[83].mxu0  ;;  %v1408_v58 = vpop.f32.mrb[83].mxu1  ;;  %v1506_v59 = vmax.f32 %v1180_v49, 0.0  ;;  %v1562_v60 = vmax.f32 %v1404_v50, 0.0 }
 0x1be   : > { %v1507_v61 = vmax.f32 %v1183_v55, 0.0  ;;  %v1563_v62 = vmax.f32 %v1407_v56, 0.0 }
 0x1c0   : > { %v2661_v0 = vpack.c.bf16 %v1507_v61, %v1506_v59  ;;  %v2801_v1 = vpack.c.bf16 %v1563_v62, %v1562_v60 }
 0x1c1   : > { %v1187_v2 = vpop.f32.mrb[84].mxu0  ;;  %v1411_v3 = vpop.f32.mrb[84].mxu1 }
 0x1c2   : > { %2857 = vst [vmem:[%s3369_s5 + $0xa0] sm:$0xff] %v2661_v0   ;;  %2885 = vst [vmem:[%s3369_s5 + $0x180] sm:$0xff] %v2801_v1   ;;  %v1188_v4 = vadd.f32 %v3357_v63, %v1187_v2  ;;  %v1412_v5 = vadd.f32 %v3357_v63, %v1411_v3  ;;  %v1189_v6 = vpop.f32.mrb[85].mxu0  ;;  %v1413_v7 = vpop.f32.mrb[85].mxu1 }
 0x1c3   : > { %v1190_v8 = vpop.f32.mrb[86].mxu0  ;;  %v1414_v9 = vpop.f32.mrb[86].mxu1 }
 0x1c4   : > { %v1191_v10 = vadd.f32 %v3357_v63, %v1190_v8  ;;  %v1415_v11 = vadd.f32 %v3357_v63, %v1414_v9  ;;  %v1192_v12 = vpop.f32.mrb[87].mxu0  ;;  %v1416_v13 = vpop.f32.mrb[87].mxu1  ;;  %v1508_v14 = vmax.f32 %v1188_v4, 0.0  ;;  %v1564_v15 = vmax.f32 %v1412_v5, 0.0 }
 0x1c6   : > { %v1509_v16 = vmax.f32 %v1191_v10, 0.0  ;;  %v1565_v17 = vmax.f32 %v1415_v11, 0.0 }
 0x1c8   : > { %v2666_v18 = vpack.c.bf16 %v1509_v16, %v1508_v14  ;;  %v2806_v19 = vpack.c.bf16 %v1565_v17, %v1564_v15  ;;  %v3118_v14 = vld [vmem:[%s3532_s2] ss:$0 sm:$0xff] }
 0x1c9   : > { %v1195_v20 = vpop.f32.mrb[88].mxu0  ;;  %v1419_v21 = vpop.f32.mrb[88].mxu1 }
 0x1ca   : > { %2858 = vst [vmem:[%s3369_s5 + $0xa8] sm:$0xff] %v2666_v18   ;;  %2886 = vst [vmem:[%s3369_s5 + $0x188] sm:$0xff] %v2806_v19   ;;  %v1196_v22 = vadd.f32 %v3357_v63, %v1195_v20  ;;  %v1420_v23 = vadd.f32 %v3357_v63, %v1419_v21  ;;  %v1197_v24 = vpop.f32.mrb[89].mxu0  ;;  %v1421_v25 = vpop.f32.mrb[89].mxu1 }
 0x1cb   : > { %v1198_v26 = vpop.f32.mrb[90].mxu0  ;;  %v1422_v27 = vpop.f32.mrb[90].mxu1 }
 0x1cc   : > { %v1199_v28 = vadd.f32 %v3357_v63, %v1198_v26  ;;  %v1423_v29 = vadd.f32 %v3357_v63, %v1422_v27  ;;  %v1200_v30 = vpop.f32.mrb[91].mxu0  ;;  %v1424_v31 = vpop.f32.mrb[91].mxu1  ;;  %v1510_v32 = vmax.f32 %v1196_v22, 0.0  ;;  %v1566_v33 = vmax.f32 %v1420_v23, 0.0 }
 0x1ce   : > { %v1511_v34 = vmax.f32 %v1199_v28, 0.0  ;;  %v1567_v35 = vmax.f32 %v1423_v29, 0.0 }
 0x1d0   : > { %v2671_v36 = vpack.c.bf16 %v1511_v34, %v1510_v32  ;;  %v2811_v37 = vpack.c.bf16 %v1567_v35, %v1566_v33 }
 0x1d1   : > { %v1203_v38 = vpop.f32.mrb[92].mxu0  ;;  %v1427_v39 = vpop.f32.mrb[92].mxu1 }
 0x1d2   : > { %2859 = vst [vmem:[%s3369_s5 + $0xb0] sm:$0xff] %v2671_v36   ;;  %2887 = vst [vmem:[%s3369_s5 + $0x190] sm:$0xff] %v2811_v37   ;;  %v1204_v40 = vadd.f32 %v3357_v63, %v1203_v38  ;;  %v1428_v41 = vadd.f32 %v3357_v63, %v1427_v39  ;;  %v1205_v42 = vpop.f32.mrb[93].mxu0  ;;  %v1429_v43 = vpop.f32.mrb[93].mxu1 }
 0x1d3   : > { %v1206_v44 = vpop.f32.mrb[94].mxu0  ;;  %v1430_v45 = vpop.f32.mrb[94].mxu1 }
 0x1d4   : > { %v1207_v46 = vadd.f32 %v3357_v63, %v1206_v44  ;;  %v1431_v47 = vadd.f32 %v3357_v63, %v1430_v45  ;;  %v1208_v48 = vpop.f32.mrb[95].mxu0  ;;  %v1432_v49 = vpop.f32.mrb[95].mxu1  ;;  %v1512_v50 = vmax.f32 %v1204_v40, 0.0  ;;  %v1568_v51 = vmax.f32 %v1428_v41, 0.0 }
 0x1d6   : > { %v1513_v52 = vmax.f32 %v1207_v46, 0.0  ;;  %v1569_v53 = vmax.f32 %v1431_v47, 0.0 }
 0x1d8   : > { %v2676_v54 = vpack.c.bf16 %v1513_v52, %v1512_v50  ;;  %v2816_v55 = vpack.c.bf16 %v1569_v53, %v1568_v51 }
 0x1d9   : > { %v1211_v56 = vpop.f32.mrb[96].mxu0  ;;  %v1435_v57 = vpop.f32.mrb[96].mxu1 }
 0x1da   : > { %2860 = vst [vmem:[%s3369_s5 + $0xb8] sm:$0xff] %v2676_v54   ;;  %2888 = vst [vmem:[%s3369_s5 + $0x198] sm:$0xff] %v2816_v55   ;;  %v1212_v58 = vadd.f32 %v3357_v63, %v1211_v56  ;;  %v1436_v59 = vadd.f32 %v3357_v63, %v1435_v57  ;;  %v1213_v60 = vpop.f32.mrb[97].mxu0  ;;  %v1437_v61 = vpop.f32.mrb[97].mxu1 }
 0x1db   : > { %v1214_v62 = vpop.f32.mrb[98].mxu0  ;;  %v1438_v0 = vpop.f32.mrb[98].mxu1 }
 0x1dc   : > { %v1215_v1 = vadd.f32 %v3357_v63, %v1214_v62  ;;  %v1439_v2 = vadd.f32 %v3357_v63, %v1438_v0  ;;  %v1216_v3 = vpop.f32.mrb[99].mxu0  ;;  %v1440_v4 = vpop.f32.mrb[99].mxu1  ;;  %v1514_v5 = vmax.f32 %v1212_v58, 0.0  ;;  %v1570_v6 = vmax.f32 %v1436_v59, 0.0 }
 0x1de   : > { %v1515_v7 = vmax.f32 %v1215_v1, 0.0  ;;  %v1571_v8 = vmax.f32 %v1439_v2, 0.0 }
 0x1e0   : > { %v2681_v9 = vpack.c.bf16 %v1515_v7, %v1514_v5  ;;  %v2821_v10 = vpack.c.bf16 %v1571_v8, %v1570_v6 }
 0x1e1   : > { %v1219_v11 = vpop.f32.mrb[100].mxu0  ;;  %v1443_v12 = vpop.f32.mrb[100].mxu1 }
 0x1e2   : > { %2861 = vst [vmem:[%s3369_s5 + $0xc0] sm:$0xff] %v2681_v9   ;;  %2889 = vst [vmem:[%s3369_s5 + $0x1a0] sm:$0xff] %v2821_v10   ;;  %v1220_v13 = vadd.f32 %v3357_v63, %v1219_v11  ;;  %v1444_v15 = vadd.f32 %v3118_v14, %v1443_v12  ;;  %v1221_v16 = vpop.f32.mrb[101].mxu0  ;;  %v1445_v17 = vpop.f32.mrb[101].mxu1 }
 0x1e3   : > { %v1222_v18 = vpop.f32.mrb[102].mxu0  ;;  %v1446_v19 = vpop.f32.mrb[102].mxu1 }
 0x1e4   : > { %v1223_v20 = vadd.f32 %v3118_v14, %v1222_v18  ;;  %v1447_v21 = vadd.f32 %v3118_v14, %v1446_v19  ;;  %v1224_v22 = vpop.f32.mrb[103].mxu0  ;;  %v1448_v23 = vpop.f32.mrb[103].mxu1  ;;  %v1516_v24 = vmax.f32 %v1220_v13, 0.0  ;;  %v1572_v25 = vmax.f32 %v1444_v15, 0.0 }
 0x1e6   : > { %v1517_v26 = vmax.f32 %v1223_v20, 0.0  ;;  %v1573_v27 = vmax.f32 %v1447_v21, 0.0 }
 0x1e8   : > { %v2686_v63 = vpack.c.bf16 %v1517_v26, %v1516_v24  ;;  %v2826_v28 = vpack.c.bf16 %v1573_v27, %v1572_v25 }
 0x1e9   : > { %v1227_v29 = vpop.f32.mrb[104].mxu0  ;;  %v1451_v30 = vpop.f32.mrb[104].mxu1 }
 0x1ea   : > { %2862 = vst [vmem:[%s3369_s5 + $0xc8] sm:$0xff] %v2686_v63   ;;  %2890 = vst [vmem:[%s3369_s5 + $0x1a8] sm:$0xff] %v2826_v28   ;;  %v1228_v31 = vadd.f32 %v3118_v14, %v1227_v29  ;;  %v1452_v32 = vadd.f32 %v3118_v14, %v1451_v30  ;;  %v1229_v33 = vpop.f32.mrb[105].mxu0  ;;  %v1453_v34 = vpop.f32.mrb[105].mxu1 }
 0x1eb   : > { %v1230_v35 = vpop.f32.mrb[106].mxu0  ;;  %v1454_v36 = vpop.f32.mrb[106].mxu1 }
 0x1ec   : > { %v1231_v37 = vadd.f32 %v3118_v14, %v1230_v35  ;;  %v1455_v38 = vadd.f32 %v3118_v14, %v1454_v36  ;;  %v1232_v39 = vpop.f32.mrb[107].mxu0  ;;  %v1456_v40 = vpop.f32.mrb[107].mxu1  ;;  %v1518_v41 = vmax.f32 %v1228_v31, 0.0  ;;  %v1574_v42 = vmax.f32 %v1452_v32, 0.0 }
 0x1ee   : > { %v1519_v43 = vmax.f32 %v1231_v37, 0.0  ;;  %v1575_v44 = vmax.f32 %v1455_v38, 0.0 }
 0x1f0   : > { %v2691_v45 = vpack.c.bf16 %v1519_v43, %v1518_v41  ;;  %v2831_v46 = vpack.c.bf16 %v1575_v44, %v1574_v42 }
 0x1f1   : > { %v1235_v47 = vpop.f32.mrb[108].mxu0  ;;  %v1459_v48 = vpop.f32.mrb[108].mxu1 }
 0x1f2   : > { %2863 = vst [vmem:[%s3369_s5 + $0xd0] sm:$0xff] %v2691_v45   ;;  %2891 = vst [vmem:[%s3369_s5 + $0x1b0] sm:$0xff] %v2831_v46   ;;  %v1236_v49 = vadd.f32 %v3118_v14, %v1235_v47  ;;  %v1460_v50 = vadd.f32 %v3118_v14, %v1459_v48  ;;  %v1237_v51 = vpop.f32.mrb[109].mxu0  ;;  %v1461_v52 = vpop.f32.mrb[109].mxu1 }
 0x1f3   : > { %v1238_v53 = vpop.f32.mrb[110].mxu0  ;;  %v1462_v54 = vpop.f32.mrb[110].mxu1 }
 0x1f4   : > { %v1239_v55 = vadd.f32 %v3118_v14, %v1238_v53  ;;  %v1463_v56 = vadd.f32 %v3118_v14, %v1462_v54  ;;  %v1240_v57 = vpop.f32.mrb[111].mxu0  ;;  %v1464_v58 = vpop.f32.mrb[111].mxu1  ;;  %v1520_v59 = vmax.f32 %v1236_v49, 0.0  ;;  %v1576_v60 = vmax.f32 %v1460_v50, 0.0 }
 0x1f6   : > { %v1521_v61 = vmax.f32 %v1239_v55, 0.0  ;;  %v1577_v62 = vmax.f32 %v1463_v56, 0.0 }
 0x1f8   : > { %v2696_v0 = vpack.c.bf16 %v1521_v61, %v1520_v59  ;;  %v2836_v1 = vpack.c.bf16 %v1577_v62, %v1576_v60 }
 0x1fa   : > { %2864 = vst [vmem:[%s3369_s5 + $0xd8] sm:$0xff] %v2696_v0   ;;  %2892 = vst [vmem:[%s3369_s5 + $0x1b8] sm:$0xff] %v2836_v1  }
 0x1fb PF: > { %s13_s12 = sadd.s32 1, %s3125_s12  }
 0x1fc   : > { %p10_p4 = scmp.ge.s32.totalorder %s13_s12, 4  }
 0x1fe   :  { %12 = sbr.rel (!%p10_p4) target bundleno = 1 (0x1), region = 62 }

// kernel: dqn_forward.3
= control target key start
LH: loop header
LB: loop body
LE: loop exit
PB: predicated region body
PF: predicated region fallthrough
CT: control target
= control target key end

     0   :  { %v13138_v0 = vmov 0   ;;  %vm1344_vm0 = vcmask 261120   ;;  %s13130_s1 = inlined_call_operand.vmem [shape: bf16[256,32], index: 1, kind: input, shape index: {}]   ;;  %s13131_s0 = inlined_call_operand.vmem [shape: bf16[1,800,256], index: 0, kind: input, shape index: {}]   ;;  %s13132_s3 = inlined_call_operand.vmem [shape: bf16[100,32,256], index: 3, kind: input, shape index: {}]   ;;  %s13133_s2 = inlined_call_operand.vmem [shape: f32[1,32], index: 2, kind: input, shape index: {}]   ;;  %s13134_s5 = inlined_call_operand.vmem [shape: bf16[256,128], index: 5, kind: input, shape index: {}]   ;;  %s13135_s4 = inlined_call_operand.vmem [shape: f32[1,256], index: 4, kind: input, shape index: {}]   ;;  %s13136_s6 = inlined_call_operand.vmem [shape: f32[1,128], index: 6, kind: input, shape index: {}]   ;;  %s13137_s7 = inlined_call_operand.vmem [shape: f32[1,8,128], index: 7, kind: output, shape index: {}]  }
   0x1   :  { %762 = vmatprep.subr.bf16.mxu0 %v13138_v0  ;;  %v9736_v1 = vld [vmem:[%s13130_s1] sm:$0xff]   ;;  %1444 = vmatprep.mubr.bf16.mxu1 %v13138_v0  ;;  %v9737_v2 = vld [vmem:[%s13130_s1 + $0x8] sm:$0xff]   ;;  %v9738_v3 = vld [vmem:[%s13130_s1 + $0x10] sm:$0xff]  }
   0x2   :  { %763 = vmatpush1.bf16.msra.mxu0 %v9736_v1  ;;  %v9739_v4 = vld [vmem:[%s13130_s1 + $0x18] sm:$0xff]   ;;  %v9740_v5 = vld [vmem:[%s13130_s1 + $0x20] sm:$0xff]   ;;  %v9741_v7 = vld [vmem:[%s13130_s1 + $0x28] sm:$0xff]  }
   0x3   :  { %764 = vmatprep.subr.bf16.mxu0 %v13138_v0  ;;  %v9754_v6 = vld [vmem:[%s13131_s0 + $0x4] ss:$8 sps:$4 sm:$0xff]   ;;  %v9742_v8 = vld [vmem:[%s13130_s1 + $0x30] sm:$0xff]   ;;  %v9743_v9 = vld [vmem:[%s13130_s1 + $0x38] sm:$0xff]  }
   0x4   :  { %794 = vmatprep.mubr.bf16.mxu0 %v9754_v6  ;;  %v9744_v10 = vld [vmem:[%s13130_s1 + $0x40] sm:$0xff]   ;;  %v9745_v11 = vld [vmem:[%s13130_s1 + $0x48] sm:$0xff]   ;;  %v9746_v12 = vld [vmem:[%s13130_s1 + $0x50] sm:$0xff]  }
   0x5   :  { %v9747_v13 = vld [vmem:[%s13130_s1 + $0x58] sm:$0xff]   ;;  %v9748_v14 = vld [vmem:[%s13130_s1 + $0x60] sm:$0xff]   ;;  %v9749_v15 = vld [vmem:[%s13130_s1 + $0x68] sm:$0xff]  }
   0x6   :  { %765 = vmatpush1.bf16.msra.mxu0 %v9737_v2  ;;  %v9750_v16 = vld [vmem:[%s13130_s1 + $0x70] sm:$0xff]   ;;  %v9751_v17 = vld [vmem:[%s13130_s1 + $0x78] sm:$0xff]   ;;  %v9752_v18 = vld [vmem:[%s13131_s0] ss:$8 sps:$4 sm:$0xff]  }
   0x7   :  { %766 = vmatprep.subr.bf16.mxu0 %v13138_v0  ;;  %v9755_v19 = vld [vmem:[%s13131_s0 + $0x14] ss:$8 sps:$4 sm:$0xff]   ;;  %v9757_v20 = vld [vmem:[%s13131_s0 + $0x10] ss:$8 sps:$4 sm:$0xff]   ;;  %v9758_v21 = vld [vmem:[%s13131_s0 + $0x24] ss:$8 sps:$4 sm:$0xff]  }
   0x8   :  { %v9760_v22 = vld [vmem:[%s13131_s0 + $0x20] ss:$8 sps:$4 sm:$0xff]   ;;  %v9761_v23 = vld [vmem:[%s13131_s0 + $0x34] ss:$8 sps:$4 sm:$0xff]   ;;  %v9763_v24 = vld [vmem:[%s13131_s0 + $0x30] ss:$8 sps:$4 sm:$0xff]  }
   0x9   :  { %v9764_v25 = vld [vmem:[%s13131_s0 + $0x44] ss:$8 sps:$4 sm:$0xff]   ;;  %v9766_v26 = vld [vmem:[%s13131_s0 + $0x40] ss:$8 sps:$4 sm:$0xff]   ;;  %v9767_v27 = vld [vmem:[%s13131_s0 + $0x54] ss:$8 sps:$4 sm:$0xff]  }
   0xa   :  { %767 = vmatpush1.bf16.msra.mxu0 %v9738_v3  ;;  %v9769_v28 = vld [vmem:[%s13131_s0 + $0x50] ss:$8 sps:$4 sm:$0xff]   ;;  %v9770_v29 = vld [vmem:[%s13131_s0 + $0x64] ss:$8 sps:$4 sm:$0xff]   ;;  %v9772_v30 = vld [vmem:[%s13131_s0 + $0x60] ss:$8 sps:$4 sm:$0xff]  }
   0xb   :  { %768 = vmatprep.subr.bf16.mxu0 %v13138_v0  ;;  %v9773_v31 = vld [vmem:[%s13131_s0 + $0x74] ss:$8 sps:$4 sm:$0xff]   ;;  %v9775_v32 = vld [vmem:[%s13131_s0 + $0x70] ss:$8 sps:$4 sm:$0xff]   ;;  %v9776_v33 = vld [vmem:[%s13131_s0 + $0x84] ss:$8 sps:$4 sm:$0xff]  }
   0xc   :  { %v9778_v34 = vld [vmem:[%s13131_s0 + $0x80] ss:$8 sps:$4 sm:$0xff]   ;;  %v9779_v35 = vld [vmem:[%s13131_s0 + $0x94] ss:$8 sps:$4 sm:$0xff]   ;;  %v9781_v36 = vld [vmem:[%s13131_s0 + $0x90] ss:$8 sps:$4 sm:$0xff]  }
   0xd   :  { %v9782_v37 = vld [vmem:[%s13131_s0 + $0xa4] ss:$8 sps:$4 sm:$0xff]   ;;  %v9784_v38 = vld [vmem:[%s13131_s0 + $0xa0] ss:$8 sps:$4 sm:$0xff]   ;;  %v9785_v39 = vld [vmem:[%s13131_s0 + $0xb4] ss:$8 sps:$4 sm:$0xff]  }
   0xe   :  { %769 = vmatpush1.bf16.msra.mxu0 %v9739_v4  ;;  %v9833_v40 = vld [vmem:[%s13132_s3 + $0x4] ss:$8 sps:$4 sm:$0xff]   ;;  %v9835_v41 = vld [vmem:[%s13132_s3] ss:$8 sps:$4 sm:$0xff]   ;;  %v9787_v42 = vld [vmem:[%s13131_s0 + $0xb0] ss:$8 sps:$4 sm:$0xff]  }
   0xf   :  { %770 = vmatprep.subr.bf16.mxu0 %v13138_v0  ;;  %1412 = vmatprep.subr.bf16.mxu1 %v9833_v40  ;;  %v9836_v43 = vld [vmem:[%s13132_s3 + $0x14] ss:$8 sps:$4 sm:$0xff]   ;;  %v9788_v44 = vld [vmem:[%s13131_s0 + $0xc4] ss:$8 sps:$4 sm:$0xff]   ;;  %v9840_v45 = vld [vmem:[%s13132_s3 + $0x10] ss:$8 sps:$4 sm:$0xff]  }
  0x10   :  { %1413 = vmatpush1.bf16.msra.mxu1 %v9835_v41  ;;  %v9790_v46 = vld [vmem:[%s13131_s0 + $0xc0] ss:$8 sps:$4 sm:$0xff]   ;;  %v9791_v47 = vld [vmem:[%s13131_s0 + $0xd4] ss:$8 sps:$4 sm:$0xff]   ;;  %v9847_v48 = vld [vmem:[%s13132_s3 + $0xa4] ss:$8 sps:$4 sm:$0xff]  }
  0x11   :  { %1414 = vmatprep.subr.bf16.mxu1 %v9836_v43  ;;  %v9793_v49 = vld [vmem:[%s13131_s0 + $0xd0] ss:$8 sps:$4 sm:$0xff]   ;;  %v9794_v50 = vld [vmem:[%s13131_s0 + $0xe4] ss:$8 sps:$4 sm:$0xff]   ;;  %v9796_v51 = vld [vmem:[%s13131_s0 + $0xe0] ss:$8 sps:$4 sm:$0xff]  }
  0x12   :  { %771 = vmatpush1.bf16.msra.mxu0 %v9740_v5  ;;  %v9797_v52 = vld [vmem:[%s13131_s0 + $0xf4] ss:$8 sps:$4 sm:$0xff]   ;;  %v9799_v53 = vld [vmem:[%s13131_s0 + $0xf0] ss:$8 sps:$4 sm:$0xff]   ;;  %v9800_v54 = vld [vmem:[%s13131_s0 + $0x104] ss:$8 sps:$4 sm:$0xff]  }
  0x13   :  { %772 = vmatprep.subr.bf16.mxu0 %v13138_v0  ;;  %v9802_v55 = vld [vmem:[%s13131_s0 + $0x100] ss:$8 sps:$4 sm:$0xff]   ;;  %v9803_v56 = vld [vmem:[%s13131_s0 + $0x114] ss:$8 sps:$4 sm:$0xff]   ;;  %v9883_v58 = vld [vmem:[%s13132_s3 + $0x84] ss:$8 sps:$4 sm:$0xff]  }
  0x14   :  { %1415 = vmatpush1.bf16.msra.mxu1 %v9840_v45  ;;  %v9881_v57 = vld [vmem:[%s13132_s3 + $0x80] ss:$8 sps:$4 sm:$0xff]   ;;  %v9805_v59 = vld [vmem:[%s13131_s0 + $0x110] ss:$8 sps:$4 sm:$0xff]   ;;  %v9806_v60 = vld [vmem:[%s13131_s0 + $0x124] ss:$8 sps:$4 sm:$0xff]  }
  0x15   :  { %1482 = vmatprep.subr.bf16.mxu1 %v9847_v48  ;;  %v9808_v61 = vld [vmem:[%s13131_s0 + $0x120] ss:$8 sps:$4 sm:$0xff]   ;;  %v9809_v62 = vld [vmem:[%s13131_s0 + $0x134] ss:$8 sps:$4 sm:$0xff]   ;;  %v9811_v63 = vld [vmem:[%s13131_s0 + $0x130] ss:$8 sps:$4 sm:$0xff]  }
  0x16   :  { %773 = vmatpush1.bf16.msra.mxu0 %v9741_v7  ;;  %v9812_v1 = vld [vmem:[%s13131_s0 + $0x144] ss:$8 sps:$4 sm:$0xff]   ;;  %v9814_v2 = vld [vmem:[%s13131_s0 + $0x140] ss:$8 sps:$4 sm:$0xff]   ;;  %v9815_v3 = vld [vmem:[%s13131_s0 + $0x154] ss:$8 sps:$4 sm:$0xff]  }
  0x17   :  { %774 = vmatprep.subr.bf16.mxu0 %v13138_v0  ;;  %v9817_v4 = vld [vmem:[%s13131_s0 + $0x150] ss:$8 sps:$4 sm:$0xff]   ;;  %v9818_v5 = vld [vmem:[%s13131_s0 + $0x164] ss:$8 sps:$4 sm:$0xff]   ;;  %v9820_v6 = vld [vmem:[%s13131_s0 + $0x160] ss:$8 sps:$4 sm:$0xff]  }
  0x18   :  { %v9821_v7 = vld [vmem:[%s13131_s0 + $0x174] ss:$8 sps:$4 sm:$0xff]   ;;  %v9857_v40 = vld [vmem:[%s13131_s0 + $0x1e4] ss:$8 sps:$4 sm:$0xff]   ;;  %v9862_v48 = vld [vmem:[%s13131_s0 + $0x1e0] ss:$8 sps:$4 sm:$0xff]  }
  0x19   :  { %v9861_v45 = vld [vmem:[%s13132_s3 + $0x34] ss:$8 sps:$4 sm:$0xff]  }
  0x1a   :  { %775 = vmatpush1.bf16.msra.mxu0 %v9742_v8  ;;  %v9823_v8 = vld [vmem:[%s13131_s0 + $0x170] ss:$8 sps:$4 sm:$0xff]  }
  0x1b   :  { %776 = vmatprep.subr.bf16.mxu0 %v13138_v0 }
  0x1e   :  { %777 = vmatpush1.bf16.msra.mxu0 %v9743_v9  ;;  %v9824_v9 = vld [vmem:[%s13131_s0 + $0x184] ss:$8 sps:$4 sm:$0xff]  }
  0x1f   :  { %778 = vmatprep.subr.bf16.mxu0 %v13138_v0 }
  0x22   :  { %779 = vmatpush1.bf16.msra.mxu0 %v9744_v10  ;;  %v9826_v10 = vld [vmem:[%s13131_s0 + $0x180] ss:$8 sps:$4 sm:$0xff]  }
  0x23   :  { %780 = vmatprep.subr.bf16.mxu0 %v13138_v0 }
  0x26   :  { %781 = vmatpush1.bf16.msra.mxu0 %v9745_v11  ;;  %v9827_v11 = vld [vmem:[%s13131_s0 + $0x194] ss:$8 sps:$4 sm:$0xff]  }
  0x27   :  { %782 = vmatprep.subr.bf16.mxu0 %v13138_v0 }
  0x2a   :  { %783 = vmatpush1.bf16.msra.mxu0 %v9746_v12  ;;  %v9829_v12 = vld [vmem:[%s13131_s0 + $0x190] ss:$8 sps:$4 sm:$0xff]  }
  0x2b   :  { %784 = vmatprep.subr.bf16.mxu0 %v13138_v0 }
  0x2e   :  { %785 = vmatpush1.bf16.msra.mxu0 %v9747_v13  ;;  %v9830_v13 = vld [vmem:[%s13131_s0 + $0x1a4] ss:$8 sps:$4 sm:$0xff]  }
  0x2f   :  { %786 = vmatprep.subr.bf16.mxu0 %v13138_v0 }
  0x32   :  { %787 = vmatpush1.bf16.msra.mxu0 %v9748_v14  ;;  %v9832_v14 = vld [vmem:[%s13131_s0 + $0x1a0] ss:$8 sps:$4 sm:$0xff]  }
  0x33   :  { %788 = vmatprep.subr.bf16.mxu0 %v13138_v0 }
  0x36   :  { %789 = vmatpush1.bf16.msra.mxu0 %v9749_v15  ;;  %v9838_v15 = vld [vmem:[%s13131_s0 + $0x1b4] ss:$8 sps:$4 sm:$0xff]  }
  0x37   :  { %790 = vmatprep.subr.bf16.mxu0 %v13138_v0 }
  0x3a   :  { %791 = vmatpush1.bf16.msra.mxu0 %v9750_v16  ;;  %v10816_v16 = vld [vmem:[%s13133_s2] ss:$0 sm:$0xff] }
  0x3b   :  { %792 = vmatprep.subr.bf16.mxu0 %v13138_v0 }
  0x3e   :  { %793 = vmatpush1.bf16.msra.mxu0 %v9751_v17  ;;  %v9841_v17 = vld [vmem:[%s13131_s0 + $0x1b0] ss:$8 sps:$4 sm:$0xff]  }
  0x3f   :  { %1348 = vmatprep.subr.bf16.mxu0 %v9883_v58  ;;  %v9863_v58 = vld [vmem:[%s13132_s3 + $0xc0] ss:$8 sps:$4 sm:$0xff]  }
  0x41   :  { %795 = vmatmul.mubr.bf16.vlgmr.msra.gmra.mrb[0].mxu0 %v9752_v18 }
  0x42   :  { %802 = vmatprep.mubr.bf16.mxu0 %v9755_v19  ;;  %1349 = vmatpush1.bf16.msra.mxu0 %v9881_v57 }
  0x49   :  { %803 = vmatmul.mubr.bf16.gmra.mrb[4].mxu0 %v9757_v20 }
  0x4a   :  { %810 = vmatprep.mubr.bf16.mxu0 %v9758_v21 }
  0x51   :  { %811 = vmatmul.mubr.bf16.gmra.mrb[8].mxu0 %v9760_v22  ;;  %v9842_v22 = vld [vmem:[%s13131_s0 + $0x1c4] ss:$8 sps:$4 sm:$0xff]  }
  0x52   :  { %818 = vmatprep.mubr.bf16.mxu0 %v9761_v23 }
  0x59   :  { %819 = vmatmul.mubr.bf16.gmra.mrb[12].mxu0 %v9763_v24 }
  0x5a   :  { %826 = vmatprep.mubr.bf16.mxu0 %v9764_v25  ;;  %v9845_v25 = vld [vmem:[%s13132_s3 + $0xa0] ss:$8 sps:$4 sm:$0xff]  }
  0x61   :  { %827 = vmatmul.mubr.bf16.gmra.mrb[16].mxu0 %v9766_v26  ;;  %v9852_v26 = vld [vmem:[%s13132_s3 + $0xb4] ss:$8 sps:$4 sm:$0xff]  }
  0x62   :  { %834 = vmatprep.mubr.bf16.mxu0 %v9767_v27 }
  0x69   :  { %835 = vmatmul.mubr.bf16.gmra.mrb[20].mxu0 %v9769_v28  ;;  %v9850_v28 = vld [vmem:[%s13132_s3 + $0xb0] ss:$8 sps:$4 sm:$0xff]  }
  0x6a   :  { %842 = vmatprep.mubr.bf16.mxu0 %v9770_v29  ;;  %v9844_v29 = vld [vmem:[%s13131_s0 + $0x1c0] ss:$8 sps:$4 sm:$0xff]  }
  0x71   :  { %843 = vmatmul.mubr.bf16.gmra.mrb[24].mxu0 %v9772_v30  ;;  %v9856_v30 = vld [vmem:[%s13132_s3 + $0x24] ss:$8 sps:$4 sm:$0xff]  }
  0x72   :  { %850 = vmatprep.mubr.bf16.mxu0 %v9773_v31 }
  0x79   :  { %851 = vmatmul.mubr.bf16.gmra.mrb[28].mxu0 %v9775_v32 }
  0x7a   :  { %858 = vmatprep.mubr.bf16.mxu0 %v9776_v33 }
  0x81   :  { %859 = vmatmul.mubr.bf16.gmra.mrb[32].mxu0 %v9778_v34  ;;  %v9848_v34 = vld [vmem:[%s13131_s0 + $0x1d4] ss:$8 sps:$4 sm:$0xff]  }
  0x82   :  { %866 = vmatprep.mubr.bf16.mxu0 %v9779_v35 }
  0x89   :  { %867 = vmatmul.mubr.bf16.gmra.mrb[36].mxu0 %v9781_v36  ;;  %v9853_v36 = vld [vmem:[%s13131_s0 + $0x1d0] ss:$8 sps:$4 sm:$0xff]  }
  0x8a   :  { %874 = vmatprep.mubr.bf16.mxu0 %v9782_v37 }
  0x91   :  { %875 = vmatmul.mubr.bf16.gmra.mrb[40].mxu0 %v9784_v38 }
  0x92   :  { %882 = vmatprep.mubr.bf16.mxu0 %v9785_v39 }
  0x99   :  { %883 = vmatmul.mubr.bf16.gmra.mrb[44].mxu0 %v9787_v42 }
  0x9a   :  { %890 = vmatprep.mubr.bf16.mxu0 %v9788_v44  ;;  %v9854_v44 = vld [vmem:[%s13132_s3 + $0x20] ss:$8 sps:$4 sm:$0xff]  }
  0xa1   :  { %891 = vmatmul.mubr.bf16.gmra.mrb[48].mxu0 %v9790_v46 }
  0xa2   :  { %898 = vmatprep.mubr.bf16.mxu0 %v9791_v47 }
  0xa9   :  { %899 = vmatmul.mubr.bf16.gmra.mrb[52].mxu0 %v9793_v49 }
  0xaa   :  { %906 = vmatprep.mubr.bf16.mxu0 %v9794_v50 }
  0xb1   :  { %907 = vmatmul.mubr.bf16.gmra.mrb[56].mxu0 %v9796_v51  ;;  %v9859_v51 = vld [vmem:[%s13132_s3 + $0x30] ss:$8 sps:$4 sm:$0xff]  }
  0xb2   :  { %914 = vmatprep.mubr.bf16.mxu0 %v9797_v52 }
  0xb9   :  { %915 = vmatmul.mubr.bf16.gmra.mrb[60].mxu0 %v9799_v53  ;;  %v9866_v53 = vld [vmem:[%s13131_s0 + $0x1f4] ss:$8 sps:$4 sm:$0xff]  }
  0xba   :  { %922 = vmatprep.mubr.bf16.mxu0 %v9800_v54 }
  0xc1   :  { %923 = vmatmul.mubr.bf16.gmra.mrb[64].mxu0 %v9802_v55  ;;  %v9865_v55 = vld [vmem:[%s13132_s3 + $0xc4] ss:$8 sps:$4 sm:$0xff]  }
  0xc2   :  { %930 = vmatprep.mubr.bf16.mxu0 %v9803_v56 }
  0xc9   :  { %931 = vmatmul.mubr.bf16.gmra.mrb[68].mxu0 %v9805_v59  ;;  %v9870_v59 = vld [vmem:[%s13132_s3 + $0xd4] ss:$8 sps:$4 sm:$0xff]  }
  0xca   :  { %938 = vmatprep.mubr.bf16.mxu0 %v9806_v60 }
  0xd1   :  { %939 = vmatmul.mubr.bf16.gmra.mrb[72].mxu0 %v9808_v61  ;;  %v9871_v61 = vld [vmem:[%s13131_s0 + $0x1f0] ss:$8 sps:$4 sm:$0xff]  }
  0xd2   :  { %946 = vmatprep.mubr.bf16.mxu0 %v9809_v62 }
  0xd9   :  { %947 = vmatmul.mubr.bf16.gmra.mrb[76].mxu0 %v9811_v63 }
  0xda   :  { %954 = vmatprep.mubr.bf16.mxu0 %v9812_v1 }
  0xe1   :  { %955 = vmatmul.mubr.bf16.gmra.mrb[80].mxu0 %v9814_v2  ;;  %v9868_v2 = vld [vmem:[%s13132_s3 + $0xd0] ss:$8 sps:$4 sm:$0xff]  }
  0xe2   :  { %962 = vmatprep.mubr.bf16.mxu0 %v9815_v3  ;;  %v9875_v3 = vld [vmem:[%s13131_s0 + $0x204] ss:$8 sps:$4 sm:$0xff]  }
  0xe9   :  { %963 = vmatmul.mubr.bf16.gmra.mrb[84].mxu0 %v9817_v4 }
  0xea   :  { %970 = vmatprep.mubr.bf16.mxu0 %v9818_v5  ;;  %v9874_v5 = vld [vmem:[%s13132_s3 + $0x44] ss:$8 sps:$4 sm:$0xff]  }
  0xf1   :  { %971 = vmatmul.mubr.bf16.gmra.mrb[88].mxu0 %v9820_v6 }
  0xf2   :  { %978 = vmatprep.mubr.bf16.mxu0 %v9821_v7 }
  0xf9   :  { %979 = vmatmul.mubr.bf16.gmra.mrb[92].mxu0 %v9823_v8  ;;  %v9872_v8 = vld [vmem:[%s13132_s3 + $0x40] ss:$8 sps:$4 sm:$0xff]  }
  0xfa   :  { %986 = vmatprep.mubr.bf16.mxu0 %v9824_v9  ;;  %v9879_v9 = vld [vmem:[%s13132_s3 + $0x54] ss:$8 sps:$4 sm:$0xff]  }
 0x101   :  { %987 = vmatmul.mubr.bf16.gmra.mrb[96].mxu0 %v9826_v10 }
 0x102   :  { %994 = vmatprep.mubr.bf16.mxu0 %v9827_v11  ;;  %v9880_v11 = vld [vmem:[%s13131_s0 + $0x200] ss:$8 sps:$4 sm:$0xff]  }
 0x109   :  { %995 = vmatmul.mubr.bf16.gmra.mrb[100].mxu0 %v9829_v12 }
 0x10a   :  { %1002 = vmatprep.mubr.bf16.mxu0 %v9830_v13 }
 0x111   :  { %1003 = vmatmul.mubr.bf16.gmra.mrb[104].mxu0 %v9832_v14  ;;  %v9877_v14 = vld [vmem:[%s13132_s3 + $0x50] ss:$8 sps:$4 sm:$0xff]  }
 0x112   :  { %1010 = vmatprep.mubr.bf16.mxu0 %v9838_v15  ;;  %v9887_v15 = vld [vmem:[%s13131_s0 + $0x214] ss:$8 sps:$4 sm:$0xff]  }
 0x114   :  { %v796_v18 = vpop.f32.mrb[0].mxu0 }
 0x115   :  { %v797_v19 = vadd.f32 %v10816_v16, %v796_v18  ;;  %v798_v20 = vpop.f32.mrb[1].mxu0 }
 0x116   :  { %v799_v21 = vpop.f32.mrb[2].mxu0 }
 0x117   :  { %v1195_v23 = vmax.f32 %v797_v19, 0.0  ;;  %v801_v24 = vpop.f32.mrb[3].mxu0  ;;  %v800_v46 = vadd.f32 %v10816_v16, %v799_v21  ;;  %v9886_v19 = vld [vmem:[%s13132_s3 + $0xe4] ss:$8 sps:$4 sm:$0xff]   ;;  %v9884_v21 = vld [vmem:[%s13132_s3 + $0xe0] ss:$8 sps:$4 sm:$0xff]  }
 0x119   :  { %v1295_v27 = vpack.c.bf16 %v1195_v23, %v1195_v23  ;;  %1011 = vmatmul.mubr.bf16.gmra.mrb[108].mxu0 %v9841_v17  ;;  %v1196_v54 = vmax.f32 %v800_v46, 0.0 }
 0x11a   :  { %1018 = vmatprep.mubr.bf16.mxu0 %v9842_v22  ;;  %v9891_v22 = vld [vmem:[%s13132_s3 + $0xf4] ss:$8 sps:$4 sm:$0xff]  }
 0x11b   :  { %8825 = vmatmul.mubr.msk.bf16.vlgmr.msra.gmra.mrb[0].mxu1 %vm1344_vm0, %v1295_v27  ;;  %v1300_v60 = vpack.c.bf16 %v1196_v54, %v1196_v54 }
 0x11c   :  { %v10841_v31 = vpop.f32.mrb[4].mxu0  ;;  %1483 = vmatpush1.bf16.msra.mxu1 %v9845_v25  ;;  %1514 = vmatprep.mubr.bf16.mxu1 %v13138_v0 }
 0x11d   :  { %v806_v32 = vpop.f32.mrb[5].mxu0  ;;  %1484 = vmatprep.subr.bf16.mxu1 %v9852_v26  ;;  %v805_v10 = vadd.f32 %v10816_v16, %v10841_v31  ;;  %v9892_v26 = vld [vmem:[%s13131_s0 + $0x210] ss:$8 sps:$4 sm:$0xff]  }
 0x11e   :  { %v10844_v33 = vpop.f32.mrb[6].mxu0  ;;  %v9895_v32 = vld [vmem:[%s13132_s3 + $0x64] ss:$8 sps:$4 sm:$0xff]  }
 0x11f   :  { %v809_v35 = vpop.f32.mrb[7].mxu0  ;;  %v1197_v18 = vmax.f32 %v805_v10, 0.0 }
 0x120   :  { %1485 = vmatpush1.bf16.msra.mxu1 %v9850_v28  ;;  %v9889_v28 = vld [vmem:[%s13132_s3 + $0xf0] ss:$8 sps:$4 sm:$0xff]   ;;  %v9893_v35 = vld [vmem:[%s13132_s3 + $0x60] ss:$8 sps:$4 sm:$0xff]  }
 0x121   :  { %1019 = vmatmul.mubr.bf16.gmra.mrb[112].mxu0 %v9844_v29  ;;  %1546 = vmatprep.subr.bf16.mxu1 %v9856_v30  ;;  %v1306_v23 = vpack.c.bf16 %v1197_v18, %v1197_v18  ;;  %v9896_v29 = vld [vmem:[%s13131_s0 + $0x224] ss:$8 sps:$4 sm:$0xff]  }
 0x122   :  { %1026 = vmatprep.mubr.bf16.mxu0 %v9848_v34 }
 0x124   :  { %v10852_v37 = vpop.f32.mrb[8].mxu0 }
 0x125   :  { %v814_v38 = vpop.f32.mrb[9].mxu0 }
 0x126   :  { %v815_v39 = vpop.f32.mrb[10].mxu0 }
 0x127   :  { %v816_v41 = vadd.f32 %v10816_v16, %v815_v39  ;;  %v817_v42 = vpop.f32.mrb[11].mxu0  ;;  %v9900_v39 = vld [vmem:[%s13132_s3 + $0x74] ss:$8 sps:$4 sm:$0xff]  }
 0x129   :  { %v1200_v43 = vmax.f32 %v816_v41, 0.0  ;;  %1027 = vmatmul.mubr.bf16.gmra.mrb[116].mxu0 %v9853_v36  ;;  %v808_v36 = vadd.f32 %v10816_v16, %v10844_v33  ;;  %v10042_v41 = vld [vmem:[%s13132_s3 + $0x94] ss:$8 sps:$4 sm:$0xff]   ;;  %v9901_v33 = vld [vmem:[%s13131_s0 + $0x220] ss:$8 sps:$4 sm:$0xff]  }
 0x12a   :  { %1034 = vmatprep.mubr.bf16.mxu0 %v9857_v40  ;;  %v10040_v40 = vld [vmem:[%s13132_s3 + $0x90] ss:$8 sps:$4 sm:$0xff]   ;;  %1350 = vmatprep.subr.bf16.mxu0 %v10042_v41 }
 0x12b   :  { %v1453_v47 = vpack.c.bf16 %v1200_v43, %v1200_v43  ;;  %1351 = vmatpush1.bf16.msra.mxu0 %v10040_v40 }
 0x12c   :  { %v820_v49 = vpop.f32.mrb[12].mxu0 }
 0x12d   :  { %8834 = vmatmul.mubr.msk.bf16.vlgmr.msra.gmra.mrb[4].mxu1 %vm1344_vm0, %v1453_v47  ;;  %v822_v50 = vpop.f32.mrb[13].mxu0  ;;  %v821_v57 = vadd.f32 %v10816_v16, %v820_v49  ;;  %v1198_v47 = vmax.f32 %v808_v36, 0.0  ;;  %v9937_v36 = vld [vmem:[%s13131_s0 + $0x260] ss:$8 sps:$4 sm:$0xff]  }
 0x12e   :  { %1547 = vmatpush1.bf16.msra.mxu1 %v9854_v44  ;;  %1578 = vmatprep.mubr.bf16.mxu1 %v13138_v0  ;;  %v823_v52 = vpop.f32.mrb[14].mxu0  ;;  %v9898_v44 = vld [vmem:[%s13132_s3 + $0x70] ss:$8 sps:$4 sm:$0xff]  }
 0x12f   :  { %1548 = vmatprep.subr.bf16.mxu1 %v9861_v45  ;;  %v825_v56 = vpop.f32.mrb[15].mxu0  ;;  %v1201_v63 = vmax.f32 %v821_v57, 0.0  ;;  %v824_v24 = vadd.f32 %v10816_v16, %v823_v52  ;;  %v9905_v45 = vld [vmem:[%s13131_s0 + $0x234] ss:$8 sps:$4 sm:$0xff]   ;;  %v1312_v52 = vpack.c.bf16 %v1198_v47, %v1198_v47 }
 0x130   :  { %v9910_v56 = vld [vmem:[%s13131_s0 + $0x230] ss:$8 sps:$4 sm:$0xff]  }
 0x131   :  { %1035 = vmatmul.mubr.bf16.gmra.mrb[120].mxu0 %v9862_v48  ;;  %v1587_v7 = vpack.c.bf16 %v1201_v63, %v1201_v63  ;;  %v1202_v31 = vmax.f32 %v824_v24, 0.0  ;;  %v9904_v48 = vld [vmem:[%s13132_s3 + $0x104] ss:$8 sps:$4 sm:$0xff]  }
 0x132   :  { %1549 = vmatpush1.bf16.msra.mxu1 %v9859_v51  ;;  %1042 = vmatprep.mubr.bf16.mxu0 %v9866_v53  ;;  %v9902_v51 = vld [vmem:[%s13132_s3 + $0x100] ss:$8 sps:$4 sm:$0xff]   ;;  %v9909_v53 = vld [vmem:[%s13132_s3 + $0x114] ss:$8 sps:$4 sm:$0xff]   ;;  %v9932_v24 = vld [vmem:[%s13131_s0 + $0x264] ss:$8 sps:$4 sm:$0xff]  }
 0x133   :  { %1616 = vmatprep.subr.bf16.mxu1 %v9865_v55  ;;  %v1721_v38 = vpack.c.bf16 %v1202_v31, %v1202_v31  ;;  %v9929_v31 = vld [vmem:[%s13132_s3 + $0x160] ss:$8 sps:$4 sm:$0xff]  }
 0x134   :  { %v10889_v62 = vpop.f32.mrb[16].mxu0 }
 0x135   :  { %8839 = vmatmul.mubr.msk.bf16.vlgmr.msra.gmra.mrb[8].mxu1 %vm1344_vm0, %v1300_v60  ;;  %v830_v1 = vpop.f32.mrb[17].mxu0  ;;  %v829_v50 = vadd.f32 %v10816_v16, %v10889_v62 }
 0x136   :  { %1617 = vmatpush1.bf16.msra.mxu1 %v9863_v58  ;;  %1648 = vmatprep.mubr.bf16.mxu1 %v13138_v0  ;;  %v10899_v4 = vpop.f32.mrb[18].mxu0  ;;  %v9907_v58 = vld [vmem:[%s13132_s3 + $0x110] ss:$8 sps:$4 sm:$0xff]   ;;  %v9911_v1 = vld [vmem:[%s13132_s3 + $0x120] ss:$8 sps:$4 sm:$0xff]  }
 0x137   :  { %1618 = vmatprep.subr.bf16.mxu1 %v9870_v59  ;;  %v833_v6 = vpop.f32.mrb[19].mxu0  ;;  %v1203_v55 = vmax.f32 %v829_v50, 0.0  ;;  %v9914_v59 = vld [vmem:[%s13131_s0 + $0x244] ss:$8 sps:$4 sm:$0xff]  }
 0x138   :  { %v9919_v6 = vld [vmem:[%s13131_s0 + $0x240] ss:$8 sps:$4 sm:$0xff]  }
 0x139   :  { %1043 = vmatmul.mubr.bf16.gmra.mrb[124].mxu0 %v9871_v61  ;;  %v9913_v61 = vld [vmem:[%s13132_s3 + $0x124] ss:$8 sps:$4 sm:$0xff]   ;;  %v1855_v63 = vpack.c.bf16 %v1203_v55, %v1203_v55 }
 0x13a   :  { %1619 = vmatpush1.bf16.msra.mxu1 %v9868_v2  ;;  %1050 = vmatprep.mubr.bf16.mxu0 %v9875_v3  ;;  %v832_v2 = vadd.f32 %v10816_v16, %v10899_v4  ;;  %v9918_v3 = vld [vmem:[%s13132_s3 + $0x134] ss:$8 sps:$4 sm:$0xff]  }
 0x13b   :  { %1680 = vmatprep.subr.bf16.mxu1 %v9874_v5  ;;  %v9923_v4 = vld [vmem:[%s13131_s0 + $0x254] ss:$8 sps:$4 sm:$0xff]  }
 0x13c   :  { %v10915_v12 = vpop.f32.mrb[20].mxu0  ;;  %v1204_v10 = vmax.f32 %v832_v2, 0.0 }
 0x13d   :  { %8848 = vmatmul.mubr.msk.bf16.vlgmr.msra.gmra.mrb[12].mxu1 %vm1344_vm0, %v1587_v7  ;;  %v838_v13 = vpop.f32.mrb[21].mxu0 }
 0x13e   :  { %1681 = vmatpush1.bf16.msra.mxu1 %v9872_v8  ;;  %1712 = vmatprep.mubr.bf16.mxu1 %v13138_v0  ;;  %v10925_v17 = vpop.f32.mrb[22].mxu0  ;;  %v9916_v8 = vld [vmem:[%s13132_s3 + $0x130] ss:$8 sps:$4 sm:$0xff]   ;;  %v1927_v18 = vpack.c.bf16 %v1204_v10, %v1204_v10 }
 0x13f   :  { %1682 = vmatprep.subr.bf16.mxu1 %v9879_v9  ;;  %v841_v20 = vpop.f32.mrb[23].mxu0 }
 0x141   :  { %1051 = vmatmul.mubr.bf16.gmra.mrb[128].mxu0 %v9880_v11  ;;  %v9922_v11 = vld [vmem:[%s13132_s3 + $0x144] ss:$8 sps:$4 sm:$0xff]  }
 0x142   :  { %1683 = vmatpush1.bf16.msra.mxu1 %v9877_v14  ;;  %1058 = vmatprep.mubr.bf16.mxu0 %v9887_v15  ;;  %v837_v14 = vadd.f32 %v10816_v16, %v10915_v12  ;;  %v9920_v15 = vld [vmem:[%s13132_s3 + $0x140] ss:$8 sps:$4 sm:$0xff]   ;;  %v9928_v12 = vld [vmem:[%s13131_s0 + $0x250] ss:$8 sps:$4 sm:$0xff]  }
 0x143   :  { %1750 = vmatprep.subr.bf16.mxu1 %v9886_v19  ;;  %v9927_v19 = vld [vmem:[%s13132_s3 + $0x154] ss:$8 sps:$4 sm:$0xff]  }
 0x144   :  { %v10937_v25 = vpop.f32.mrb[24].mxu0 }
 0x145   :  { %8853 = vmatmul.mubr.msk.bf16.vlgmr.msra.gmra.mrb[16].mxu1 %vm1344_vm0, %v1306_v23  ;;  %v846_v27 = vpop.f32.mrb[25].mxu0  ;;  %v9925_v23 = vld [vmem:[%s13132_s3 + $0x150] ss:$8 sps:$4 sm:$0xff]  }
 0x146   :  { %1751 = vmatpush1.bf16.msra.mxu1 %v9884_v21  ;;  %1782 = vmatprep.mubr.bf16.mxu1 %v13138_v0  ;;  %v10950_v30 = vpop.f32.mrb[26].mxu0  ;;  %v1205_v21 = vmax.f32 %v837_v14, 0.0  ;;  %v9931_v27 = vld [vmem:[%s13132_s3 + $0x164] ss:$8 sps:$4 sm:$0xff]   ;;  %v9963_v14 = vld [vmem:[%s13132_s3 + $0x1d4] ss:$8 sps:$4 sm:$0xff]  }
 0x147   :  { %1752 = vmatprep.subr.bf16.mxu1 %v9891_v22  ;;  %v849_v34 = vpop.f32.mrb[27].mxu0 }
 0x148   :  { %v9936_v34 = vld [vmem:[%s13132_s3 + $0x174] ss:$8 sps:$4 sm:$0xff]  }
 0x149   :  { %1059 = vmatmul.mubr.bf16.gmra.mrb[132].mxu0 %v9892_v26 }
 0x14a   :  { %1753 = vmatpush1.bf16.msra.mxu1 %v9889_v28  ;;  %1066 = vmatprep.mubr.bf16.mxu0 %v9896_v29  ;;  %v1999_v29 = vpack.c.bf16 %v1205_v21, %v1205_v21  ;;  %v9961_v21 = vld [vmem:[%s13132_s3 + $0x1d0] ss:$8 sps:$4 sm:$0xff]  }
 0x14b   :  { %1814 = vmatprep.subr.bf16.mxu1 %v9895_v32  ;;  %v840_v32 = vadd.f32 %v10816_v16, %v10925_v17  ;;  %v9941_v17 = vld [vmem:[%s13131_s0 + $0x274] ss:$8 sps:$4 sm:$0xff]  }
 0x14c   :  { %v10969_v42 = vpop.f32.mrb[28].mxu0 }
 0x14d   :  { %8862 = vmatmul.mubr.msk.bf16.vlgmr.msra.gmra.mrb[20].mxu1 %vm1344_vm0, %v1721_v38  ;;  %v854_v43 = vpop.f32.mrb[29].mxu0  ;;  %v1206_v41 = vmax.f32 %v840_v32, 0.0  ;;  %v853_v10 = vadd.f32 %v10816_v16, %v10969_v42  ;;  %v9964_v42 = vld [vmem:[%s13131_s0 + $0x290] ss:$8 sps:$4 sm:$0xff]  }
 0x14e   :  { %1815 = vmatpush1.bf16.msra.mxu1 %v9893_v35  ;;  %1846 = vmatprep.mubr.bf16.mxu1 %v13138_v0  ;;  %v10982_v46 = vpop.f32.mrb[30].mxu0 }
 0x14f   :  { %1816 = vmatprep.subr.bf16.mxu1 %v9900_v39  ;;  %v857_v49 = vpop.f32.mrb[31].mxu0  ;;  %v9934_v39 = vld [vmem:[%s13132_s3 + $0x170] ss:$8 sps:$4 sm:$0xff]   ;;  %v2071_v47 = vpack.c.bf16 %v1206_v41, %v1206_v41  ;;  %v9976_v41 = vld [vmem:[%s13132_s3 + $0x204] ss:$8 sps:$4 sm:$0xff]  }
 0x151   :  { %1067 = vmatmul.mubr.bf16.gmra.mrb[136].mxu0 %v9901_v33  ;;  %v9940_v33 = vld [vmem:[%s13132_s3 + $0x184] ss:$8 sps:$4 sm:$0xff]  }
 0x152   :  { %1817 = vmatpush1.bf16.msra.mxu1 %v9898_v44  ;;  %1074 = vmatprep.mubr.bf16.mxu0 %v9905_v45  ;;  %v845_v44 = vadd.f32 %v10816_v16, %v10937_v25  ;;  %v9938_v45 = vld [vmem:[%s13132_s3 + $0x180] ss:$8 sps:$4 sm:$0xff]   ;;  %v9946_v25 = vld [vmem:[%s13131_s0 + $0x270] ss:$8 sps:$4 sm:$0xff]  }
 0x153   :  { %1884 = vmatprep.subr.bf16.mxu1 %v9904_v48  ;;  %v9945_v48 = vld [vmem:[%s13132_s3 + $0x194] ss:$8 sps:$4 sm:$0xff]  }
 0x154   :  { %v10995_v54 = vpop.f32.mrb[32].mxu0  ;;  %v1207_v50 = vmax.f32 %v845_v44, 0.0  ;;  %v9974_v44 = vld [vmem:[%s13132_s3 + $0x200] ss:$8 sps:$4 sm:$0xff]  }
 0x155   :  { %8867 = vmatmul.mubr.msk.bf16.vlgmr.msra.gmra.mrb[24].mxu1 %vm1344_vm0, %v1312_v52  ;;  %v862_v57 = vpop.f32.mrb[33].mxu0  ;;  %v9943_v52 = vld [vmem:[%s13132_s3 + $0x190] ss:$8 sps:$4 sm:$0xff]  }
 0x156   :  { %1885 = vmatpush1.bf16.msra.mxu1 %v9902_v51  ;;  %1916 = vmatprep.mubr.bf16.mxu1 %v13138_v0  ;;  %v11008_v60 = vpop.f32.mrb[34].mxu0 }
 0x157   :  { %1886 = vmatprep.subr.bf16.mxu1 %v9909_v53  ;;  %v865_v62 = vpop.f32.mrb[35].mxu0  ;;  %v9950_v53 = vld [vmem:[%s13131_s0 + $0x284] ss:$8 sps:$4 sm:$0xff]  }
 0x158   :  { %v9954_v62 = vld [vmem:[%s13132_s3 + $0x1b4] ss:$8 sps:$4 sm:$0xff]  }
 0x159   :  { %1075 = vmatmul.mubr.bf16.gmra.mrb[140].mxu0 %v9910_v56  ;;  %v9949_v56 = vld [vmem:[%s13132_s3 + $0x1a4] ss:$8 sps:$4 sm:$0xff]  }
 0x15a   :  { %1887 = vmatpush1.bf16.msra.mxu1 %v9907_v58  ;;  %1082 = vmatprep.mubr.bf16.mxu0 %v9914_v59  ;;  %v2143_v58 = vpack.c.bf16 %v1207_v50, %v1207_v50  ;;  %v9947_v59 = vld [vmem:[%s13132_s3 + $0x1a0] ss:$8 sps:$4 sm:$0xff]  }
 0x15b   :  { %1956 = vmatprep.subr.bf16.mxu1 %v9913_v61  ;;  %v848_v61 = vadd.f32 %v10816_v16, %v10950_v30  ;;  %v9959_v30 = vld [vmem:[%s13131_s0 + $0x294] ss:$8 sps:$4 sm:$0xff]  }
 0x15c   :  { %v11021_v5 = vpop.f32.mrb[36].mxu0 }
 0x15d   :  { %8876 = vmatmul.mubr.msk.bf16.vlgmr.msra.gmra.mrb[28].mxu1 %vm1344_vm0, %v1855_v63  ;;  %v870_v7 = vpop.f32.mrb[37].mxu0 }
 0x15e   :  { %1957 = vmatpush1.bf16.msra.mxu1 %v9911_v1  ;;  %1988 = vmatprep.mubr.bf16.mxu1 %v13138_v0  ;;  %v11034_v9 = vpop.f32.mrb[38].mxu0  ;;  %v9955_v1 = vld [vmem:[%s13131_s0 + $0x280] ss:$8 sps:$4 sm:$0xff]   ;;  %v1208_v7 = vmax.f32 %v848_v61, 0.0  ;;  %v864_v61 = vadd.f32 %v10816_v16, %v11008_v60  ;;  %v9995_v60 = vld [vmem:[%s13131_s0 + $0x2d4] ss:$8 sps:$4 sm:$0xff]  }
 0x15f   :  { %1958 = vmatprep.subr.bf16.mxu1 %v9918_v3  ;;  %v873_v13 = vpop.f32.mrb[39].mxu0  ;;  %v9952_v3 = vld [vmem:[%s13132_s3 + $0x1b0] ss:$8 sps:$4 sm:$0xff]  }
 0x160   :  { %v2215_v13 = vpack.c.bf16 %v1208_v7, %v1208_v7 }
 0x161   :  { %1083 = vmatmul.mubr.bf16.gmra.mrb[144].mxu0 %v9919_v6 }
 0x162   :  { %1959 = vmatpush1.bf16.msra.mxu1 %v9916_v8  ;;  %1090 = vmatprep.mubr.bf16.mxu0 %v9923_v4  ;;  %v9958_v8 = vld [vmem:[%s13132_s3 + $0x1c4] ss:$8 sps:$4 sm:$0xff]  }
 0x163   :  { %2028 = vmatprep.subr.bf16.mxu1 %v9922_v11  ;;  %v9956_v11 = vld [vmem:[%s13132_s3 + $0x1c0] ss:$8 sps:$4 sm:$0xff]  }
 0x164   :  { %v11047_v20 = vpop.f32.mrb[40].mxu0 }
 0x165   :  { %8885 = vmatmul.mubr.msk.bf16.vlgmr.msra.gmra.mrb[32].mxu1 %vm1344_vm0, %v1927_v18  ;;  %v878_v22 = vpop.f32.mrb[41].mxu0  ;;  %v1209_v18 = vmax.f32 %v853_v10, 0.0 }
 0x166   :  { %2029 = vmatpush1.bf16.msra.mxu1 %v9920_v15  ;;  %2060 = vmatprep.mubr.bf16.mxu1 %v13138_v0  ;;  %v11060_v26 = vpop.f32.mrb[42].mxu0 }
 0x167   :  { %2030 = vmatprep.subr.bf16.mxu1 %v9927_v19  ;;  %v881_v28 = vpop.f32.mrb[43].mxu0 }
 0x168   :  { %v9965_v28 = vld [vmem:[%s13132_s3 + $0x1e0] ss:$8 sps:$4 sm:$0xff]  }
 0x169   :  { %1091 = vmatmul.mubr.bf16.gmra.mrb[148].mxu0 %v9928_v12  ;;  %v9968_v12 = vld [vmem:[%s13131_s0 + $0x2a4] ss:$8 sps:$4 sm:$0xff]  }
 0x16a   :  { %2031 = vmatpush1.bf16.msra.mxu1 %v9925_v23  ;;  %1098 = vmatprep.mubr.bf16.mxu0 %v9932_v24  ;;  %v9967_v23 = vld [vmem:[%s13132_s3 + $0x1e4] ss:$8 sps:$4 sm:$0xff]  }
 0x16b   :  { %2100 = vmatprep.subr.bf16.mxu1 %v9931_v27  ;;  %v2287_v27 = vpack.c.bf16 %v1209_v18, %v1209_v18  ;;  %v9999_v18 = vld [vmem:[%s13132_s3 + $0x254] ss:$8 sps:$4 sm:$0xff]  }
 0x16c   :  { %v11073_v35 = vpop.f32.mrb[44].mxu0 }
 0x16d   :  { %8894 = vmatmul.mubr.msk.bf16.vlgmr.msra.gmra.mrb[36].mxu1 %vm1344_vm0, %v1999_v29  ;;  %v886_v38 = vpop.f32.mrb[45].mxu0  ;;  %v856_v29 = vadd.f32 %v10816_v16, %v10982_v46  ;;  %v9977_v46 = vld [vmem:[%s13131_s0 + $0x2b4] ss:$8 sps:$4 sm:$0xff]  }
 0x16e   :  { %2101 = vmatpush1.bf16.msra.mxu1 %v9929_v31  ;;  %2132 = vmatprep.mubr.bf16.mxu1 %v13138_v0  ;;  %v11086_v40 = vpop.f32.mrb[46].mxu0  ;;  %v9972_v31 = vld [vmem:[%s13132_s3 + $0x1f4] ss:$8 sps:$4 sm:$0xff]   ;;  %v9970_v38 = vld [vmem:[%s13132_s3 + $0x1f0] ss:$8 sps:$4 sm:$0xff]  }
 0x16f   :  { %2102 = vmatprep.subr.bf16.mxu1 %v9936_v34  ;;  %v889_v43 = vpop.f32.mrb[47].mxu0  ;;  %v9973_v34 = vld [vmem:[%s13131_s0 + $0x2a0] ss:$8 sps:$4 sm:$0xff]  }
 0x170   :  { %v861_v43 = vadd.f32 %v10816_v16, %v10995_v54  ;;  %v9982_v54 = vld [vmem:[%s13131_s0 + $0x2b0] ss:$8 sps:$4 sm:$0xff]  }
 0x171   :  { %1099 = vmatmul.mubr.bf16.gmra.mrb[152].mxu0 %v9937_v36 }
 0x172   :  { %2103 = vmatpush1.bf16.msra.mxu1 %v9934_v39  ;;  %1106 = vmatprep.mubr.bf16.mxu0 %v9941_v17  ;;  %v1210_v17 = vmax.f32 %v856_v29, 0.0  ;;  %v1211_v50 = vmax.f32 %v861_v43, 0.0 }
 0x173   :  { %2172 = vmatprep.subr.bf16.mxu1 %v9940_v33 }
 0x174   :  { %v11099_v49 = vpop.f32.mrb[48].mxu0 }
 0x175   :  { %8903 = vmatmul.mubr.msk.bf16.vlgmr.msra.gmra.mrb[40].mxu1 %vm1344_vm0, %v2071_v47  ;;  %v894_v51 = vpop.f32.mrb[49].mxu0  ;;  %v9981_v47 = vld [vmem:[%s13132_s3 + $0x214] ss:$8 sps:$4 sm:$0xff]  }
 0x176   :  { %2173 = vmatpush1.bf16.msra.mxu1 %v9938_v45  ;;  %2204 = vmatprep.mubr.bf16.mxu1 %v13138_v0  ;;  %v11112_v55 = vpop.f32.mrb[50].mxu0  ;;  %v2359_v45 = vpack.c.bf16 %v1210_v17, %v1210_v17  ;;  %v9979_v51 = vld [vmem:[%s13132_s3 + $0x210] ss:$8 sps:$4 sm:$0xff]  }
 0x177   :  { %2174 = vmatprep.subr.bf16.mxu1 %v9945_v48  ;;  %v897_v57 = vpop.f32.mrb[51].mxu0 }
 0x179   :  { %1107 = vmatmul.mubr.bf16.gmra.mrb[156].mxu0 %v9946_v25 }
 0x17a   :  { %2175 = vmatpush1.bf16.msra.mxu1 %v9943_v52  ;;  %1114 = vmatprep.mubr.bf16.mxu0 %v9950_v53  ;;  %v9986_v52 = vld [vmem:[%s13131_s0 + $0x2c4] ss:$8 sps:$4 sm:$0xff]  }
 0x17b   :  { %2244 = vmatprep.subr.bf16.mxu1 %v9949_v56  ;;  %v9985_v56 = vld [vmem:[%s13132_s3 + $0x224] ss:$8 sps:$4 sm:$0xff]  }
 0x17c   :  { %v11125_v63 = vpop.f32.mrb[52].mxu0 }
 0x17d   :  { %8912 = vmatmul.mubr.msk.bf16.vlgmr.msra.gmra.mrb[44].mxu1 %vm1344_vm0, %v2143_v58  ;;  %v902_v2 = vpop.f32.mrb[53].mxu0  ;;  %v2431_v58 = vpack.c.bf16 %v1211_v50, %v1211_v50  ;;  %v10120_v50 = vld [vmem:[%s13132_s3 + $0x724] ss:$8 sps:$4 sm:$0xff]  }
 0x17e   :  { %2245 = vmatpush1.bf16.msra.mxu1 %v9947_v59  ;;  %2276 = vmatprep.mubr.bf16.mxu1 %v13138_v0  ;;  %v11138_v6 = vpop.f32.mrb[54].mxu0  ;;  %v9983_v59 = vld [vmem:[%s13132_s3 + $0x220] ss:$8 sps:$4 sm:$0xff]  }
 0x17f   :  { %2246 = vmatprep.subr.bf16.mxu1 %v9954_v62  ;;  %v905_v4 = vpop.f32.mrb[55].mxu0  ;;  %v9990_v62 = vld [vmem:[%s13132_s3 + $0x234] ss:$8 sps:$4 sm:$0xff]   ;;  %v9991_v2 = vld [vmem:[%s13131_s0 + $0x2c0] ss:$8 sps:$4 sm:$0xff]   ;;  %5412 = vmatprep.subr.bf16.mxu0 %v10120_v50 }
 0x180   :  { %v9994_v4 = vld [vmem:[%s13132_s3 + $0x244] ss:$8 sps:$4 sm:$0xff]  }
 0x181   :  { %1115 = vmatmul.mubr.bf16.gmra.mrb[160].mxu0 %v9955_v1 }
 0x182   :  { %2247 = vmatpush1.bf16.msra.mxu1 %v9952_v3  ;;  %1122 = vmatprep.mubr.bf16.mxu0 %v9959_v30  ;;  %v9988_v30 = vld [vmem:[%s13132_s3 + $0x230] ss:$8 sps:$4 sm:$0xff]  }
 0x183   :  { %2316 = vmatprep.subr.bf16.mxu1 %v9958_v8  ;;  %v1212_v8 = vmax.f32 %v864_v61, 0.0  ;;  %v10021_v61 = vld [vmem:[%s13132_s3 + $0x2a4] ss:$8 sps:$4 sm:$0xff]  }
 0x184   :  { %v11151_v15 = vpop.f32.mrb[56].mxu0 }
 0x185   :  { %8921 = vmatmul.mubr.msk.bf16.vlgmr.msra.gmra.mrb[48].mxu1 %vm1344_vm0, %v2215_v13  ;;  %v910_v19 = vpop.f32.mrb[57].mxu0  ;;  %v9992_v13 = vld [vmem:[%s13132_s3 + $0x240] ss:$8 sps:$4 sm:$0xff]  }
 0x186   :  { %2317 = vmatpush1.bf16.msra.mxu1 %v9956_v11  ;;  %2348 = vmatprep.mubr.bf16.mxu1 %v13138_v0  ;;  %v11164_v22 = vpop.f32.mrb[58].mxu0  ;;  %v869_v11 = vadd.f32 %v10816_v16, %v11021_v5  ;;  %v10000_v5 = vld [vmem:[%s13131_s0 + $0x2d0] ss:$8 sps:$4 sm:$0xff]  }
 0x187   :  { %2318 = vmatprep.subr.bf16.mxu1 %v9963_v14  ;;  %v913_v24 = vpop.f32.mrb[59].mxu0  ;;  %v2503_v14 = vpack.c.bf16 %v1212_v8, %v1212_v8  ;;  %v10026_v8 = vld [vmem:[%s13132_s3 + $0x2b4] ss:$8 sps:$4 sm:$0xff]  }
 0x188   :  { %v1213_v19 = vmax.f32 %v869_v11, 0.0 }
 0x189   :  { %1123 = vmatmul.mubr.bf16.gmra.mrb[164].mxu0 %v9964_v42 }
 0x18a   :  { %2319 = vmatpush1.bf16.msra.mxu1 %v9961_v21  ;;  %1130 = vmatprep.mubr.bf16.mxu0 %v9968_v12  ;;  %v9997_v12 = vld [vmem:[%s13132_s3 + $0x250] ss:$8 sps:$4 sm:$0xff]   ;;  %v2575_v29 = vpack.c.bf16 %v1213_v19, %v1213_v19  ;;  %v10030_v19 = vld [vmem:[%s13132_s3 + $0x2c4] ss:$8 sps:$4 sm:$0xff]  }
 0x18b   :  { %2388 = vmatprep.subr.bf16.mxu1 %v9967_v23  ;;  %v10004_v23 = vld [vmem:[%s13131_s0 + $0x2e4] ss:$8 sps:$4 sm:$0xff]  }
 0x18c   :  { %v11177_v32 = vpop.f32.mrb[60].mxu0 }
 0x18d   :  { %8930 = vmatmul.mubr.msk.bf16.vlgmr.msra.gmra.mrb[52].mxu1 %vm1344_vm0, %v2287_v27  ;;  %v918_v36 = vpop.f32.mrb[61].mxu0  ;;  %v10003_v27 = vld [vmem:[%s13132_s3 + $0x264] ss:$8 sps:$4 sm:$0xff]  }
 0x18e   :  { %2389 = vmatpush1.bf16.msra.mxu1 %v9965_v28  ;;  %2420 = vmatprep.mubr.bf16.mxu1 %v13138_v0  ;;  %v11190_v39 = vpop.f32.mrb[62].mxu0  ;;  %v10008_v36 = vld [vmem:[%s13132_s3 + $0x274] ss:$8 sps:$4 sm:$0xff]  }
 0x18f   :  { %2390 = vmatprep.subr.bf16.mxu1 %v9972_v31  ;;  %v921_v33 = vpop.f32.mrb[63].mxu0  ;;  %v10001_v31 = vld [vmem:[%s13132_s3 + $0x260] ss:$8 sps:$4 sm:$0xff]  }
 0x191   :  { %1131 = vmatmul.mubr.bf16.gmra.mrb[168].mxu0 %v9973_v34  ;;  %v872_v34 = vadd.f32 %v10816_v16, %v11034_v9  ;;  %v10013_v9 = vld [vmem:[%s13131_s0 + $0x2f4] ss:$8 sps:$4 sm:$0xff]  }
 0x192   :  { %2391 = vmatpush1.bf16.msra.mxu1 %v9970_v38  ;;  %1138 = vmatprep.mubr.bf16.mxu0 %v9977_v46  ;;  %v10009_v46 = vld [vmem:[%s13131_s0 + $0x2e0] ss:$8 sps:$4 sm:$0xff]  }
 0x193   :  { %2460 = vmatprep.subr.bf16.mxu1 %v9976_v41  ;;  %v10006_v41 = vld [vmem:[%s13132_s3 + $0x270] ss:$8 sps:$4 sm:$0xff]   ;;  %v1214_v43 = vmax.f32 %v872_v34, 0.0 }
 0x194   :  { %v11203_v48 = vpop.f32.mrb[64].mxu0  ;;  %v10033_v34 = vld [vmem:[%s13132_s3 + $0x2d0] ss:$8 sps:$4 sm:$0xff]  }
 0x195   :  { %8939 = vmatmul.mubr.msk.bf16.vlgmr.msra.gmra.mrb[56].mxu1 %vm1344_vm0, %v2359_v45  ;;  %v926_v25 = vpop.f32.mrb[65].mxu0 }
 0x196   :  { %2461 = vmatpush1.bf16.msra.mxu1 %v9974_v44  ;;  %2492 = vmatprep.mubr.bf16.mxu1 %v13138_v0  ;;  %v11216_v53 = vpop.f32.mrb[66].mxu0  ;;  %v10012_v44 = vld [vmem:[%s13132_s3 + $0x284] ss:$8 sps:$4 sm:$0xff]   ;;  %v2647_v25 = vpack.c.bf16 %v1214_v43, %v1214_v43  ;;  %v10037_v43 = vld [vmem:[%s13132_s3 + $0x2e0] ss:$8 sps:$4 sm:$0xff]  }
 0x197   :  { %2462 = vmatprep.subr.bf16.mxu1 %v9981_v47  ;;  %v929_v57 = vpop.f32.mrb[67].mxu0  ;;  %v877_v47 = vadd.f32 %v10816_v16, %v11047_v20  ;;  %v10018_v20 = vld [vmem:[%s13131_s0 + $0x2f0] ss:$8 sps:$4 sm:$0xff]  }
 0x198   :  { %v10015_v57 = vld [vmem:[%s13132_s3 + $0x290] ss:$8 sps:$4 sm:$0xff]  }
 0x199   :  { %1139 = vmatmul.mubr.bf16.gmra.mrb[172].mxu0 %v9982_v54  ;;  %v10010_v54 = vld [vmem:[%s13132_s3 + $0x280] ss:$8 sps:$4 sm:$0xff]   ;;  %v1215_v16 = vmax.f32 %v877_v47, 0.0 }
 0x19a   :  { %2463 = vmatpush1.bf16.msra.mxu1 %v9979_v51  ;;  %1146 = vmatprep.mubr.bf16.mxu0 %v9986_v52  ;;  %v10017_v51 = vld [vmem:[%s13132_s3 + $0x294] ss:$8 sps:$4 sm:$0xff]  }
 0x19b   :  { %2532 = vmatprep.subr.bf16.mxu1 %v9985_v56 }
 0x19c   :  { %v11229_v1 = vpop.f32.mrb[68].mxu0 }
 0x19d   :  { %8948 = vmatmul.mubr.msk.bf16.vlgmr.msra.gmra.mrb[60].mxu1 %vm1344_vm0, %v2431_v58  ;;  %v934_v3 = vpop.f32.mrb[69].mxu0  ;;  %v10022_v58 = vld [vmem:[%s13131_s0 + $0x304] ss:$8 sps:$4 sm:$0xff]  }
 0x19e   :  { %2533 = vmatpush1.bf16.msra.mxu1 %v9983_v59  ;;  %2564 = vmatprep.mubr.bf16.mxu1 %v13138_v0  ;;  %v11242_v7 = vpop.f32.mrb[70].mxu0  ;;  %v10019_v3 = vld [vmem:[%s13132_s3 + $0x2a0] ss:$8 sps:$4 sm:$0xff]  }
 0x19f   :  { %2534 = vmatprep.subr.bf16.mxu1 %v9990_v62  ;;  %v937_v10 = vpop.f32.mrb[71].mxu0 }
 0x1a0   :  { %v10027_v10 = vld [vmem:[%s13131_s0 + $0x300] ss:$8 sps:$4 sm:$0xff]  }
 0x1a1   :  { %1147 = vmatmul.mubr.bf16.gmra.mrb[176].mxu0 %v9991_v2  ;;  %v2719_v2 = vpack.c.bf16 %v1215_v16, %v1215_v16 }
 0x1a2   :  { %2535 = vmatpush1.bf16.msra.mxu1 %v9988_v30  ;;  %1154 = vmatprep.mubr.bf16.mxu0 %v9995_v60  ;;  %v11334_v30 = vld [vmem:[%s13133_s2] ss:$0 sm:$0xff] }
 0x1a3   :  { %2604 = vmatprep.subr.bf16.mxu1 %v9994_v4  ;;  %v880_v60 = vadd.f32 %v11334_v30, %v11060_v26  ;;  %v10031_v26 = vld [vmem:[%s13131_s0 + $0x314] ss:$8 sps:$4 sm:$0xff]  }
 0x1a4   :  { %v11255_v42 = vpop.f32.mrb[72].mxu0 }
 0x1a5   :  { %8957 = vmatmul.mubr.msk.bf16.vlgmr.msra.gmra.mrb[64].mxu1 %vm1344_vm0, %v2503_v14  ;;  %v942_v21 = vpop.f32.mrb[73].mxu0 }
 0x1a6   :  { %2605 = vmatpush1.bf16.msra.mxu1 %v9992_v13  ;;  %2636 = vmatprep.mubr.bf16.mxu1 %v13138_v0  ;;  %v11268_v24 = vpop.f32.mrb[74].mxu0  ;;  %v10024_v13 = vld [vmem:[%s13132_s3 + $0x2b0] ss:$8 sps:$4 sm:$0xff]   ;;  %v885_v21 = vadd.f32 %v11334_v30, %v11073_v35 }
 0x1a7   :  { %2606 = vmatprep.subr.bf16.mxu1 %v9999_v18  ;;  %v945_v28 = vpop.f32.mrb[75].mxu0  ;;  %v1216_v18 = vmax.f32 %v880_v60, 0.0  ;;  %v10036_v35 = vld [vmem:[%s13131_s0 + $0x310] ss:$8 sps:$4 sm:$0xff]  }
 0x1a9   :  { %1155 = vmatmul.mubr.bf16.gmra.mrb[180].mxu0 %v10000_v5 }
 0x1aa   :  { %2607 = vmatpush1.bf16.msra.mxu1 %v9997_v12  ;;  %1162 = vmatprep.mubr.bf16.mxu0 %v10004_v23  ;;  %v10028_v12 = vld [vmem:[%s13132_s3 + $0x2c0] ss:$8 sps:$4 sm:$0xff]   ;;  %v2791_v23 = vpack.c.bf16 %v1216_v18, %v1216_v18 }
 0x1ab   :  { %2676 = vmatprep.subr.bf16.mxu1 %v10003_v27  ;;  %v10035_v27 = vld [vmem:[%s13132_s3 + $0x2d4] ss:$8 sps:$4 sm:$0xff]  }
 0x1ac   :  { %v11281_v38 = vpop.f32.mrb[76].mxu0 }
 0x1ad   :  { %8966 = vmatmul.mubr.msk.bf16.vlgmr.msra.gmra.mrb[68].mxu1 %vm1344_vm0, %v2575_v29  ;;  %v950_v17 = vpop.f32.mrb[77].mxu0  ;;  %v1217_v29 = vmax.f32 %v885_v21, 0.0  ;;  %v896_v21 = vadd.f32 %v11334_v30, %v11112_v55 }
 0x1ae   :  { %2677 = vmatpush1.bf16.msra.mxu1 %v10001_v31  ;;  %2708 = vmatprep.mubr.bf16.mxu1 %v13138_v0  ;;  %v11294_v33 = vpop.f32.mrb[78].mxu0  ;;  %v10039_v17 = vld [vmem:[%s13132_s3 + $0x2e4] ss:$8 sps:$4 sm:$0xff]  }
 0x1af   :  { %2678 = vmatprep.subr.bf16.mxu1 %v10008_v36  ;;  %v953_v45 = vpop.f32.mrb[79].mxu0  ;;  %v1220_v55 = vmax.f32 %v896_v21, 0.0 }
 0x1b0   :  { %v888_v45 = vadd.f32 %v11334_v30, %v11086_v40  ;;  %v10118_v40 = vld [vmem:[%s13132_s3 + $0x720] ss:$8 sps:$4 sm:$0xff]  }
 0x1b1   :  { %1163 = vmatmul.mubr.bf16.gmra.mrb[184].mxu0 %v10009_v46  ;;  %v813_v46 = vadd.f32 %v11334_v30, %v10852_v37  ;;  %v10045_v37 = vld [vmem:[%s13132_s3 + $0x2f4] ss:$8 sps:$4 sm:$0xff]  }
 0x1b2   :  { %2679 = vmatpush1.bf16.msra.mxu1 %v10006_v41  ;;  %1170 = vmatprep.mubr.bf16.mxu0 %v10013_v9  ;;  %v2863_v9 = vpack.c.bf16 %v1217_v29, %v1217_v29  ;;  %v1218_v16 = vmax.f32 %v888_v45, 0.0  ;;  %v10055_v29 = vld [vmem:[%s13132_s3 + $0x330] ss:$8 sps:$4 sm:$0xff]  }
 0x1b3   :  { %2748 = vmatprep.subr.bf16.mxu1 %v10012_v44  ;;  %v1199_v44 = vmax.f32 %v813_v46, 0.0  ;;  %v901_v46 = vadd.f32 %v11334_v30, %v11125_v63  ;;  %v10061_v63 = vld [vmem:[%s13132_s3 + $0x350] ss:$8 sps:$4 sm:$0xff]  }
 0x1b4   :  { %v11310_v52 = vpop.f32.mrb[80].mxu0 }
 0x1b5   :  { %8975 = vmatmul.mubr.msk.bf16.vlgmr.msra.gmra.mrb[72].mxu1 %vm1344_vm0, %v2647_v25  ;;  %v958_v56 = vpop.f32.mrb[81].mxu0 }
 0x1b6   :  { %2749 = vmatpush1.bf16.msra.mxu1 %v10010_v54  ;;  %2780 = vmatprep.mubr.bf16.mxu1 %v13138_v0  ;;  %v11323_v59 = vpop.f32.mrb[82].mxu0  ;;  %v10043_v54 = vld [vmem:[%s13132_s3 + $0x2f0] ss:$8 sps:$4 sm:$0xff]  }
 0x1b7   :  { %2750 = vmatprep.subr.bf16.mxu1 %v10017_v51  ;;  %v961_v62 = vpop.f32.mrb[83].mxu0  ;;  %v1318_v51 = vpack.c.bf16 %v1199_v44, %v1199_v44  ;;  %v1221_v44 = vmax.f32 %v901_v46, 0.0 }
 0x1b8   :  { %v2935_v62 = vpack.c.bf16 %v1218_v16, %v1218_v16  ;;  %v904_v16 = vadd.f32 %v11334_v30, %v11138_v6 }
 0x1b9   :  { %1171 = vmatmul.mubr.bf16.gmra.mrb[188].mxu0 %v10018_v20  ;;  %v10048_v20 = vld [vmem:[%s13132_s3 + $0x304] ss:$8 sps:$4 sm:$0xff]  }
 0x1ba   :  { %2751 = vmatpush1.bf16.msra.mxu1 %v10015_v57  ;;  %1178 = vmatprep.mubr.bf16.mxu0 %v10022_v58  ;;  %v10126_v57 = vld [vmem:[%s13132_s3 + $0x734] ss:$8 sps:$4 sm:$0xff]   ;;  %v893_v58 = vadd.f32 %v11334_v30, %v11099_v49  ;;  %v10132_v49 = vld [vmem:[%s13132_s3 + $0x764] ss:$8 sps:$4 sm:$0xff]  }
 0x1bb   :  { %2820 = vmatprep.subr.bf16.mxu1 %v10021_v61  ;;  %v10046_v61 = vld [vmem:[%s13132_s3 + $0x300] ss:$8 sps:$4 sm:$0xff]  }
 0x1bc   :  { %v11341_v4 = vpop.f32.mrb[84].mxu0 }
 0x1bd   :  { %8984 = vmatmul.mubr.msk.bf16.vlgmr.msra.gmra.mrb[76].mxu1 %vm1344_vm0, %v2719_v2  ;;  %v966_v11 = vpop.f32.mrb[85].mxu0  ;;  %v10051_v2 = vld [vmem:[%s13132_s3 + $0x314] ss:$8 sps:$4 sm:$0xff]  }
 0x1be   :  { %2821 = vmatpush1.bf16.msra.mxu1 %v10019_v3  ;;  %2852 = vmatprep.mubr.bf16.mxu1 %v13138_v0  ;;  %v11354_v14 = vpop.f32.mrb[86].mxu0  ;;  %v10124_v3 = vld [vmem:[%s13132_s3 + $0x730] ss:$8 sps:$4 sm:$0xff]  }
 0x1bf   :  { %2822 = vmatprep.subr.bf16.mxu1 %v10026_v8  ;;  %v969_v5 = vpop.f32.mrb[87].mxu0  ;;  %v1219_v8 = vmax.f32 %v893_v58, 0.0  ;;  %v10049_v11 = vld [vmem:[%s13132_s3 + $0x310] ss:$8 sps:$4 sm:$0xff]  }
 0x1c0   :  { %v10052_v5 = vld [vmem:[%s13132_s3 + $0x320] ss:$8 sps:$4 sm:$0xff]  }
 0x1c1   :  { %1179 = vmatmul.mubr.bf16.gmra.mrb[192].mxu0 %v10027_v10 }
 0x1c2   :  { %2823 = vmatpush1.bf16.msra.mxu1 %v10024_v13  ;;  %1186 = vmatprep.mubr.bf16.mxu0 %v10031_v26  ;;  %v10054_v26 = vld [vmem:[%s13132_s3 + $0x324] ss:$8 sps:$4 sm:$0xff]  }
 0x1c3   :  { %2892 = vmatprep.subr.bf16.mxu1 %v10030_v19  ;;  %v3007_v19 = vpack.c.bf16 %v1219_v8, %v1219_v8 }
 0x1c4   :  { %v11367_v28 = vpop.f32.mrb[88].mxu0 }
 0x1c5   :  { %8993 = vmatmul.mubr.msk.bf16.vlgmr.msra.gmra.mrb[80].mxu1 %vm1344_vm0, %v2791_v23  ;;  %v974_v31 = vpop.f32.mrb[89].mxu0 }
 0x1c6   :  { %2893 = vmatpush1.bf16.msra.mxu1 %v10028_v12  ;;  %2924 = vmatprep.mubr.bf16.mxu1 %v13138_v0  ;;  %v11377_v36 = vpop.f32.mrb[90].mxu0  ;;  %v10057_v12 = vld [vmem:[%s13132_s3 + $0x334] ss:$8 sps:$4 sm:$0xff]   ;;  %v10060_v31 = vld [vmem:[%s13132_s3 + $0x344] ss:$8 sps:$4 sm:$0xff]  }
 0x1c7   :  { %2894 = vmatprep.subr.bf16.mxu1 %v10035_v27  ;;  %v977_v41 = vpop.f32.mrb[91].mxu0 }
 0x1c8   :  { %v3079_v41 = vpack.c.bf16 %v1220_v55, %v1220_v55 }
 0x1c9   :  { %1187 = vmatmul.mubr.bf16.gmra.mrb[196].mxu0 %v10036_v35 }
 0x1ca   :  { %2895 = vmatpush1.bf16.msra.mxu1 %v10033_v34  ;;  %1380 = vmatprep.mubr.bf16.mxu0 %v13138_v0 }
 0x1cb   :  { %2964 = vmatprep.subr.bf16.mxu1 %v10039_v17  ;;  %v10058_v17 = vld [vmem:[%s13132_s3 + $0x340] ss:$8 sps:$4 sm:$0xff]  }
 0x1cc   :  { %v11393_v47 = vpop.f32.mrb[92].mxu0 }
 0x1cd   :  { %9002 = vmatmul.mubr.msk.bf16.vlgmr.msra.gmra.mrb[84].mxu1 %vm1344_vm0, %v2863_v9  ;;  %v982_v50 = vpop.f32.mrb[93].mxu0  ;;  %v10063_v9 = vld [vmem:[%s13132_s3 + $0x354] ss:$8 sps:$4 sm:$0xff]  }
 0x1ce   :  { %2965 = vmatpush1.bf16.msra.mxu1 %v10037_v43  ;;  %2996 = vmatprep.mubr.bf16.mxu1 %v13138_v0  ;;  %v11400_v25 = vpop.f32.mrb[94].mxu0  ;;  %v10066_v50 = vld [vmem:[%s13132_s3 + $0x364] ss:$8 sps:$4 sm:$0xff]  }
 0x1cf   :  { %2966 = vmatprep.subr.bf16.mxu1 %v10045_v37  ;;  %v985_v56 = vpop.f32.mrb[95].mxu0 }
 0x1d1   :  { %8820 = vmatmul.mubr.msk.bf16.vlgmr.msra.gmra.mrb[200].mxu0 %vm1344_vm0, %v1318_v51  ;;  %v10064_v51 = vld [vmem:[%s13132_s3 + $0x360] ss:$8 sps:$4 sm:$0xff]  }
 0x1d2   :  { %2967 = vmatpush1.bf16.msra.mxu1 %v10043_v54  ;;  %5413 = vmatpush1.bf16.msra.mxu0 %v10118_v40  ;;  %v3151_v40 = vpack.c.bf16 %v1221_v44, %v1221_v44 }
 0x1d3   :  { %3036 = vmatprep.subr.bf16.mxu1 %v10048_v20  ;;  %5414 = vmatprep.subr.bf16.mxu0 %v10126_v57  ;;  %v10069_v20 = vld [vmem:[%s13132_s3 + $0x374] ss:$8 sps:$4 sm:$0xff]  }
 0x1d4   :  { %v11423_v60 = vpop.f32.mrb[96].mxu0  ;;  %5444 = vmatprep.mubr.bf16.mxu0 %v13138_v0 }
 0x1d5   :  { %9011 = vmatmul.mubr.msk.bf16.vlgmr.msra.gmra.mrb[88].mxu1 %vm1344_vm0, %v2935_v62  ;;  %v990_v10 = vpop.f32.mrb[97].mxu0  ;;  %v1222_v62 = vmax.f32 %v904_v16, 0.0  ;;  %v10084_v16 = vld [vmem:[%s13132_s3 + $0x3c4] ss:$8 sps:$4 sm:$0xff]  }
 0x1d6   :  { %3037 = vmatpush1.bf16.msra.mxu1 %v10046_v61  ;;  %3068 = vmatprep.mubr.bf16.mxu1 %v13138_v0  ;;  %v11434_v13 = vpop.f32.mrb[98].mxu0  ;;  %v10067_v61 = vld [vmem:[%s13132_s3 + $0x370] ss:$8 sps:$4 sm:$0xff]  }
 0x1d7   :  { %3038 = vmatprep.subr.bf16.mxu1 %v10051_v2  ;;  %v993_v18 = vpop.f32.mrb[99].mxu0  ;;  %5415 = vmatpush1.bf16.msra.mxu0 %v10124_v3  ;;  %v10072_v3 = vld [vmem:[%s13132_s3 + $0x384] ss:$8 sps:$4 sm:$0xff]  }
 0x1d8   :  { %5556 = vmatprep.subr.bf16.mxu0 %v10132_v49  ;;  %v3223_v18 = vpack.c.bf16 %v1222_v62, %v1222_v62 }
 0x1da   :  { %3039 = vmatpush1.bf16.msra.mxu1 %v10049_v11  ;;  %v909_v11 = vadd.f32 %v11334_v30, %v11151_v15  ;;  %v10073_v15 = vld [vmem:[%s13132_s3 + $0x390] ss:$8 sps:$4 sm:$0xff]  }
 0x1db   :  { %3108 = vmatprep.subr.bf16.mxu1 %v10054_v26  ;;  %v10070_v26 = vld [vmem:[%s13132_s3 + $0x380] ss:$8 sps:$4 sm:$0xff]  }
 0x1dc   :  { %v11447_v23 = vpop.f32.mrb[100].mxu0  ;;  %v1223_v21 = vmax.f32 %v909_v11, 0.0 }
 0x1dd   :  { %9020 = vmatmul.mubr.msk.bf16.vlgmr.msra.gmra.mrb[92].mxu1 %vm1344_vm0, %v3007_v19  ;;  %v998_v27 = vpop.f32.mrb[101].mxu0  ;;  %v10075_v19 = vld [vmem:[%s13132_s3 + $0x394] ss:$8 sps:$4 sm:$0xff]  }
 0x1de   :  { %3109 = vmatpush1.bf16.msra.mxu1 %v10052_v5  ;;  %3140 = vmatprep.mubr.bf16.mxu1 %v13138_v0  ;;  %v11454_v35 = vpop.f32.mrb[102].mxu0 }
 0x1df   :  { %3110 = vmatprep.subr.bf16.mxu1 %v10057_v12  ;;  %v1001_v34 = vpop.f32.mrb[103].mxu0 }
 0x1e0   :  { %v3295_v34 = vpack.c.bf16 %v1223_v21, %v1223_v21  ;;  %v10087_v21 = vld [vmem:[%s13132_s3 + $0x3d4] ss:$8 sps:$4 sm:$0xff]  }
 0x1e2   :  { %3111 = vmatpush1.bf16.msra.mxu1 %v10055_v29  ;;  %v10078_v29 = vld [vmem:[%s13132_s3 + $0x3a4] ss:$8 sps:$4 sm:$0xff]  }
 0x1e3   :  { %3180 = vmatprep.subr.bf16.mxu1 %v10060_v31 }
 0x1e4   :  { %v11467_v43 = vpop.f32.mrb[104].mxu0 }
 0x1e5   :  { %9029 = vmatmul.mubr.msk.bf16.vlgmr.msra.gmra.mrb[96].mxu1 %vm1344_vm0, %v3079_v41  ;;  %v1006_v45 = vpop.f32.mrb[105].mxu0  ;;  %v912_v41 = vadd.f32 %v11334_v30, %v11164_v22  ;;  %v10079_v22 = vld [vmem:[%s13132_s3 + $0x3b0] ss:$8 sps:$4 sm:$0xff]  }
 0x1e6   :  { %3181 = vmatpush1.bf16.msra.mxu1 %v10058_v17  ;;  %3212 = vmatprep.mubr.bf16.mxu1 %v13138_v0  ;;  %v11474_v37 = vpop.f32.mrb[106].mxu0  ;;  %v10076_v17 = vld [vmem:[%s13132_s3 + $0x3a0] ss:$8 sps:$4 sm:$0xff]  }
 0x1e7   :  { %3182 = vmatprep.subr.bf16.mxu1 %v10063_v9  ;;  %v1009_v54 = vpop.f32.mrb[107].mxu0  ;;  %v10081_v9 = vld [vmem:[%s13132_s3 + $0x3b4] ss:$8 sps:$4 sm:$0xff]   ;;  %v10130_v45 = vld [vmem:[%s13132_s3 + $0x760] ss:$8 sps:$4 sm:$0xff]  }
 0x1ea   :  { %3183 = vmatpush1.bf16.msra.mxu1 %v10061_v63 }
 0x1eb   :  { %3252 = vmatprep.subr.bf16.mxu1 %v10066_v50  ;;  %v10138_v50 = vld [vmem:[%s13132_s3 + $0x774] ss:$8 sps:$4 sm:$0xff]  }
 0x1ec   :  { %v11487_v56 = vpop.f32.mrb[108].mxu0 }
 0x1ed   :  { %9038 = vmatmul.mubr.msk.bf16.vlgmr.msra.gmra.mrb[100].mxu1 %vm1344_vm0, %v3151_v40  ;;  %v1014_v57 = vpop.f32.mrb[109].mxu0 }
 0x1ee   :  { %3253 = vmatpush1.bf16.msra.mxu1 %v10064_v51  ;;  %v11490_v58 = vpop.f32.mrb[0].mxu1  ;;  %3284 = vmatprep.mubr.bf16.mxu1 %v13138_v0  ;;  %v11496_v6 = vpop.f32.mrb[110].mxu0  ;;  %v1224_v51 = vmax.f32 %v912_v41, 0.0  ;;  %v10136_v57 = vld [vmem:[%s13132_s3 + $0x770] ss:$8 sps:$4 sm:$0xff]  }
 0x1ef   :  { %v11498_v2 = vpop.f32.mrb[1].mxu1  ;;  %3254 = vmatprep.subr.bf16.mxu1 %v10069_v20  ;;  %v1017_v49 = vpop.f32.mrb[111].mxu0 }
 0x1f0   :  { %v1450_v8 = vpop.f32.mrb[2].mxu1  ;;  %v917_v49 = vadd.f32 %v11334_v30, %v11177_v32  ;;  %v10142_v32 = vld [vmem:[%s13132_s3 + $0x7a0] ss:$8 sps:$4 sm:$0xff]  }
 0x1f1   :  { %v1451_v10 = vpop.f32.mrb[3].mxu1 }
 0x1f2   :  { %3255 = vmatpush1.bf16.msra.mxu1 %v10067_v61 }
 0x1f3   :  { %3324 = vmatprep.subr.bf16.mxu1 %v10072_v3  ;;  %v10144_v3 = vld [vmem:[%s13132_s3 + $0x7a4] ss:$8 sps:$4 sm:$0xff]  }
 0x1f4   :  { %v11511_v5 = vpop.f32.mrb[112].mxu0 }
 0x1f5   :  { %9047 = vmatmul.mubr.msk.bf16.vlgmr.msra.gmra.mrb[104].mxu1 %vm1344_vm0, %v3223_v18  ;;  %v1022_v12 = vpop.f32.mrb[113].mxu0  ;;  %v3367_v18 = vpack.c.bf16 %v1224_v51, %v1224_v51 }
 0x1f6   :  { %3325 = vmatpush1.bf16.msra.mxu1 %v10070_v26  ;;  %3356 = vmatprep.mubr.bf16.mxu1 %v13138_v0  ;;  %v1023_v27 = vpop.f32.mrb[114].mxu0  ;;  %v10082_v26 = vld [vmem:[%s13132_s3 + $0x3c0] ss:$8 sps:$4 sm:$0xff]  }
 0x1f7   :  { %3326 = vmatprep.subr.bf16.mxu1 %v10075_v19  ;;  %v1024_v55 = vadd.f32 %v11334_v30, %v1023_v27  ;;  %v1025_v31 = vpop.f32.mrb[115].mxu0  ;;  %v1225_v27 = vmax.f32 %v917_v49, 0.0 }
 0x1f8   :  { %v10085_v31 = vld [vmem:[%s13132_s3 + $0x3d0] ss:$8 sps:$4 sm:$0xff]  }
 0x1f9   :  { %v1252_v46 = vmax.f32 %v1024_v55, 0.0  ;;  %v10150_v55 = vld [vmem:[%s13132_s3 + $0x7b4] ss:$8 sps:$4 sm:$0xff]  }
 0x1fa   :  { %3327 = vmatpush1.bf16.msra.mxu1 %v10073_v15 }
 0x1fb   :  { %3396 = vmatprep.subr.bf16.mxu1 %v10078_v29  ;;  %v5383_v44 = vpack.c.bf16 %v1252_v46, %v1252_v46  ;;  %v10090_v46 = vld [vmem:[%s13132_s3 + $0x3e4] ss:$8 sps:$4 sm:$0xff]  }
 0x1fc   :  { %v11533_v63 = vpop.f32.mrb[116].mxu0 }
 0x1fd   :  { %9056 = vmatmul.mubr.msk.bf16.vlgmr.msra.gmra.mrb[108].mxu1 %vm1344_vm0, %v3295_v34  ;;  %v1030_v54 = vpop.f32.mrb[117].mxu0  ;;  %9317 = vmatmul.mubr.msk.bf16.vlgmr.msra.gmra.mrb[204].mxu0 %vm1344_vm0, %v5383_v44  ;;  %v10148_v44 = vld [vmem:[%s13132_s3 + $0x7b0] ss:$8 sps:$4 sm:$0xff]  }
 0x1fe   :  { %3397 = vmatpush1.bf16.msra.mxu1 %v10076_v17  ;;  %3428 = vmatprep.mubr.bf16.mxu1 %v13138_v0  ;;  %v1031_v40 = vpop.f32.mrb[118].mxu0 }
 0x1ff   :  { %3398 = vmatprep.subr.bf16.mxu1 %v10081_v9  ;;  %v1032_v20 = vadd.f32 %v11334_v30, %v1031_v40  ;;  %5557 = vmatpush1.bf16.msra.mxu0 %v10130_v45  ;;  %v1033_v61 = vpop.f32.mrb[119].mxu0  ;;  %v3439_v45 = vpack.c.bf16 %v1225_v27, %v1225_v27  ;;  %v10156_v40 = vld [vmem:[%s13132_s3 + $0x7e4] ss:$8 sps:$4 sm:$0xff]   ;;  %v10160_v27 = vld [vmem:[%s13132_s3 + $0x7f0] ss:$8 sps:$4 sm:$0xff]  }
 0x200   :  { %v1516_v62 = vpop.f32.mrb[4].mxu1  ;;  %5558 = vmatprep.subr.bf16.mxu0 %v10138_v50  ;;  %5588 = vmatprep.mubr.bf16.mxu0 %v13138_v0 }
 0x201   :  { %v1518_v8 = vpop.f32.mrb[5].mxu1  ;;  %v1254_v10 = vmax.f32 %v1032_v20, 0.0  ;;  %v10088_v20 = vld [vmem:[%s13132_s3 + $0x3e0] ss:$8 sps:$4 sm:$0xff]  }
 0x202   :  { %3399 = vmatpush1.bf16.msra.mxu1 %v10079_v22  ;;  %v1520_v11 = vpop.f32.mrb[6].mxu1 }
 0x203   :  { %v1521_v19 = vpop.f32.mrb[7].mxu1  ;;  %3468 = vmatprep.subr.bf16.mxu1 %v10084_v16  ;;  %v5527_v12 = vpack.c.bf16 %v1254_v10, %v1254_v10  ;;  %5559 = vmatpush1.bf16.msra.mxu0 %v10136_v57  ;;  %v920_v57 = vadd.f32 %v11334_v30, %v11190_v39  ;;  %v10162_v39 = vld [vmem:[%s13132_s3 + $0x7f4] ss:$8 sps:$4 sm:$0xff]   ;;  %v10091_v11 = vld [vmem:[%s13132_s3 + $0x3f0] ss:$8 sps:$4 sm:$0xff]  }
 0x204   :  { %v11563_v15 = vpop.f32.mrb[120].mxu0  ;;  %5700 = vmatprep.subr.bf16.mxu0 %v10144_v3  ;;  %v10096_v19 = vld [vmem:[%s13132_s3 + $0x404] ss:$8 sps:$4 sm:$0xff]  }
 0x205   :  { %9065 = vmatmul.mubr.msk.bf16.vlgmr.msra.gmra.mrb[112].mxu1 %vm1344_vm0, %v3367_v18  ;;  %v1038_v29 = vpop.f32.mrb[121].mxu0  ;;  %v1226_v18 = vmax.f32 %v920_v57, 0.0 }
 0x206   :  { %3469 = vmatpush1.bf16.msra.mxu1 %v10082_v26  ;;  %3500 = vmatprep.mubr.bf16.mxu1 %v13138_v0  ;;  %v1039_v34 = vpop.f32.mrb[122].mxu0  ;;  %v925_v29 = vadd.f32 %v11334_v30, %v11203_v48  ;;  %v10099_v48 = vld [vmem:[%s13132_s3 + $0x414] ss:$8 sps:$4 sm:$0xff]  }
 0x207   :  { %3470 = vmatprep.subr.bf16.mxu1 %v10087_v21  ;;  %9335 = vmatmul.mubr.msk.bf16.vlgmr.msra.gmra.mrb[208].mxu0 %vm1344_vm0, %v5527_v12  ;;  %v1040_v17 = vadd.f32 %v11334_v30, %v1039_v34  ;;  %v1041_v41 = vpop.f32.mrb[123].mxu0  ;;  %v10168_v34 = vld [vmem:[%s13132_s3 + $0x824] ss:$8 sps:$4 sm:$0xff]  }
 0x208   :  { %v1580_v9 = vpop.f32.mrb[8].mxu1  ;;  %5701 = vmatpush1.bf16.msra.mxu0 %v10142_v32  ;;  %5732 = vmatprep.mubr.bf16.mxu0 %v13138_v0  ;;  %v3511_v41 = vpack.c.bf16 %v1226_v18, %v1226_v18 }
 0x209   :  { %v11585_v50 = vadd.f32 %v1580_v9, %v1516_v62  ;;  %v1582_v54 = vpop.f32.mrb[9].mxu1  ;;  %v1256_v22 = vmax.f32 %v1040_v17, 0.0  ;;  %5702 = vmatprep.subr.bf16.mxu0 %v10150_v55  ;;  %v10093_v62 = vld [vmem:[%s13132_s3 + $0x3f4] ss:$8 sps:$4 sm:$0xff]   ;;  %v10094_v17 = vld [vmem:[%s13132_s3 + $0x400] ss:$8 sps:$4 sm:$0xff]  }
 0x20a   :  { %v11590_v51 = vadd.f32 %v1582_v54, %v1518_v8  ;;  %3471 = vmatpush1.bf16.msra.mxu1 %v10085_v31  ;;  %v1584_v16 = vpop.f32.mrb[10].mxu1  ;;  %v10154_v8 = vld [vmem:[%s13132_s3 + $0x7e0] ss:$8 sps:$4 sm:$0xff]  }
 0x20b   :  { %v1585_v61 = vpop.f32.mrb[11].mxu1  ;;  %3540 = vmatprep.subr.bf16.mxu1 %v10090_v46  ;;  %v5671_v3 = vpack.c.bf16 %v1256_v22, %v1256_v22  ;;  %v10166_v54 = vld [vmem:[%s13132_s3 + $0x820] ss:$8 sps:$4 sm:$0xff]   ;;  %v1227_v22 = vmax.f32 %v925_v29, 0.0  ;;  %v10174_v16 = vld [vmem:[%s13132_s3 + $0x834] ss:$8 sps:$4 sm:$0xff]   ;;  %v928_v29 = vadd.f32 %v11334_v30, %v11216_v53 }
 0x20c   :  { %5703 = vmatpush1.bf16.msra.mxu0 %v10148_v44  ;;  %v11600_v49 = vpop.f32.mrb[124].mxu0  ;;  %v10102_v61 = vld [vmem:[%s13132_s3 + $0x424] ss:$8 sps:$4 sm:$0xff]   ;;  %v10186_v53 = vld [vmem:[%s13132_s3 + $0x874] ss:$8 sps:$4 sm:$0xff]  }
 0x20d   :  { %9074 = vmatmul.mubr.msk.bf16.vlgmr.msra.gmra.mrb[116].mxu1 %vm1344_vm0, %v3439_v45  ;;  %v1046_v10 = vpop.f32.mrb[125].mxu0  ;;  %5844 = vmatprep.subr.bf16.mxu0 %v10156_v40 }
 0x20e   :  { %3541 = vmatpush1.bf16.msra.mxu1 %v10088_v20  ;;  %3572 = vmatprep.mubr.bf16.mxu1 %v13138_v0  ;;  %v1047_v26 = vpop.f32.mrb[126].mxu0  ;;  %v10097_v20 = vld [vmem:[%s13132_s3 + $0x410] ss:$8 sps:$4 sm:$0xff]  }
 0x20f   :  { %3542 = vmatprep.subr.bf16.mxu1 %v10093_v62  ;;  %9353 = vmatmul.mubr.msk.bf16.vlgmr.msra.gmra.mrb[212].mxu0 %vm1344_vm0, %v5671_v3  ;;  %v1048_v21 = vadd.f32 %v11334_v30, %v1047_v26  ;;  %v1049_v12 = vpop.f32.mrb[127].mxu0  ;;  %v10172_v10 = vld [vmem:[%s13132_s3 + $0x830] ss:$8 sps:$4 sm:$0xff]  }
 0x210   :  { %v1650_v32 = vpop.f32.mrb[12].mxu1  ;;  %5845 = vmatpush1.bf16.msra.mxu0 %v10154_v8  ;;  %5876 = vmatprep.mubr.bf16.mxu0 %v13138_v0 }
 0x211   :  { %v1652_v55 = vpop.f32.mrb[13].mxu1  ;;  %v1258_v31 = vmax.f32 %v1048_v21, 0.0  ;;  %5846 = vmatprep.subr.bf16.mxu0 %v10162_v39  ;;  %v3583_v39 = vpack.c.bf16 %v1227_v22, %v1227_v22 }
 0x212   :  { %3543 = vmatpush1.bf16.msra.mxu1 %v10091_v11  ;;  %v1654_v46 = vpop.f32.mrb[14].mxu1 }
 0x213   :  { %v1655_v9 = vpop.f32.mrb[15].mxu1  ;;  %3612 = vmatprep.subr.bf16.mxu1 %v10096_v19  ;;  %v5815_v44 = vpack.c.bf16 %v1258_v31, %v1258_v31  ;;  %v10180_v19 = vld [vmem:[%s13132_s3 + $0x864] ss:$8 sps:$4 sm:$0xff]   ;;  %v10105_v31 = vld [vmem:[%s13132_s3 + $0x434] ss:$8 sps:$4 sm:$0xff]  }
 0x214   :  { %5847 = vmatpush1.bf16.msra.mxu0 %v10160_v27  ;;  %v11633_v45 = vpop.f32.mrb[128].mxu0  ;;  %v10100_v27 = vld [vmem:[%s13132_s3 + $0x420] ss:$8 sps:$4 sm:$0xff]  }
 0x215   :  { %9083 = vmatmul.mubr.msk.bf16.vlgmr.msra.gmra.mrb[120].mxu1 %vm1344_vm0, %v3511_v41  ;;  %v1054_v40 = vpop.f32.mrb[129].mxu0  ;;  %5988 = vmatprep.subr.bf16.mxu0 %v10168_v34  ;;  %v10103_v41 = vld [vmem:[%s13132_s3 + $0x430] ss:$8 sps:$4 sm:$0xff]  }
 0x216   :  { %3613 = vmatpush1.bf16.msra.mxu1 %v10094_v17  ;;  %3644 = vmatprep.mubr.bf16.mxu1 %v13138_v0  ;;  %v1055_v57 = vpop.f32.mrb[130].mxu0 }
 0x217   :  { %3614 = vmatprep.subr.bf16.mxu1 %v10099_v48  ;;  %9371 = vmatmul.mubr.msk.bf16.vlgmr.msra.gmra.mrb[216].mxu0 %vm1344_vm0, %v5815_v44  ;;  %v1056_v62 = vadd.f32 %v11334_v30, %v1055_v57  ;;  %v1057_v3 = vpop.f32.mrb[131].mxu0  ;;  %v1228_v48 = vmax.f32 %v928_v29, 0.0  ;;  %v10108_v44 = vld [vmem:[%s13132_s3 + $0x444] ss:$8 sps:$4 sm:$0xff]   ;;  %v10198_v29 = vld [vmem:[%s13132_s3 + $0x8b4] ss:$8 sps:$4 sm:$0xff]  }
 0x218   :  { %v1714_v8 = vpop.f32.mrb[16].mxu1  ;;  %5989 = vmatpush1.bf16.msra.mxu0 %v10166_v54  ;;  %6020 = vmatprep.mubr.bf16.mxu0 %v13138_v0 }
 0x219   :  { %v11655_v11 = vadd.f32 %v1714_v8, %v1650_v32  ;;  %v1716_v26 = vpop.f32.mrb[17].mxu1  ;;  %v1260_v18 = vmax.f32 %v1056_v62, 0.0  ;;  %5990 = vmatprep.subr.bf16.mxu0 %v10174_v16  ;;  %v10184_v16 = vld [vmem:[%s13132_s3 + $0x870] ss:$8 sps:$4 sm:$0xff]   ;;  %v10192_v62 = vld [vmem:[%s13132_s3 + $0x8a4] ss:$8 sps:$4 sm:$0xff]  }
 0x21a   :  { %v11660_v21 = vadd.f32 %v1716_v26, %v1652_v55  ;;  %3615 = vmatpush1.bf16.msra.mxu1 %v10097_v20  ;;  %v1718_v12 = vpop.f32.mrb[18].mxu1  ;;  %v10178_v55 = vld [vmem:[%s13132_s3 + $0x860] ss:$8 sps:$4 sm:$0xff]   ;;  %v933_v20 = vadd.f32 %v11334_v30, %v11229_v1  ;;  %v10111_v1 = vld [vmem:[%s13132_s3 + $0x454] ss:$8 sps:$4 sm:$0xff]  }
 0x21b   :  { %v1719_v32 = vpop.f32.mrb[19].mxu1  ;;  %3684 = vmatprep.subr.bf16.mxu1 %v10102_v61  ;;  %v5959_v34 = vpack.c.bf16 %v1260_v18, %v1260_v18  ;;  %v10106_v8 = vld [vmem:[%s13132_s3 + $0x440] ss:$8 sps:$4 sm:$0xff]  }
 0x21c   :  { %5991 = vmatpush1.bf16.msra.mxu0 %v10172_v10  ;;  %v11670_v46 = vpop.f32.mrb[132].mxu0  ;;  %v3655_v10 = vpack.c.bf16 %v1228_v48, %v1228_v48  ;;  %v1229_v12 = vmax.f32 %v933_v20, 0.0  ;;  %v10109_v32 = vld [vmem:[%s13132_s3 + $0x450] ss:$8 sps:$4 sm:$0xff]  }
 0x21d   :  { %9092 = vmatmul.mubr.msk.bf16.vlgmr.msra.gmra.mrb[124].mxu1 %vm1344_vm0, %v3583_v39  ;;  %v1062_v17 = vpop.f32.mrb[133].mxu0  ;;  %6132 = vmatprep.subr.bf16.mxu0 %v10180_v19  ;;  %v10190_v19 = vld [vmem:[%s13132_s3 + $0x8a0] ss:$8 sps:$4 sm:$0xff]  }
 0x21e   :  { %3685 = vmatpush1.bf16.msra.mxu1 %v10100_v27  ;;  %3716 = vmatprep.mubr.bf16.mxu1 %v13138_v0  ;;  %v1063_v9 = vpop.f32.mrb[134].mxu0 }
 0x21f   :  { %3686 = vmatprep.subr.bf16.mxu1 %v10105_v31  ;;  %9389 = vmatmul.mubr.msk.bf16.vlgmr.msra.gmra.mrb[220].mxu0 %vm1344_vm0, %v5959_v34  ;;  %v1064_v54 = vadd.f32 %v11334_v30, %v1063_v9  ;;  %v1065_v22 = vpop.f32.mrb[135].mxu0  ;;  %v10114_v34 = vld [vmem:[%s13132_s3 + $0x464] ss:$8 sps:$4 sm:$0xff]   ;;  %v3727_v9 = vpack.c.bf16 %v1229_v12, %v1229_v12 }
 0x220   :  { %v1784_v40 = vpop.f32.mrb[20].mxu1  ;;  %6133 = vmatpush1.bf16.msra.mxu0 %v10178_v55  ;;  %6164 = vmatprep.mubr.bf16.mxu0 %v13138_v0  ;;  %v10204_v22 = vld [vmem:[%s13132_s3 + $0x8e4] ss:$8 sps:$4 sm:$0xff]  }
 0x221   :  { %v1786_v57 = vpop.f32.mrb[21].mxu1  ;;  %v1262_v61 = vmax.f32 %v1064_v54, 0.0  ;;  %6134 = vmatprep.subr.bf16.mxu0 %v10186_v53  ;;  %v10123_v12 = vld [vmem:[%s13132_s3 + $0x484] ss:$8 sps:$4 sm:$0xff]  }
 0x222   :  { %3687 = vmatpush1.bf16.msra.mxu1 %v10103_v41  ;;  %v1788_v3 = vpop.f32.mrb[22].mxu1  ;;  %v10196_v41 = vld [vmem:[%s13132_s3 + $0x8b0] ss:$8 sps:$4 sm:$0xff]  }
 0x223   :  { %v1789_v39 = vpop.f32.mrb[23].mxu1  ;;  %3756 = vmatprep.subr.bf16.mxu1 %v10108_v44  ;;  %v6103_v26 = vpack.c.bf16 %v1262_v61, %v1262_v61  ;;  %v10112_v61 = vld [vmem:[%s13132_s3 + $0x460] ss:$8 sps:$4 sm:$0xff]   ;;  %v10117_v3 = vld [vmem:[%s13132_s3 + $0x474] ss:$8 sps:$4 sm:$0xff]  }
 0x224   :  { %6135 = vmatpush1.bf16.msra.mxu0 %v10184_v16  ;;  %v11703_v18 = vpop.f32.mrb[136].mxu0 }
 0x225   :  { %9101 = vmatmul.mubr.msk.bf16.vlgmr.msra.gmra.mrb[128].mxu1 %vm1344_vm0, %v3655_v10  ;;  %v1070_v27 = vpop.f32.mrb[137].mxu0  ;;  %6276 = vmatprep.subr.bf16.mxu0 %v10192_v62  ;;  %v936_v62 = vadd.f32 %v11334_v30, %v11242_v7  ;;  %v10210_v7 = vld [vmem:[%s13132_s3 + $0x8f4] ss:$8 sps:$4 sm:$0xff]  }
 0x226   :  { %3757 = vmatpush1.bf16.msra.mxu1 %v10106_v8  ;;  %3788 = vmatprep.mubr.bf16.mxu1 %v13138_v0  ;;  %v1071_v31 = vpop.f32.mrb[138].mxu0 }
 0x227   :  { %3758 = vmatprep.subr.bf16.mxu1 %v10111_v1  ;;  %9407 = vmatmul.mubr.msk.bf16.vlgmr.msra.gmra.mrb[224].mxu0 %vm1344_vm0, %v6103_v26  ;;  %v1072_v55 = vadd.f32 %v11334_v30, %v1071_v31  ;;  %v1073_v17 = vpop.f32.mrb[139].mxu0  ;;  %v10115_v1 = vld [vmem:[%s13132_s3 + $0x470] ss:$8 sps:$4 sm:$0xff]  }
 0x228   :  { %v1848_v53 = vpop.f32.mrb[24].mxu1  ;;  %6277 = vmatpush1.bf16.msra.mxu0 %v10190_v19  ;;  %6308 = vmatprep.mubr.bf16.mxu0 %v13138_v0  ;;  %v1230_v19 = vmax.f32 %v936_v62, 0.0  ;;  %v10208_v31 = vld [vmem:[%s13132_s3 + $0x8f0] ss:$8 sps:$4 sm:$0xff]  }
 0x229   :  { %v11725_v48 = vadd.f32 %v1848_v53, %v1784_v40  ;;  %v1850_v44 = vpop.f32.mrb[25].mxu1  ;;  %v1264_v54 = vmax.f32 %v1072_v55, 0.0  ;;  %6278 = vmatprep.subr.bf16.mxu0 %v10198_v29  ;;  %v10216_v53 = vld [vmem:[%s13132_s3 + $0x924] ss:$8 sps:$4 sm:$0xff]  }
 0x22a   :  { %v11730_v16 = vadd.f32 %v1850_v44, %v1786_v57  ;;  %3759 = vmatpush1.bf16.msra.mxu1 %v10109_v32  ;;  %v1852_v20 = vpop.f32.mrb[26].mxu1  ;;  %v10202_v57 = vld [vmem:[%s13132_s3 + $0x8e0] ss:$8 sps:$4 sm:$0xff]   ;;  %v3799_v44 = vpack.c.bf16 %v1230_v19, %v1230_v19  ;;  %v10220_v19 = vld [vmem:[%s13132_s3 + $0x930] ss:$8 sps:$4 sm:$0xff]  }
 0x22b   :  { %v1853_v40 = vpop.f32.mrb[27].mxu1  ;;  %3828 = vmatprep.subr.bf16.mxu1 %v10114_v34  ;;  %v6247_v8 = vpack.c.bf16 %v1264_v54, %v1264_v54  ;;  %v941_v34 = vadd.f32 %v11334_v30, %v11255_v42  ;;  %v10129_v42 = vld [vmem:[%s13132_s3 + $0x494] ss:$8 sps:$4 sm:$0xff]  }
 0x22c   :  { %v11740_v10 = vpop.f32.mrb[140].mxu0  ;;  %6279 = vmatpush1.bf16.msra.mxu0 %v10196_v41 }
 0x22d   :  { %9110 = vmatmul.mubr.msk.bf16.vlgmr.msra.gmra.mrb[132].mxu1 %vm1344_vm0, %v3727_v9  ;;  %v1078_v39 = vpop.f32.mrb[141].mxu0  ;;  %6420 = vmatprep.subr.bf16.mxu0 %v10204_v22  ;;  %v10121_v9 = vld [vmem:[%s13132_s3 + $0x480] ss:$8 sps:$4 sm:$0xff]   ;;  %v1231_v62 = vmax.f32 %v941_v34, 0.0  ;;  %v10228_v34 = vld [vmem:[%s13132_s3 + $0x964] ss:$8 sps:$4 sm:$0xff]  }
 0x22e   :  { %3829 = vmatpush1.bf16.msra.mxu1 %v10112_v61  ;;  %3860 = vmatprep.mubr.bf16.mxu1 %v13138_v0  ;;  %v1079_v26 = vpop.f32.mrb[142].mxu0  ;;  %v10214_v61 = vld [vmem:[%s13132_s3 + $0x920] ss:$8 sps:$4 sm:$0xff]   ;;  %v10135_v39 = vld [vmem:[%s13132_s3 + $0x4a4] ss:$8 sps:$4 sm:$0xff]  }
 0x22f   :  { %3830 = vmatprep.subr.bf16.mxu1 %v10117_v3  ;;  %v1080_v27 = vadd.f32 %v11334_v30, %v1079_v26  ;;  %v1081_v29 = vpop.f32.mrb[143].mxu0  ;;  %9425 = vmatmul.mubr.msk.bf16.vlgmr.msra.gmra.mrb[228].mxu0 %vm1344_vm0, %v6247_v8  ;;  %v10222_v3 = vld [vmem:[%s13132_s3 + $0x934] ss:$8 sps:$4 sm:$0xff]   ;;  %v10127_v8 = vld [vmem:[%s13132_s3 + $0x490] ss:$8 sps:$4 sm:$0xff]  }
 0x230   :  { %v11758_v32 = vpop.f32.mrb[28].mxu1  ;;  %6421 = vmatpush1.bf16.msra.mxu0 %v10202_v57  ;;  %6452 = vmatprep.mubr.bf16.mxu0 %v13138_v0 }
 0x231   :  { %v11766_v55 = vpop.f32.mrb[29].mxu1  ;;  %v1266_v17 = vmax.f32 %v1080_v27, 0.0  ;;  %6422 = vmatprep.subr.bf16.mxu0 %v10210_v7 }
 0x232   :  { %3831 = vmatpush1.bf16.msra.mxu1 %v10115_v1  ;;  %v1922_v41 = vpop.f32.mrb[30].mxu1 }
 0x233   :  { %v1923_v54 = vpop.f32.mrb[31].mxu1  ;;  %3900 = vmatprep.subr.bf16.mxu1 %v10123_v12  ;;  %v6391_v22 = vpack.c.bf16 %v1266_v17, %v1266_v17  ;;  %v3871_v12 = vpack.c.bf16 %v1231_v62, %v1231_v62  ;;  %v10133_v41 = vld [vmem:[%s13132_s3 + $0x4a0] ss:$8 sps:$4 sm:$0xff]  }
 0x234   :  { %v11777_v20 = vpop.f32.mrb[144].mxu0  ;;  %6423 = vmatpush1.bf16.msra.mxu0 %v10208_v31 }
 0x235   :  { %9119 = vmatmul.mubr.msk.bf16.vlgmr.msra.gmra.mrb[136].mxu1 %vm1344_vm0, %v3799_v44  ;;  %v1086_v40 = vpop.f32.mrb[145].mxu0  ;;  %6564 = vmatprep.subr.bf16.mxu0 %v10216_v53  ;;  %v10141_v44 = vld [vmem:[%s13132_s3 + $0x4b4] ss:$8 sps:$4 sm:$0xff]  }
 0x236   :  { %3901 = vmatpush1.bf16.msra.mxu1 %v10121_v9  ;;  %3932 = vmatprep.mubr.bf16.mxu1 %v13138_v0  ;;  %v1087_v57 = vpop.f32.mrb[146].mxu0 }
 0x237   :  { %3902 = vmatprep.subr.bf16.mxu1 %v10129_v42  ;;  %v1088_v7 = vadd.f32 %v11334_v30, %v1087_v57  ;;  %v1089_v1 = vpop.f32.mrb[147].mxu0  ;;  %9443 = vmatmul.mubr.msk.bf16.vlgmr.msra.gmra.mrb[232].mxu0 %vm1344_vm0, %v6391_v22 }
 0x238   :  { %v1990_v26 = vpop.f32.mrb[32].mxu1  ;;  %6565 = vmatpush1.bf16.msra.mxu0 %v10214_v61  ;;  %6596 = vmatprep.mubr.bf16.mxu0 %v13138_v0  ;;  %v10139_v61 = vld [vmem:[%s13132_s3 + $0x4b0] ss:$8 sps:$4 sm:$0xff]   ;;  %v949_v1 = vadd.f32 %v11334_v30, %v11281_v38 }
 0x239   :  { %v11800_v27 = vadd.f32 %v1990_v26, %v11585_v50  ;;  %v1992_v29 = vpop.f32.mrb[33].mxu1  ;;  %v1268_v31 = vmax.f32 %v1088_v7, 0.0  ;;  %6566 = vmatprep.subr.bf16.mxu0 %v10222_v3  ;;  %v944_v50 = vadd.f32 %v11334_v30, %v11268_v24  ;;  %v10234_v24 = vld [vmem:[%s13132_s3 + $0x974] ss:$8 sps:$4 sm:$0xff]   ;;  %v10147_v3 = vld [vmem:[%s13132_s3 + $0x4c4] ss:$8 sps:$4 sm:$0xff]  }
 0x23a   :  { %v11806_v17 = vadd.f32 %v1992_v29, %v11590_v51  ;;  %3903 = vmatpush1.bf16.msra.mxu1 %v10127_v8  ;;  %v1994_v53 = vpop.f32.mrb[34].mxu1  ;;  %v10226_v51 = vld [vmem:[%s13132_s3 + $0x960] ss:$8 sps:$4 sm:$0xff]   ;;  %v10232_v7 = vld [vmem:[%s13132_s3 + $0x970] ss:$8 sps:$4 sm:$0xff]  }
 0x23b   :  { %v1995_v9 = vpop.f32.mrb[35].mxu1  ;;  %3972 = vmatprep.subr.bf16.mxu1 %v10135_v39  ;;  %v6535_v54 = vpack.c.bf16 %v1268_v31, %v1268_v31  ;;  %v1232_v40 = vmax.f32 %v944_v50, 0.0  ;;  %v10240_v29 = vld [vmem:[%s13132_s3 + $0x9a4] ss:$8 sps:$4 sm:$0xff]   ;;  %v10145_v53 = vld [vmem:[%s13132_s3 + $0x4c0] ss:$8 sps:$4 sm:$0xff]  }
 0x23c   :  { %v11816_v42 = vpop.f32.mrb[148].mxu0  ;;  %6567 = vmatpush1.bf16.msra.mxu0 %v10220_v19 }
 0x23d   :  { %9128 = vmatmul.mubr.msk.bf16.vlgmr.msra.gmra.mrb[140].mxu1 %vm1344_vm0, %v3871_v12  ;;  %v1094_v22 = vpop.f32.mrb[149].mxu0  ;;  %6708 = vmatprep.subr.bf16.mxu0 %v10228_v34  ;;  %v3943_v38 = vpack.c.bf16 %v1232_v40, %v1232_v40 }
 0x23e   :  { %3973 = vmatpush1.bf16.msra.mxu1 %v10133_v41  ;;  %4004 = vmatprep.mubr.bf16.mxu1 %v13138_v0  ;;  %v1095_v62 = vpop.f32.mrb[150].mxu0  ;;  %v10151_v22 = vld [vmem:[%s13132_s3 + $0x4d0] ss:$8 sps:$4 sm:$0xff]  }
 0x23f   :  { %3974 = vmatprep.subr.bf16.mxu1 %v10141_v44  ;;  %v1096_v8 = vadd.f32 %v11334_v30, %v1095_v62  ;;  %v1097_v57 = vpop.f32.mrb[151].mxu0  ;;  %9461 = vmatmul.mubr.msk.bf16.vlgmr.msra.gmra.mrb[236].mxu0 %vm1344_vm0, %v6535_v54  ;;  %v1233_v44 = vmax.f32 %v949_v1, 0.0 }
 0x240   :  { %v2062_v39 = vpop.f32.mrb[36].mxu1  ;;  %6709 = vmatpush1.bf16.msra.mxu0 %v10226_v51  ;;  %6740 = vmatprep.mubr.bf16.mxu0 %v13138_v0  ;;  %v10246_v51 = vld [vmem:[%s13132_s3 + $0x9b4] ss:$8 sps:$4 sm:$0xff]  }
 0x241   :  { %v11841_v26 = vadd.f32 %v2062_v39, %v11655_v11  ;;  %v2064_v19 = vpop.f32.mrb[37].mxu1  ;;  %v1270_v12 = vmax.f32 %v1096_v8, 0.0  ;;  %6710 = vmatprep.subr.bf16.mxu0 %v10234_v24  ;;  %v10153_v11 = vld [vmem:[%s13132_s3 + $0x4d4] ss:$8 sps:$4 sm:$0xff]   ;;  %v10244_v8 = vld [vmem:[%s13132_s3 + $0x9b0] ss:$8 sps:$4 sm:$0xff]   ;;  %v4015_v57 = vpack.c.bf16 %v1233_v44, %v1233_v44 }
 0x242   :  { %v11847_v31 = vadd.f32 %v2064_v19, %v11660_v21  ;;  %3975 = vmatpush1.bf16.msra.mxu1 %v10139_v61  ;;  %v2066_v34 = vpop.f32.mrb[38].mxu1  ;;  %v10238_v21 = vld [vmem:[%s13132_s3 + $0x9a0] ss:$8 sps:$4 sm:$0xff]   ;;  %v10159_v61 = vld [vmem:[%s13132_s3 + $0x4e4] ss:$8 sps:$4 sm:$0xff]  }
 0x243   :  { %v2067_v41 = vpop.f32.mrb[39].mxu1  ;;  %4044 = vmatprep.subr.bf16.mxu1 %v10147_v3  ;;  %v6679_v50 = vpack.c.bf16 %v1270_v12, %v1270_v12  ;;  %v10252_v19 = vld [vmem:[%s13132_s3 + $0x9e4] ss:$8 sps:$4 sm:$0xff]  }
 0x244   :  { %v11855_v9 = vpop.f32.mrb[152].mxu0  ;;  %6711 = vmatpush1.bf16.msra.mxu0 %v10232_v7 }
 0x245   :  { %9137 = vmatmul.mubr.msk.bf16.vlgmr.msra.gmra.mrb[144].mxu1 %vm1344_vm0, %v3943_v38  ;;  %v1102_v54 = vpop.f32.mrb[153].mxu0  ;;  %6852 = vmatprep.subr.bf16.mxu0 %v10240_v29  ;;  %v10157_v29 = vld [vmem:[%s13132_s3 + $0x4e0] ss:$8 sps:$4 sm:$0xff]   ;;  %v10165_v38 = vld [vmem:[%s13132_s3 + $0x4f4] ss:$8 sps:$4 sm:$0xff]  }
 0x246   :  { %4045 = vmatpush1.bf16.msra.mxu1 %v10145_v53  ;;  %4076 = vmatprep.mubr.bf16.mxu1 %v13138_v0  ;;  %v1103_v24 = vpop.f32.mrb[154].mxu0  ;;  %v952_v53 = vadd.f32 %v11334_v30, %v11294_v33  ;;  %v10258_v33 = vld [vmem:[%s13132_s3 + $0x9f4] ss:$8 sps:$4 sm:$0xff]   ;;  %v10171_v54 = vld [vmem:[%s13132_s3 + $0x504] ss:$8 sps:$4 sm:$0xff]  }
 0x247   :  { %4046 = vmatprep.subr.bf16.mxu1 %v10153_v11  ;;  %v1104_v62 = vadd.f32 %v11334_v30, %v1103_v24  ;;  %v1105_v40 = vpop.f32.mrb[155].mxu0  ;;  %9479 = vmatmul.mubr.msk.bf16.vlgmr.msra.gmra.mrb[240].mxu0 %vm1344_vm0, %v6679_v50  ;;  %v10250_v50 = vld [vmem:[%s13132_s3 + $0x9e0] ss:$8 sps:$4 sm:$0xff]   ;;  %v10163_v30 = vld [vmem:[%s13132_s3 + $0x4f0] ss:$8 sps:$4 sm:$0xff]  }
 0x248   :  { %v2134_v3 = vpop.f32.mrb[40].mxu1  ;;  %6853 = vmatpush1.bf16.msra.mxu0 %v10238_v21  ;;  %6884 = vmatprep.mubr.bf16.mxu0 %v13138_v0  ;;  %v1234_v44 = vmax.f32 %v952_v53, 0.0 }
 0x249   :  { %v2136_v39 = vpop.f32.mrb[41].mxu1  ;;  %v11878_v7 = vadd.f32 %v2134_v3, %v11725_v48  ;;  %v1272_v1 = vmax.f32 %v1104_v62, 0.0  ;;  %6854 = vmatprep.subr.bf16.mxu0 %v10246_v51  ;;  %v11913_v51 = vld [vmem:[%s13133_s2] ss:$0 sm:$0xff]  ;;  %v10256_v62 = vld [vmem:[%s13132_s3 + $0x9f0] ss:$8 sps:$4 sm:$0xff]  }
 0x24a   :  { %4047 = vmatpush1.bf16.msra.mxu1 %v10151_v22  ;;  %v2138_v12 = vpop.f32.mrb[42].mxu1  ;;  %v11887_v34 = vadd.f32 %v2136_v39, %v11730_v16  ;;  %v957_v40 = vadd.f32 %v11913_v51, %v11310_v52  ;;  %v10177_v52 = vld [vmem:[%s13132_s3 + $0x514] ss:$8 sps:$4 sm:$0xff]  }
 0x24b   :  { %v2139_v48 = vpop.f32.mrb[43].mxu1  ;;  %4116 = vmatprep.subr.bf16.mxu1 %v10159_v61  ;;  %v6823_v41 = vpack.c.bf16 %v1272_v1, %v1272_v1  ;;  %v10169_v1 = vld [vmem:[%s13132_s3 + $0x500] ss:$8 sps:$4 sm:$0xff]  }
 0x24c   :  { %v11894_v11 = vpop.f32.mrb[156].mxu0  ;;  %6855 = vmatpush1.bf16.msra.mxu0 %v10244_v8  ;;  %v10262_v48 = vld [vmem:[%s13132_s3 + $0xa20] ss:$8 sps:$4 sm:$0xff]  }
 0x24d   :  { %9146 = vmatmul.mubr.msk.bf16.vlgmr.msra.gmra.mrb[148].mxu1 %vm1344_vm0, %v4015_v57  ;;  %v1110_v16 = vpop.f32.mrb[157].mxu0  ;;  %6996 = vmatprep.subr.bf16.mxu0 %v10252_v19  ;;  %v10264_v57 = vld [vmem:[%s13132_s3 + $0xa24] ss:$8 sps:$4 sm:$0xff]   ;;  %v4087_v19 = vpack.c.bf16 %v1234_v44, %v1234_v44 }
 0x24e   :  { %4117 = vmatpush1.bf16.msra.mxu1 %v10157_v29  ;;  %4148 = vmatprep.mubr.bf16.mxu1 %v13138_v0  ;;  %v1111_v21 = vpop.f32.mrb[158].mxu0  ;;  %v10175_v16 = vld [vmem:[%s13132_s3 + $0x510] ss:$8 sps:$4 sm:$0xff]  }
 0x24f   :  { %4118 = vmatprep.subr.bf16.mxu1 %v10165_v38  ;;  %v1112_v22 = vadd.f32 %v11913_v51, %v1111_v21  ;;  %v1113_v24 = vpop.f32.mrb[159].mxu0  ;;  %9497 = vmatmul.mubr.msk.bf16.vlgmr.msra.gmra.mrb[244].mxu0 %vm1344_vm0, %v6823_v41  ;;  %v1235_v38 = vmax.f32 %v957_v40, 0.0 }
 0x250   :  { %v11917_v61 = vpop.f32.mrb[44].mxu1  ;;  %6997 = vmatpush1.bf16.msra.mxu0 %v10250_v50  ;;  %7028 = vmatprep.mubr.bf16.mxu0 %v13138_v0  ;;  %v10270_v50 = vld [vmem:[%s13132_s3 + $0xa34] ss:$8 sps:$4 sm:$0xff]  }
 0x251   :  { %v11925_v3 = vpop.f32.mrb[45].mxu1  ;;  %v1274_v8 = vmax.f32 %v1112_v22, 0.0  ;;  %6998 = vmatprep.subr.bf16.mxu0 %v10258_v33  ;;  %v10268_v22 = vld [vmem:[%s13132_s3 + $0xa30] ss:$8 sps:$4 sm:$0xff]   ;;  %v4159_v24 = vpack.c.bf16 %v1235_v38, %v1235_v38  ;;  %v10274_v38 = vld [vmem:[%s13132_s3 + $0xa60] ss:$8 sps:$4 sm:$0xff]  }
 0x252   :  { %4119 = vmatpush1.bf16.msra.mxu1 %v10163_v30  ;;  %v2210_v39 = vpop.f32.mrb[46].mxu1  ;;  %v10183_v30 = vld [vmem:[%s13132_s3 + $0x524] ss:$8 sps:$4 sm:$0xff]  }
 0x253   :  { %v2211_v12 = vpop.f32.mrb[47].mxu1  ;;  %4188 = vmatprep.subr.bf16.mxu1 %v10171_v54  ;;  %v6967_v29 = vpack.c.bf16 %v1274_v8, %v1274_v8 }
 0x254   :  { %v11936_v53 = vpop.f32.mrb[160].mxu0  ;;  %6999 = vmatpush1.bf16.msra.mxu0 %v10256_v62  ;;  %v960_v12 = vadd.f32 %v11913_v51, %v11323_v59  ;;  %v10282_v59 = vld [vmem:[%s13132_s3 + $0xa74] ss:$8 sps:$4 sm:$0xff]  }
 0x255   :  { %9155 = vmatmul.mubr.msk.bf16.vlgmr.msra.gmra.mrb[152].mxu1 %vm1344_vm0, %v4087_v19  ;;  %v1118_v41 = vpop.f32.mrb[161].mxu0  ;;  %7140 = vmatprep.subr.bf16.mxu0 %v10264_v57  ;;  %v10276_v57 = vld [vmem:[%s13132_s3 + $0xa64] ss:$8 sps:$4 sm:$0xff]  }
 0x256   :  { %4189 = vmatpush1.bf16.msra.mxu1 %v10169_v1  ;;  %4220 = vmatprep.mubr.bf16.mxu1 %v13138_v0  ;;  %v1119_v33 = vpop.f32.mrb[162].mxu0  ;;  %v10181_v1 = vld [vmem:[%s13132_s3 + $0x520] ss:$8 sps:$4 sm:$0xff]   ;;  %v10187_v41 = vld [vmem:[%s13132_s3 + $0x530] ss:$8 sps:$4 sm:$0xff]  }
 0x257   :  { %4190 = vmatprep.subr.bf16.mxu1 %v10177_v52  ;;  %v1120_v21 = vadd.f32 %v11913_v51, %v1119_v33  ;;  %v1121_v44 = vpop.f32.mrb[163].mxu0  ;;  %9515 = vmatmul.mubr.msk.bf16.vlgmr.msra.gmra.mrb[248].mxu0 %vm1344_vm0, %v6967_v29  ;;  %v10189_v52 = vld [vmem:[%s13132_s3 + $0x534] ss:$8 sps:$4 sm:$0xff]   ;;  %v10195_v33 = vld [vmem:[%s13132_s3 + $0x544] ss:$8 sps:$4 sm:$0xff]  }
 0x258   :  { %v2278_v54 = vpop.f32.mrb[48].mxu1  ;;  %7141 = vmatpush1.bf16.msra.mxu0 %v10262_v48  ;;  %7172 = vmatprep.mubr.bf16.mxu0 %v13138_v0 }
 0x259   :  { %v2280_v62 = vpop.f32.mrb[49].mxu1  ;;  %v11959_v40 = vadd.f32 %v2278_v54, %v11800_v27  ;;  %v1276_v8 = vmax.f32 %v1120_v21, 0.0  ;;  %7142 = vmatprep.subr.bf16.mxu0 %v10270_v50  ;;  %v10280_v54 = vld [vmem:[%s13132_s3 + $0xa70] ss:$8 sps:$4 sm:$0xff]  }
 0x25a   :  { %4191 = vmatpush1.bf16.msra.mxu1 %v10175_v16  ;;  %v2282_v39 = vpop.f32.mrb[50].mxu1  ;;  %v11968_v19 = vadd.f32 %v2280_v62, %v11806_v17  ;;  %v1236_v16 = vmax.f32 %v960_v12, 0.0 }
 0x25b   :  { %v2283_v27 = vpop.f32.mrb[51].mxu1  ;;  %4260 = vmatprep.subr.bf16.mxu1 %v10183_v30  ;;  %v7111_v29 = vpack.c.bf16 %v1276_v8, %v1276_v8 }
 0x25c   :  { %v11975_v48 = vpop.f32.mrb[164].mxu0  ;;  %7143 = vmatpush1.bf16.msra.mxu0 %v10268_v22  ;;  %v965_v22 = vadd.f32 %v11913_v51, %v11341_v4  ;;  %v4231_v4 = vpack.c.bf16 %v1236_v16, %v1236_v16  ;;  %v10207_v16 = vld [vmem:[%s13132_s3 + $0x564] ss:$8 sps:$4 sm:$0xff]  }
 0x25d   :  { %9164 = vmatmul.mubr.msk.bf16.vlgmr.msra.gmra.mrb[156].mxu1 %vm1344_vm0, %v4159_v24  ;;  %v1126_v17 = vpop.f32.mrb[165].mxu0  ;;  %7284 = vmatprep.subr.bf16.mxu0 %v10276_v57  ;;  %v10288_v57 = vld [vmem:[%s13132_s3 + $0xaa4] ss:$8 sps:$4 sm:$0xff]  }
 0x25e   :  { %4261 = vmatpush1.bf16.msra.mxu1 %v10181_v1  ;;  %4292 = vmatprep.mubr.bf16.mxu1 %v13138_v0  ;;  %v1127_v50 = vpop.f32.mrb[166].mxu0  ;;  %v10193_v1 = vld [vmem:[%s13132_s3 + $0x540] ss:$8 sps:$4 sm:$0xff]   ;;  %v1237_v17 = vmax.f32 %v965_v22, 0.0 }
 0x25f   :  { %4262 = vmatprep.subr.bf16.mxu1 %v10189_v52  ;;  %v1128_v30 = vadd.f32 %v11913_v51, %v1127_v50  ;;  %v1129_v21 = vpop.f32.mrb[167].mxu0  ;;  %9533 = vmatmul.mubr.msk.bf16.vlgmr.msra.gmra.mrb[252].mxu0 %vm1344_vm0, %v7111_v29 }
 0x260   :  { %v2350_v44 = vpop.f32.mrb[52].mxu1  ;;  %7285 = vmatpush1.bf16.msra.mxu0 %v10274_v38  ;;  %7316 = vmatprep.mubr.bf16.mxu0 %v13138_v0  ;;  %v10286_v38 = vld [vmem:[%s13132_s3 + $0xaa0] ss:$8 sps:$4 sm:$0xff]  }
 0x261   :  { %v2352_v24 = vpop.f32.mrb[53].mxu1  ;;  %v12000_v62 = vadd.f32 %v2350_v44, %v11841_v26  ;;  %v1278_v8 = vmax.f32 %v1128_v30, 0.0  ;;  %7286 = vmatprep.subr.bf16.mxu0 %v10282_v59  ;;  %v10201_v26 = vld [vmem:[%s13132_s3 + $0x554] ss:$8 sps:$4 sm:$0xff]   ;;  %v10292_v44 = vld [vmem:[%s13132_s3 + $0xab0] ss:$8 sps:$4 sm:$0xff]  }
 0x262   :  { %4263 = vmatpush1.bf16.msra.mxu1 %v10187_v41  ;;  %v2354_v39 = vpop.f32.mrb[54].mxu1  ;;  %v12009_v12 = vadd.f32 %v2352_v24, %v11847_v31  ;;  %v10294_v59 = vld [vmem:[%s13132_s3 + $0xab4] ss:$8 sps:$4 sm:$0xff]   ;;  %v10199_v41 = vld [vmem:[%s13132_s3 + $0x550] ss:$8 sps:$4 sm:$0xff]  }
 0x263   :  { %v2355_v27 = vpop.f32.mrb[55].mxu1  ;;  %4332 = vmatprep.subr.bf16.mxu1 %v10195_v33  ;;  %v7255_v52 = vpack.c.bf16 %v1278_v8, %v1278_v8 }
 0x264   :  { %v12014_v29 = vpop.f32.mrb[168].mxu0  ;;  %7287 = vmatpush1.bf16.msra.mxu0 %v10280_v54  ;;  %v4303_v54 = vpack.c.bf16 %v1237_v17, %v1237_v17 }
 0x265   :  { %9173 = vmatmul.mubr.msk.bf16.vlgmr.msra.gmra.mrb[160].mxu1 %vm1344_vm0, %v4231_v4  ;;  %v1134_v31 = vpop.f32.mrb[169].mxu0  ;;  %7428 = vmatprep.subr.bf16.mxu0 %v10288_v57  ;;  %v10300_v57 = vld [vmem:[%s13132_s3 + $0xae4] ss:$8 sps:$4 sm:$0xff]   ;;  %v10205_v4 = vld [vmem:[%s13132_s3 + $0x560] ss:$8 sps:$4 sm:$0xff]  }
 0x266   :  { %4333 = vmatpush1.bf16.msra.mxu1 %v10193_v1  ;;  %4364 = vmatprep.mubr.bf16.mxu1 %v13138_v0  ;;  %v1135_v50 = vpop.f32.mrb[170].mxu0  ;;  %v10211_v31 = vld [vmem:[%s13132_s3 + $0x570] ss:$8 sps:$4 sm:$0xff]  }
 0x267   :  { %4334 = vmatprep.subr.bf16.mxu1 %v10201_v26  ;;  %v1136_v33 = vadd.f32 %v11913_v51, %v1135_v50  ;;  %v1137_v30 = vpop.f32.mrb[171].mxu0  ;;  %9551 = vmatmul.mubr.msk.bf16.vlgmr.msra.gmra.mrb[0].mxu0 %vm1344_vm0, %v7255_v52  ;;  %v10213_v26 = vld [vmem:[%s13132_s3 + $0x574] ss:$8 sps:$4 sm:$0xff]   ;;  %v10219_v50 = vld [vmem:[%s13132_s3 + $0x584] ss:$8 sps:$4 sm:$0xff]  }
 0x268   :  { %v2422_v21 = vpop.f32.mrb[56].mxu1  ;;  %7429 = vmatpush1.bf16.msra.mxu0 %v10286_v38  ;;  %7460 = vmatprep.mubr.bf16.mxu0 %v13138_v0 }
 0x269   :  { %v12037_v22 = vadd.f32 %v2422_v21, %v11878_v7  ;;  %v2424_v24 = vpop.f32.mrb[57].mxu1  ;;  %v1280_v8 = vmax.f32 %v1136_v33, 0.0  ;;  %7430 = vmatprep.subr.bf16.mxu0 %v10294_v59  ;;  %v968_v7 = vadd.f32 %v11913_v51, %v11354_v14  ;;  %v10306_v14 = vld [vmem:[%s13132_s3 + $0xaf4] ss:$8 sps:$4 sm:$0xff]   ;;  %v10304_v21 = vld [vmem:[%s13132_s3 + $0xaf0] ss:$8 sps:$4 sm:$0xff]  }
 0x26a   :  { %v12043_v39 = vadd.f32 %v2424_v24, %v11887_v34  ;;  %4335 = vmatpush1.bf16.msra.mxu1 %v10199_v41  ;;  %v2426_v1 = vpop.f32.mrb[58].mxu1  ;;  %v10298_v34 = vld [vmem:[%s13132_s3 + $0xae0] ss:$8 sps:$4 sm:$0xff]  }
 0x26b   :  { %v2427_v27 = vpop.f32.mrb[59].mxu1  ;;  %4404 = vmatprep.subr.bf16.mxu1 %v10207_v16  ;;  %v7399_v52 = vpack.c.bf16 %v1280_v8, %v1280_v8  ;;  %v1238_v41 = vmax.f32 %v968_v7, 0.0  ;;  %v10312_v8 = vld [vmem:[%s13132_s3 + $0xb24] ss:$8 sps:$4 sm:$0xff]   ;;  %v10217_v1 = vld [vmem:[%s13132_s3 + $0x580] ss:$8 sps:$4 sm:$0xff]  }
 0x26c   :  { %v12053_v38 = vpop.f32.mrb[172].mxu0  ;;  %7431 = vmatpush1.bf16.msra.mxu0 %v10292_v44  ;;  %v973_v44 = vadd.f32 %v11913_v51, %v11367_v28  ;;  %v10225_v28 = vld [vmem:[%s13132_s3 + $0x594] ss:$8 sps:$4 sm:$0xff]  }
 0x26d   :  { %9182 = vmatmul.mubr.msk.bf16.vlgmr.msra.gmra.mrb[164].mxu1 %vm1344_vm0, %v4303_v54  ;;  %v1142_v17 = vpop.f32.mrb[173].mxu0  ;;  %7572 = vmatprep.subr.bf16.mxu0 %v10300_v57 }
 0x26e   :  { %4405 = vmatpush1.bf16.msra.mxu1 %v10205_v4  ;;  %4436 = vmatprep.mubr.bf16.mxu1 %v13138_v0  ;;  %v1143_v59 = vpop.f32.mrb[174].mxu0  ;;  %v4375_v4 = vpack.c.bf16 %v1238_v41, %v1238_v41  ;;  %v10231_v41 = vld [vmem:[%s13132_s3 + $0x5a4] ss:$8 sps:$4 sm:$0xff]  }
 0x26f   :  { %4406 = vmatprep.subr.bf16.mxu1 %v10213_v26  ;;  %v1144_v16 = vadd.f32 %v11913_v51, %v1143_v59  ;;  %v1145_v33 = vpop.f32.mrb[175].mxu0  ;;  %9569 = vmatmul.mubr.msk.bf16.vlgmr.msra.gmra.mrb[4].mxu0 %vm1344_vm0, %v7399_v52  ;;  %v10310_v52 = vld [vmem:[%s13132_s3 + $0xb20] ss:$8 sps:$4 sm:$0xff]  }
 0x270   :  { %v12071_v30 = vpop.f32.mrb[60].mxu1  ;;  %7573 = vmatpush1.bf16.msra.mxu0 %v10298_v34  ;;  %7604 = vmatprep.mubr.bf16.mxu0 %v13138_v0  ;;  %v1239_v34 = vmax.f32 %v973_v44, 0.0 }
 0x271   :  { %v12079_v54 = vpop.f32.mrb[61].mxu1  ;;  %v1282_v24 = vmax.f32 %v1144_v16, 0.0  ;;  %7574 = vmatprep.subr.bf16.mxu0 %v10306_v14  ;;  %v10318_v14 = vld [vmem:[%s13132_s3 + $0xb34] ss:$8 sps:$4 sm:$0xff]  }
 0x272   :  { %4407 = vmatpush1.bf16.msra.mxu1 %v10211_v31  ;;  %v2498_v57 = vpop.f32.mrb[62].mxu1  ;;  %v10223_v31 = vld [vmem:[%s13132_s3 + $0x590] ss:$8 sps:$4 sm:$0xff]   ;;  %v4447_v44 = vpack.c.bf16 %v1239_v34, %v1239_v34 }
 0x273   :  { %v2499_v7 = vpop.f32.mrb[63].mxu1  ;;  %4476 = vmatprep.subr.bf16.mxu1 %v10219_v50  ;;  %v7543_v27 = vpack.c.bf16 %v1282_v24, %v1282_v24 }
 0x274   :  { %v12090_v26 = vpop.f32.mrb[176].mxu0  ;;  %7575 = vmatpush1.bf16.msra.mxu0 %v10304_v21  ;;  %v10316_v21 = vld [vmem:[%s13132_s3 + $0xb30] ss:$8 sps:$4 sm:$0xff]  }
 0x275   :  { %9191 = vmatmul.mubr.msk.bf16.vlgmr.msra.gmra.mrb[168].mxu1 %vm1344_vm0, %v4375_v4  ;;  %v1150_v17 = vpop.f32.mrb[177].mxu0  ;;  %7716 = vmatprep.subr.bf16.mxu0 %v10312_v8 }
 0x276   :  { %4477 = vmatpush1.bf16.msra.mxu1 %v10217_v1  ;;  %4508 = vmatprep.mubr.bf16.mxu1 %v13138_v0  ;;  %v1151_v59 = vpop.f32.mrb[178].mxu0  ;;  %v10324_v1 = vld [vmem:[%s13132_s3 + $0xb64] ss:$8 sps:$4 sm:$0xff]  }
 0x277   :  { %4478 = vmatprep.subr.bf16.mxu1 %v10225_v28  ;;  %v1152_v50 = vadd.f32 %v11913_v51, %v1151_v59  ;;  %v1153_v16 = vpop.f32.mrb[179].mxu0  ;;  %9587 = vmatmul.mubr.msk.bf16.vlgmr.msra.gmra.mrb[8].mxu0 %vm1344_vm0, %v7543_v27  ;;  %v10229_v28 = vld [vmem:[%s13132_s3 + $0x5a0] ss:$8 sps:$4 sm:$0xff]  }
 0x278   :  { %v2566_v33 = vpop.f32.mrb[64].mxu1  ;;  %7717 = vmatpush1.bf16.msra.mxu0 %v10310_v52  ;;  %7748 = vmatprep.mubr.bf16.mxu0 %v13138_v0  ;;  %v10237_v52 = vld [vmem:[%s13132_s3 + $0x5b4] ss:$8 sps:$4 sm:$0xff]  }
 0x279   :  { %v12113_v24 = vadd.f32 %v2566_v33, %v11959_v40  ;;  %v2568_v8 = vpop.f32.mrb[65].mxu1  ;;  %v1284_v57 = vmax.f32 %v1152_v50, 0.0  ;;  %7718 = vmatprep.subr.bf16.mxu0 %v10318_v14  ;;  %v976_v40 = vadd.f32 %v11913_v51, %v11377_v36  ;;  %v10330_v36 = vld [vmem:[%s13132_s3 + $0xb74] ss:$8 sps:$4 sm:$0xff]   ;;  %v10243_v50 = vld [vmem:[%s13132_s3 + $0x5c4] ss:$8 sps:$4 sm:$0xff]  }
 0x27a   :  { %v12119_v4 = vadd.f32 %v2568_v8, %v11968_v19  ;;  %4479 = vmatpush1.bf16.msra.mxu1 %v10223_v31  ;;  %v2570_v7 = vpop.f32.mrb[66].mxu1  ;;  %v10322_v19 = vld [vmem:[%s13132_s3 + $0xb60] ss:$8 sps:$4 sm:$0xff]   ;;  %v10235_v31 = vld [vmem:[%s13132_s3 + $0x5b0] ss:$8 sps:$4 sm:$0xff]   ;;  %v981_v8 = vadd.f32 %v11913_v51, %v11393_v47 }
 0x27b   :  { %v2571_v27 = vpop.f32.mrb[67].mxu1  ;;  %4548 = vmatprep.subr.bf16.mxu1 %v10231_v41  ;;  %v7687_v34 = vpack.c.bf16 %v1284_v57, %v1284_v57  ;;  %v1240_v41 = vmax.f32 %v976_v40, 0.0 }
 0x27c   :  { %v12129_v17 = vpop.f32.mrb[180].mxu0  ;;  %7719 = vmatpush1.bf16.msra.mxu0 %v10316_v21 }
 0x27d   :  { %9200 = vmatmul.mubr.msk.bf16.vlgmr.msra.gmra.mrb[172].mxu1 %vm1344_vm0, %v4447_v44  ;;  %v1158_v14 = vpop.f32.mrb[181].mxu0  ;;  %7860 = vmatprep.subr.bf16.mxu0 %v10324_v1  ;;  %v10328_v44 = vld [vmem:[%s13132_s3 + $0xb70] ss:$8 sps:$4 sm:$0xff]   ;;  %v4519_v47 = vpack.c.bf16 %v1240_v41, %v1240_v41 }
 0x27e   :  { %4549 = vmatpush1.bf16.msra.mxu1 %v10229_v28  ;;  %4580 = vmatprep.mubr.bf16.mxu1 %v13138_v0  ;;  %v1159_v59 = vpop.f32.mrb[182].mxu0  ;;  %v10336_v28 = vld [vmem:[%s13132_s3 + $0xba4] ss:$8 sps:$4 sm:$0xff]   ;;  %v10247_v41 = vld [vmem:[%s13132_s3 + $0x5d0] ss:$8 sps:$4 sm:$0xff]  }
 0x27f   :  { %4550 = vmatprep.subr.bf16.mxu1 %v10237_v52  ;;  %v1160_v16 = vadd.f32 %v11913_v51, %v1159_v59  ;;  %v1161_v33 = vpop.f32.mrb[183].mxu0  ;;  %9605 = vmatmul.mubr.msk.bf16.vlgmr.msra.gmra.mrb[12].mxu0 %vm1344_vm0, %v7687_v34  ;;  %v10241_v52 = vld [vmem:[%s13132_s3 + $0x5c0] ss:$8 sps:$4 sm:$0xff]   ;;  %v10342_v59 = vld [vmem:[%s13132_s3 + $0xbb4] ss:$8 sps:$4 sm:$0xff]  }
 0x280   :  { %v2638_v21 = vpop.f32.mrb[68].mxu1  ;;  %7861 = vmatpush1.bf16.msra.mxu0 %v10322_v19  ;;  %7892 = vmatprep.mubr.bf16.mxu0 %v13138_v0 }
 0x281   :  { %v12154_v57 = vadd.f32 %v2638_v21, %v12000_v62  ;;  %v2640_v1 = vpop.f32.mrb[69].mxu1  ;;  %v1286_v7 = vmax.f32 %v1160_v16, 0.0  ;;  %7862 = vmatprep.subr.bf16.mxu0 %v10330_v36  ;;  %v10249_v62 = vld [vmem:[%s13132_s3 + $0x5d4] ss:$8 sps:$4 sm:$0xff]   ;;  %v1241_v36 = vmax.f32 %v981_v8, 0.0 }
 0x282   :  { %v12160_v40 = vadd.f32 %v2640_v1, %v12009_v12  ;;  %4551 = vmatpush1.bf16.msra.mxu1 %v10235_v31  ;;  %v2642_v27 = vpop.f32.mrb[70].mxu1  ;;  %v10334_v12 = vld [vmem:[%s13132_s3 + $0xba0] ss:$8 sps:$4 sm:$0xff]   ;;  %v10255_v16 = vld [vmem:[%s13132_s3 + $0x5e4] ss:$8 sps:$4 sm:$0xff]  }
 0x283   :  { %v2643_v34 = vpop.f32.mrb[71].mxu1  ;;  %4620 = vmatprep.subr.bf16.mxu1 %v10243_v50  ;;  %v7831_v19 = vpack.c.bf16 %v1286_v7, %v1286_v7  ;;  %v10340_v8 = vld [vmem:[%s13132_s3 + $0xbb0] ss:$8 sps:$4 sm:$0xff]   ;;  %v4591_v1 = vpack.c.bf16 %v1241_v36, %v1241_v36 }
 0x284   :  { %v12168_v14 = vpop.f32.mrb[184].mxu0  ;;  %7863 = vmatpush1.bf16.msra.mxu0 %v10328_v44 }
 0x285   :  { %9209 = vmatmul.mubr.msk.bf16.vlgmr.msra.gmra.mrb[176].mxu1 %vm1344_vm0, %v4519_v47  ;;  %v1166_v31 = vpop.f32.mrb[185].mxu0  ;;  %8004 = vmatprep.subr.bf16.mxu0 %v10336_v28 }
 0x286   :  { %4621 = vmatpush1.bf16.msra.mxu1 %v10241_v52  ;;  %4652 = vmatprep.mubr.bf16.mxu1 %v13138_v0  ;;  %v1167_v50 = vpop.f32.mrb[186].mxu0  ;;  %v10348_v52 = vld [vmem:[%s13132_s3 + $0xbe4] ss:$8 sps:$4 sm:$0xff]  }
 0x287   :  { %4622 = vmatprep.subr.bf16.mxu1 %v10249_v62  ;;  %v1168_v33 = vadd.f32 %v11913_v51, %v1167_v50  ;;  %v1169_v21 = vpop.f32.mrb[187].mxu0  ;;  %9623 = vmatmul.mubr.msk.bf16.vlgmr.msra.gmra.mrb[16].mxu0 %vm1344_vm0, %v7831_v19  ;;  %v10253_v62 = vld [vmem:[%s13132_s3 + $0x5e0] ss:$8 sps:$4 sm:$0xff]  }
 0x288   :  { %v2710_v44 = vpop.f32.mrb[72].mxu1  ;;  %8005 = vmatpush1.bf16.msra.mxu0 %v10334_v12  ;;  %8036 = vmatprep.mubr.bf16.mxu0 %v13138_v0  ;;  %v10261_v12 = vld [vmem:[%s13132_s3 + $0x5f4] ss:$8 sps:$4 sm:$0xff]  }
 0x289   :  { %v12191_v7 = vadd.f32 %v2710_v44, %v12037_v22  ;;  %v2712_v28 = vpop.f32.mrb[73].mxu1  ;;  %v1288_v27 = vmax.f32 %v1168_v33, 0.0  ;;  %8006 = vmatprep.subr.bf16.mxu0 %v10342_v59  ;;  %v984_v22 = vadd.f32 %v11913_v51, %v11400_v25  ;;  %v10354_v25 = vld [vmem:[%s13132_s3 + $0xbf4] ss:$8 sps:$4 sm:$0xff]   ;;  %v10267_v33 = vld [vmem:[%s13132_s3 + $0x604] ss:$8 sps:$4 sm:$0xff]  }
 0x28a   :  { %v12197_v47 = vadd.f32 %v2712_v28, %v12043_v39  ;;  %4623 = vmatpush1.bf16.msra.mxu1 %v10247_v41  ;;  %v2714_v34 = vpop.f32.mrb[74].mxu1  ;;  %v10346_v39 = vld [vmem:[%s13132_s3 + $0xbe0] ss:$8 sps:$4 sm:$0xff]   ;;  %v10259_v41 = vld [vmem:[%s13132_s3 + $0x5f0] ss:$8 sps:$4 sm:$0xff]   ;;  %v989_v28 = vadd.f32 %v11913_v51, %v11423_v60 }
 0x28b   :  { %v2715_v19 = vpop.f32.mrb[75].mxu1  ;;  %4692 = vmatprep.subr.bf16.mxu1 %v10255_v16  ;;  %v7975_v36 = vpack.c.bf16 %v1288_v27, %v1288_v27  ;;  %v1242_v16 = vmax.f32 %v984_v22, 0.0  ;;  %v10360_v34 = vld [vmem:[%s13132_s3 + $0xc24] ss:$8 sps:$4 sm:$0xff]   ;;  %v10265_v22 = vld [vmem:[%s13132_s3 + $0x600] ss:$8 sps:$4 sm:$0xff]  }
 0x28c   :  { %v12207_v31 = vpop.f32.mrb[188].mxu0  ;;  %8007 = vmatpush1.bf16.msra.mxu0 %v10340_v8  ;;  %v10273_v60 = vld [vmem:[%s13132_s3 + $0x614] ss:$8 sps:$4 sm:$0xff]  }
 0x28d   :  { %9218 = vmatmul.mubr.msk.bf16.vlgmr.msra.gmra.mrb[180].mxu1 %vm1344_vm0, %v4591_v1  ;;  %v1174_v59 = vpop.f32.mrb[189].mxu0  ;;  %8148 = vmatprep.subr.bf16.mxu0 %v10348_v52  ;;  %v10352_v1 = vld [vmem:[%s13132_s3 + $0xbf0] ss:$8 sps:$4 sm:$0xff]   ;;  %v4663_v19 = vpack.c.bf16 %v1242_v16, %v1242_v16 }
 0x28e   :  { %4693 = vmatpush1.bf16.msra.mxu1 %v10253_v62  ;;  %4724 = vmatprep.mubr.bf16.mxu1 %v13138_v0  ;;  %v1175_v50 = vpop.f32.mrb[190].mxu0  ;;  %v10358_v59 = vld [vmem:[%s13132_s3 + $0xc20] ss:$8 sps:$4 sm:$0xff]   ;;  %v10271_v16 = vld [vmem:[%s13132_s3 + $0x610] ss:$8 sps:$4 sm:$0xff]  }
 0x28f   :  { %4694 = vmatprep.subr.bf16.mxu1 %v10261_v12  ;;  %v1176_v21 = vadd.f32 %v11913_v51, %v1175_v50  ;;  %v1177_v44 = vpop.f32.mrb[191].mxu0  ;;  %9641 = vmatmul.mubr.msk.bf16.vlgmr.msra.gmra.mrb[20].mxu0 %vm1344_vm0, %v7975_v36  ;;  %v10366_v50 = vld [vmem:[%s13132_s3 + $0xc34] ss:$8 sps:$4 sm:$0xff]  }
 0x290   :  { %v12225_v8 = vpop.f32.mrb[76].mxu1  ;;  %8149 = vmatpush1.bf16.msra.mxu0 %v10346_v39  ;;  %8180 = vmatprep.mubr.bf16.mxu0 %v13138_v0 }
 0x291   :  { %v12233_v27 = vpop.f32.mrb[77].mxu1  ;;  %v1290_v52 = vmax.f32 %v1176_v21, 0.0  ;;  %8150 = vmatprep.subr.bf16.mxu0 %v10354_v25  ;;  %v1243_v25 = vmax.f32 %v989_v28, 0.0  ;;  %v10279_v21 = vld [vmem:[%s13132_s3 + $0x624] ss:$8 sps:$4 sm:$0xff]  }
 0x292   :  { %4695 = vmatpush1.bf16.msra.mxu1 %v10259_v41  ;;  %v2786_v62 = vpop.f32.mrb[78].mxu1 }
 0x293   :  { %v2787_v12 = vpop.f32.mrb[79].mxu1  ;;  %4764 = vmatprep.subr.bf16.mxu1 %v10267_v33  ;;  %v8119_v36 = vpack.c.bf16 %v1290_v52, %v1290_v52  ;;  %v10364_v52 = vld [vmem:[%s13132_s3 + $0xc30] ss:$8 sps:$4 sm:$0xff]  }
 0x294   :  { %v12244_v39 = vpop.f32.mrb[192].mxu0  ;;  %8151 = vmatpush1.bf16.msra.mxu0 %v10352_v1  ;;  %v10378_v12 = vld [vmem:[%s13132_s3 + $0xc64] ss:$8 sps:$4 sm:$0xff]  }
 0x295   :  { %9227 = vmatmul.mubr.msk.bf16.vlgmr.msra.gmra.mrb[184].mxu1 %vm1344_vm0, %v4663_v19  ;;  %v1182_v41 = vpop.f32.mrb[193].mxu0  ;;  %8292 = vmatprep.subr.bf16.mxu0 %v10360_v34  ;;  %v4735_v34 = vpack.c.bf16 %v1243_v25, %v1243_v25 }
 0x296   :  { %4765 = vmatpush1.bf16.msra.mxu1 %v10265_v22  ;;  %4796 = vmatprep.mubr.bf16.mxu1 %v13138_v0  ;;  %v1183_v33 = vpop.f32.mrb[194].mxu0 }
 0x297   :  { %4766 = vmatprep.subr.bf16.mxu1 %v10273_v60  ;;  %v1184_v44 = vadd.f32 %v11913_v51, %v1183_v33  ;;  %v1185_v1 = vpop.f32.mrb[195].mxu0  ;;  %9659 = vmatmul.mubr.msk.bf16.vlgmr.msra.gmra.mrb[24].mxu0 %vm1344_vm0, %v8119_v36 }
 0x298   :  { %v2854_v28 = vpop.f32.mrb[80].mxu1  ;;  %8293 = vmatpush1.bf16.msra.mxu0 %v10358_v59  ;;  %8324 = vmatprep.mubr.bf16.mxu0 %v13138_v0  ;;  %v10277_v59 = vld [vmem:[%s13132_s3 + $0x620] ss:$8 sps:$4 sm:$0xff]  }
 0x299   :  { %v12267_v62 = vadd.f32 %v2854_v28, %v12113_v24  ;;  %v2856_v22 = vpop.f32.mrb[81].mxu1  ;;  %v1292_v19 = vmax.f32 %v1184_v44, 0.0  ;;  %8294 = vmatprep.subr.bf16.mxu0 %v10366_v50  ;;  %v992_v24 = vadd.f32 %v11913_v51, %v11434_v13  ;;  %v10285_v50 = vld [vmem:[%s13132_s3 + $0x634] ss:$8 sps:$4 sm:$0xff]  }
 0x29a   :  { %v12273_v60 = vadd.f32 %v2856_v22, %v12119_v4  ;;  %4767 = vmatpush1.bf16.msra.mxu1 %v10271_v16  ;;  %v2858_v36 = vpop.f32.mrb[82].mxu1  ;;  %v10376_v4 = vld [vmem:[%s13132_s3 + $0xc60] ss:$8 sps:$4 sm:$0xff]   ;;  %v10384_v13 = vld [vmem:[%s13132_s3 + $0xc74] ss:$8 sps:$4 sm:$0xff]  }
 0x29b   :  { %v2859_v25 = vpop.f32.mrb[83].mxu1  ;;  %4836 = vmatprep.subr.bf16.mxu1 %v10279_v21  ;;  %v8263_v41 = vpack.c.bf16 %v1292_v19, %v1292_v19  ;;  %v10283_v21 = vld [vmem:[%s13132_s3 + $0x630] ss:$8 sps:$4 sm:$0xff]   ;;  %v1244_v1 = vmax.f32 %v992_v24, 0.0 }
 0x29c   :  { %v12283_v33 = vpop.f32.mrb[196].mxu0  ;;  %8295 = vmatpush1.bf16.msra.mxu0 %v10364_v52  ;;  %v10382_v19 = vld [vmem:[%s13132_s3 + $0xc70] ss:$8 sps:$4 sm:$0xff]  }
 0x29d   :  { %9236 = vmatmul.mubr.msk.bf16.vlgmr.msra.gmra.mrb[188].mxu1 %vm1344_vm0, %v4735_v34  ;;  %v1190_v16 = vpop.f32.mrb[197].mxu0  ;;  %8436 = vmatprep.subr.bf16.mxu0 %v10378_v12  ;;  %v10291_v34 = vld [vmem:[%s13132_s3 + $0x644] ss:$8 sps:$4 sm:$0xff]   ;;  %v997_v12 = vadd.f32 %v11913_v51, %v11447_v23  ;;  %v10297_v23 = vld [vmem:[%s13132_s3 + $0x654] ss:$8 sps:$4 sm:$0xff]  }
 0x29e   :  { %4837 = vmatpush1.bf16.msra.mxu1 %v10277_v59  ;;  %v1191_v44 = vpop.f32.mrb[198].mxu0  ;;  %4868 = vmatprep.mubr.bf16.mxu1 %v13138_v0 }
 0x29f   :  { %4838 = vmatprep.subr.bf16.mxu1 %v10285_v50  ;;  %v1192_v28 = vadd.f32 %v11913_v51, %v1191_v44  ;;  %v1193_v52 = vpop.f32.mrb[199].mxu0  ;;  %9677 = vmatmul.mubr.msk.bf16.vlgmr.msra.gmra.mrb[28].mxu0 %vm1344_vm0, %v8263_v41  ;;  %v10289_v50 = vld [vmem:[%s13132_s3 + $0x640] ss:$8 sps:$4 sm:$0xff]  }
 0x2a0   :  { %v2926_v22 = vpop.f32.mrb[84].mxu1  ;;  %8437 = vmatpush1.bf16.msra.mxu0 %v10376_v4  ;;  %8468 = vmatprep.mubr.bf16.mxu0 %v13138_v0  ;;  %v4807_v4 = vpack.c.bf16 %v1244_v1, %v1244_v1  ;;  %v10295_v1 = vld [vmem:[%s13132_s3 + $0x650] ss:$8 sps:$4 sm:$0xff]  }
 0x2a1   :  { %v12308_v36 = vadd.f32 %v2926_v22, %v12154_v57  ;;  %v2928_v59 = vpop.f32.mrb[85].mxu1  ;;  %v1294_v24 = vmax.f32 %v1192_v28, 0.0  ;;  %8438 = vmatprep.subr.bf16.mxu0 %v10384_v13  ;;  %v1245_v13 = vmax.f32 %v997_v12, 0.0 }
 0x2a2   :  { %v12311_v25 = vadd.f32 %v2928_v59, %v12160_v40  ;;  %4839 = vmatpush1.bf16.msra.mxu1 %v10283_v21  ;;  %v2930_v41 = vpop.f32.mrb[86].mxu1 }
 0x2a3   :  { %v8407_v16 = vpack.c.bf16 %v1294_v24, %v1294_v24  ;;  %v2931_v44 = vpop.f32.mrb[87].mxu1  ;;  %4908 = vmatprep.subr.bf16.mxu1 %v10291_v34  ;;  %v4879_v12 = vpack.c.bf16 %v1245_v13, %v1245_v13  ;;  %v1005_v13 = vadd.f32 %v11913_v51, %v11467_v43  ;;  %v10319_v43 = vld [vmem:[%s13132_s3 + $0x690] ss:$8 sps:$4 sm:$0xff]  }
 0x2a4   :  { %v1382_v57 = vpop.f32.mrb[200].mxu0  ;;  %8439 = vmatpush1.bf16.msra.mxu0 %v10382_v19 }
 0x2a5   :  { %v1447_v40 = vadd.f32 %v11490_v58, %v1382_v57  ;;  %v1384_v28 = vpop.f32.mrb[201].mxu0  ;;  %9245 = vmatmul.mubr.msk.bf16.vlgmr.msra.gmra.mrb[192].mxu1 %vm1344_vm0, %v4807_v4  ;;  %v10303_v58 = vld [vmem:[%s13132_s3 + $0x664] ss:$8 sps:$4 sm:$0xff]  }
 0x2a6   :  { %v1449_v21 = vadd.f32 %v11498_v2, %v1384_v28  ;;  %4909 = vmatpush1.bf16.msra.mxu1 %v10289_v50  ;;  %v1386_v52 = vpop.f32.mrb[202].mxu0  ;;  %4940 = vmatprep.mubr.bf16.mxu1 %v13138_v0  ;;  %v10315_v57 = vld [vmem:[%s13132_s3 + $0x684] ss:$8 sps:$4 sm:$0xff]  }
 0x2a7   :  { %v1925_v34 = vadd.f32 %v11758_v32, %v1447_v40  ;;  %v1387_v22 = vpop.f32.mrb[203].mxu0  ;;  %4910 = vmatprep.subr.bf16.mxu1 %v10297_v23  ;;  %9695 = vmatmul.mubr.msk.bf16.vlgmr.msra.gmra.mrb[32].mxu0 %vm1344_vm0, %v8407_v16  ;;  %v10301_v16 = vld [vmem:[%s13132_s3 + $0x660] ss:$8 sps:$4 sm:$0xff]   ;;  %v10307_v23 = vld [vmem:[%s13132_s3 + $0x670] ss:$8 sps:$4 sm:$0xff]  }
 0x2a8   :  { %v1926_v2 = vadd.f32 %v11766_v55, %v1449_v21  ;;  %v2998_v19 = vpop.f32.mrb[88].mxu1  ;;  %v1000_v55 = vadd.f32 %v11913_v51, %v11454_v35  ;;  %v1247_v22 = vmax.f32 %v1005_v13, 0.0 }
 0x2a9   :  { %v2213_v59 = vadd.f32 %v11917_v61, %v1925_v34  ;;  %v12334_v24 = vadd.f32 %v2998_v19, %v12191_v7  ;;  %v3000_v41 = vpop.f32.mrb[89].mxu1  ;;  %v10321_v34 = vld [vmem:[%s13132_s3 + $0x694] ss:$8 sps:$4 sm:$0xff]  }
 0x2aa   :  { %v2214_v32 = vadd.f32 %v11925_v3, %v1926_v2  ;;  %v12338_v50 = vadd.f32 %v3000_v41, %v12197_v47  ;;  %4911 = vmatpush1.bf16.msra.mxu1 %v10295_v1  ;;  %v3002_v4 = vpop.f32.mrb[90].mxu1  ;;  %v10309_v3 = vld [vmem:[%s13132_s3 + $0x674] ss:$8 sps:$4 sm:$0xff]   ;;  %v5023_v19 = vpack.c.bf16 %v1247_v22, %v1247_v22  ;;  %v10349_v22 = vld [vmem:[%s13132_s3 + $0x6e0] ss:$8 sps:$4 sm:$0xff]  }
 0x2ab   :  { %v3003_v44 = vpop.f32.mrb[91].mxu1  ;;  %4980 = vmatprep.subr.bf16.mxu1 %v10303_v58  ;;  %v2501_v61 = vadd.f32 %v12071_v30, %v2213_v59  ;;  %v1246_v30 = vmax.f32 %v1000_v55, 0.0  ;;  %v10327_v58 = vld [vmem:[%s13132_s3 + $0x6a4] ss:$8 sps:$4 sm:$0xff]   ;;  %v10325_v4 = vld [vmem:[%s13132_s3 + $0x6a0] ss:$8 sps:$4 sm:$0xff]  }
 0x2ac   :  { %v2502_v7 = vadd.f32 %v12079_v54, %v2214_v32 }
 0x2ad   :  { %9254 = vmatmul.mubr.msk.bf16.vlgmr.msra.gmra.mrb[196].mxu1 %vm1344_vm0, %v4879_v12  ;;  %v2789_v47 = vadd.f32 %v12225_v8, %v2501_v61  ;;  %v4951_v52 = vpack.c.bf16 %v1246_v30, %v1246_v30  ;;  %v10337_v30 = vld [vmem:[%s13132_s3 + $0x6c0] ss:$8 sps:$4 sm:$0xff]  }
 0x2ae   :  { %4981 = vmatpush1.bf16.msra.mxu1 %v10301_v16  ;;  %v2790_v35 = vadd.f32 %v12233_v27, %v2502_v7  ;;  %5012 = vmatprep.mubr.bf16.mxu1 %v13138_v0  ;;  %v10313_v27 = vld [vmem:[%s13132_s3 + $0x680] ss:$8 sps:$4 sm:$0xff]   ;;  %v1008_v16 = vadd.f32 %v11913_v51, %v11474_v37  ;;  %v10339_v37 = vld [vmem:[%s13132_s3 + $0x6c4] ss:$8 sps:$4 sm:$0xff]  }
 0x2af   :  { %4982 = vmatprep.subr.bf16.mxu1 %v10309_v3  ;;  %v1013_v3 = vadd.f32 %v11913_v51, %v11487_v56  ;;  %v10345_v56 = vld [vmem:[%s13132_s3 + $0x6d4] ss:$8 sps:$4 sm:$0xff]  }
 0x2b0   :  { %v3070_v54 = vpop.f32.mrb[92].mxu1  ;;  %v1248_v44 = vmax.f32 %v1008_v16, 0.0 }
 0x2b1   :  { %v12362_v8 = vadd.f32 %v3070_v54, %v2789_v47  ;;  %v3072_v40 = vpop.f32.mrb[93].mxu1  ;;  %v1249_v13 = vmax.f32 %v1013_v3, 0.0 }
 0x2b2   :  { %v12364_v28 = vadd.f32 %v3072_v40, %v2790_v35  ;;  %4983 = vmatpush1.bf16.msra.mxu1 %v10307_v23  ;;  %v3074_v21 = vpop.f32.mrb[94].mxu1 }
 0x2b3   :  { %v3075_v1 = vpop.f32.mrb[95].mxu1  ;;  %5052 = vmatprep.subr.bf16.mxu1 %v10315_v57  ;;  %v5095_v57 = vpack.c.bf16 %v1248_v44, %v1248_v44  ;;  %v5167_v21 = vpack.c.bf16 %v1249_v13, %v1249_v13  ;;  %v10373_v13 = vld [vmem:[%s13132_s3 + $0x750] ss:$8 sps:$4 sm:$0xff]  }
 0x2b5   :  { %9263 = vmatmul.mubr.msk.bf16.vlgmr.msra.gmra.mrb[200].mxu1 %vm1344_vm0, %v4951_v52 }
 0x2b6   :  { %5053 = vmatpush1.bf16.msra.mxu1 %v10313_v27  ;;  %5084 = vmatprep.mubr.bf16.mxu1 %v13138_v0 }
 0x2b7   :  { %5054 = vmatprep.subr.bf16.mxu1 %v10321_v34 }
 0x2b8   :  { %v3142_v2 = vpop.f32.mrb[96].mxu1 }
 0x2b9   :  { %v12381_v12 = vadd.f32 %v3142_v2, %v12267_v62  ;;  %v3144_v59 = vpop.f32.mrb[97].mxu1  ;;  %v10333_v62 = vld [vmem:[%s13132_s3 + $0x6b4] ss:$8 sps:$4 sm:$0xff]  }
 0x2ba   :  { %v12384_v41 = vadd.f32 %v3144_v59, %v12273_v60  ;;  %5055 = vmatpush1.bf16.msra.mxu1 %v10319_v43  ;;  %v3146_v32 = vpop.f32.mrb[98].mxu1  ;;  %v10331_v60 = vld [vmem:[%s13132_s3 + $0x6b0] ss:$8 sps:$4 sm:$0xff]   ;;  %v1016_v43 = vadd.f32 %v11913_v51, %v11496_v6  ;;  %v10363_v6 = vld [vmem:[%s13132_s3 + $0x704] ss:$8 sps:$4 sm:$0xff]  }
 0x2bb   :  { %v3147_v55 = vpop.f32.mrb[99].mxu1  ;;  %5124 = vmatprep.subr.bf16.mxu1 %v10327_v58 }
 0x2bc   :  { %v1250_v2 = vmax.f32 %v1016_v43, 0.0  ;;  %v10361_v55 = vld [vmem:[%s13132_s3 + $0x700] ss:$8 sps:$4 sm:$0xff]  }
 0x2bd   :  { %9272 = vmatmul.mubr.msk.bf16.vlgmr.msra.gmra.mrb[204].mxu1 %vm1344_vm0, %v5023_v19 }
 0x2be   :  { %5125 = vmatpush1.bf16.msra.mxu1 %v10325_v4  ;;  %5156 = vmatprep.mubr.bf16.mxu1 %v13138_v0 }
 0x2bf   :  { %5126 = vmatprep.subr.bf16.mxu1 %v10333_v62  ;;  %v5239_v62 = vpack.c.bf16 %v1250_v2, %v1250_v2 }
 0x2c0   :  { %v3214_v61 = vpop.f32.mrb[100].mxu1 }
 0x2c1   :  { %v12405_v7 = vadd.f32 %v3214_v61, %v12308_v36  ;;  %v3216_v47 = vpop.f32.mrb[101].mxu1  ;;  %v10343_v36 = vld [vmem:[%s13132_s3 + $0x6d0] ss:$8 sps:$4 sm:$0xff]  }
 0x2c2   :  { %v12408_v23 = vadd.f32 %v3216_v47, %v12311_v25  ;;  %5127 = vmatpush1.bf16.msra.mxu1 %v10331_v60  ;;  %v3218_v35 = vpop.f32.mrb[102].mxu1  ;;  %v10351_v25 = vld [vmem:[%s13132_s3 + $0x6e4] ss:$8 sps:$4 sm:$0xff]   ;;  %v1021_v60 = vadd.f32 %v11913_v51, %v11511_v5 }
 0x2c3   :  { %v3219_v54 = vpop.f32.mrb[103].mxu1  ;;  %5196 = vmatprep.subr.bf16.mxu1 %v10339_v37  ;;  %v10372_v5 = vld [vmem:[%s13132_s3 + $0x744] ss:$8 sps:$4 sm:$0xff]  }
 0x2c4   :  { %v1251_v37 = vmax.f32 %v1021_v60, 0.0  ;;  %v12480_v54 = vld [vmem:[%s13133_s2] ss:$0 sm:$0xff] }
 0x2c5   :  { %9281 = vmatmul.mubr.msk.bf16.vlgmr.msra.gmra.mrb[208].mxu1 %vm1344_vm0, %v5095_v57 }
 0x2c6   :  { %5197 = vmatpush1.bf16.msra.mxu1 %v10337_v30  ;;  %5228 = vmatprep.mubr.bf16.mxu1 %v13138_v0  ;;  %v10370_v30 = vld [vmem:[%s13132_s3 + $0x740] ss:$8 sps:$4 sm:$0xff]   ;;  %v5311_v57 = vpack.c.bf16 %v1251_v37, %v1251_v37 }
 0x2c7   :  { %5198 = vmatprep.subr.bf16.mxu1 %v10345_v56 }
 0x2c8   :  { %v3286_v40 = vpop.f32.mrb[104].mxu1 }
 0x2c9   :  { %v12425_v27 = vadd.f32 %v3286_v40, %v12334_v24  ;;  %v3288_v52 = vpop.f32.mrb[105].mxu1  ;;  %v10357_v24 = vld [vmem:[%s13132_s3 + $0x6f4] ss:$8 sps:$4 sm:$0xff]  }
 0x2ca   :  { %v12428_v1 = vadd.f32 %v3288_v52, %v12338_v50  ;;  %5199 = vmatpush1.bf16.msra.mxu1 %v10343_v36  ;;  %v3290_v34 = vpop.f32.mrb[106].mxu1  ;;  %v10355_v50 = vld [vmem:[%s13132_s3 + $0x6f0] ss:$8 sps:$4 sm:$0xff]  }
 0x2cb   :  { %v3291_v58 = vpop.f32.mrb[107].mxu1  ;;  %5268 = vmatprep.subr.bf16.mxu1 %v10351_v25 }
 0x2cd   :  { %9290 = vmatmul.mubr.msk.bf16.vlgmr.msra.gmra.mrb[212].mxu1 %vm1344_vm0, %v5167_v21 }
 0x2ce   :  { %5269 = vmatpush1.bf16.msra.mxu1 %v10349_v22  ;;  %5300 = vmatprep.mubr.bf16.mxu1 %v13138_v0 }
 0x2cf   :  { %5270 = vmatprep.subr.bf16.mxu1 %v10357_v24 }
 0x2d0   :  { %v3358_v19 = vpop.f32.mrb[108].mxu1  ;;  %v12492_v36 = vpop.f32.mrb[204].mxu0 }
 0x2d1   :  { %v12447_v59 = vadd.f32 %v3358_v19, %v12362_v8  ;;  %v3360_v32 = vpop.f32.mrb[109].mxu1  ;;  %v10369_v8 = vld [vmem:[%s13132_s3 + $0x714] ss:$8 sps:$4 sm:$0xff]   ;;  %v12497_v40 = vpop.f32.mrb[205].mxu0  ;;  %v1037_v19 = vadd.f32 %v12480_v54, %v11563_v15 }
 0x2d2   :  { %v12450_v4 = vadd.f32 %v3360_v32, %v12364_v28  ;;  %5271 = vmatpush1.bf16.msra.mxu1 %v10355_v50  ;;  %v3362_v16 = vpop.f32.mrb[110].mxu1  ;;  %v10367_v28 = vld [vmem:[%s13132_s3 + $0x710] ss:$8 sps:$4 sm:$0xff]   ;;  %v5450_v52 = vpop.f32.mrb[206].mxu0  ;;  %v10379_v50 = vld [vmem:[%s13132_s3 + $0x780] ss:$8 sps:$4 sm:$0xff]  }
 0x2d3   :  { %v3363_v44 = vpop.f32.mrb[111].mxu1  ;;  %5340 = vmatprep.subr.bf16.mxu1 %v10363_v6  ;;  %v5451_v43 = vpop.f32.mrb[207].mxu0  ;;  %v1255_v60 = vmax.f32 %v1037_v19, 0.0  ;;  %v10396_v52 = vld [vmem:[%s13132_s3 + $0x804] ss:$8 sps:$4 sm:$0xff]  }
 0x2d4   :  { %v10390_v44 = vld [vmem:[%s13132_s3 + $0x7c4] ss:$8 sps:$4 sm:$0xff]   ;;  %v10394_v19 = vld [vmem:[%s13132_s3 + $0x800] ss:$8 sps:$4 sm:$0xff]  }
 0x2d5   :  { %9299 = vmatmul.mubr.msk.bf16.vlgmr.msra.gmra.mrb[216].mxu1 %vm1344_vm0, %v5239_v62  ;;  %v10385_v62 = vld [vmem:[%s13132_s3 + $0x790] ss:$8 sps:$4 sm:$0xff]  }
 0x2d6   :  { %5341 = vmatpush1.bf16.msra.mxu1 %v10361_v55  ;;  %5372 = vmatprep.mubr.bf16.mxu1 %v13138_v0 }
 0x2d7   :  { %5342 = vmatprep.subr.bf16.mxu1 %v10369_v8 }
 0x2d8   :  { %v3430_v51 = vpop.f32.mrb[112].mxu1 }
 0x2d9   :  { %v12469_v61 = vadd.f32 %v3430_v51, %v12381_v12  ;;  %v3432_v3 = vpop.f32.mrb[113].mxu1  ;;  %v1029_v12 = vadd.f32 %v12480_v54, %v11533_v63  ;;  %v10381_v63 = vld [vmem:[%s13132_s3 + $0x784] ss:$8 sps:$4 sm:$0xff]  }
 0x2da   :  { %v12472_v47 = vadd.f32 %v3432_v3, %v12384_v41  ;;  %5343 = vmatpush1.bf16.msra.mxu1 %v10367_v28  ;;  %v3434_v35 = vpop.f32.mrb[114].mxu1  ;;  %v10375_v41 = vld [vmem:[%s13132_s3 + $0x754] ss:$8 sps:$4 sm:$0xff]   ;;  %v12508_v2 = vpop.f32.mrb[208].mxu0 }
 0x2db   :  { %v3435_v56 = vpop.f32.mrb[115].mxu1  ;;  %5484 = vmatprep.subr.bf16.mxu1 %v10372_v5  ;;  %v1253_v25 = vmax.f32 %v1029_v12, 0.0 }
 0x2dc   :  { %v5599_v56 = vpack.c.bf16 %v1255_v60, %v1255_v60 }
 0x2dd   :  { %9308 = vmatmul.mubr.msk.bf16.vlgmr.msra.gmra.mrb[220].mxu1 %vm1344_vm0, %v5311_v57  ;;  %v5455_v6 = vpack.c.bf16 %v1253_v25, %v1253_v25  ;;  %v10388_v57 = vld [vmem:[%s13132_s3 + $0x7c0] ss:$8 sps:$4 sm:$0xff]  }
 0x2de   :  { %5485 = vmatpush1.bf16.msra.mxu1 %v10370_v30  ;;  %5516 = vmatprep.mubr.bf16.mxu1 %v13138_v0 }
 0x2df   :  { %5486 = vmatprep.subr.bf16.mxu1 %v10375_v41  ;;  %v1045_v41 = vadd.f32 %v12480_v54, %v11600_v49 }
 0x2e0   :  { %v3502_v21 = vpop.f32.mrb[116].mxu1 }
 0x2e1   :  { %v12500_v34 = vadd.f32 %v3502_v21, %v12405_v7  ;;  %v3504_v22 = vpop.f32.mrb[117].mxu1  ;;  %v10387_v7 = vld [vmem:[%s13132_s3 + $0x794] ss:$8 sps:$4 sm:$0xff]   ;;  %v10391_v21 = vld [vmem:[%s13132_s3 + $0x7d0] ss:$8 sps:$4 sm:$0xff]   ;;  %v1257_v49 = vmax.f32 %v1045_v41, 0.0 }
 0x2e2   :  { %v12503_v58 = vadd.f32 %v3504_v22, %v12408_v23  ;;  %5487 = vmatpush1.bf16.msra.mxu1 %v10373_v13  ;;  %v3506_v24 = vpop.f32.mrb[118].mxu1  ;;  %v12515_v23 = vpop.f32.mrb[209].mxu0 }
 0x2e3   :  { %v3507_v32 = vpop.f32.mrb[119].mxu1  ;;  %5628 = vmatprep.subr.bf16.mxu1 %v10381_v63  ;;  %v5594_v16 = vpop.f32.mrb[210].mxu0 }
 0x2e4   :  { %v5595_v55 = vpop.f32.mrb[211].mxu0  ;;  %v1053_v16 = vadd.f32 %v12480_v54, %v11633_v45 }
 0x2e5   :  { %9326 = vmatmul.mubr.msk.bf16.vlgmr.msra.gmra.mrb[224].mxu1 %vm1344_vm0, %v5455_v6  ;;  %v12522_v15 = vpop.f32.mrb[212].mxu0 }
 0x2e6   :  { %5629 = vmatpush1.bf16.msra.mxu1 %v10379_v50  ;;  %5660 = vmatprep.mubr.bf16.mxu1 %v13138_v0  ;;  %v12527_v8 = vpop.f32.mrb[213].mxu0  ;;  %v1259_v45 = vmax.f32 %v1053_v16, 0.0  ;;  %v10406_v16 = vld [vmem:[%s13132_s3 + $0x880] ss:$8 sps:$4 sm:$0xff]  }
 0x2e7   :  { %5630 = vmatprep.subr.bf16.mxu1 %v10387_v7  ;;  %v5738_v37 = vpop.f32.mrb[214].mxu0  ;;  %v5743_v7 = vpack.c.bf16 %v1257_v49, %v1257_v49  ;;  %v10403_v49 = vld [vmem:[%s13132_s3 + $0x850] ss:$8 sps:$4 sm:$0xff]  }
 0x2e8   :  { %v3574_v28 = vpop.f32.mrb[120].mxu1  ;;  %v5739_v3 = vpop.f32.mrb[215].mxu0 }
 0x2e9   :  { %v12530_v5 = vadd.f32 %v3574_v28, %v12425_v27  ;;  %v3576_v51 = vpop.f32.mrb[121].mxu1  ;;  %v10393_v27 = vld [vmem:[%s13132_s3 + $0x7d4] ss:$8 sps:$4 sm:$0xff]   ;;  %v10402_v28 = vld [vmem:[%s13132_s3 + $0x844] ss:$8 sps:$4 sm:$0xff]  }
 0x2ea   :  { %v12533_v35 = vadd.f32 %v3576_v51, %v12428_v1  ;;  %5631 = vmatpush1.bf16.msra.mxu1 %v10385_v62  ;;  %v3578_v30 = vpop.f32.mrb[122].mxu1  ;;  %v12538_v12 = vpop.f32.mrb[216].mxu0 }
 0x2eb   :  { %v3579_v13 = vpop.f32.mrb[123].mxu1  ;;  %5772 = vmatprep.subr.bf16.mxu1 %v10390_v44  ;;  %v12545_v1 = vpop.f32.mrb[217].mxu0  ;;  %v10397_v44 = vld [vmem:[%s13132_s3 + $0x810] ss:$8 sps:$4 sm:$0xff]  }
 0x2ec   :  { %v5882_v25 = vpop.f32.mrb[218].mxu0  ;;  %v5887_v13 = vpack.c.bf16 %v1259_v45, %v1259_v45 }
 0x2ed   :  { %9344 = vmatmul.mubr.msk.bf16.vlgmr.msra.gmra.mrb[228].mxu1 %vm1344_vm0, %v5599_v56  ;;  %v5883_v63 = vpop.f32.mrb[219].mxu0  ;;  %v10400_v56 = vld [vmem:[%s13132_s3 + $0x840] ss:$8 sps:$4 sm:$0xff]  }
 0x2ee   :  { %5773 = vmatpush1.bf16.msra.mxu1 %v10388_v57  ;;  %5804 = vmatprep.mubr.bf16.mxu1 %v13138_v0 }
 0x2ef   :  { %5774 = vmatprep.subr.bf16.mxu1 %v10393_v27  ;;  %v1061_v27 = vadd.f32 %v12480_v54, %v11670_v46 }
 0x2f0   :  { %v3646_v22 = vpop.f32.mrb[124].mxu1 }
 0x2f1   :  { %v12556_v43 = vadd.f32 %v3646_v22, %v12447_v59  ;;  %v3648_v24 = vpop.f32.mrb[125].mxu1  ;;  %v10399_v59 = vld [vmem:[%s13132_s3 + $0x814] ss:$8 sps:$4 sm:$0xff]   ;;  %v1261_v46 = vmax.f32 %v1061_v27, 0.0 }
 0x2f2   :  { %v12559_v50 = vadd.f32 %v3648_v24, %v12450_v4  ;;  %5775 = vmatpush1.bf16.msra.mxu1 %v10391_v21  ;;  %v3650_v6 = vpop.f32.mrb[126].mxu1  ;;  %v12564_v32 = vpop.f32.mrb[220].mxu0 }
 0x2f3   :  { %v3651_v55 = vpop.f32.mrb[127].mxu1  ;;  %5916 = vmatprep.subr.bf16.mxu1 %v10396_v52  ;;  %v12571_v4 = vpop.f32.mrb[221].mxu0  ;;  %v10408_v52 = vld [vmem:[%s13132_s3 + $0x884] ss:$8 sps:$4 sm:$0xff]  }
 0x2f4   :  { %v6026_v62 = vpop.f32.mrb[222].mxu0 }
 0x2f5   :  { %9362 = vmatmul.mubr.msk.bf16.vlgmr.msra.gmra.mrb[232].mxu1 %vm1344_vm0, %v5743_v7  ;;  %v6027_v60 = vpop.f32.mrb[223].mxu0  ;;  %v1069_v62 = vadd.f32 %v12480_v54, %v11703_v18 }
 0x2f6   :  { %5917 = vmatpush1.bf16.msra.mxu1 %v10394_v19  ;;  %5948 = vmatprep.mubr.bf16.mxu1 %v13138_v0 }
 0x2f7   :  { %5918 = vmatprep.subr.bf16.mxu1 %v10399_v59  ;;  %v6031_v59 = vpack.c.bf16 %v1261_v46, %v1261_v46  ;;  %v1263_v18 = vmax.f32 %v1069_v62, 0.0 }
 0x2f8   :  { %v3718_v37 = vpop.f32.mrb[128].mxu1 }
 0x2f9   :  { %v12582_v51 = vadd.f32 %v3718_v37, %v12469_v61  ;;  %v3720_v3 = vpop.f32.mrb[129].mxu1  ;;  %v10405_v61 = vld [vmem:[%s13132_s3 + $0x854] ss:$8 sps:$4 sm:$0xff]   ;;  %v10414_v37 = vld [vmem:[%s13132_s3 + $0x8c4] ss:$8 sps:$4 sm:$0xff]  }
 0x2fa   :  { %v12585_v30 = vadd.f32 %v3720_v3, %v12472_v47  ;;  %5919 = vmatpush1.bf16.msra.mxu1 %v10397_v44  ;;  %v3722_v57 = vpop.f32.mrb[130].mxu1  ;;  %v12590_v41 = vpop.f32.mrb[224].mxu0 }
 0x2fb   :  { %v3723_v25 = vpop.f32.mrb[131].mxu1  ;;  %6060 = vmatprep.subr.bf16.mxu1 %v10402_v28  ;;  %v12597_v47 = vpop.f32.mrb[225].mxu0  ;;  %v10409_v28 = vld [vmem:[%s13132_s3 + $0x890] ss:$8 sps:$4 sm:$0xff]  }
 0x2fc   :  { %v6170_v63 = vpop.f32.mrb[226].mxu0  ;;  %v10412_v25 = vld [vmem:[%s13132_s3 + $0x8c0] ss:$8 sps:$4 sm:$0xff]  }
 0x2fd   :  { %9380 = vmatmul.mubr.msk.bf16.vlgmr.msra.gmra.mrb[236].mxu1 %vm1344_vm0, %v5887_v13  ;;  %v6171_v21 = vpop.f32.mrb[227].mxu0  ;;  %v6175_v63 = vpack.c.bf16 %v1263_v18, %v1263_v18 }
 0x2fe   :  { %6061 = vmatpush1.bf16.msra.mxu1 %v10400_v56  ;;  %6092 = vmatprep.mubr.bf16.mxu1 %v13138_v0  ;;  %v1077_v21 = vadd.f32 %v12480_v54, %v11740_v10 }
 0x2ff   :  { %6062 = vmatprep.subr.bf16.mxu1 %v10405_v61 }
 0x300   :  { %v3790_v22 = vpop.f32.mrb[132].mxu1  ;;  %v1265_v10 = vmax.f32 %v1077_v21, 0.0 }
 0x301   :  { %v12608_v24 = vadd.f32 %v3790_v22, %v12500_v34  ;;  %v3792_v6 = vpop.f32.mrb[133].mxu1  ;;  %v10411_v34 = vld [vmem:[%s13132_s3 + $0x894] ss:$8 sps:$4 sm:$0xff]   ;;  %v10415_v22 = vld [vmem:[%s13132_s3 + $0x8d0] ss:$8 sps:$4 sm:$0xff]  }
 0x302   :  { %v12611_v19 = vadd.f32 %v3792_v6, %v12503_v58  ;;  %6063 = vmatpush1.bf16.msra.mxu1 %v10403_v49  ;;  %v3794_v7 = vpop.f32.mrb[134].mxu1  ;;  %v12616_v55 = vpop.f32.mrb[228].mxu0  ;;  %v10420_v6 = vld [vmem:[%s13132_s3 + $0x904] ss:$8 sps:$4 sm:$0xff]  }
 0x303   :  { %v3795_v60 = vpop.f32.mrb[135].mxu1  ;;  %6204 = vmatprep.subr.bf16.mxu1 %v10408_v52  ;;  %v12623_v58 = vpop.f32.mrb[229].mxu0 }
 0x304   :  { %v6314_v44 = vpop.f32.mrb[230].mxu0 }
 0x305   :  { %9398 = vmatmul.mubr.msk.bf16.vlgmr.msra.gmra.mrb[240].mxu1 %vm1344_vm0, %v6031_v59  ;;  %v6315_v45 = vpop.f32.mrb[231].mxu0 }
 0x306   :  { %6205 = vmatpush1.bf16.msra.mxu1 %v10406_v16  ;;  %6236 = vmatprep.mubr.bf16.mxu1 %v13138_v0  ;;  %v6319_v45 = vpack.c.bf16 %v1265_v10, %v1265_v10  ;;  %v1093_v10 = vadd.f32 %v12480_v54, %v11816_v42 }
 0x307   :  { %6206 = vmatprep.subr.bf16.mxu1 %v10411_v34  ;;  %v10418_v34 = vld [vmem:[%s13132_s3 + $0x900] ss:$8 sps:$4 sm:$0xff]  }
 0x308   :  { %v3862_v3 = vpop.f32.mrb[136].mxu1  ;;  %v1269_v42 = vmax.f32 %v1093_v10, 0.0 }
 0x309   :  { %v12634_v57 = vadd.f32 %v3862_v3, %v12530_v5  ;;  %v3864_v56 = vpop.f32.mrb[137].mxu1  ;;  %v10417_v5 = vld [vmem:[%s13132_s3 + $0x8d4] ss:$8 sps:$4 sm:$0xff]  }
 0x30a   :  { %v12637_v13 = vadd.f32 %v3864_v56, %v12533_v35  ;;  %6207 = vmatpush1.bf16.msra.mxu1 %v10409_v28  ;;  %v3866_v27 = vpop.f32.mrb[138].mxu1  ;;  %v12642_v61 = vpop.f32.mrb[232].mxu0  ;;  %v1085_v28 = vadd.f32 %v12480_v54, %v11777_v20  ;;  %v10421_v56 = vld [vmem:[%s13132_s3 + $0x910] ss:$8 sps:$4 sm:$0xff]  }
 0x30b   :  { %v3867_v49 = vpop.f32.mrb[139].mxu1  ;;  %6348 = vmatprep.subr.bf16.mxu1 %v10414_v37  ;;  %v12649_v35 = vpop.f32.mrb[233].mxu0  ;;  %v10426_v27 = vld [vmem:[%s13132_s3 + $0x944] ss:$8 sps:$4 sm:$0xff]  }
 0x30c   :  { %v6458_v46 = vpop.f32.mrb[234].mxu0  ;;  %v1267_v20 = vmax.f32 %v1085_v28, 0.0 }
 0x30d   :  { %9416 = vmatmul.mubr.msk.bf16.vlgmr.msra.gmra.mrb[244].mxu1 %vm1344_vm0, %v6175_v63  ;;  %v6459_v52 = vpop.f32.mrb[235].mxu0  ;;  %v10424_v46 = vld [vmem:[%s13132_s3 + $0x940] ss:$8 sps:$4 sm:$0xff]  }
 0x30e   :  { %6349 = vmatpush1.bf16.msra.mxu1 %v10412_v25  ;;  %6380 = vmatprep.mubr.bf16.mxu1 %v13138_v0 }
 0x30f   :  { %6350 = vmatprep.subr.bf16.mxu1 %v10417_v5 }
 0x310   :  { %v3934_v7 = vpop.f32.mrb[140].mxu1 }
 0x311   :  { %v12660_v16 = vadd.f32 %v3934_v7, %v12556_v43  ;;  %v3936_v59 = vpop.f32.mrb[141].mxu1  ;;  %v10423_v43 = vld [vmem:[%s13132_s3 + $0x914] ss:$8 sps:$4 sm:$0xff]  }
 0x312   :  { %v12663_v62 = vadd.f32 %v3936_v59, %v12559_v50  ;;  %6351 = vmatpush1.bf16.msra.mxu1 %v10415_v22  ;;  %v3938_v60 = vpop.f32.mrb[142].mxu1  ;;  %v12668_v44 = vpop.f32.mrb[236].mxu0  ;;  %v6463_v22 = vpack.c.bf16 %v1267_v20, %v1267_v20  ;;  %v6607_v20 = vpack.c.bf16 %v1269_v42, %v1269_v42 }
 0x313   :  { %v3939_v18 = vpop.f32.mrb[143].mxu1  ;;  %6492 = vmatprep.subr.bf16.mxu1 %v10420_v6  ;;  %v12675_v50 = vpop.f32.mrb[237].mxu0  ;;  %v10427_v60 = vld [vmem:[%s13132_s3 + $0x950] ss:$8 sps:$4 sm:$0xff]  }
 0x314   :  { %v6602_v37 = vpop.f32.mrb[238].mxu0 }
 0x315   :  { %9434 = vmatmul.mubr.msk.bf16.vlgmr.msra.gmra.mrb[248].mxu1 %vm1344_vm0, %v6319_v45  ;;  %v6603_v3 = vpop.f32.mrb[239].mxu0 }
 0x316   :  { %6493 = vmatpush1.bf16.msra.mxu1 %v10418_v34  ;;  %6524 = vmatprep.mubr.bf16.mxu1 %v13138_v0  ;;  %v10432_v34 = vld [vmem:[%s13132_s3 + $0x984] ss:$8 sps:$4 sm:$0xff]   ;;  %v10430_v3 = vld [vmem:[%s13132_s3 + $0x980] ss:$8 sps:$4 sm:$0xff]  }
 0x317   :  { %6494 = vmatprep.subr.bf16.mxu1 %v10423_v43 }
 0x318   :  { %v4006_v25 = vpop.f32.mrb[144].mxu1 }
 0x319   :  { %v12686_v63 = vadd.f32 %v4006_v25, %v12582_v51  ;;  %v4008_v21 = vpop.f32.mrb[145].mxu1  ;;  %v10429_v51 = vld [vmem:[%s13132_s3 + $0x954] ss:$8 sps:$4 sm:$0xff]  }
 0x31a   :  { %v12689_v49 = vadd.f32 %v4008_v21, %v12585_v30  ;;  %6495 = vmatpush1.bf16.msra.mxu1 %v10421_v56  ;;  %v4010_v5 = vpop.f32.mrb[146].mxu1  ;;  %v12694_v52 = vpop.f32.mrb[240].mxu0 }
 0x31b   :  { %v4011_v6 = vpop.f32.mrb[147].mxu1  ;;  %6636 = vmatprep.subr.bf16.mxu1 %v10426_v27  ;;  %v12701_v30 = vpop.f32.mrb[241].mxu0  ;;  %v1101_v27 = vadd.f32 %v12480_v54, %v11855_v9 }
 0x31c   :  { %v6746_v7 = vpop.f32.mrb[242].mxu0 }
 0x31d   :  { %9452 = vmatmul.mubr.msk.bf16.vlgmr.msra.gmra.mrb[252].mxu1 %vm1344_vm0, %v6463_v22  ;;  %v6747_v59 = vpop.f32.mrb[243].mxu0  ;;  %v1271_v9 = vmax.f32 %v1101_v27, 0.0  ;;  %v10438_v22 = vld [vmem:[%s13132_s3 + $0x9c4] ss:$8 sps:$4 sm:$0xff]  }
 0x31e   :  { %6637 = vmatpush1.bf16.msra.mxu1 %v10424_v46  ;;  %6668 = vmatprep.mubr.bf16.mxu1 %v13138_v0  ;;  %v10433_v46 = vld [vmem:[%s13132_s3 + $0x990] ss:$8 sps:$4 sm:$0xff]   ;;  %v10444_v27 = vld [vmem:[%s13132_s3 + $0xa04] ss:$8 sps:$4 sm:$0xff]  }
 0x31f   :  { %6638 = vmatprep.subr.bf16.mxu1 %v10429_v51 }
 0x320   :  { %v4078_v45 = vpop.f32.mrb[148].mxu1 }
 0x321   :  { %v12712_v28 = vadd.f32 %v4078_v45, %v12608_v24  ;;  %v4080_v18 = vpop.f32.mrb[149].mxu1  ;;  %v10435_v24 = vld [vmem:[%s13132_s3 + $0x994] ss:$8 sps:$4 sm:$0xff]   ;;  %v1109_v45 = vadd.f32 %v12480_v54, %v11894_v11 }
 0x322   :  { %v12715_v43 = vadd.f32 %v4080_v18, %v12611_v19  ;;  %6639 = vmatpush1.bf16.msra.mxu1 %v10427_v60  ;;  %v4082_v37 = vpop.f32.mrb[150].mxu1  ;;  %v12720_v56 = vpop.f32.mrb[244].mxu0  ;;  %v10436_v60 = vld [vmem:[%s13132_s3 + $0x9c0] ss:$8 sps:$4 sm:$0xff]  }
 0x323   :  { %v4083_v25 = vpop.f32.mrb[151].mxu1  ;;  %6780 = vmatprep.subr.bf16.mxu1 %v10432_v34  ;;  %v12727_v19 = vpop.f32.mrb[245].mxu0  ;;  %v6751_v34 = vpack.c.bf16 %v1271_v9, %v1271_v9  ;;  %v1273_v11 = vmax.f32 %v1109_v45, 0.0  ;;  %v10442_v9 = vld [vmem:[%s13132_s3 + $0xa00] ss:$8 sps:$4 sm:$0xff]  }
 0x324   :  { %v6890_v21 = vpop.f32.mrb[246].mxu0  ;;  %v10445_v45 = vld [vmem:[%s13132_s3 + $0xa10] ss:$8 sps:$4 sm:$0xff]  }
 0x325   :  { %9470 = vmatmul.mubr.msk.bf16.vlgmr.msra.gmra.mrb[0].mxu1 %vm1344_vm0, %v6607_v20  ;;  %v6891_v5 = vpop.f32.mrb[247].mxu0  ;;  %v10439_v20 = vld [vmem:[%s13132_s3 + $0x9d0] ss:$8 sps:$4 sm:$0xff]  }
 0x326   :  { %6781 = vmatpush1.bf16.msra.mxu1 %v10430_v3  ;;  %6812 = vmatprep.mubr.bf16.mxu1 %v13138_v0 }
 0x327   :  { %6782 = vmatprep.subr.bf16.mxu1 %v10435_v24 }
 0x328   :  { %v4150_v10 = vpop.f32.mrb[152].mxu1 }
 0x329   :  { %v12738_v6 = vadd.f32 %v4150_v10, %v12634_v57  ;;  %v4152_v51 = vpop.f32.mrb[153].mxu1  ;;  %v10441_v57 = vld [vmem:[%s13132_s3 + $0x9d4] ss:$8 sps:$4 sm:$0xff]   ;;  %v6895_v10 = vpack.c.bf16 %v1273_v11, %v1273_v11 }
 0x32a   :  { %v12741_v7 = vadd.f32 %v4152_v51, %v12637_v13  ;;  %6783 = vmatpush1.bf16.msra.mxu1 %v10433_v46  ;;  %v4154_v59 = vpop.f32.mrb[154].mxu1  ;;  %v12746_v42 = vpop.f32.mrb[248].mxu0  ;;  %v1117_v51 = vadd.f32 %v12480_v54, %v11936_v53 }
 0x32b   :  { %v4155_v18 = vpop.f32.mrb[155].mxu1  ;;  %6924 = vmatprep.subr.bf16.mxu1 %v10438_v22  ;;  %v12753_v13 = vpop.f32.mrb[249].mxu0 }
 0x32c   :  { %v7034_v37 = vpop.f32.mrb[250].mxu0  ;;  %v1275_v53 = vmax.f32 %v1117_v51, 0.0  ;;  %v10450_v18 = vld [vmem:[%s13132_s3 + $0xa44] ss:$8 sps:$4 sm:$0xff]  }
 0x32d   :  { %9488 = vmatmul.mubr.msk.bf16.vlgmr.msra.gmra.mrb[4].mxu1 %vm1344_vm0, %v6751_v34  ;;  %v7035_v3 = vpop.f32.mrb[251].mxu0 }
 0x32e   :  { %6925 = vmatpush1.bf16.msra.mxu1 %v10436_v60  ;;  %6956 = vmatprep.mubr.bf16.mxu1 %v13138_v0 }
 0x32f   :  { %6926 = vmatprep.subr.bf16.mxu1 %v10441_v57 }
 0x330   :  { %v4222_v25 = vpop.f32.mrb[156].mxu1 }
 0x331   :  { %v12764_v24 = vadd.f32 %v4222_v25, %v12660_v16  ;;  %v4224_v21 = vpop.f32.mrb[157].mxu1  ;;  %v10447_v16 = vld [vmem:[%s13132_s3 + $0xa14] ss:$8 sps:$4 sm:$0xff]  }
 0x332   :  { %v12767_v5 = vadd.f32 %v4224_v21, %v12663_v62  ;;  %6927 = vmatpush1.bf16.msra.mxu1 %v10439_v20  ;;  %v4226_v46 = vpop.f32.mrb[158].mxu1  ;;  %v12772_v22 = vpop.f32.mrb[252].mxu0  ;;  %v7039_v21 = vpack.c.bf16 %v1275_v53, %v1275_v53 }
 0x333   :  { %v4227_v59 = vpop.f32.mrb[159].mxu1  ;;  %7068 = vmatprep.subr.bf16.mxu1 %v10444_v27  ;;  %v12779_v62 = vpop.f32.mrb[253].mxu0  ;;  %v10448_v27 = vld [vmem:[%s13132_s3 + $0xa40] ss:$8 sps:$4 sm:$0xff]   ;;  %v1125_v46 = vadd.f32 %v12480_v54, %v11975_v48 }
 0x334   :  { %v7178_v60 = vpop.f32.mrb[254].mxu0  ;;  %v10451_v59 = vld [vmem:[%s13132_s3 + $0xa50] ss:$8 sps:$4 sm:$0xff]  }
 0x335   :  { %9506 = vmatmul.mubr.msk.bf16.vlgmr.msra.gmra.mrb[8].mxu1 %vm1344_vm0, %v6895_v10  ;;  %v7179_v34 = vpop.f32.mrb[255].mxu0  ;;  %v1277_v48 = vmax.f32 %v1125_v46, 0.0 }
 0x336   :  { %7069 = vmatpush1.bf16.msra.mxu1 %v10442_v9  ;;  %7100 = vmatprep.mubr.bf16.mxu1 %v13138_v0 }
 0x337   :  { %7070 = vmatprep.subr.bf16.mxu1 %v10447_v16  ;;  %v10456_v16 = vld [vmem:[%s13132_s3 + $0xa84] ss:$8 sps:$4 sm:$0xff]  }
 0x338   :  { %v4294_v57 = vpop.f32.mrb[160].mxu1 }
 0x339   :  { %v12790_v37 = vadd.f32 %v4294_v57, %v12686_v63  ;;  %v4296_v3 = vpop.f32.mrb[161].mxu1  ;;  %v10453_v63 = vld [vmem:[%s13132_s3 + $0xa54] ss:$8 sps:$4 sm:$0xff]   ;;  %v10454_v57 = vld [vmem:[%s13132_s3 + $0xa80] ss:$8 sps:$4 sm:$0xff]  }
 0x33a   :  { %v12793_v20 = vadd.f32 %v4296_v3, %v12689_v49  ;;  %7071 = vmatpush1.bf16.msra.mxu1 %v10445_v45  ;;  %v4298_v11 = vpop.f32.mrb[162].mxu1  ;;  %v12798_v25 = vpop.f32.mrb[0].mxu0 }
 0x33b   :  { %v4299_v9 = vpop.f32.mrb[163].mxu1  ;;  %7212 = vmatprep.subr.bf16.mxu1 %v10450_v18  ;;  %v12805_v49 = vpop.f32.mrb[1].mxu0  ;;  %v7183_v11 = vpack.c.bf16 %v1277_v48, %v1277_v48 }
 0x33c   :  { %v7322_v10 = vpop.f32.mrb[2].mxu0 }
 0x33d   :  { %9524 = vmatmul.mubr.msk.bf16.vlgmr.msra.gmra.mrb[12].mxu1 %vm1344_vm0, %v7039_v21  ;;  %v7323_v51 = vpop.f32.mrb[3].mxu0  ;;  %v10462_v10 = vld [vmem:[%s13132_s3 + $0xac4] ss:$8 sps:$4 sm:$0xff]  }
 0x33e   :  { %7213 = vmatpush1.bf16.msra.mxu1 %v10448_v27  ;;  %7244 = vmatprep.mubr.bf16.mxu1 %v13138_v0  ;;  %v1133_v27 = vadd.f32 %v12480_v54, %v12014_v29 }
 0x33f   :  { %7214 = vmatprep.subr.bf16.mxu1 %v10453_v63  ;;  %v10457_v63 = vld [vmem:[%s13132_s3 + $0xa90] ss:$8 sps:$4 sm:$0xff]  }
 0x340   :  { %v4366_v60 = vpop.f32.mrb[164].mxu1  ;;  %v1279_v29 = vmax.f32 %v1133_v27, 0.0 }
 0x341   :  { %v12816_v34 = vadd.f32 %v4366_v60, %v12712_v28  ;;  %v4368_v45 = vpop.f32.mrb[165].mxu1  ;;  %v10459_v28 = vld [vmem:[%s13132_s3 + $0xa94] ss:$8 sps:$4 sm:$0xff]  }
 0x342   :  { %v12819_v53 = vadd.f32 %v4368_v45, %v12715_v43  ;;  %7215 = vmatpush1.bf16.msra.mxu1 %v10451_v59  ;;  %v4370_v18 = vpop.f32.mrb[166].mxu1  ;;  %v12824_v3 = vpop.f32.mrb[4].mxu0  ;;  %v10460_v45 = vld [vmem:[%s13132_s3 + $0xac0] ss:$8 sps:$4 sm:$0xff]  }
 0x343   :  { %v4371_v21 = vpop.f32.mrb[167].mxu1  ;;  %7356 = vmatprep.subr.bf16.mxu1 %v10456_v16  ;;  %v12831_v43 = vpop.f32.mrb[5].mxu0 }
 0x344   :  { %v7466_v46 = vpop.f32.mrb[6].mxu0 }
 0x345   :  { %9542 = vmatmul.mubr.msk.bf16.vlgmr.msra.gmra.mrb[16].mxu1 %vm1344_vm0, %v7183_v11  ;;  %v7467_v9 = vpop.f32.mrb[7].mxu0  ;;  %v1141_v11 = vadd.f32 %v12480_v54, %v12053_v38  ;;  %v10463_v46 = vld [vmem:[%s13132_s3 + $0xad0] ss:$8 sps:$4 sm:$0xff]  }
 0x346   :  { %7357 = vmatpush1.bf16.msra.mxu1 %v10454_v57  ;;  %7388 = vmatprep.mubr.bf16.mxu1 %v13138_v0  ;;  %v7327_v57 = vpack.c.bf16 %v1279_v29, %v1279_v29  ;;  %v10468_v9 = vld [vmem:[%s13132_s3 + $0xb04] ss:$8 sps:$4 sm:$0xff]  }
 0x347   :  { %7358 = vmatprep.subr.bf16.mxu1 %v10459_v28  ;;  %v1281_v38 = vmax.f32 %v1141_v11, 0.0  ;;  %v1149_v11 = vadd.f32 %v12480_v54, %v12090_v26 }
 0x348   :  { %v4438_v51 = vpop.f32.mrb[168].mxu1 }
 0x349   :  { %v12842_v59 = vadd.f32 %v4438_v51, %v12738_v6  ;;  %v4440_v48 = vpop.f32.mrb[169].mxu1  ;;  %v10465_v6 = vld [vmem:[%s13132_s3 + $0xad4] ss:$8 sps:$4 sm:$0xff]   ;;  %v1283_v26 = vmax.f32 %v1149_v11, 0.0 }
 0x34a   :  { %v12845_v16 = vadd.f32 %v4440_v48, %v12741_v7  ;;  %7359 = vmatpush1.bf16.msra.mxu1 %v10457_v63  ;;  %v4442_v60 = vpop.f32.mrb[170].mxu1  ;;  %v12850_v18 = vpop.f32.mrb[8].mxu0 }
 0x34b   :  { %v4443_v27 = vpop.f32.mrb[171].mxu1  ;;  %7500 = vmatprep.subr.bf16.mxu1 %v10462_v10  ;;  %v12857_v7 = vpop.f32.mrb[9].mxu0  ;;  %v10466_v60 = vld [vmem:[%s13132_s3 + $0xb00] ss:$8 sps:$4 sm:$0xff]   ;;  %v7615_v11 = vpack.c.bf16 %v1283_v26, %v1283_v26  ;;  %v10480_v26 = vld [vmem:[%s13132_s3 + $0xb84] ss:$8 sps:$4 sm:$0xff]  }
 0x34c   :  { %13140 = vst [vmem:[#allocation2_spill] sm:$0xff] %v12857_v7  ;;  %v7610_v21 = vpop.f32.mrb[10].mxu0 }
 0x34d   :  { %9560 = vmatmul.mubr.msk.bf16.vlgmr.msra.gmra.mrb[20].mxu1 %vm1344_vm0, %v7327_v57  ;;  %v7611_v28 = vpop.f32.mrb[11].mxu0  ;;  %v7471_v57 = vpack.c.bf16 %v1281_v38, %v1281_v38 }
 0x34e   :  { %7501 = vmatpush1.bf16.msra.mxu1 %v10460_v45  ;;  %7532 = vmatprep.mubr.bf16.mxu1 %v13138_v0  ;;  %v10469_v28 = vld [vmem:[%s13132_s3 + $0xb10] ss:$8 sps:$4 sm:$0xff]  }
 0x34f   :  { %7502 = vmatprep.subr.bf16.mxu1 %v10465_v6 }
 0x350   :  { %v4510_v63 = vpop.f32.mrb[172].mxu1 }
 0x351   :  { %v12868_v29 = vadd.f32 %v4510_v63, %v12764_v24  ;;  %v4512_v10 = vpop.f32.mrb[173].mxu1  ;;  %v10471_v24 = vld [vmem:[%s13132_s3 + $0xb14] ss:$8 sps:$4 sm:$0xff]  }
 0x352   :  { %v12871_v51 = vadd.f32 %v4512_v10, %v12767_v5  ;;  %7503 = vmatpush1.bf16.msra.mxu1 %v10463_v46  ;;  %v4514_v48 = vpop.f32.mrb[174].mxu1  ;;  %v12876_v45 = vpop.f32.mrb[12].mxu0  ;;  %v10474_v46 = vld [vmem:[%s13132_s3 + $0xb44] ss:$8 sps:$4 sm:$0xff]  }
 0x353   :  { %v4515_v27 = vpop.f32.mrb[175].mxu1  ;;  %7644 = vmatprep.subr.bf16.mxu1 %v10468_v9  ;;  %v12883_v5 = vpop.f32.mrb[13].mxu0 }
 0x354   :  { %v7754_v6 = vpop.f32.mrb[14].mxu0  ;;  %v1157_v27 = vadd.f32 %v12480_v54, %v12129_v17 }
 0x355   :  { %9578 = vmatmul.mubr.msk.bf16.vlgmr.msra.gmra.mrb[24].mxu1 %vm1344_vm0, %v7471_v57  ;;  %v7755_v21 = vpop.f32.mrb[15].mxu0 }
 0x356   :  { %7645 = vmatpush1.bf16.msra.mxu1 %v10466_v60  ;;  %7676 = vmatprep.mubr.bf16.mxu1 %v13138_v0  ;;  %v10472_v60 = vld [vmem:[%s13132_s3 + $0xb40] ss:$8 sps:$4 sm:$0xff]   ;;  %v1285_v17 = vmax.f32 %v1157_v27, 0.0 }
 0x357   :  { %7646 = vmatprep.subr.bf16.mxu1 %v10471_v24 }
 0x358   :  { %v4582_v38 = vpop.f32.mrb[176].mxu1 }
 0x359   :  { %v12894_v9 = vadd.f32 %v4582_v38, %v12790_v37  ;;  %v4584_v63 = vpop.f32.mrb[177].mxu1  ;;  %v10477_v37 = vld [vmem:[%s13132_s3 + $0xb54] ss:$8 sps:$4 sm:$0xff]  }
 0x35a   :  { %v12897_v10 = vadd.f32 %v4584_v63, %v12793_v20  ;;  %7647 = vmatpush1.bf16.msra.mxu1 %v10469_v28  ;;  %v4586_v48 = vpop.f32.mrb[178].mxu1  ;;  %v12902_v57 = vpop.f32.mrb[16].mxu0  ;;  %v10475_v28 = vld [vmem:[%s13132_s3 + $0xb50] ss:$8 sps:$4 sm:$0xff]  }
 0x35b   :  { %13141 = vst [vmem:[#allocation3_spill] sm:$0xff] %v12902_v57  ;;  %v4587_v24 = vpop.f32.mrb[179].mxu1  ;;  %7788 = vmatprep.subr.bf16.mxu1 %v10474_v46  ;;  %v12909_v20 = vpop.f32.mrb[17].mxu0 }
 0x35c   :  { %13142 = vst [vmem:[#allocation4_spill] sm:$0xff] %v12909_v20  ;;  %v7898_v6 = vpop.f32.mrb[18].mxu0  ;;  %v7759_v24 = vpack.c.bf16 %v1285_v17, %v1285_v17  ;;  %v10481_v17 = vld [vmem:[%s13132_s3 + $0xb90] ss:$8 sps:$4 sm:$0xff]  }
 0x35d   :  { %9596 = vmatmul.mubr.msk.bf16.vlgmr.msra.gmra.mrb[28].mxu1 %vm1344_vm0, %v7615_v11  ;;  %v7899_v21 = vpop.f32.mrb[19].mxu0  ;;  %v10478_v11 = vld [vmem:[%s13132_s3 + $0xb80] ss:$8 sps:$4 sm:$0xff]  }
 0x35e   :  { %7789 = vmatpush1.bf16.msra.mxu1 %v10472_v60  ;;  %7820 = vmatprep.mubr.bf16.mxu1 %v13138_v0 }
 0x35f   :  { %7790 = vmatprep.subr.bf16.mxu1 %v10477_v37  ;;  %v1165_v37 = vadd.f32 %v12480_v54, %v12168_v14 }
 0x360   :  { %v4654_v46 = vpop.f32.mrb[180].mxu1 }
 0x361   :  { %v12920_v38 = vadd.f32 %v4654_v46, %v12816_v34  ;;  %v4656_v63 = vpop.f32.mrb[181].mxu1  ;;  %v10483_v34 = vld [vmem:[%s13132_s3 + $0xb94] ss:$8 sps:$4 sm:$0xff]   ;;  %v1287_v14 = vmax.f32 %v1165_v37, 0.0 }
 0x362   :  { %v12923_v48 = vadd.f32 %v4656_v63, %v12819_v53  ;;  %7791 = vmatpush1.bf16.msra.mxu1 %v10475_v28  ;;  %v4658_v60 = vpop.f32.mrb[182].mxu1  ;;  %v12928_v27 = vpop.f32.mrb[20].mxu0 }
 0x363   :  { %v4659_v6 = vpop.f32.mrb[183].mxu1  ;;  %7932 = vmatprep.subr.bf16.mxu1 %v10480_v26  ;;  %v12935_v53 = vpop.f32.mrb[21].mxu0  ;;  %v10486_v26 = vld [vmem:[%s13132_s3 + $0xbc4] ss:$8 sps:$4 sm:$0xff]  }
 0x364   :  { %v8042_v21 = vpop.f32.mrb[22].mxu0  ;;  %v10484_v6 = vld [vmem:[%s13132_s3 + $0xbc0] ss:$8 sps:$4 sm:$0xff]  }
 0x365   :  { %9614 = vmatmul.mubr.msk.bf16.vlgmr.msra.gmra.mrb[32].mxu1 %vm1344_vm0, %v7759_v24  ;;  %v8043_v28 = vpop.f32.mrb[23].mxu0  ;;  %v1173_v21 = vadd.f32 %v12480_v54, %v12207_v31 }
 0x366   :  { %7933 = vmatpush1.bf16.msra.mxu1 %v10478_v11  ;;  %7964 = vmatprep.mubr.bf16.mxu1 %v13138_v0 }
 0x367   :  { %7934 = vmatprep.subr.bf16.mxu1 %v10483_v34  ;;  %v7903_v34 = vpack.c.bf16 %v1287_v14, %v1287_v14  ;;  %v10487_v14 = vld [vmem:[%s13132_s3 + $0xbd0] ss:$8 sps:$4 sm:$0xff]   ;;  %v1289_v31 = vmax.f32 %v1173_v21, 0.0 }
 0x368   :  { %v4726_v46 = vpop.f32.mrb[184].mxu1 }
 0x369   :  { %v12946_v63 = vadd.f32 %v4726_v46, %v12842_v59  ;;  %v4728_v60 = vpop.f32.mrb[185].mxu1  ;;  %v10489_v59 = vld [vmem:[%s13132_s3 + $0xbd4] ss:$8 sps:$4 sm:$0xff]   ;;  %v8047_v21 = vpack.c.bf16 %v1289_v31, %v1289_v31  ;;  %v10493_v31 = vld [vmem:[%s13132_s3 + $0xc10] ss:$8 sps:$4 sm:$0xff]  }
 0x36a   :  { %v12949_v24 = vadd.f32 %v4728_v60, %v12845_v16  ;;  %7935 = vmatpush1.bf16.msra.mxu1 %v10481_v17  ;;  %v4730_v11 = vpop.f32.mrb[186].mxu1  ;;  %v12954_v37 = vpop.f32.mrb[24].mxu0 }
 0x36b   :  { %13143 = vst [vmem:[#allocation5_spill] sm:$0xff] %v12954_v37  ;;  %v4731_v28 = vpop.f32.mrb[187].mxu1  ;;  %8076 = vmatprep.subr.bf16.mxu1 %v10486_v26  ;;  %v12961_v16 = vpop.f32.mrb[25].mxu0  ;;  %v10492_v26 = vld [vmem:[%s13132_s3 + $0xc04] ss:$8 sps:$4 sm:$0xff]  }
 0x36c   :  { %13144 = vst [vmem:[#allocation6_spill] sm:$0xff] %v12961_v16  ;;  %v8186_v17 = vpop.f32.mrb[26].mxu0 }
 0x36d   :  { %9632 = vmatmul.mubr.msk.bf16.vlgmr.msra.gmra.mrb[36].mxu1 %vm1344_vm0, %v7903_v34  ;;  %v8187_v46 = vpop.f32.mrb[27].mxu0  ;;  %v10490_v17 = vld [vmem:[%s13132_s3 + $0xc00] ss:$8 sps:$4 sm:$0xff]  }
 0x36e   :  { %8077 = vmatpush1.bf16.msra.mxu1 %v10484_v6  ;;  %8108 = vmatprep.mubr.bf16.mxu1 %v13138_v0 }
 0x36f   :  { %8078 = vmatprep.subr.bf16.mxu1 %v10489_v59  ;;  %v1181_v59 = vadd.f32 %v12480_v54, %v12244_v39 }
 0x370   :  { %v4798_v60 = vpop.f32.mrb[188].mxu1 }
 0x371   :  { %v4805_v11 = vadd.f32 %v4798_v60, %v12868_v29  ;;  %v4800_v28 = vpop.f32.mrb[189].mxu1  ;;  %v10495_v29 = vld [vmem:[%s13132_s3 + $0xc14] ss:$8 sps:$4 sm:$0xff]   ;;  %v1291_v39 = vmax.f32 %v1181_v59, 0.0 }
 0x372   :  { %v4806_v34 = vadd.f32 %v4800_v28, %v12871_v51  ;;  %8079 = vmatpush1.bf16.msra.mxu1 %v10487_v14  ;;  %v4802_v6 = vpop.f32.mrb[190].mxu1  ;;  %v12976_v46 = vpop.f32.mrb[28].mxu0  ;;  %v13145_v28 = vmov 0  }
 0x373   :  { %v4803_v0 = vpop.f32.mrb[191].mxu1  ;;  %8220 = vmatprep.subr.bf16.mxu1 %v10492_v26  ;;  %v12983_v60 = vpop.f32.mrb[29].mxu0  ;;  %v8191_v59 = vpack.c.bf16 %v1291_v39, %v1291_v39  ;;  %v10499_v39 = vld [vmem:[%s13132_s3 + $0xc50] ss:$8 sps:$4 sm:$0xff]  }
 0x374   :  { %v8330_v51 = vpop.f32.mrb[30].mxu0  ;;  %v10498_v0 = vld [vmem:[%s13132_s3 + $0xc44] ss:$8 sps:$4 sm:$0xff]  }
 0x375   :  { %9650 = vmatmul.mubr.msk.bf16.vlgmr.msra.gmra.mrb[40].mxu1 %vm1344_vm0, %v8047_v21  ;;  %v8331_v14 = vpop.f32.mrb[31].mxu0 }
 0x376   :  { %8221 = vmatpush1.bf16.msra.mxu1 %v10490_v17  ;;  %8252 = vmatprep.mubr.bf16.mxu1 %v13145_v28  ;;  %v10496_v14 = vld [vmem:[%s13132_s3 + $0xc40] ss:$8 sps:$4 sm:$0xff]  }
 0x377   :  { %8222 = vmatprep.subr.bf16.mxu1 %v10495_v29  ;;  %v1189_v29 = vadd.f32 %v12480_v54, %v12283_v33 }
 0x378   :  { %v4870_v26 = vpop.f32.mrb[192].mxu1 }
 0x379   :  { %v4877_v6 = vadd.f32 %v4870_v26, %v12894_v9  ;;  %v4872_v51 = vpop.f32.mrb[193].mxu1  ;;  %v10501_v9 = vld [vmem:[%s13132_s3 + $0xc54] ss:$8 sps:$4 sm:$0xff]   ;;  %v1293_v33 = vmax.f32 %v1189_v29, 0.0 }
 0x37a   :  { %v4878_v21 = vadd.f32 %v4872_v51, %v12897_v10  ;;  %8223 = vmatpush1.bf16.msra.mxu1 %v10493_v31  ;;  %v4874_v17 = vpop.f32.mrb[194].mxu1  ;;  %v12998_v16 = vpop.f32.mrb[32].mxu0 }
 0x37b   :  { %13146 = vst [vmem:[#allocation7_spill] sm:$0xff] %v12998_v16  ;;  %v4875_v37 = vpop.f32.mrb[195].mxu1  ;;  %8364 = vmatprep.subr.bf16.mxu1 %v10498_v0  ;;  %v13005_v26 = vpop.f32.mrb[33].mxu0 }
 0x37c   :  { %13147 = vst [vmem:[#allocation8_spill] sm:$0xff] %v13005_v26  ;;  %v8474_v10 = vpop.f32.mrb[34].mxu0 }
 0x37d   :  { %9668 = vmatmul.mubr.msk.bf16.vlgmr.msra.gmra.mrb[44].mxu1 %vm1344_vm0, %v8191_v59  ;;  %v8475_v31 = vpop.f32.mrb[35].mxu0  ;;  %v8335_v10 = vpack.c.bf16 %v1293_v33, %v1293_v33 }
 0x37e   :  { %8365 = vmatpush1.bf16.msra.mxu1 %v10496_v14  ;;  %8396 = vmatprep.mubr.bf16.mxu1 %v13145_v28 }
 0x37f   :  { %8366 = vmatprep.subr.bf16.mxu1 %v10501_v9 }
 0x380   :  { %v4942_v54 = vpop.f32.mrb[196].mxu1 }
 0x381   :  { %v4949_v37 = vadd.f32 %v4942_v54, %v12920_v38  ;;  %v4944_v0 = vpop.f32.mrb[197].mxu1 }
 0x382   :  { %v4950_v51 = vadd.f32 %v4944_v0, %v12923_v48  ;;  %8367 = vmatpush1.bf16.msra.mxu1 %v10499_v39  ;;  %v4946_v17 = vpop.f32.mrb[198].mxu1 }
 0x383   :  { %v4947_v59 = vpop.f32.mrb[199].mxu1 }
 0x385   :  { %9686 = vmatmul.mubr.msk.bf16.vlgmr.msra.gmra.mrb[48].mxu1 %vm1344_vm0, %v8335_v10 }
 0x388   :  { %v5014_v14 = vpop.f32.mrb[200].mxu1 }
 0x389   :  { %v5021_v31 = vadd.f32 %v5014_v14, %v12946_v63  ;;  %v5016_v26 = vpop.f32.mrb[201].mxu1 }
 0x38a   :  { %v5022_v28 = vadd.f32 %v5016_v26, %v12949_v24  ;;  %v5018_v29 = vpop.f32.mrb[202].mxu1 }
 0x38b   :  { %v5019_v9 = vpop.f32.mrb[203].mxu1 }
 0x390   :  { %v5086_v16 = vpop.f32.mrb[204].mxu1 }
 0x391   :  { %v5093_v20 = vadd.f32 %v5086_v16, %v4805_v11  ;;  %v5088_v38 = vpop.f32.mrb[205].mxu1 }
 0x392   :  { %v5094_v54 = vadd.f32 %v5088_v38, %v4806_v34  ;;  %v5090_v57 = vpop.f32.mrb[206].mxu1 }
 0x393   :  { %v5091_v48 = vpop.f32.mrb[207].mxu1 }
 0x398   :  { %v5158_v39 = vpop.f32.mrb[208].mxu1 }
 0x399   :  { %v5165_v0 = vadd.f32 %v5158_v39, %v4877_v6  ;;  %v5160_v33 = vpop.f32.mrb[209].mxu1 }
 0x39a   :  { %v5166_v17 = vadd.f32 %v5160_v33, %v4878_v21  ;;  %v5162_v59 = vpop.f32.mrb[210].mxu1 }
 0x39b   :  { %v5453_v10 = vadd.f32 %v12492_v36, %v5165_v0  ;;  %v5163_v7 = vpop.f32.mrb[211].mxu1 }
 0x39c   :  { %v5454_v63 = vadd.f32 %v12497_v40, %v5166_v17 }
 0x39d   :  { %v5741_v24 = vadd.f32 %v12522_v15, %v5453_v10 }
 0x39e   :  { %v5742_v26 = vadd.f32 %v12527_v8, %v5454_v63 }
 0x39f   :  { %v6029_v16 = vadd.f32 %v12564_v32, %v5741_v24 }
 0x3a0   :  { %v6030_v11 = vadd.f32 %v12571_v4, %v5742_v26  ;;  %v5230_v57 = vpop.f32.mrb[212].mxu1 }
 0x3a1   :  { %v6317_v34 = vadd.f32 %v12616_v55, %v6029_v16  ;;  %v5237_v6 = vadd.f32 %v5230_v57, %v4949_v37  ;;  %v5232_v14 = vpop.f32.mrb[213].mxu1  ;;  %v13149_v16 = vld [vmem:[#allocation3_spill] sm:$0xff]  ;;  %v13150_v57 = vld [vmem:[#allocation4_spill] sm:$0xff] }
 0x3a2   :  { %v6318_v21 = vadd.f32 %v12623_v58, %v6030_v11  ;;  %v5238_v29 = vadd.f32 %v5232_v14, %v4950_v51  ;;  %v5234_v36 = vpop.f32.mrb[214].mxu1  ;;  %v13152_v14 = vld [vmem:[#allocation6_spill] sm:$0xff] }
 0x3a3   :  { %v6605_v7 = vadd.f32 %v12668_v44, %v6317_v34  ;;  %v5235_v40 = vpop.f32.mrb[215].mxu1  ;;  %v13151_v34 = vld [vmem:[#allocation5_spill] sm:$0xff]  ;;  %v13154_v36 = vld [vmem:[#allocation8_spill] sm:$0xff] }
 0x3a4   :  { %v6606_v15 = vadd.f32 %v12675_v50, %v6318_v21  ;;  %v13153_v21 = vld [vmem:[#allocation7_spill] sm:$0xff] }
 0x3a5   :  { %v6893_v8 = vadd.f32 %v12720_v56, %v6605_v7 }
 0x3a6   :  { %v6894_v32 = vadd.f32 %v12727_v19, %v6606_v15 }
 0x3a7   :  { %v7181_v4 = vadd.f32 %v12772_v22, %v6893_v8 }
 0x3a8   :  { %v7182_v9 = vadd.f32 %v12779_v62, %v6894_v32  ;;  %v5302_v55 = vpop.f32.mrb[216].mxu1  ;;  %v10502_v32 = vld [vmem:[%s13134_s5 + $0x40] sm:$0xff]  }
 0x3a9   :  { %v7469_v37 = vadd.f32 %v12824_v3, %v7181_v4  ;;  %v5309_v38 = vadd.f32 %v5302_v55, %v5021_v31  ;;  %v5304_v58 = vpop.f32.mrb[217].mxu1  ;;  %9713 = vmatprep.subr.bf16.mxu1 %v10502_v32  ;;  %v10503_v4 = vld [vmem:[%s13134_s5] sm:$0xff]  }
 0x3aa   :  { %v7470_v51 = vadd.f32 %v12831_v43, %v7182_v9  ;;  %v5310_v48 = vadd.f32 %v5304_v58, %v5022_v28  ;;  %v5306_v44 = vpop.f32.mrb[218].mxu1  ;;  %9714 = vmatpush3.bf16.msra.mxu1 %v10503_v4 }
 0x3ab   :  { %v7757_v39 = vadd.f32 %v12876_v45, %v7469_v37  ;;  %v5597_v50 = vadd.f32 %v12508_v2, %v5309_v38  ;;  %v5307_v56 = vpop.f32.mrb[219].mxu1  ;;  %v10504_v38 = vld [vmem:[%s13134_s5 + $0x48] sm:$0xff]  }
 0x3ac   :  { %v7758_v19 = vadd.f32 %v12883_v5, %v7470_v51  ;;  %v5598_v22 = vadd.f32 %v12515_v23, %v5310_v48  ;;  %v10505_v48 = vld [vmem:[%s13134_s5 + $0x8] sm:$0xff]   ;;  %9715 = vmatprep.subr.bf16.mxu1 %v10504_v38 }
 0x3ad   :  { %v8045_v62 = vadd.f32 %v12928_v27, %v7757_v39  ;;  %v5885_v0 = vadd.f32 %v12538_v12, %v5597_v50  ;;  %v10506_v39 = vld [vmem:[%s13134_s5 + $0x50] sm:$0xff]  }
 0x3ae   :  { %v8046_v3 = vadd.f32 %v12935_v53, %v7758_v19  ;;  %v5886_v31 = vadd.f32 %v12545_v1, %v5598_v22  ;;  %9716 = vmatpush3.bf16.msra.mxu1 %v10505_v48  ;;  %v10507_v50 = vld [vmem:[%s13134_s5 + $0x10] sm:$0xff]  }
 0x3af   :  { %v6173_v43 = vadd.f32 %v12590_v41, %v5885_v0  ;;  %v13043_v28 = vadd.f32 %v12976_v46, %v8045_v62  ;;  %9717 = vmatprep.subr.bf16.mxu1 %v10506_v39  ;;  %v10508_v62 = vld [vmem:[%s13134_s5 + $0x58] sm:$0xff]  }
 0x3b0   :  { %v6174_v2 = vadd.f32 %v12597_v47, %v5886_v31  ;;  %v13047_v45 = vadd.f32 %v12983_v60, %v8046_v3  ;;  %v5374_v5 = vpop.f32.mrb[220].mxu1  ;;  %v10509_v31 = vld [vmem:[%s13134_s5 + $0x18] sm:$0xff]  }
 0x3b1   :  { %v6461_v23 = vadd.f32 %v12642_v61, %v6173_v43  ;;  %v5381_v27 = vadd.f32 %v5374_v5, %v5093_v20  ;;  %v5376_v33 = vpop.f32.mrb[221].mxu1  ;;  %v10511_v5 = vld [vmem:[%s13134_s5 + $0x20] sm:$0xff]  }
 0x3b2   :  { %v6462_v12 = vadd.f32 %v12649_v35, %v6174_v2  ;;  %v5382_v53 = vadd.f32 %v5376_v33, %v5094_v54  ;;  %v5378_v17 = vpop.f32.mrb[222].mxu1  ;;  %v13148_v54 = vld [vmem:[#allocation2_spill] sm:$0xff]  ;;  %9718 = vmatpush3.bf16.msra.mxu1 %v10507_v50 }
 0x3b3   :  { %v6749_v1 = vadd.f32 %v12694_v52, %v6461_v23  ;;  %v5379_v41 = vpop.f32.mrb[223].mxu1  ;;  %9719 = vmatprep.subr.bf16.mxu1 %v10508_v62  ;;  %v10510_v2 = vld [vmem:[%s13134_s5 + $0x60] sm:$0xff]  }
 0x3b4   :  { %v6750_v46 = vadd.f32 %v12701_v30, %v6462_v12  ;;  %v10512_v12 = vld [vmem:[%s13134_s5 + $0x68] sm:$0xff]  }
 0x3b5   :  { %v7037_v59 = vadd.f32 %v12746_v42, %v6749_v1  ;;  %v10513_v1 = vld [vmem:[%s13134_s5 + $0x28] sm:$0xff]  }
 0x3b6   :  { %v7038_v47 = vadd.f32 %v12753_v13, %v6750_v46  ;;  %9720 = vmatpush3.bf16.msra.mxu1 %v10509_v31  ;;  %v10514_v46 = vld [vmem:[%s13134_s5 + $0x70] sm:$0xff]  }
 0x3b7   :  { %v7325_v60 = vadd.f32 %v12798_v25, %v7037_v59  ;;  %9721 = vmatprep.subr.bf16.mxu1 %v10510_v2  ;;  %v10515_v59 = vld [vmem:[%s13134_s5 + $0x30] sm:$0xff]  }
 0x3b8   :  { %v7326_v10 = vadd.f32 %v12805_v49, %v7038_v47  ;;  %v5518_v61 = vpop.f32.mrb[224].mxu1 }
 0x3b9   :  { %v7613_v20 = vadd.f32 %v12850_v18, %v7325_v60  ;;  %v5525_v63 = vadd.f32 %v5518_v61, %v5237_v6  ;;  %v5520_v35 = vpop.f32.mrb[225].mxu1  ;;  %v10516_v61 = vld [vmem:[%s13134_s5 + $0x78] sm:$0xff]  }
 0x3ba   :  { %v7614_v24 = vadd.f32 %v13148_v54, %v7326_v10  ;;  %v5526_v26 = vadd.f32 %v5520_v35, %v5238_v29  ;;  %v5522_v52 = vpop.f32.mrb[226].mxu1  ;;  %9722 = vmatpush3.bf16.msra.mxu1 %v10511_v5  ;;  %v10517_v35 = vld [vmem:[%s13134_s5 + $0x38] sm:$0xff]  }
 0x3bb   :  { %v7901_v11 = vadd.f32 %v13149_v16, %v7613_v20  ;;  %v5523_v30 = vpop.f32.mrb[227].mxu1  ;;  %9723 = vmatprep.subr.bf16.mxu1 %v10512_v12 }
 0x3bc   :  { %v7902_v42 = vadd.f32 %v13150_v57, %v7614_v24 }
 0x3bd   :  { %v8189_v13 = vadd.f32 %v13151_v34, %v7901_v11 }
 0x3be   :  { %v8190_v25 = vadd.f32 %v13152_v14, %v7902_v42  ;;  %9724 = vmatpush3.bf16.msra.mxu1 %v10513_v1 }
 0x3bf   :  { %v13064_v49 = vadd.f32 %v13153_v21, %v8189_v13  ;;  %9725 = vmatprep.subr.bf16.mxu1 %v10514_v46 }
 0x3c0   :  { %v13067_v18 = vadd.f32 %v13154_v36, %v8190_v25  ;;  %v5662_v6 = vpop.f32.mrb[228].mxu1 }
 0x3c1   :  { %v5669_v7 = vadd.f32 %v5662_v6, %v5381_v27  ;;  %v5664_v40 = vpop.f32.mrb[229].mxu1 }
 0x3c2   :  { %v5670_v29 = vadd.f32 %v5664_v40, %v5382_v53  ;;  %v5666_v15 = vpop.f32.mrb[230].mxu1  ;;  %9726 = vmatpush3.bf16.msra.mxu1 %v10515_v59 }
 0x3c3   :  { %v5667_v8 = vpop.f32.mrb[231].mxu1  ;;  %9727 = vmatprep.subr.bf16.mxu1 %v10516_v61 }
 0x3c6   :  { %9728 = vmatpush3.bf16.msra.mxu1 %v10517_v35 }
 0x3c8   :  { %v5806_v9 = vpop.f32.mrb[232].mxu1 }
 0x3c9   :  { %v5813_v55 = vadd.f32 %v5806_v9, %v5525_v63  ;;  %v5808_v37 = vpop.f32.mrb[233].mxu1 }
 0x3ca   :  { %v5814_v58 = vadd.f32 %v5808_v37, %v5526_v26  ;;  %v5810_v51 = vpop.f32.mrb[234].mxu1 }
 0x3cb   :  { %v5811_v44 = vpop.f32.mrb[235].mxu1 }
 0x3d0   :  { %v5950_v56 = vpop.f32.mrb[236].mxu1 }
 0x3d1   :  { %v5957_v19 = vadd.f32 %v5950_v56, %v5669_v7  ;;  %v5952_v22 = vpop.f32.mrb[237].mxu1 }
 0x3d2   :  { %v5958_v0 = vadd.f32 %v5952_v22, %v5670_v29  ;;  %v5954_v3 = vpop.f32.mrb[238].mxu1 }
 0x3d3   :  { %v5955_v43 = vpop.f32.mrb[239].mxu1 }
 0x3d8   :  { %v6094_v23 = vpop.f32.mrb[240].mxu1 }
 0x3d9   :  { %v6101_v27 = vadd.f32 %v6094_v23, %v5813_v55  ;;  %v6096_v33 = vpop.f32.mrb[241].mxu1 }
 0x3da   :  { %v6102_v53 = vadd.f32 %v6096_v33, %v5814_v58  ;;  %v6098_v17 = vpop.f32.mrb[242].mxu1 }
 0x3db   :  { %v6099_v41 = vpop.f32.mrb[243].mxu1 }
 0x3e0   :  { %v6238_v47 = vpop.f32.mrb[244].mxu1 }
 0x3e1   :  { %v6245_v60 = vadd.f32 %v6238_v47, %v5957_v19  ;;  %v6240_v10 = vpop.f32.mrb[245].mxu1 }
 0x3e2   :  { %v6246_v20 = vadd.f32 %v6240_v10, %v5958_v0  ;;  %v6242_v63 = vpop.f32.mrb[246].mxu1 }
 0x3e3   :  { %v6243_v54 = vpop.f32.mrb[247].mxu1 }
 0x3e8   :  { %v6382_v24 = vpop.f32.mrb[248].mxu1 }
 0x3e9   :  { %v6389_v26 = vadd.f32 %v6382_v24, %v6101_v27  ;;  %v6384_v52 = vpop.f32.mrb[249].mxu1 }
 0x3ea   :  { %v6390_v16 = vadd.f32 %v6384_v52, %v6102_v53  ;;  %v6386_v11 = vpop.f32.mrb[250].mxu1 }
 0x3eb   :  { %v6387_v30 = vpop.f32.mrb[251].mxu1 }
 0x3f0   :  { %v6526_v57 = vpop.f32.mrb[252].mxu1 }
 0x3f1   :  { %v6533_v42 = vadd.f32 %v6526_v57, %v6245_v60  ;;  %v6528_v34 = vpop.f32.mrb[253].mxu1 }
 0x3f2   :  { %v6534_v13 = vadd.f32 %v6528_v34, %v6246_v20  ;;  %v6530_v14 = vpop.f32.mrb[254].mxu1 }
 0x3f3   :  { %v6531_v25 = vpop.f32.mrb[255].mxu1 }
 0x3f8   :  { %v6670_v21 = vpop.f32.mrb[0].mxu1 }
 0x3f9   :  { %v6677_v36 = vadd.f32 %v6670_v21, %v6389_v26  ;;  %v6672_v6 = vpop.f32.mrb[1].mxu1 }
 0x3fa   :  { %v6678_v7 = vadd.f32 %v6672_v6, %v6390_v16  ;;  %v6674_v40 = vpop.f32.mrb[2].mxu1 }
 0x3fb   :  { %v6675_v29 = vpop.f32.mrb[3].mxu1 }
 0x400   :  { %v6814_v15 = vpop.f32.mrb[4].mxu1 }
 0x401   :  { %v6821_v8 = vadd.f32 %v6814_v15, %v6533_v42  ;;  %v6816_v32 = vpop.f32.mrb[5].mxu1  ;;  %v8487_v15 = vlaneseq }
 0x402   :  { %v6822_v4 = vadd.f32 %v6816_v32, %v6534_v13  ;;  %v6818_v9 = vpop.f32.mrb[6].mxu1 }
 0x403   :  { %v6819_v55 = vpop.f32.mrb[7].mxu1 }
 0x408   :  { %v6958_v37 = vpop.f32.mrb[8].mxu1 }
 0x409   :  { %v6965_v38 = vadd.f32 %v6958_v37, %v6677_v36  ;;  %v6960_v58 = vpop.f32.mrb[9].mxu1 }
 0x40a   :  { %v6966_v51 = vadd.f32 %v6960_v58, %v6678_v7  ;;  %v6962_v48 = vpop.f32.mrb[10].mxu1  ;;  %v8488_v58 = vshrl.u32 %v8487_v15, 7 }
 0x40b   :  { %v6963_v44 = vpop.f32.mrb[11].mxu1 }
 0x40c   :  { %v8489_v48 = vsub.s32 0, %v8488_v58 }
 0x410   :  { %v7102_v39 = vpop.f32.mrb[12].mxu1 }
 0x411   :  { %v7109_v50 = vadd.f32 %v7102_v39, %v6821_v8  ;;  %v7104_v56 = vpop.f32.mrb[13].mxu1  ;;  %v8485_v39 = vld [vmem:[%s13135_s4] sm:$0x3] }
 0x412   :  { %v7110_v19 = vadd.f32 %v7104_v56, %v6822_v4  ;;  %v7106_v22 = vpop.f32.mrb[14].mxu1 }
 0x413   :  { %v7107_v62 = vpop.f32.mrb[15].mxu1 }
 0x418   :  { %v7246_v0 = vpop.f32.mrb[16].mxu1 }
 0x419   :  { %v7253_v3 = vadd.f32 %v7246_v0, %v6965_v38  ;;  %v7248_v31 = vpop.f32.mrb[17].mxu1 }
 0x41a   :  { %v7254_v43 = vadd.f32 %v7248_v31, %v6966_v51  ;;  %v7250_v2 = vpop.f32.mrb[18].mxu1 }
 0x41b   :  { %v7251_v5 = vpop.f32.mrb[19].mxu1 }
 0x420   :  { %v7390_v23 = vpop.f32.mrb[20].mxu1 }
 0x421   :  { %v7397_v27 = vadd.f32 %v7390_v23, %v7109_v50  ;;  %v7392_v33 = vpop.f32.mrb[21].mxu1  ;;  %v8493_v50 = vsub.s32 1, %v8488_v58 }
 0x422   :  { %v7398_v12 = vadd.f32 %v7392_v33, %v7110_v19  ;;  %v7394_v53 = vpop.f32.mrb[22].mxu1 }
 0x423   :  { %v7395_v17 = vpop.f32.mrb[23].mxu1 }
 0x428   :  { %v7534_v1 = vpop.f32.mrb[24].mxu1 }
 0x429   :  { %v7541_v41 = vadd.f32 %v7534_v1, %v7253_v3  ;;  %v7536_v46 = vpop.f32.mrb[25].mxu1  ;;  %v8490_v3 = vrot.slane %v8485_v39, %v8489_v48 }
 0x42a   :  { %v7542_v59 = vadd.f32 %v7536_v46, %v7254_v43  ;;  %v7538_v47 = vpop.f32.mrb[26].mxu1  ;;  %v8494_v43 = vrot.slane %v8485_v39, %v8493_v50 }
 0x42b   :  { %v7539_v60 = vpop.f32.mrb[27].mxu1 }
 0x430   :  { %v7678_v10 = vpop.f32.mrb[28].mxu1 }
 0x431   :  { %v7685_v61 = vadd.f32 %v7678_v10, %v7397_v27  ;;  %v7680_v20 = vpop.f32.mrb[29].mxu1 }
 0x432   :  { %v7686_v63 = vadd.f32 %v7680_v20, %v7398_v12  ;;  %v7682_v35 = vpop.f32.mrb[30].mxu1 }
 0x433   :  { %v7683_v54 = vpop.f32.mrb[31].mxu1 }
 0x438   :  { %v7822_v24 = vpop.f32.mrb[32].mxu1 }
 0x439   :  { %v7829_v26 = vadd.f32 %v7822_v24, %v7541_v41  ;;  %v7824_v52 = vpop.f32.mrb[33].mxu1 }
 0x43a   :  { %v7830_v16 = vadd.f32 %v7824_v52, %v7542_v59  ;;  %v7826_v11 = vpop.f32.mrb[34].mxu1 }
 0x43b   :  { %v7827_v30 = vpop.f32.mrb[35].mxu1 }
 0x440   :  { %v7966_v57 = vpop.f32.mrb[36].mxu1 }
 0x441   :  { %v7973_v42 = vadd.f32 %v7966_v57, %v7685_v61  ;;  %v7968_v34 = vpop.f32.mrb[37].mxu1 }
 0x442   :  { %v7974_v13 = vadd.f32 %v7968_v34, %v7686_v63  ;;  %v7970_v14 = vpop.f32.mrb[38].mxu1 }
 0x443   :  { %v7971_v25 = vpop.f32.mrb[39].mxu1 }
 0x448   :  { %v8110_v21 = vpop.f32.mrb[40].mxu1 }
 0x449   :  { %v8117_v36 = vadd.f32 %v8110_v21, %v7829_v26  ;;  %v8112_v6 = vpop.f32.mrb[41].mxu1 }
 0x44a   :  { %v8118_v7 = vadd.f32 %v8112_v6, %v7830_v16  ;;  %v8114_v40 = vpop.f32.mrb[42].mxu1 }
 0x44b   :  { %v8115_v29 = vpop.f32.mrb[43].mxu1 }
 0x450   :  { %v8254_v8 = vpop.f32.mrb[44].mxu1 }
 0x451   :  { %v8261_v32 = vadd.f32 %v8254_v8, %v7973_v42  ;;  %v8256_v4 = vpop.f32.mrb[45].mxu1 }
 0x452   :  { %v8262_v9 = vadd.f32 %v8256_v4, %v7974_v13  ;;  %v8258_v55 = vpop.f32.mrb[46].mxu1 }
 0x453   :  { %v8479_v37 = vadd.f32 %v13043_v28, %v8261_v32  ;;  %v8259_v38 = vpop.f32.mrb[47].mxu1 }
 0x454   :  { %v8480_v51 = vadd.f32 %v13047_v45, %v8262_v9 }
 0x458   :  { %v8398_v44 = vpop.f32.mrb[48].mxu1 }
 0x459   :  { %v8405_v56 = vadd.f32 %v8398_v44, %v8117_v36  ;;  %v8400_v19 = vpop.f32.mrb[49].mxu1 }
 0x45a   :  { %v8406_v22 = vadd.f32 %v8400_v19, %v8118_v7  ;;  %v8402_v62 = vpop.f32.mrb[50].mxu1 }
 0x45b   :  { %v8481_v0 = vadd.f32 %v13064_v49, %v8405_v56  ;;  %v8403_v31 = vpop.f32.mrb[51].mxu1  ;;  %v9696_v49 = vld [vmem:[%s13136_s6] ss:$0 sm:$0xff] }
 0x45c   :  { %v8482_v28 = vadd.f32 %v13067_v18, %v8406_v22 }
 0x45d   :  { %v8483_v2 = vadd.f32 %v8481_v0, %v8479_v37 }
 0x45e   :  { %v8484_v45 = vadd.f32 %v8482_v28, %v8480_v51 }
 0x45f   :  { %v8497_v5 = vadd.f32 %v8490_v3, %v8483_v2 }
 0x460   :  { %v8498_v23 = vadd.f32 %v8494_v43, %v8484_v45 }
 0x461   :  { %v8499_v27 = vmax.f32 %v8497_v5, 0.0 }
 0x462   :  { %v8500_v33 = vmax.f32 %v8498_v23, 0.0 }
 0x463   :  { %v8501_v53 = vpack.c.bf16 %v8499_v27, %v8499_v27 }
 0x464   :  { %v8502_v12 = vpack.c.bf16 %v8500_v33, %v8500_v33 }
 0x466   :  { %8670 = vmatprep.mubr.bf16.mxu1 %v8502_v12 }
 0x467   :  { %8671 = vmatmul.mubr.bf16.vlgmr.msra.gmra.mrb[52].mxu1 %v8501_v53 }
 0x53a   :  { %v9729_v17 = vpop.f32.mrb[52].mxu1 }
 0x53b   :  { %v9730_v1 = vpop.f32.mrb[53].mxu1 }
 0x53c   :  { %v9731_v41 = vadd.f32 %v9730_v1, %v9729_v17  ;;  %v9732_v46 = vpop.f32.mrb[54].mxu1 }
 0x53d   :  { %v9733_v18 = vpop.f32.mrb[55].mxu1 }
 0x53e   :  { %v8673_v59 = vadd.f32 %v9731_v41, %v9696_v49 }
 0x540   :  { %8678 = vst [vmem:[%s13137_s7] sm:$0xff] %v8673_v59 }

</bundles_post_ra>
